<compile_context>
chip_gen: v7x
topology: tpu7x:2x2x1
jax: 0.10.0
libtpu: 0.0.40
codegen_flags: <defaults>
</compile_context>

<pallas_src>
import functools

import jax
import jax.numpy as jnp
from jax.experimental import pallas as pl
from jax.experimental.pallas import tpu as pltpu


FEAT_PAD = 128        # feature lanes padded to a full vreg width
TILE_ROWS = 512       # pixel rows per grid step (amortizes per-step overhead)
N_PARALLEL = 2        # outer "parallel" grid axis (2 TCs on v7x; harmless elsewhere)


# ---------------------------------------------------------------------------
# Fused kernel: LPIPS-style perceptual distance + L1 (centre tap) for
# (rec4, x1) and (rec1, x1) on one tile of 3x3-patch rows.
# ---------------------------------------------------------------------------
def _img_loss_kernel(p4_ref, p1_ref, px_ref, w_ref, b_ref, lw_ref,
                     lp_ref, l1_ref, *, tm, c):
    t = pl.program_id(1)

    @pl.when(t == 0)
    def _():
        lp_ref[...] = jnp.zeros_like(lp_ref)
        l1_ref[...] = jnp.zeros_like(l1_ref)

    p4 = p4_ref[...]                       # (tm, 9C) bf16 patches of rec4
    p1 = p1_ref[...]                       # (tm, 9C) bf16 patches of rec1
    px = px_ref[...]                       # (tm, 9C) bf16 patches of x1

    # One concatenated MXU dot (single RHS push) for all three streams.
    pcat = jnp.concatenate([p4, p1, px], axis=0)                    # (3*tm, 9C)
    feat = jnp.dot(pcat, w_ref[...], preferred_element_type=jnp.float32)
    feat = jnp.maximum(feat + b_ref[...], 0.0)                      # (3*tm, 128)

    # LPIPS-style per-pixel unit normalisation over feature lanes.
    inv = jax.lax.rsqrt(jnp.sum(feat * feat, axis=-1, keepdims=True) + 1e-10)
    featn = feat * inv

    f4 = featn[0 * tm:1 * tm]
    f1 = featn[1 * tm:2 * tm]
    fx = featn[2 * tm:3 * tm]

    # Weighted squared feature distances, accumulated lane-dense (no per-step
    # cross-lane reduce, no masked scalar store).
    d = ((f4 - fx) ** 2 + (f1 - fx) ** 2) * lw_ref[...]             # (tm, 128)
    lp_ref[...] += d[jnp.newaxis]

    # L1 term from the centre tap (columns 4C:5C) of the 3x3 patch rows.
    c4 = p4[:, 4 * c:5 * c].astype(jnp.float32)
    c1 = p1[:, 4 * c:5 * c].astype(jnp.float32)
    cx = px[:, 4 * c:5 * c].astype(jnp.float32)
    l1_ref[...] += (jnp.abs(c4 - cx) + jnp.abs(c1 - cx))[jnp.newaxis]


# ---------------------------------------------------------------------------
# Glue
# ---------------------------------------------------------------------------
def _im2col3x3(x_nhwc):
    """3x3 patches with zero padding=1.  (B,H,W,C) -> (B*H*W, 9*C)."""
    B, H, W, C = x_nhwc.shape
    xp = jnp.pad(x_nhwc, ((0, 0), (1, 1), (1, 1), (0, 0)))
    cols = []
    for dy in range(3):
        for dx in range(3):
            cols.append(xp[:, dy:dy + H, dx:dx + W, :])
    return jnp.concatenate(cols, axis=-1).reshape(B * H * W, 9 * C)


def _patches_bf16(img_nchw):
    nhwc = jnp.transpose(img_nchw.astype(jnp.float32), (0, 2, 3, 1))
    return _im2col3x3(nhwc.astype(jnp.bfloat16))


def img_loss_module(rec4, rec1, x1, params):
    """loss = L1(rec4,x1) + L1(rec1,x1) + perc(rec4,x1).mean() + perc(rec1,x1).mean()"""
    B, C, H, W = x1.shape
    n_pix = B * H * W
    n_elem = B * C * H * W
    K = 9 * C

    # TODO(synk): form the 3x3 patches inside the kernel from a halo'd slab
    # (manual DMA) instead of materialising the 9x im2col in HBM; Mosaic
    # lane/sublane reshape constraints make that non-trivial, so patches are
    # materialised by XLA here (in bf16 to halve the HBM traffic).
    p4 = _patches_bf16(rec4)
    p1 = _patches_bf16(rec1)
    px = _patches_bf16(x1)

    tm = TILE_ROWS
    n_tiles = -(-n_pix // tm)
    P = N_PARALLEL if n_tiles >= N_PARALLEL else 1
    t_inner = -(-n_tiles // P)
    m_pad = P * t_inner * tm
    if m_pad > n_pix:
        pad = ((0, m_pad - n_pix), (0, 0))
        p4, p1, px = jnp.pad(p4, pad), jnp.pad(p1, pad), jnp.pad(px, pad)

    # Pad params to 128 feature lanes; zero lanes contribute exactly zero.
    w = params["w"].astype(jnp.float32)
    b = params["b"].astype(jnp.float32)
    lw = params["lw"].astype(jnp.float32)
    nf = w.shape[1]
    assert nf <= FEAT_PAD
    w128 = jnp.pad(w, ((0, 0), (0, FEAT_PAD - nf))).astype(jnp.bfloat16)
    b128 = jnp.pad(b, ((0, 0), (0, FEAT_PAD - nf)))
    lw128 = jnp.pad(lw, ((0, 0), (0, FEAT_PAD - nf)))

    patch_idx = lambda p, t: (p * t_inner + t, 0)
    const_idx = lambda p, t: (0, 0)

    lp_part, l1_part = pl.pallas_call(
        functools.partial(_img_loss_kernel, tm=tm, c=C),
        out_shape=(jax.ShapeDtypeStruct((P, tm, FEAT_PAD), jnp.float32),
                   jax.ShapeDtypeStruct((P, tm, C), jnp.float32)),
        grid=(P, t_inner),
        in_specs=[
            pl.BlockSpec((tm, K), patch_idx),
            pl.BlockSpec((tm, K), patch_idx),
            pl.BlockSpec((tm, K), patch_idx),
            pl.BlockSpec((K, FEAT_PAD), const_idx),
            pl.BlockSpec((1, FEAT_PAD), const_idx),
            pl.BlockSpec((1, FEAT_PAD), const_idx),
        ],
        out_specs=(
            pl.BlockSpec((1, tm, FEAT_PAD), lambda p, t: (p, 0, 0)),
            pl.BlockSpec((1, tm, C), lambda p, t: (p, 0, 0)),
        ),
        compiler_params=pltpu.CompilerParams(
            dimension_semantics=("parallel", "arbitrary")),
    )(p4, p1, px, w128, b128, lw128)

    l1 = jnp.sum(l1_part) / n_elem     # mean over batch*channel*spatial (both recs)
    lp = jnp.sum(lp_part) / n_pix      # mean over batch*spatial (both recs)
    return l1 + lp


def make_params(c_in, n_feat=32):
    """Deterministic synthetic perceptual-loss parameters."""
    k = jax.random.PRNGKey(42)
    k1, k2, k3 = jax.random.split(k, 3)
    w = 0.1 * jax.random.normal(k1, (9 * c_in, n_feat), dtype=jnp.float32)
    b = 0.01 * jax.random.normal(k2, (1, n_feat), dtype=jnp.float32)
    lw = jnp.abs(jax.random.normal(k3, (1, n_feat), dtype=jnp.float32))
    return {"w": w, "b": b, "lw": lw}


# ---------------------------------------------------------------------------
# Pure-JAX references
# ---------------------------------------------------------------------------
def _lpips_surrogate_f32(a_nchw, b_nchw, params):
    pa = _im2col3x3(jnp.transpose(a_nchw, (0, 2, 3, 1)))
    pb = _im2col3x3(jnp.transpose(b_nchw, (0, 2, 3, 1)))

    def feat(p):
        f = jnp.maximum(p @ params["w"] + params["b"], 0.0)
        return f * jax.lax.rsqrt(jnp.sum(f * f, axis=-1, keepdims=True) + 1e-10)

    d = (feat(pa) - feat(pb)) ** 2
    return jnp.mean(jnp.sum(d * params["lw"], axis=-1))


def _ref_loss_f32(rec4, rec1, x1, params):
    l1 = jnp.mean(jnp.abs(rec4 - x1)) + jnp.mean(jnp.abs(rec1 - x1))
    lp = (_lpips_surrogate_f32(rec4, x1, params)
          + _lpips_surrogate_f32(rec1, x1, params))
    return l1 + lp


def _ref_loss_bf16(rec4, rec1, x1, params):
    """Same numerics as the kernel path (bf16 patches/weights, f32 accum)."""
    p4, p1, px = _patches_bf16(rec4), _patches_bf16(rec1), _patches_bf16(x1)
    w = params["w"].astype(jnp.bfloat16)

    def feat(p):
        f = jnp.dot(p, w, preferred_element_type=jnp.float32) + params["b"]
        f = jnp.maximum(f, 0.0)
        return f * jax.lax.rsqrt(jnp.sum(f * f, axis=-1, keepdims=True) + 1e-10)

    f4, f1, fx = feat(p4), feat(p1), feat(px)
    n_pix = px.shape[0]
    lp = (jnp.sum((f4 - fx) ** 2 * params["lw"]) +
          jnp.sum((f1 - fx) ** 2 * params["lw"])) / n_pix
    C = x1.shape[1]
    c4 = p4[:, 4 * C:5 * C].astype(jnp.float32)
    c1 = p1[:, 4 * C:5 * C].astype(jnp.float32)
    cx = px[:, 4 * C:5 * C].astype(jnp.float32)
    l1 = (jnp.sum(jnp.abs(c4 - cx)) + jnp.sum(jnp.abs(c1 - cx))) / x1.size
    return l1 + lp


if __name__ == "__main__":
    B, C, H, W = 2, 3, 32, 32
    key = jax.random.PRNGKey(0)
    kx, k4, k1_ = jax.random.split(key, 3)
    x1 = jax.random.uniform(kx, (B, C, H, W), dtype=jnp.float32)
    rec4 = jnp.clip(x1 + 0.10 * jax.random.normal(k4, x1.shape, dtype=jnp.float32),
                    0.0, 1.0)
    rec1 = jnp.clip(x1 + 0.25 * jax.random.normal(k1_, x1.shape, dtype=jnp.float32),
                    0.0, 1.0)

    params = make_params(C, n_feat=32)

    loss_fn = jax.jit(functools.partial(img_loss_module, params=params))
    loss = jax.block_until_ready(loss_fn(rec4, rec1, x1))

    ref_b = _ref_loss_bf16(rec4, rec1, x1, params)   # same numerics as kernel path
    ref_f = _ref_loss_f32(rec4, rec1, x1, params)    # full-f32 module semantics
    assert jnp.allclose(loss, ref_b, rtol=1e-2, atol=1e-4), (loss, ref_b)
    assert jnp.allclose(loss, ref_f, rtol=5e-2, atol=5e-3), (loss, ref_f)

    print("KERNEL_OK")
</pallas_src>

<mosaic_0001>
module attributes {stable_mosaic.version = 11 : i64} {
  func.func @_img_loss_kernel(%arg0: i32, %arg1: i32, %arg2: memref<512x27xbf16, #tpu.memory_space<vmem>>, %arg3: memref<512x27xbf16, #tpu.memory_space<vmem>>, %arg4: memref<512x27xbf16, #tpu.memory_space<vmem>>, %arg5: memref<27x128xbf16, #tpu.memory_space<vmem>>, %arg6: memref<1x128xf32, #tpu.memory_space<vmem>>, %arg7: memref<1x128xf32, #tpu.memory_space<vmem>>, %arg8: memref<1x512x128xf32, #tpu.memory_space<vmem>>, %arg9: memref<1x512x3xf32, #tpu.memory_space<vmem>>) attributes {dimension_semantics = [#tpu.dimension_semantics<parallel>, #tpu.dimension_semantics<arbitrary>], iteration_bounds = array<i64: 2, 2>, scalar_prefetch = 0 : i64, scratch_operands = 0 : i64, tpu.core_type = #tpu.core_type<tc>, window_params = [{transform_indices = @transform_0, window_bounds = array<i64: 512, 27>}, {transform_indices = @transform_1, window_bounds = array<i64: 512, 27>}, {transform_indices = @transform_2, window_bounds = array<i64: 512, 27>}, {pipeline_mode = #tpu.pipeline_mode<synchronous>, transform_indices = @transform_3, window_bounds = array<i64: 27, 128>}, {pipeline_mode = #tpu.pipeline_mode<synchronous>, transform_indices = @transform_4, window_bounds = array<i64: 1, 128>}, {pipeline_mode = #tpu.pipeline_mode<synchronous>, transform_indices = @transform_5, window_bounds = array<i64: 1, 128>}, {transform_indices = @transform_6, window_bounds = array<i64: 1, 512, 128>}, {transform_indices = @transform_7, window_bounds = array<i64: 1, 512, 3>}]} {
    %c0_i32 = arith.constant 0 : i32
    %0 = arith.cmpi eq, %arg1, %c0_i32 : i32
    %1 = arith.extui %0 : i1 to i32
    %c0_i32_0 = arith.constant 0 : i32
    %2 = arith.cmpi ne, %1, %c0_i32_0 : i32
    scf.if %2 {
      %cst_27 = arith.constant 0.000000e+00 : f32
      %52 = vector.broadcast %cst_27 : f32 to vector<1x512x128xf32>
      %c0_28 = arith.constant 0 : index
      %c0_29 = arith.constant 0 : index
      %c0_30 = arith.constant 0 : index
      %53 = vector.load %arg8[%c0_28, %c0_29, %c0_30] : memref<1x512x128xf32, #tpu.memory_space<vmem>>, vector<1x512x128xf32>
      tpu.vector_store %arg8[%c0_28, %c0_29, %c0_30], %52 {strides = array<i32>} : memref<1x512x128xf32, #tpu.memory_space<vmem>>, vector<1x512x128xf32>,
      %cst_31 = arith.constant 0.000000e+00 : f32
      %54 = vector.broadcast %cst_31 : f32 to vector<1x512x3xf32>
      %c0_32 = arith.constant 0 : index
      %c0_33 = arith.constant 0 : index
      %c0_34 = arith.constant 0 : index
      %55 = vector.load %arg9[%c0_32, %c0_33, %c0_34] : memref<1x512x3xf32, #tpu.memory_space<vmem>>, vector<1x512x3xf32>
      tpu.vector_store %arg9[%c0_32, %c0_33, %c0_34], %54 {strides = array<i32>} : memref<1x512x3xf32, #tpu.memory_space<vmem>>, vector<1x512x3xf32>,
    } else {
    }
    %c0 = arith.constant 0 : index
    %c0_1 = arith.constant 0 : index
    %3 = vector.load %arg2[%c0, %c0_1] : memref<512x27xbf16, #tpu.memory_space<vmem>>, vector<512x27xbf16>
    %c0_2 = arith.constant 0 : index
    %c0_3 = arith.constant 0 : index
    %4 = vector.load %arg3[%c0_2, %c0_3] : memref<512x27xbf16, #tpu.memory_space<vmem>>, vector<512x27xbf16>
    %c0_4 = arith.constant 0 : index
    %c0_5 = arith.constant 0 : index
    %5 = vector.load %arg4[%c0_4, %c0_5] : memref<512x27xbf16, #tpu.memory_space<vmem>>, vector<512x27xbf16>
    %6 = tpu.concatenate %3, %4, %5 in 0 : vector<512x27xbf16>, vector<512x27xbf16>, vector<512x27xbf16> -> vector<1536x27xbf16>
    %c0_6 = arith.constant 0 : index
    %c0_7 = arith.constant 0 : index
    %7 = vector.load %arg5[%c0_6, %c0_7] : memref<27x128xbf16, #tpu.memory_space<vmem>>, vector<27x128xbf16>
    %cst = arith.constant dense<0.000000e+00> : vector<1536x128xf32>
    %8 = tpu.matmul %6, %7, %cst {dimension_numbers = #tpu.dot_dimension_numbers<[1], [0], [0], [1], [0, 0, 1, 1], [], []>} : vector<1536x27xbf16>, vector<27x128xbf16>, vector<1536x128xf32> -> vector<1536x128xf32>
    %c0_8 = arith.constant 0 : index
    %c0_9 = arith.constant 0 : index
    %9 = vector.load %arg6[%c0_8, %c0_9] : memref<1x128xf32, #tpu.memory_space<vmem>>, vector<1x128xf32>
    %10 = vector.broadcast %9 : vector<1x128xf32> to vector<1536x128xf32>
    %11 = arith.addf %8, %10 : vector<1536x128xf32>
    %cst_10 = arith.constant 0.000000e+00 : f32
    %12 = vector.broadcast %cst_10 : f32 to vector<1536x128xf32>
    %13 = arith.maximumf %11, %12 : vector<1536x128xf32>
    %14 = arith.mulf %13, %13 : vector<1536x128xf32>
    %cst_11 = arith.constant dense<0.000000e+00> : vector<1536xf32>
    %15 = vector.multi_reduction <add>, %14, %cst_11 [1] : vector<1536x128xf32> to vector<1536xf32>
    %16 = vector.shape_cast %15 : vector<1536xf32> to vector<1536x1xf32>
    %cst_12 = arith.constant 1.000000e-10 : f32
    %17 = vector.broadcast %cst_12 : f32 to vector<1536x1xf32>
    %18 = arith.addf %16, %17 : vector<1536x1xf32>
    %19 = math.rsqrt %18 : vector<1536x1xf32>
    %20 = vector.broadcast %19 : vector<1536x1xf32> to vector<1536x128xf32>
    %21 = arith.mulf %13, %20 : vector<1536x128xf32>
    %22 = vector.extract_strided_slice %21 {offsets = [0, 0], sizes = [512, 128], strides = [1, 1]} : vector<1536x128xf32> to vector<512x128xf32>
    %23 = vector.extract_strided_slice %21 {offsets = [512, 0], sizes = [512, 128], strides = [1, 1]} : vector<1536x128xf32> to vector<512x128xf32>
    %24 = vector.extract_strided_slice %21 {offsets = [1024, 0], sizes = [512, 128], strides = [1, 1]} : vector<1536x128xf32> to vector<512x128xf32>
    %25 = arith.subf %22, %24 : vector<512x128xf32>
    %26 = arith.mulf %25, %25 : vector<512x128xf32>
    %27 = arith.subf %23, %24 : vector<512x128xf32>
    %28 = arith.mulf %27, %27 : vector<512x128xf32>
    %29 = arith.addf %26, %28 : vector<512x128xf32>
    %c0_13 = arith.constant 0 : index
    %c0_14 = arith.constant 0 : index
    %30 = vector.load %arg7[%c0_13, %c0_14] : memref<1x128xf32, #tpu.memory_space<vmem>>, vector<1x128xf32>
    %31 = vector.broadcast %30 : vector<1x128xf32> to vector<512x128xf32>
    %32 = arith.mulf %29, %31 : vector<512x128xf32>
    %c0_15 = arith.constant 0 : index
    %c0_16 = arith.constant 0 : index
    %c0_17 = arith.constant 0 : index
    %33 = vector.load %arg8[%c0_15, %c0_16, %c0_17] : memref<1x512x128xf32, #tpu.memory_space<vmem>>, vector<1x512x128xf32>
    %34 = vector.shape_cast %32 : vector<512x128xf32> to vector<1x512x128xf32>
    %35 = arith.addf %33, %34 : vector<1x512x128xf32>
    %c0_18 = arith.constant 0 : index
    %c0_19 = arith.constant 0 : index
    %c0_20 = arith.constant 0 : index
    %36 = vector.load %arg8[%c0_18, %c0_19, %c0_20] : memref<1x512x128xf32, #tpu.memory_space<vmem>>, vector<1x512x128xf32>
    tpu.vector_store %arg8[%c0_18, %c0_19, %c0_20], %35 {strides = array<i32>} : memref<1x512x128xf32, #tpu.memory_space<vmem>>, vector<1x512x128xf32>,
    %37 = vector.extract_strided_slice %3 {offsets = [0, 12], sizes = [512, 3], strides = [1, 1]} : vector<512x27xbf16> to vector<512x3xbf16>
    %38 = arith.extf %37 : vector<512x3xbf16> to vector<512x3xf32>
    %39 = vector.extract_strided_slice %4 {offsets = [0, 12], sizes = [512, 3], strides = [1, 1]} : vector<512x27xbf16> to vector<512x3xbf16>
    %40 = arith.extf %39 : vector<512x3xbf16> to vector<512x3xf32>
    %41 = vector.extract_strided_slice %5 {offsets = [0, 12], sizes = [512, 3], strides = [1, 1]} : vector<512x27xbf16> to vector<512x3xbf16>
    %42 = arith.extf %41 : vector<512x3xbf16> to vector<512x3xf32>
    %c0_21 = arith.constant 0 : index
    %c0_22 = arith.constant 0 : index
    %c0_23 = arith.constant 0 : index
    %43 = vector.load %arg9[%c0_21, %c0_22, %c0_23] : memref<1x512x3xf32, #tpu.memory_space<vmem>>, vector<1x512x3xf32>
    %44 = arith.subf %38, %42 : vector<512x3xf32>
    %45 = math.absf %44 : vector<512x3xf32>
    %46 = arith.subf %40, %42 : vector<512x3xf32>
    %47 = math.absf %46 : vector<512x3xf32>
    %48 = arith.addf %45, %47 : vector<512x3xf32>
    %49 = vector.shape_cast %48 : vector<512x3xf32> to vector<1x512x3xf32>
    %50 = arith.addf %43, %49 : vector<1x512x3xf32>
    %c0_24 = arith.constant 0 : index
    %c0_25 = arith.constant 0 : index
    %c0_26 = arith.constant 0 : index
    %51 = vector.load %arg9[%c0_24, %c0_25, %c0_26] : memref<1x512x3xf32, #tpu.memory_space<vmem>>, vector<1x512x3xf32>
    tpu.vector_store %arg9[%c0_24, %c0_25, %c0_26], %50 {strides = array<i32>} : memref<1x512x3xf32, #tpu.memory_space<vmem>>, vector<1x512x3xf32>,
    return
  }
  func.func @transform_0(%arg0: i32, %arg1: i32) -> (i32, i32) {
    %c2_i32 = arith.constant 2 : i32
    %0 = arith.muli %arg0, %c2_i32 : i32
    %1 = arith.addi %0, %arg1 : i32
    %c0_i32 = arith.constant 0 : i32
    %c0_i32_0 = arith.constant 0 : i32
    return %1, %c0_i32 : i32, i32
  }
  func.func @transform_1(%arg0: i32, %arg1: i32) -> (i32, i32) {
    %c2_i32 = arith.constant 2 : i32
    %0 = arith.muli %arg0, %c2_i32 : i32
    %1 = arith.addi %0, %arg1 : i32
    %c0_i32 = arith.constant 0 : i32
    %c0_i32_0 = arith.constant 0 : i32
    return %1, %c0_i32 : i32, i32
  }
  func.func @transform_2(%arg0: i32, %arg1: i32) -> (i32, i32) {
    %c2_i32 = arith.constant 2 : i32
    %0 = arith.muli %arg0, %c2_i32 : i32
    %1 = arith.addi %0, %arg1 : i32
    %c0_i32 = arith.constant 0 : i32
    %c0_i32_0 = arith.constant 0 : i32
    return %1, %c0_i32 : i32, i32
  }
  func.func @transform_3(%arg0: i32, %arg1: i32) -> (i32, i32) {
    %c0_i32 = arith.constant 0 : i32
    %c0_i32_0 = arith.constant 0 : i32
    %c0_i32_1 = arith.constant 0 : i32
    return %c0_i32, %c0_i32_0 : i32, i32
  }
  func.func @transform_4(%arg0: i32, %arg1: i32) -> (i32, i32) {
    %c0_i32 = arith.constant 0 : i32
    %c0_i32_0 = arith.constant 0 : i32
    %c0_i32_1 = arith.constant 0 : i32
    return %c0_i32, %c0_i32_0 : i32, i32
  }
  func.func @transform_5(%arg0: i32, %arg1: i32) -> (i32, i32) {
    %c0_i32 = arith.constant 0 : i32
    %c0_i32_0 = arith.constant 0 : i32
    %c0_i32_1 = arith.constant 0 : i32
    return %c0_i32, %c0_i32_0 : i32, i32
  }
  func.func @transform_6(%arg0: i32, %arg1: i32) -> (i32, i32, i32) {
    %c0_i32 = arith.constant 0 : i32
    %c0_i32_0 = arith.constant 0 : i32
    %c0_i32_1 = arith.constant 0 : i32
    return %arg0, %c0_i32, %c0_i32_0 : i32, i32, i32
  }
  func.func @transform_7(%arg0: i32, %arg1: i32) -> (i32, i32, i32) {
    %c0_i32 = arith.constant 0 : i32
    %c0_i32_0 = arith.constant 0 : i32
    %c0_i32_1 = arith.constant 0 : i32
    return %arg0, %c0_i32, %c0_i32_0 : i32, i32, i32
  }
}

</mosaic_0001>

<bundles_post_ra>
// kernel: img_loss_module.1
= control target key start
LH: loop header
LB: loop body
LE: loop exit
PB: predicated region body
PF: predicated region fallthrough
CT: control target
= control target key end

     0   :  { %s6639_s24 = smov 0   ;;  %s6641_s25 = smov 0   ;;  %s11752_s0 = inlined_call_operand.vmem [shape: bf16[2048,27], index: 0, kind: input, shape index: {}]   ;;  %s11753_s1 = inlined_call_operand.vmem [shape: bf16[2048,27], index: 1, kind: input, shape index: {}]   ;;  %s11754_s2 = inlined_call_operand.vmem [shape: bf16[2048,27], index: 2, kind: input, shape index: {}]   ;;  %s11755_s3 = inlined_call_operand.vmem [shape: bf16[27,128], index: 3, kind: input, shape index: {}]   ;;  %s11756_s4 = inlined_call_operand.vmem [shape: f32[1,128], index: 4, kind: input, shape index: {}]   ;;  %s11757_s5 = inlined_call_operand.vmem [shape: f32[1,128], index: 5, kind: input, shape index: {}]   ;;  %s11758_s6 = inlined_call_operand.vmem [shape: f32[2,512,128], index: 6, kind: output, shape index: {0}]   ;;  %s11759_s7 = inlined_call_operand.vmem [shape: f32[2,512,3], index: 7, kind: output, shape index: {1}]  }
   0x1   :  { %s6643_s26 = smov 0   ;;  %s6645_s27 = smov 0  }
   0x2   :  { %s6647_s28 = smov 0  }
   0x3 LB: > { %s27_s29 = sadd.s32 1, %s6586_s26  ;;  %s30_s30 = sadd.s32 1, %s6590_s27  ;;  %s6594_s28 = sphi %s6647_s28, %s18_s28   ;;  %s6590_s27 = sphi %s6645_s27, %s13489_s27   ;;  %s6586_s26 = sphi %s6643_s26, %s13488_s26   ;;  %s6582_s25 = sphi %s6641_s25, %s13487_s25   ;;  %s6578_s24 = sphi %s6639_s24, %s13486_s24  }
   0x4   : > { %p28_p0 = scmp.ge.s32.totalorder %s27_s29, 2  ;;  %p5338_p1 = scmp.ge.s32.totalorder %s6594_s28, 1 }
   0x5   : > { %p299_p2 = scmp.lt.s32.totalorder %s6594_s28, 5 }
   0x6   : > { %s13491_s29 = smov (%p28_p0, %s27_s29), 0  ;;  %s13493_s30 = smov (!%p28_p0, %s30_s30), %s6590_s27 }
   0x7   : > { %p300_p3 = pnand %p5338_p1, %p299_p2  ;;  %p32_p4 = scmp.ge.s32.totalorder %s13493_s30, 2 }
   0x9   : > { %s13495_s30 = smov (%p32_p4, %s13493_s30), 0  ;;  %303 = sbr.rel (%p300_p3) target bundleno = 1016 (0x3f8), region = 44 }
  0x10   : > { %s5339_s8 = sshll.u32 %s6582_s25, 1  ;;  %p382_p5 = scmp.lt.s32.totalorder %s6582_s25, 1 }
  0x11   : > { %s353_s9 = sadd.s32 %s6578_s24, %s5339_s8  ;;  %p5352_p7 = scmp.ne.s32.totalorder %s6578_s24, 0 }
  0x12   : > { %s5340_s10 = sshll.u32 %s353_s9, 6  ;;  %s13497_s25 = smov (!%p382_p5, %s6582_s25), 1  ;;  %vm461_vm0 = vcmask (!%p5352_p7), 23552   ;;  %v6596_v0 = vmov (!%p5352_p7), 0.0  }
  0x13   : > { %p355_p6 = scmp.lt.s32.totalorder %s5340_s10, 255  ;;  %s5551_s11 = sshll.u32 %s13497_s25, 9 }
  0x14   : > { %s6675_s15 = scalar_lea.vmem %s11758_s6, %s5551_s11  ;;  %396 = sbr.rel (%p5352_p7) target bundleno = 85 (0x55), region = 48 }
  0x15   : > { %s13499_s10 = smov (!%p355_p6, %s5340_s10), 255  ;;  %397 = vst [vmem:[%s6675_s15] sm:$0xff] (!%p5352_p7), %v6596_v0  ;;  %398 = vst [vmem:[%s6675_s15 + $0x8] sm:$0xff] (!%p5352_p7), %v6596_v0 }
  0x16   : > { %s5341_s12 = sshll.u32 %s13499_s10, 2  ;;  %s6695_s10 = scalar_lea.vmem %s11759_s7, %s5551_s11  ;;  %399 = vst [vmem:[%s6675_s15 + $0x10] sm:$0xff] (!%p5352_p7), %v6596_v0  ;;  %400 = vst [vmem:[%s6675_s15 + $0x18] sm:$0xff] (!%p5352_p7), %v6596_v0 }
  0x17   : > { %s6680_s18 = scalar_lea.vmem %s11752_s0, %s5341_s12  ;;  %s6685_s21 = scalar_lea.vmem %s11753_s1, %s5341_s12  ;;  %401 = vst [vmem:[%s6675_s15 + $0x20] sm:$0xff] (!%p5352_p7), %v6596_v0  ;;  %402 = vst [vmem:[%s6675_s15 + $0x28] sm:$0xff] (!%p5352_p7), %v6596_v0 }
  0x18   : > { %s6690_s25 = scalar_lea.vmem %s11754_s2, %s5341_s12  ;;  %403 = vst [vmem:[%s6675_s15 + $0x30] sm:$0xff] (!%p5352_p7), %v6596_v0  ;;  %404 = vst [vmem:[%s6675_s15 + $0x38] sm:$0xff] (!%p5352_p7), %v6596_v0 }
  0x19   : > { %405 = vst [vmem:[%s6675_s15 + $0x40] sm:$0xff] (!%p5352_p7), %v6596_v0  ;;  %406 = vst [vmem:[%s6675_s15 + $0x48] sm:$0xff] (!%p5352_p7), %v6596_v0 }
  0x1a   : > { %407 = vst [vmem:[%s6675_s15 + $0x50] sm:$0xff] (!%p5352_p7), %v6596_v0  ;;  %408 = vst [vmem:[%s6675_s15 + $0x58] sm:$0xff] (!%p5352_p7), %v6596_v0 }
  0x1b   : > { %409 = vst [vmem:[%s6675_s15 + $0x60] sm:$0xff] %v6596_v0  ;;  %410 = vst [vmem:[%s6675_s15 + $0x68] sm:$0xff] %v6596_v0 }
  0x1c   : > { %411 = vst [vmem:[%s6675_s15 + $0x70] sm:$0xff] %v6596_v0  ;;  %412 = vst [vmem:[%s6675_s15 + $0x78] sm:$0xff] %v6596_v0 }
  0x1d   : > { %413 = vst [vmem:[%s6675_s15 + $0x80] sm:$0xff] %v6596_v0  ;;  %414 = vst [vmem:[%s6675_s15 + $0x88] sm:$0xff] %v6596_v0 }
  0x1e   : > { %415 = vst [vmem:[%s6675_s15 + $0x90] sm:$0xff] %v6596_v0  ;;  %416 = vst [vmem:[%s6675_s15 + $0x98] sm:$0xff] %v6596_v0 }
  0x1f   : > { %417 = vst [vmem:[%s6675_s15 + $0xa0] sm:$0xff] %v6596_v0  ;;  %418 = vst [vmem:[%s6675_s15 + $0xa8] sm:$0xff] %v6596_v0 }
  0x20   : > { %419 = vst [vmem:[%s6675_s15 + $0xb0] sm:$0xff] %v6596_v0  ;;  %420 = vst [vmem:[%s6675_s15 + $0xb8] sm:$0xff] %v6596_v0 }
  0x21   : > { %421 = vst [vmem:[%s6675_s15 + $0xc0] sm:$0xff] %v6596_v0  ;;  %422 = vst [vmem:[%s6675_s15 + $0xc8] sm:$0xff] %v6596_v0 }
  0x22   : > { %423 = vst [vmem:[%s6675_s15 + $0xd0] sm:$0xff] %v6596_v0  ;;  %424 = vst [vmem:[%s6675_s15 + $0xd8] sm:$0xff] %v6596_v0 }
  0x23   : > { %425 = vst [vmem:[%s6675_s15 + $0xe0] sm:$0xff] %v6596_v0  ;;  %426 = vst [vmem:[%s6675_s15 + $0xe8] sm:$0xff] %v6596_v0 }
  0x24   : > { %427 = vst [vmem:[%s6675_s15 + $0xf0] sm:$0xff] %v6596_v0  ;;  %428 = vst [vmem:[%s6675_s15 + $0xf8] sm:$0xff] %v6596_v0 }
  0x25   : > { %429 = vst [vmem:[%s6675_s15 + $0x100] sm:$0xff] %v6596_v0  ;;  %430 = vst [vmem:[%s6675_s15 + $0x108] sm:$0xff] %v6596_v0 }
  0x26   : > { %431 = vst [vmem:[%s6675_s15 + $0x110] sm:$0xff] %v6596_v0  ;;  %432 = vst [vmem:[%s6675_s15 + $0x118] sm:$0xff] %v6596_v0 }
  0x27   : > { %433 = vst [vmem:[%s6675_s15 + $0x120] sm:$0xff] %v6596_v0  ;;  %434 = vst [vmem:[%s6675_s15 + $0x128] sm:$0xff] %v6596_v0 }
  0x28   : > { %435 = vst [vmem:[%s6675_s15 + $0x130] sm:$0xff] %v6596_v0  ;;  %436 = vst [vmem:[%s6675_s15 + $0x138] sm:$0xff] %v6596_v0 }
  0x29   : > { %437 = vst [vmem:[%s6675_s15 + $0x140] sm:$0xff] %v6596_v0  ;;  %438 = vst [vmem:[%s6675_s15 + $0x148] sm:$0xff] %v6596_v0 }
  0x2a   : > { %439 = vst [vmem:[%s6675_s15 + $0x150] sm:$0xff] %v6596_v0  ;;  %440 = vst [vmem:[%s6675_s15 + $0x158] sm:$0xff] %v6596_v0 }
  0x2b   : > { %441 = vst [vmem:[%s6675_s15 + $0x160] sm:$0xff] %v6596_v0  ;;  %442 = vst [vmem:[%s6675_s15 + $0x168] sm:$0xff] %v6596_v0 }
  0x2c   : > { %443 = vst [vmem:[%s6675_s15 + $0x170] sm:$0xff] %v6596_v0  ;;  %444 = vst [vmem:[%s6675_s15 + $0x178] sm:$0xff] %v6596_v0 }
  0x2d   : > { %445 = vst [vmem:[%s6675_s15 + $0x180] sm:$0xff] %v6596_v0  ;;  %446 = vst [vmem:[%s6675_s15 + $0x188] sm:$0xff] %v6596_v0 }
  0x2e   : > { %447 = vst [vmem:[%s6675_s15 + $0x190] sm:$0xff] %v6596_v0  ;;  %448 = vst [vmem:[%s6675_s15 + $0x198] sm:$0xff] %v6596_v0 }
  0x2f   : > { %449 = vst [vmem:[%s6675_s15 + $0x1a0] sm:$0xff] %v6596_v0  ;;  %450 = vst [vmem:[%s6675_s15 + $0x1a8] sm:$0xff] %v6596_v0 }
  0x30   : > { %451 = vst [vmem:[%s6675_s15 + $0x1b0] sm:$0xff] %v6596_v0  ;;  %452 = vst [vmem:[%s6675_s15 + $0x1b8] sm:$0xff] %v6596_v0 }
  0x31   : > { %453 = vst [vmem:[%s6675_s15 + $0x1c0] sm:$0xff] %v6596_v0  ;;  %454 = vst [vmem:[%s6675_s15 + $0x1c8] sm:$0xff] %v6596_v0 }
  0x32   : > { %455 = vst [vmem:[%s6675_s15 + $0x1d0] sm:$0xff] %v6596_v0  ;;  %456 = vst [vmem:[%s6675_s15 + $0x1d8] sm:$0xff] %v6596_v0 }
  0x33   : > { %457 = vst [vmem:[%s6675_s15 + $0x1e0] sm:$0xff] %v6596_v0  ;;  %458 = vst [vmem:[%s6675_s15 + $0x1e8] sm:$0xff] %v6596_v0 }
  0x34   : > { %459 = vst [vmem:[%s6675_s15 + $0x1f0] sm:$0xff] %v6596_v0  ;;  %460 = vst [vmem:[%s6675_s15 + $0x1f8] sm:$0xff] %v6596_v0 }
  0x35   : > { %462 = vst.msk [vmem:[%s6695_s10] sm:$0xff] %vm461_vm0, %v6596_v0  ;;  %463 = vst.msk [vmem:[%s6695_s10 + $0x8] sm:$0xff] %vm461_vm0, %v6596_v0 }
  0x36   : > { %464 = vst.msk [vmem:[%s6695_s10 + $0x10] sm:$0xff] %vm461_vm0, %v6596_v0  ;;  %465 = vst.msk [vmem:[%s6695_s10 + $0x18] sm:$0xff] %vm461_vm0, %v6596_v0 }
  0x37   : > { %466 = vst.msk [vmem:[%s6695_s10 + $0x20] sm:$0xff] %vm461_vm0, %v6596_v0  ;;  %467 = vst.msk [vmem:[%s6695_s10 + $0x28] sm:$0xff] %vm461_vm0, %v6596_v0 }
  0x38   : > { %468 = vst.msk [vmem:[%s6695_s10 + $0x30] sm:$0xff] %vm461_vm0, %v6596_v0  ;;  %469 = vst.msk [vmem:[%s6695_s10 + $0x38] sm:$0xff] %vm461_vm0, %v6596_v0 }
  0x39   : > { %470 = vst.msk [vmem:[%s6695_s10 + $0x40] sm:$0xff] %vm461_vm0, %v6596_v0  ;;  %471 = vst.msk [vmem:[%s6695_s10 + $0x48] sm:$0xff] %vm461_vm0, %v6596_v0 }
  0x3a   : > { %472 = vst.msk [vmem:[%s6695_s10 + $0x50] sm:$0xff] %vm461_vm0, %v6596_v0  ;;  %473 = vst.msk [vmem:[%s6695_s10 + $0x58] sm:$0xff] %vm461_vm0, %v6596_v0 }
  0x3b   : > { %474 = vst.msk [vmem:[%s6695_s10 + $0x60] sm:$0xff] %vm461_vm0, %v6596_v0  ;;  %475 = vst.msk [vmem:[%s6695_s10 + $0x68] sm:$0xff] %vm461_vm0, %v6596_v0 }
  0x3c   : > { %476 = vst.msk [vmem:[%s6695_s10 + $0x70] sm:$0xff] %vm461_vm0, %v6596_v0  ;;  %477 = vst.msk [vmem:[%s6695_s10 + $0x78] sm:$0xff] %vm461_vm0, %v6596_v0 }
  0x3d   : > { %478 = vst.msk [vmem:[%s6695_s10 + $0x80] sm:$0xff] %vm461_vm0, %v6596_v0  ;;  %479 = vst.msk [vmem:[%s6695_s10 + $0x88] sm:$0xff] %vm461_vm0, %v6596_v0 }
  0x3e   : > { %480 = vst.msk [vmem:[%s6695_s10 + $0x90] sm:$0xff] %vm461_vm0, %v6596_v0  ;;  %481 = vst.msk [vmem:[%s6695_s10 + $0x98] sm:$0xff] %vm461_vm0, %v6596_v0 }
  0x3f   : > { %482 = vst.msk [vmem:[%s6695_s10 + $0xa0] sm:$0xff] %vm461_vm0, %v6596_v0  ;;  %483 = vst.msk [vmem:[%s6695_s10 + $0xa8] sm:$0xff] %vm461_vm0, %v6596_v0 }
  0x40   : > { %484 = vst.msk [vmem:[%s6695_s10 + $0xb0] sm:$0xff] %vm461_vm0, %v6596_v0  ;;  %485 = vst.msk [vmem:[%s6695_s10 + $0xb8] sm:$0xff] %vm461_vm0, %v6596_v0 }
  0x41   : > { %486 = vst.msk [vmem:[%s6695_s10 + $0xc0] sm:$0xff] %vm461_vm0, %v6596_v0  ;;  %487 = vst.msk [vmem:[%s6695_s10 + $0xc8] sm:$0xff] %vm461_vm0, %v6596_v0 }
  0x42   : > { %488 = vst.msk [vmem:[%s6695_s10 + $0xd0] sm:$0xff] %vm461_vm0, %v6596_v0  ;;  %489 = vst.msk [vmem:[%s6695_s10 + $0xd8] sm:$0xff] %vm461_vm0, %v6596_v0 }
  0x43   : > { %490 = vst.msk [vmem:[%s6695_s10 + $0xe0] sm:$0xff] %vm461_vm0, %v6596_v0  ;;  %491 = vst.msk [vmem:[%s6695_s10 + $0xe8] sm:$0xff] %vm461_vm0, %v6596_v0 }
  0x44   : > { %492 = vst.msk [vmem:[%s6695_s10 + $0xf0] sm:$0xff] %vm461_vm0, %v6596_v0  ;;  %493 = vst.msk [vmem:[%s6695_s10 + $0xf8] sm:$0xff] %vm461_vm0, %v6596_v0 }
  0x45   : > { %494 = vst.msk [vmem:[%s6695_s10 + $0x100] sm:$0xff] %vm461_vm0, %v6596_v0  ;;  %495 = vst.msk [vmem:[%s6695_s10 + $0x108] sm:$0xff] %vm461_vm0, %v6596_v0 }
  0x46   : > { %496 = vst.msk [vmem:[%s6695_s10 + $0x110] sm:$0xff] %vm461_vm0, %v6596_v0  ;;  %497 = vst.msk [vmem:[%s6695_s10 + $0x118] sm:$0xff] %vm461_vm0, %v6596_v0 }
  0x47   : > { %498 = vst.msk [vmem:[%s6695_s10 + $0x120] sm:$0xff] %vm461_vm0, %v6596_v0  ;;  %499 = vst.msk [vmem:[%s6695_s10 + $0x128] sm:$0xff] %vm461_vm0, %v6596_v0 }
  0x48   : > { %500 = vst.msk [vmem:[%s6695_s10 + $0x130] sm:$0xff] %vm461_vm0, %v6596_v0  ;;  %501 = vst.msk [vmem:[%s6695_s10 + $0x138] sm:$0xff] %vm461_vm0, %v6596_v0 }
  0x49   : > { %502 = vst.msk [vmem:[%s6695_s10 + $0x140] sm:$0xff] %vm461_vm0, %v6596_v0  ;;  %503 = vst.msk [vmem:[%s6695_s10 + $0x148] sm:$0xff] %vm461_vm0, %v6596_v0 }
  0x4a   : > { %504 = vst.msk [vmem:[%s6695_s10 + $0x150] sm:$0xff] %vm461_vm0, %v6596_v0  ;;  %505 = vst.msk [vmem:[%s6695_s10 + $0x158] sm:$0xff] %vm461_vm0, %v6596_v0 }
  0x4b   : > { %506 = vst.msk [vmem:[%s6695_s10 + $0x160] sm:$0xff] %vm461_vm0, %v6596_v0  ;;  %507 = vst.msk [vmem:[%s6695_s10 + $0x168] sm:$0xff] %vm461_vm0, %v6596_v0 }
  0x4c   : > { %508 = vst.msk [vmem:[%s6695_s10 + $0x170] sm:$0xff] %vm461_vm0, %v6596_v0  ;;  %509 = vst.msk [vmem:[%s6695_s10 + $0x178] sm:$0xff] %vm461_vm0, %v6596_v0 }
  0x4d   : > { %510 = vst.msk [vmem:[%s6695_s10 + $0x180] sm:$0xff] %vm461_vm0, %v6596_v0  ;;  %511 = vst.msk [vmem:[%s6695_s10 + $0x188] sm:$0xff] %vm461_vm0, %v6596_v0 }
  0x4e   : > { %512 = vst.msk [vmem:[%s6695_s10 + $0x190] sm:$0xff] %vm461_vm0, %v6596_v0  ;;  %513 = vst.msk [vmem:[%s6695_s10 + $0x198] sm:$0xff] %vm461_vm0, %v6596_v0 }
  0x4f   : > { %514 = vst.msk [vmem:[%s6695_s10 + $0x1a0] sm:$0xff] %vm461_vm0, %v6596_v0  ;;  %515 = vst.msk [vmem:[%s6695_s10 + $0x1a8] sm:$0xff] %vm461_vm0, %v6596_v0 }
  0x50   : > { %516 = vst.msk [vmem:[%s6695_s10 + $0x1b0] sm:$0xff] %vm461_vm0, %v6596_v0  ;;  %517 = vst.msk [vmem:[%s6695_s10 + $0x1b8] sm:$0xff] %vm461_vm0, %v6596_v0 }
  0x51   : > { %518 = vst.msk [vmem:[%s6695_s10 + $0x1c0] sm:$0xff] %vm461_vm0, %v6596_v0  ;;  %519 = vst.msk [vmem:[%s6695_s10 + $0x1c8] sm:$0xff] %vm461_vm0, %v6596_v0 }
  0x52   : > { %520 = vst.msk [vmem:[%s6695_s10 + $0x1d0] sm:$0xff] %vm461_vm0, %v6596_v0  ;;  %521 = vst.msk [vmem:[%s6695_s10 + $0x1d8] sm:$0xff] %vm461_vm0, %v6596_v0 }
  0x53   : > { %522 = vst.msk [vmem:[%s6695_s10 + $0x1e0] sm:$0xff] %vm461_vm0, %v6596_v0  ;;  %523 = vst.msk [vmem:[%s6695_s10 + $0x1e8] sm:$0xff] %vm461_vm0, %v6596_v0 }
  0x54   : > { %524 = vst.msk [vmem:[%s6695_s10 + $0x1f0] sm:$0xff] %vm461_vm0, %v6596_v0  ;;  %525 = vst.msk [vmem:[%s6695_s10 + $0x1f8] sm:$0xff] %vm461_vm0, %v6596_v0 }
  0x55 PF: > { %v5894_v1 = vld [vmem:[%s11755_s3] sm:$0xff]   ;;  %vm1509_vm1 = vcmask 1044480   ;;  %v5895_v2 = vld [vmem:[%s11755_s3 + $0x8] sm:$0x3f]   ;;  %vm1510_vm2 = vcmask 1045504   ;;  %vm1220_vm3 = vcmask 220160  }
  0x56   : > { %5651 = vmatprep.subr.bf16.mxu0 %v5894_v1  ;;  %5847 = vmatprep.subr.bf16.mxu1 %v5894_v1  ;;  %v7025_v3 = vld [vmem:[%s6680_s18] sm:$0xff]   ;;  %v6597_v5 = vmov 65535   ;;  %v7029_v8 = vld [vmem:[%s6680_s18 + $0x8] sm:$0xff]   ;;  %v7035_v11 = vld [vmem:[%s6680_s18 + $0x10] sm:$0xff]   ;;  %s6598_s14 = smov 116   ;;  %vm5140_vm4 = vcmask 23552  }
  0x57   : > { %v622_v4 = vld [vmem:[%s6685_s21 + $0x80] sm:$0xff]   ;;  %5652 = vmatpush3.bf16.msra.mxu0 %v5894_v1  ;;  %5849 = vmatpush3.bf16.msra.mxu1 %v5894_v1  ;;  %v1511_v6 = vsel %vm1509_vm1, 4294967295, %v6597_v5  ;;  %v624_v9 = vld [vmem:[%s6685_s21 + $0x88] sm:$0xff]   ;;  %v626_v12 = vld [vmem:[%s6685_s21 + $0x90] sm:$0xff]   ;;  %v4245_v26 = vunpack.c.h.bf16 %v7025_v3  ;;  %v4246_v34 = vunpack.c.l.bf16 %v7029_v8  ;;  %v4244_v39 = vunpack.c.l.bf16 %v7025_v3 }
  0x58   : > { %v1512_v7 = vsel %vm1510_vm2, %v1511_v6, 0  ;;  %5655 = vmatprep.mubr.msk.bf16.mxu0 %vm1220_vm3, %v7025_v3  ;;  %5751 = vmatprep.mubr.msk.bf16.mxu1 %vm1220_vm3, %v622_v4  ;;  %v7045_v13 = vld [vmem:[%s6680_s18 + $0x18] sm:$0xff]   ;;  %v7050_v15 = vld [vmem:[%s6680_s18 + $0x20] sm:$0xff]   ;;  %v536_v17 = vld [vmem:[%s6680_s18 + $0x28] sm:$0xff]   ;;  %v4247_v52 = vunpack.c.h.bf16 %v7029_v8  ;;  %v4249_v63 = vunpack.c.h.bf16 %v7035_v11 }
  0x59   : > { %v1514_v10 = vand.u32 %v5895_v2, %v1512_v7  ;;  %v628_v14 = vld [vmem:[%s6685_s21 + $0x98] sm:$0xff]   ;;  %v630_v16 = vld [vmem:[%s6685_s21 + $0xa0] sm:$0xff]   ;;  %v632_v18 = vld [vmem:[%s6685_s21 + $0xa8] sm:$0xff]   ;;  %v4248_v2 = vunpack.c.l.bf16 %v7035_v11 }
  0x5a   : > { %v538_v19 = vld [vmem:[%s6680_s18 + $0x30] sm:$0xff]   ;;  %v540_v21 = vld [vmem:[%s6680_s18 + $0x38] sm:$0xff]   ;;  %v542_v23 = vld [vmem:[%s6680_s18 + $0x40] sm:$0xff]  }
  0x5b   : > { %5653 = vmatprep.subr.bf16.mxu0 %v1514_v10  ;;  %5848 = vmatprep.subr.bf16.mxu1 %v1514_v10  ;;  %v634_v20 = vld [vmem:[%s6685_s21 + $0xb0] sm:$0xff]   ;;  %v636_v22 = vld [vmem:[%s6685_s21 + $0xb8] sm:$0xff]   ;;  %v638_v24 = vld [vmem:[%s6685_s21 + $0xc0] sm:$0xff]  }
  0x5c   : > { %5654 = vmatpush3.bf16.msra.mxu0 %v1514_v10  ;;  %5850 = vmatpush3.bf16.msra.mxu1 %v1514_v10  ;;  %v7072_v25 = vld [vmem:[%s6685_s21] sm:$0xff]   ;;  %v7076_v27 = vld [vmem:[%s6685_s21 + $0x8] sm:$0xff]   ;;  %v546_v35 = vld [vmem:[%s6680_s18 + $0x50] sm:$0xff]  }
  0x5d   : > { %v7079_v28 = vld [vmem:[%s6690_s25] sm:$0xff]   ;;  %v544_v29 = vld [vmem:[%s6680_s18 + $0x48] sm:$0xff]   ;;  %v4309_v32 = vunpack.c.h.bf16 %v7072_v25  ;;  %v7093_v36 = vld [vmem:[%s6680_s18 + $0x58] sm:$0xff]   ;;  %v4310_v37 = vunpack.c.l.bf16 %v7076_v27  ;;  %v4311_v54 = vunpack.c.h.bf16 %v7076_v27  ;;  %v4308_v58 = vunpack.c.l.bf16 %v7072_v25 }
  0x5e   : > { %v640_v30 = vld [vmem:[%s6685_s21 + $0xc8] sm:$0xff]   ;;  %v4373_v33 = vunpack.c.h.bf16 %v7079_v28  ;;  %v642_v40 = vld [vmem:[%s6685_s21 + $0xd0] sm:$0xff]   ;;  %v7102_v43 = vld [vmem:[%s6685_s21 + $0xd8] sm:$0xff]   ;;  %v4372_v62 = vunpack.c.l.bf16 %v7079_v28 }
  0x5f   : > { %5656 = vmatmul.mubr.msk.bf16.vlgmr.msra.gmra.mrb[0].mxu0 %vm1220_vm3, %v7029_v8  ;;  %5752 = vmatmul.mubr.msk.bf16.vlgmr.msra.gmra.mrb[0].mxu1 %vm1220_vm3, %v624_v9  ;;  %v7084_v31 = vld [vmem:[%s6690_s25 + $0x8] sm:$0xff]   ;;  %v7105_v46 = vld [vmem:[%s6680_s18 + $0x60] sm:$0xff]   ;;  %v7114_v56 = vld [vmem:[%s6685_s21 + $0x10] sm:$0xff]  }
  0x60   : > { %5659 = vmatprep.mubr.msk.bf16.mxu0 %vm1220_vm3, %v7035_v11  ;;  %5755 = vmatprep.mubr.msk.bf16.mxu1 %vm1220_vm3, %v626_v12  ;;  %v4374_v38 = vunpack.c.l.bf16 %v7084_v31  ;;  %v4501_v41 = vsub.f32 %v4245_v26, %v4373_v33  ;;  %v4629_v42 = vsub.f32 %v4309_v32, %v4373_v33  ;;  %v7108_v47 = vld [vmem:[%s6685_s21 + $0xe0] sm:$0xff]   ;;  %v4375_v55 = vunpack.c.h.bf16 %v7084_v31  ;;  %v7118_v59 = vld [vmem:[%s6690_s25 + $0x10] sm:$0xff]   ;;  %v7130_v4 = vld [vmem:[%s6685_s21 + $0x18] sm:$0xff]  }
  0x61   : > { %v4313_v0 = vunpack.c.h.bf16 %v7114_v56  ;;  %v4377_v1 = vunpack.c.h.bf16 %v7118_v59  ;;  %v4312_v3 = vunpack.c.l.bf16 %v7114_v56  ;;  %v4500_v7 = vsub.f32 %v4244_v39, %v4372_v62 }
  0x62   : > { %v4502_v44 = vsub.f32 %v4246_v34, %v4374_v38  ;;  %v4630_v45 = vsub.f32 %v4310_v37, %v4374_v38  ;;  %v4565_v48 = vand.u32 2147483647, %v4501_v41  ;;  %v4693_v49 = vand.u32 2147483647, %v4629_v42 }
  0x63   : > { %v4503_v60 = vsub.f32 %v4247_v52, %v4375_v55  ;;  %v4631_v61 = vsub.f32 %v4311_v54, %v4375_v55  ;;  %v4628_v8 = vsub.f32 %v4308_v58, %v4372_v62  ;;  %v4505_v9 = vsub.f32 %v4249_v63, %v4377_v1  ;;  %v652_v62 = vld [vmem:[%s6685_s21 + $0xf8] sm:$0xff]   ;;  %v558_v63 = vld [vmem:[%s6680_s18 + $0x80] sm:$0xff]  }
  0x64   : > { %v4566_v50 = vand.u32 2147483647, %v4502_v44  ;;  %v4694_v51 = vand.u32 2147483647, %v4630_v45  ;;  %v4757_v53 = vadd.f32 %v4693_v49, %v4565_v48  ;;  %v4633_v10 = vsub.f32 %v4313_v0, %v4377_v1  ;;  %v648_v44 = vld [vmem:[%s6685_s21 + $0xe8] sm:$0xff]   ;;  %v662_v45 = vld [vmem:[%s6690_s25 + $0x20] sm:$0xff]  }
  0x65   : > { %v4567_v5 = vand.u32 2147483647, %v4503_v60  ;;  %v4695_v6 = vand.u32 2147483647, %v4631_v61  ;;  %v4376_v12 = vunpack.c.l.bf16 %v7118_v59  ;;  %v4380_v54 = vunpack.c.l.bf16 %v662_v45  ;;  %v556_v61 = vld [vmem:[%s6680_s18 + $0x78] sm:$0xff]   ;;  %v560_v0 = vld [vmem:[%s6680_s18 + $0x88] sm:$0xff]  }
  0x66   : > { %v4758_v57 = vadd.f32 %v4694_v51, %v4566_v50  ;;  %4886 = vrot.lane.b32.xlu1 %v4757_v53, %s6598_s14  ;;  %v4252_v50 = vunpack.c.l.bf16 %v7050_v15  ;;  %v554_v51 = vld [vmem:[%s6680_s18 + $0x70] sm:$0xff]  }
  0x67   : > { %5660 = vmatmul.mubr.msk.bf16.gmra.mrb[4].mxu0 %vm1220_vm3, %v7045_v13  ;;  %5756 = vmatmul.mubr.msk.bf16.gmra.mrb[4].mxu1 %vm1220_vm3, %v628_v14  ;;  %v4251_v14 = vunpack.c.h.bf16 %v7045_v13  ;;  %v4759_v11 = vadd.f32 %v4695_v6, %v4567_v5  ;;  %v562_v1 = vld [vmem:[%s6680_s18 + $0x90] sm:$0xff]  }
  0x68   : > { %5663 = vmatprep.mubr.msk.bf16.mxu0 %vm1220_vm3, %v7050_v15  ;;  %5759 = vmatprep.mubr.msk.bf16.mxu1 %vm1220_vm3, %v630_v16  ;;  %v4564_v16 = vand.u32 2147483647, %v4500_v7  ;;  %v4508_v55 = vsub.f32 %v4252_v50, %v4380_v54  ;;  %v570_v5 = vld [vmem:[%s6680_s18 + $0xb0] sm:$0xff]   ;;  %v668_v7 = vld [vmem:[%s6690_s25 + $0x38] sm:$0xff]  }
  0x69   : > { %v666_v6 = vld [vmem:[%s6690_s25 + $0x30] sm:$0xff]  }
  0x6a   : > { %4888 = vrot.lane.b32.xlu1 %v4758_v57, %s6598_s14  ;;  %v4572_v58 = vand.u32 2147483647, %v4508_v55 }
  0x6e   : > { %4890 = vrot.lane.b32.xlu1 %v4759_v11, %s6598_s14  ;;  %v674_v11 = vld [vmem:[%s6690_s25 + $0x50] sm:$0xff]  }
  0x6f   : > { %5664 = vmatmul.mubr.msk.bf16.gmra.mrb[8].mxu0 %vm1220_vm3, %v536_v17  ;;  %5760 = vmatmul.mubr.msk.bf16.gmra.mrb[8].mxu1 %vm1220_vm3, %v632_v18  ;;  %v4692_v17 = vand.u32 2147483647, %v4628_v8  ;;  %v4315_v18 = vunpack.c.h.bf16 %v7130_v4  ;;  %v574_v8 = vld [vmem:[%s6680_s18 + $0xc0] sm:$0xff]  }
  0x70   : > { %5667 = vmatprep.mubr.msk.bf16.mxu0 %vm1220_vm3, %v538_v19  ;;  %5763 = vmatprep.mubr.msk.bf16.mxu1 %vm1220_vm3, %v634_v20  ;;  %v7139_v19 = vld [vmem:[%s6690_s25 + $0x18] sm:$0xff]   ;;  %v4569_v20 = vand.u32 2147483647, %v4505_v9  ;;  %v670_v9 = vld [vmem:[%s6690_s25 + $0x40] sm:$0xff]  }
  0x71   : > { %v4379_v26 = vunpack.c.h.bf16 %v7139_v19  ;;  %v4378_v34 = vunpack.c.l.bf16 %v7139_v19 }
  0x73   : > { %v4507_v38 = vsub.f32 %v4251_v14, %v4379_v26  ;;  %v4635_v39 = vsub.f32 %v4315_v18, %v4379_v26  ;;  %v578_v14 = vld [vmem:[%s6680_s18 + $0xd0] sm:$0xff]   ;;  %v582_v18 = vld [vmem:[%s6680_s18 + $0xe0] sm:$0xff]   ;;  %v684_v26 = vld [vmem:[%s6690_s25 + $0x78] sm:$0xff]  }
  0x75   : > { %v4571_v48 = vand.u32 2147483647, %v4507_v38  ;;  %v4699_v49 = vand.u32 2147483647, %v4635_v39  ;;  %v600_v38 = vld [vmem:[%s6685_s21 + $0x28] sm:$0xff]  }
  0x77   : > { %5668 = vmatmul.mubr.msk.bf16.gmra.mrb[12].mxu0 %vm1220_vm3, %v540_v21  ;;  %5764 = vmatmul.mubr.msk.bf16.gmra.mrb[12].mxu1 %vm1220_vm3, %v636_v22  ;;  %v4697_v21 = vand.u32 2147483647, %v4633_v10  ;;  %v4504_v22 = vsub.f32 %v4248_v2, %v4376_v12  ;;  %v564_v2 = vld [vmem:[%s6680_s18 + $0x98] sm:$0xff]   ;;  %v576_v10 = vld [vmem:[%s6680_s18 + $0xc8] sm:$0xff]  }
  0x78   : > { %5671 = vmatprep.mubr.msk.bf16.mxu0 %vm1220_vm3, %v542_v23  ;;  %5767 = vmatprep.mubr.msk.bf16.mxu1 %vm1220_vm3, %v638_v24  ;;  %v4632_v23 = vsub.f32 %v4312_v3, %v4376_v12  ;;  %v4756_v24 = vadd.f32 %v4692_v17, %v4564_v16  ;;  %v566_v3 = vld [vmem:[%s6680_s18 + $0xa0] sm:$0xff]   ;;  %v672_v12 = vld [vmem:[%s6690_s25 + $0x48] sm:$0xff]   ;;  %v580_v16 = vld [vmem:[%s6680_s18 + $0xd8] sm:$0xff]  }
  0x79   : > { %v4568_v32 = vand.u32 2147483647, %v4504_v22  ;;  %v4761_v37 = vadd.f32 %v4697_v21, %v4569_v20  ;;  %v676_v17 = vld [vmem:[%s6690_s25 + $0x58] sm:$0xff]   ;;  %v584_v20 = vld [vmem:[%s6680_s18 + $0xe8] sm:$0xff]   ;;  %v586_v22 = vld [vmem:[%s6680_s18 + $0xf0] sm:$0xff]  }
  0x7a   : > { %v4696_v33 = vand.u32 2147483647, %v4632_v23  ;;  %4884 = vrot.lane.b32.xlu0 %v4756_v24, %s6598_s14  ;;  %v680_v21 = vld [vmem:[%s6690_s25 + $0x68] sm:$0xff]   ;;  %v682_v23 = vld [vmem:[%s6690_s25 + $0x70] sm:$0xff]   ;;  %v588_v24 = vld [vmem:[%s6680_s18 + $0xf8] sm:$0xff]  }
  0x7b   : > { %4894 = vrot.lane.b32.xlu1 %v4761_v37, %s6598_s14 }
  0x7f   : > { %5672 = vmatmul.mubr.msk.bf16.gmra.mrb[16].mxu0 %vm1220_vm3, %v544_v29  ;;  %5768 = vmatmul.mubr.msk.bf16.gmra.mrb[16].mxu1 %vm1220_vm3, %v640_v30  ;;  %v4250_v29 = vunpack.c.l.bf16 %v7045_v13  ;;  %v4314_v30 = vunpack.c.l.bf16 %v7130_v4  ;;  %v552_v13 = vld [vmem:[%s6680_s18 + $0x68] sm:$0xff]  }
  0x80   : > { %5675 = vmatprep.mubr.msk.bf16.mxu0 %vm1220_vm3, %v546_v35  ;;  %5771 = vmatprep.mubr.msk.bf16.mxu1 %vm1220_vm3, %v642_v40  ;;  %v7146_v35 = vld [vmem:[%s6685_s21 + $0x20] sm:$0xf]  ;;  %v4760_v40 = vadd.f32 %v4696_v33, %v4568_v32  ;;  %v690_v32 = vld [vmem:[%s6690_s25 + $0x90] sm:$0xff]   ;;  %v4437_v33 = vld [vmem:[%s6695_s10 + $0x8] sm:$0xff] }
  0x81   : > { %v4506_v41 = vsub.f32 %v4250_v29, %v4378_v34  ;;  %v4634_v42 = vsub.f32 %v4314_v30, %v4378_v34  ;;  %v7240_v29 = vld [vmem:[%s6690_s25 + $0x80] sm:$0xff]   ;;  %v688_v30 = vld [vmem:[%s6690_s25 + $0x88] sm:$0xff]  }
  0x82   : > { %4892 = vrot.lane.b32.xlu0 %v4760_v40, %s6598_s14  ;;  %12145 = vst [vmem:[#allocation2_spill] sm:$0xff] %v7240_v29  ;;  %v599_v34 = vld [vmem:[%s6685_s21 + $0x24] sm:$0xf] }
  0x83   : > { %v4570_v52 = vand.u32 2147483647, %v4506_v41  ;;  %v4698_v53 = vand.u32 2147483647, %v4634_v42  ;;  %v696_v41 = vld [vmem:[%s6690_s25 + $0xa8] sm:$0xff]  }
  0x87   : > { %5676 = vmatmul.mubr.msk.bf16.gmra.mrb[20].mxu0 %vm1220_vm3, %v7093_v36  ;;  %5772 = vmatmul.mubr.msk.bf16.gmra.mrb[20].mxu1 %vm1220_vm3, %v7102_v43  ;;  %v4316_v36 = vunpack.c.l.bf16 %v7146_v35  ;;  %v650_v43 = vld [vmem:[%s6685_s21 + $0xf0] sm:$0xff]  }
  0x88   : > { %5679 = vmatprep.mubr.msk.bf16.mxu0 %vm1220_vm3, %v7105_v46  ;;  %5775 = vmatprep.mubr.msk.bf16.mxu1 %vm1220_vm3, %v7108_v47  ;;  %v4763_v46 = vadd.f32 %v4699_v49, %v4571_v48  ;;  %v4762_v47 = vadd.f32 %v4698_v53, %v4570_v52  ;;  %v4436_v49 = vld [vmem:[%s6695_s10] sm:$0xff] }
  0x89   : > { %v4636_v57 = vsub.f32 %v4316_v36, %v4380_v54  ;;  %v4440_v53 = vld [vmem:[%s6695_s10 + $0x20] sm:$0xff] }
  0x8a   : > { %4898 = vrot.lane.b32.xlu1 %v4763_v46, %s6598_s14  ;;  %4896 = vrot.lane.b32.xlu0 %v4762_v47, %s6598_s14  ;;  %v602_v46 = vld [vmem:[%s6685_s21 + $0x30] sm:$0xff]  }
  0x8b   : > { %v4700_v15 = vand.u32 2147483647, %v4636_v57  ;;  %v604_v57 = vld [vmem:[%s6685_s21 + $0x38] sm:$0xff]  }
  0x8d   : > { %v4764_v60 = vadd.f32 %v4700_v15, %v4572_v58  ;;  %v4442_v58 = vld [vmem:[%s6695_s10 + $0x30] sm:$0xff] }
  0x8f   : > { %5680 = vmatmul.mubr.msk.bf16.gmra.mrb[24].mxu0 %vm1220_vm3, %v552_v13  ;;  %5776 = vmatmul.mubr.msk.bf16.gmra.mrb[24].mxu1 %vm1220_vm3, %v648_v44  ;;  %v694_v13 = vld [vmem:[%s6690_s25 + $0xa0] sm:$0xff]  }
  0x90   : > { %5683 = vmatprep.mubr.msk.bf16.mxu0 %vm1220_vm3, %v554_v51  ;;  %5779 = vmatprep.mubr.msk.bf16.mxu1 %vm1220_vm3, %v650_v43  ;;  %v4443_v43 = vld [vmem:[%s6695_s10 + $0x38] sm:$0xff] }
  0x91   : > { %4900 = vrot.lane.b32.xlu0 %v4764_v60, %s6598_s14  ;;  %v698_v60 = vld [vmem:[%s6690_s25 + $0xb0] sm:$0xff]  }
  0x97   : > { %5684 = vmatmul.mubr.msk.bf16.gmra.mrb[28].mxu0 %vm1220_vm3, %v556_v61  ;;  %5780 = vmatmul.mubr.msk.bf16.gmra.mrb[28].mxu1 %vm1220_vm3, %v652_v62  ;;  %v700_v62 = vld [vmem:[%s6690_s25 + $0xb8] sm:$0xff]  }
  0x98   : > { %5687 = vmatprep.mubr.msk.bf16.mxu0 %vm1220_vm3, %v558_v63  ;;  %5783 = vmatprep.mubr.msk.bf16.mxu1 %vm1220_vm3, %v7079_v28  ;;  %v568_v28 = vld [vmem:[%s6680_s18 + $0xa8] sm:$0xff]   ;;  %v4444_v63 = vld [vmem:[%s6695_s10 + $0x40] sm:$0xff] }
  0x9f   : > { %5688 = vmatmul.mubr.msk.bf16.gmra.mrb[32].mxu0 %vm1220_vm3, %v560_v0  ;;  %5784 = vmatmul.mubr.msk.bf16.gmra.mrb[32].mxu1 %vm1220_vm3, %v7084_v31  ;;  %v664_v31 = vld [vmem:[%s6690_s25 + $0x28] sm:$0xff]  }
  0xa0   : > { %5691 = vmatprep.mubr.msk.bf16.mxu0 %vm1220_vm3, %v562_v1  ;;  %5787 = vmatprep.mubr.msk.bf16.mxu1 %vm1220_vm3, %v7118_v59  ;;  %v572_v59 = vld [vmem:[%s6680_s18 + $0xb8] sm:$0xff]  }
  0xa7   : > { %5692 = vmatmul.mubr.msk.bf16.gmra.mrb[36].mxu0 %vm1220_vm3, %v564_v2  ;;  %5788 = vmatmul.mubr.msk.bf16.gmra.mrb[36].mxu1 %vm1220_vm3, %v7139_v19  ;;  %v678_v19 = vld [vmem:[%s6690_s25 + $0x60] sm:$0xff]  }
  0xa8   : > { %5695 = vmatprep.mubr.msk.bf16.mxu0 %vm1220_vm3, %v566_v3  ;;  %5791 = vmatprep.mubr.msk.bf16.mxu1 %vm1220_vm3, %v662_v45  ;;  %v4441_v45 = vld [vmem:[%s6695_s10 + $0x28] sm:$0xff]  ;;  %v606_v2 = vld [vmem:[%s6685_s21 + $0x40] sm:$0xff]  }
  0xa9   : > { %v608_v3 = vld [vmem:[%s6685_s21 + $0x48] sm:$0xff]  }
  0xaf   : > { %5696 = vmatmul.mubr.msk.bf16.gmra.mrb[40].mxu0 %vm1220_vm3, %v568_v28  ;;  %5792 = vmatmul.mubr.msk.bf16.gmra.mrb[40].mxu1 %vm1220_vm3, %v664_v31  ;;  %v702_v28 = vld [vmem:[%s6690_s25 + $0xc0] sm:$0xff]   ;;  %v704_v31 = vld [vmem:[%s6690_s25 + $0xc8] sm:$0xff]  }
  0xb0   : > { %5699 = vmatprep.mubr.msk.bf16.mxu0 %vm1220_vm3, %v570_v5  ;;  %5795 = vmatprep.mubr.msk.bf16.mxu1 %vm1220_vm3, %v666_v6  ;;  %v610_v5 = vld [vmem:[%s6685_s21 + $0x50] sm:$0xff]   ;;  %v612_v6 = vld [vmem:[%s6685_s21 + $0x58] sm:$0xff]  }
  0xb7   : > { %5700 = vmatmul.mubr.msk.bf16.gmra.mrb[44].mxu0 %vm1220_vm3, %v572_v59  ;;  %5796 = vmatmul.mubr.msk.bf16.gmra.mrb[44].mxu1 %vm1220_vm3, %v668_v7  ;;  %v706_v59 = vld [vmem:[%s6690_s25 + $0xd0] sm:$0xff]   ;;  %v708_v7 = vld [vmem:[%s6690_s25 + $0xd8] sm:$0xff]  }
  0xb8   : > { %5703 = vmatprep.mubr.msk.bf16.mxu0 %vm1220_vm3, %v574_v8  ;;  %5799 = vmatprep.mubr.msk.bf16.mxu1 %vm1220_vm3, %v670_v9  ;;  %v7323_v8 = vld [vmem:[%s11756_s4] ss:$0 sm:$0xff] }
  0xbf   : > { %5704 = vmatmul.mubr.msk.bf16.gmra.mrb[48].mxu0 %vm1220_vm3, %v576_v10  ;;  %5800 = vmatmul.mubr.msk.bf16.gmra.mrb[48].mxu1 %vm1220_vm3, %v672_v12 }
  0xc0   : > { %5707 = vmatprep.mubr.msk.bf16.mxu0 %vm1220_vm3, %v578_v14  ;;  %5803 = vmatprep.mubr.msk.bf16.mxu1 %vm1220_vm3, %v674_v11 }
  0xc7   : > { %5708 = vmatmul.mubr.msk.bf16.gmra.mrb[52].mxu0 %vm1220_vm3, %v580_v16  ;;  %5804 = vmatmul.mubr.msk.bf16.gmra.mrb[52].mxu1 %vm1220_vm3, %v676_v17 }
  0xc8   : > { %5711 = vmatprep.mubr.msk.bf16.mxu0 %vm1220_vm3, %v582_v18  ;;  %5807 = vmatprep.mubr.msk.bf16.mxu1 %vm1220_vm3, %v678_v19 }
  0xcf   : > { %5712 = vmatmul.mubr.msk.bf16.gmra.mrb[56].mxu0 %vm1220_vm3, %v584_v20  ;;  %5808 = vmatmul.mubr.msk.bf16.gmra.mrb[56].mxu1 %vm1220_vm3, %v680_v21 }
  0xd0   : > { %5715 = vmatprep.mubr.msk.bf16.mxu0 %vm1220_vm3, %v586_v22  ;;  %5811 = vmatprep.mubr.msk.bf16.mxu1 %vm1220_vm3, %v682_v23 }
  0xd7   : > { %5716 = vmatmul.mubr.msk.bf16.gmra.mrb[60].mxu0 %vm1220_vm3, %v588_v24  ;;  %5812 = vmatmul.mubr.msk.bf16.gmra.mrb[60].mxu1 %vm1220_vm3, %v684_v26 }
  0xd8   : > { %5719 = vmatprep.mubr.msk.bf16.mxu0 %vm1220_vm3, %v7072_v25  ;;  %5815 = vmatprep.mubr.msk.bf16.mxu1 %vm1220_vm3, %v7240_v29  ;;  %v692_v25 = vld [vmem:[%s6690_s25 + $0x98] sm:$0xff]  }
  0xdf   : > { %5720 = vmatmul.mubr.msk.bf16.gmra.mrb[64].mxu0 %vm1220_vm3, %v7076_v27  ;;  %5816 = vmatmul.mubr.msk.bf16.gmra.mrb[64].mxu1 %vm1220_vm3, %v688_v30  ;;  %v4887_v27 = vpop.permute.xlu1 %4886 }
  0xe0   : > { %5723 = vmatprep.mubr.msk.bf16.mxu0 %vm1220_vm3, %v7114_v56  ;;  %5819 = vmatprep.mubr.msk.bf16.mxu1 %vm1220_vm3, %v690_v32  ;;  %v5077_v37 = vadd.f32 %v4887_v27, %v4437_v33  ;;  %v5389_v56 = vcombine.low %v7146_v35, %v599_v34  ;;  %v4439_v35 = vld [vmem:[%s6695_s10 + $0x18] sm:$0xff]  ;;  %v614_v32 = vld [vmem:[%s6685_s21 + $0x60] sm:$0xff]  }
  0xe2   : > { %5142 = vst.msk [vmem:[%s6695_s10 + $0x8] sm:$0xff] %vm5140_vm4, %v5077_v37  ;;  %v616_v37 = vld [vmem:[%s6685_s21 + $0x68] sm:$0xff]  }
  0xe3   : > { %v4889_v39 = vpop.permute.xlu1 %4888 }
  0xe7   : > { %5724 = vmatmul.mubr.msk.bf16.gmra.mrb[68].mxu0 %vm1220_vm3, %v7130_v4  ;;  %5820 = vmatmul.mubr.msk.bf16.gmra.mrb[68].mxu1 %vm1220_vm3, %v692_v25  ;;  %v4438_v4 = vld [vmem:[%s6695_s10 + $0x10] sm:$0xff]  ;;  %v4891_v42 = vpop.permute.xlu1 %4890 }
  0xe8   : > { %5727 = vmatprep.mubr.msk.bf16.mxu0 %vm1220_vm3, %v5389_v56  ;;  %v5078_v40 = vadd.f32 %v4889_v39, %v4438_v4  ;;  %5823 = vmatprep.mubr.msk.bf16.mxu1 %vm1220_vm3, %v694_v13  ;;  %v5079_v44 = vadd.f32 %v4891_v42, %v4439_v35  ;;  %v710_v56 = vld [vmem:[%s6690_s25 + $0xe0] sm:$0xff]  }
  0xea   : > { %5143 = vst.msk [vmem:[%s6695_s10 + $0x10] sm:$0xff] %vm5140_vm4, %v5078_v40  ;;  %5144 = vst.msk [vmem:[%s6695_s10 + $0x18] sm:$0xff] %vm5140_vm4, %v5079_v44 }
  0xec   : > { %v4885_v50 = vpop.permute.xlu0 %4884 }
  0xed   : > { %v4895_v48 = vpop.permute.xlu1 %4894  ;;  %v5076_v51 = vadd.f32 %v4885_v50, %v4436_v49 }
  0xee   : > { %v5081_v36 = vadd.f32 %v4895_v48, %v4441_v45 }
  0xef   : > { %5728 = vmatmul.mubr.msk.bf16.gmra.mrb[72].mxu0 %vm1220_vm3, %v600_v38  ;;  %5824 = vmatmul.mubr.msk.bf16.gmra.mrb[72].mxu1 %vm1220_vm3, %v696_v41  ;;  %5141 = vst.msk [vmem:[%s6695_s10] sm:$0xff] %vm5140_vm4, %v5076_v51 }
  0xf0   : > { %5146 = vst.msk [vmem:[%s6695_s10 + $0x28] sm:$0xff] %vm5140_vm4, %v5081_v36  ;;  %5731 = vmatprep.mubr.msk.bf16.mxu0 %vm1220_vm3, %v602_v46  ;;  %5827 = vmatprep.mubr.msk.bf16.mxu1 %vm1220_vm3, %v698_v60 }
  0xf4   : > { %v4893_v54 = vpop.permute.xlu0 %4892 }
  0xf5   : > { %v5080_v55 = vadd.f32 %v4893_v54, %v4440_v53 }
  0xf7   : > { %5145 = vst.msk [vmem:[%s6695_s10 + $0x20] sm:$0xff] %vm5140_vm4, %v5080_v55  ;;  %5732 = vmatmul.mubr.msk.bf16.gmra.mrb[76].mxu0 %vm1220_vm3, %v604_v57  ;;  %5828 = vmatmul.mubr.msk.bf16.gmra.mrb[76].mxu1 %vm1220_vm3, %v700_v62 }
  0xf8   : > { %5735 = vmatprep.mubr.msk.bf16.mxu0 %vm1220_vm3, %v606_v2  ;;  %5831 = vmatprep.mubr.msk.bf16.mxu1 %vm1220_vm3, %v702_v28 }
  0xfc   : > { %v4899_v52 = vpop.permute.xlu1 %4898  ;;  %v4897_v15 = vpop.permute.xlu0 %4896 }
  0xfd   : > { %v5083_v47 = vadd.f32 %v4899_v52, %v4443_v43  ;;  %v5082_v61 = vadd.f32 %v4897_v15, %v4442_v58  ;;  %v712_v52 = vld [vmem:[%s6690_s25 + $0xe8] sm:$0xff]  }
  0xff   : > { %5148 = vst.msk [vmem:[%s6695_s10 + $0x38] sm:$0xff] %vm5140_vm4, %v5083_v47  ;;  %5147 = vst.msk [vmem:[%s6695_s10 + $0x30] sm:$0xff] %vm5140_vm4, %v5082_v61  ;;  %5736 = vmatmul.mubr.msk.bf16.gmra.mrb[80].mxu0 %vm1220_vm3, %v608_v3  ;;  %5832 = vmatmul.mubr.msk.bf16.gmra.mrb[80].mxu1 %vm1220_vm3, %v704_v31 }
 0x100   : > { %5739 = vmatprep.mubr.msk.bf16.mxu0 %vm1220_vm3, %v610_v5  ;;  %5835 = vmatprep.mubr.msk.bf16.mxu1 %vm1220_vm3, %v706_v59 }
 0x103   : > { %v4901_v0 = vpop.permute.xlu0 %4900 }
 0x104   : > { %v5084_v1 = vadd.f32 %v4901_v0, %v4444_v63 }
 0x106   : > { %5149 = vst.msk [vmem:[%s6695_s10 + $0x40] sm:$0xff] %vm5140_vm4, %v5084_v1 }
 0x107   : > { %5740 = vmatmul.mubr.msk.bf16.gmra.mrb[84].mxu0 %vm1220_vm3, %v612_v6  ;;  %5836 = vmatmul.mubr.msk.bf16.gmra.mrb[84].mxu1 %vm1220_vm3, %v708_v7 }
 0x108   : > { %5743 = vmatprep.mubr.msk.bf16.mxu0 %vm1220_vm3, %v614_v32  ;;  %5839 = vmatprep.mubr.msk.bf16.mxu1 %vm1220_vm3, %v710_v56  ;;  %v714_v32 = vld [vmem:[%s6690_s25 + $0xf0] sm:$0xff]  }
 0x10f   : > { %5744 = vmatmul.mubr.msk.bf16.gmra.mrb[88].mxu0 %vm1220_vm3, %v616_v37  ;;  %5840 = vmatmul.mubr.msk.bf16.gmra.mrb[88].mxu1 %vm1220_vm3, %v712_v52 }
 0x110   : > { %5843 = vmatprep.mubr.msk.bf16.mxu1 %vm1220_vm3, %v714_v32 }
 0x132   : > { %v5657_v9 = vpop.f32.mrb[0].mxu0  ;;  %v5753_v10 = vpop.f32.mrb[0].mxu1 }
 0x133   : > { %v1559_v12 = vadd.f32 %v5657_v9, %v7323_v8  ;;  %v1943_v14 = vadd.f32 %v5753_v10, %v7323_v8  ;;  %v1550_v11 = vpop.f32.mrb[1].mxu0  ;;  %v1934_v16 = vpop.f32.mrb[1].mxu1 }
 0x134   : > { %v1551_v17 = vadd.f32 %v7323_v8, %v1550_v11  ;;  %v5658_v18 = vpop.f32.mrb[2].mxu0  ;;  %v5754_v19 = vpop.f32.mrb[2].mxu1  ;;  %v1935_v26 = vadd.f32 %v7323_v8, %v1934_v16 }
 0x135   : > { %v7328_v20 = vmax.f32 %v1559_v12, 0.0  ;;  %v7330_v21 = vmax.f32 %v1943_v14, 0.0  ;;  %v1562_v22 = vadd.f32 %v5658_v18, %v7323_v8  ;;  %v1553_v23 = vpop.f32.mrb[3].mxu0  ;;  %v1937_v24 = vpop.f32.mrb[3].mxu1  ;;  %v1946_v30 = vadd.f32 %v5754_v19, %v7323_v8  ;;  %v618_v12 = vld [vmem:[%s6685_s21 + $0x70] sm:$0xff]   ;;  %v620_v14 = vld [vmem:[%s6685_s21 + $0x78] sm:$0xff]  }
 0x136   : > { %v7336_v25 = vmax.f32 %v1551_v17, 0.0  ;;  %v1554_v38 = vadd.f32 %v7323_v8, %v1553_v23  ;;  %v1938_v4 = vadd.f32 %v7323_v8, %v1937_v24  ;;  %v7348_v40 = vmax.f32 %v1935_v26, 0.0  ;;  %5747 = vmatprep.mubr.msk.bf16.mxu0 %vm1220_vm3, %v618_v12 }
 0x137   : > { %12146 = vst [vmem:[#allocation3_spill] sm:$0xff] %v7328_v20  ;;  %12147 = vst [vmem:[#allocation4_spill] sm:$0xff] %v7330_v21  ;;  %v7338_v33 = vmax.f32 %v1562_v22, 0.0  ;;  %v2607_v27 = vmul.f32 %v7330_v21, %v7330_v21  ;;  %v2511_v34 = vmul.f32 %v7328_v20, %v7328_v20  ;;  %v7350_v41 = vmax.f32 %v1946_v30, 0.0  ;;  %5748 = vmatmul.mubr.msk.bf16.gmra.mrb[92].mxu0 %vm1220_vm3, %v620_v14 }
 0x138   : > { %12148 = vst [vmem:[#allocation5_spill] sm:$0xff] %v7336_v25  ;;  %12150 = vst [vmem:[#allocation7_spill] sm:$0xff] %v7348_v40  ;;  %v2509_v42 = vmul.f32 %v7336_v25, %v7336_v25  ;;  %v7358_v51 = vmax.f32 %v1554_v38, 0.0  ;;  %v7360_v43 = vmax.f32 %v1938_v4, 0.0  ;;  %v2605_v47 = vmul.f32 %v7348_v40, %v7348_v40 }
 0x139   : > { %12149 = vst [vmem:[#allocation6_spill] sm:$0xff] %v7338_v33  ;;  %2897 = vadd.xlane.f32.xlu0 %v2607_v27  ;;  %2705 = vadd.xlane.f32.xlu1 %v2511_v34  ;;  %12151 = vst [vmem:[#allocation8_spill] sm:$0xff] %v7350_v41  ;;  %v2512_v35 = vmul.f32 %v7338_v33, %v7338_v33  ;;  %v2608_v46 = vmul.f32 %v7350_v41, %v7350_v41 }
 0x13a   : > { %v5661_v39 = vpop.f32.mrb[4].mxu0  ;;  %v5757_v13 = vpop.f32.mrb[4].mxu1  ;;  %12152 = vst [vmem:[#allocation9_spill] sm:$0xff] %v7358_v51  ;;  %12153 = vst [vmem:[#allocation10_spill] sm:$0xff] %v7360_v43  ;;  %v2606_v57 = vmul.f32 %v7360_v43, %v7360_v43  ;;  %v2510_v63 = vmul.f32 %v7358_v51, %v7358_v51 }
 0x13b   : > { %v1566_v44 = vpop.f32.mrb[5].mxu0  ;;  %v1950_v45 = vpop.f32.mrb[5].mxu1  ;;  %v1575_v53 = vadd.f32 %v5661_v39, %v7323_v8  ;;  %v1959_v55 = vadd.f32 %v5757_v13, %v7323_v8  ;;  %v716_v39 = vld [vmem:[%s6690_s25 + $0xf8] sm:$0xff]  }
 0x13c   : > { %v5662_v48 = vpop.f32.mrb[6].mxu0  ;;  %v5758_v49 = vpop.f32.mrb[6].mxu1  ;;  %v1567_v5 = vadd.f32 %v7323_v8, %v1566_v44  ;;  %v1951_v11 = vadd.f32 %v7323_v8, %v1950_v45  ;;  %5844 = vmatmul.mubr.msk.bf16.gmra.mrb[92].mxu1 %vm1220_vm3, %v716_v39 }
 0x13d   : > { %2707 = vadd.xlane.f32.xlu1 %v2512_v35  ;;  %2701 = vadd.xlane.f32.xlu0 %v2509_v42  ;;  %v1569_v50 = vpop.f32.mrb[7].mxu0  ;;  %v1953_v36 = vpop.f32.mrb[7].mxu1  ;;  %v1578_v54 = vadd.f32 %v5662_v48, %v7323_v8  ;;  %v7373_v60 = vmax.f32 %v1575_v53, 0.0  ;;  %v1962_v62 = vadd.f32 %v5758_v49, %v7323_v8  ;;  %v7388_v6 = vmax.f32 %v1959_v55, 0.0 }
 0x13e   : > { %v1570_v59 = vadd.f32 %v7323_v8, %v1569_v50  ;;  %v1954_v16 = vadd.f32 %v7323_v8, %v1953_v36  ;;  %v7405_v19 = vmax.f32 %v1567_v5, 0.0  ;;  %v7426_v38 = vmax.f32 %v1951_v11, 0.0 }
 0x13f   : > { %12154 = vst [vmem:[#allocation11_spill] sm:$0xff] %v7373_v60  ;;  %v7375_v61 = vmax.f32 %v1578_v54, 0.0  ;;  %12156 = vst [vmem:[#allocation13_spill] sm:$0xff] %v7388_v6  ;;  %v7391_v7 = vmax.f32 %v1962_v62, 0.0  ;;  %v2515_v10 = vmul.f32 %v7373_v60, %v7373_v60  ;;  %v2611_v24 = vmul.f32 %v7388_v6, %v7388_v6 }
 0x140   : > { %12158 = vst [vmem:[#allocation15_spill] sm:$0xff] %v7405_v19  ;;  %v7407_v22 = vmax.f32 %v1570_v59, 0.0  ;;  %12160 = vst [vmem:[#allocation17_spill] sm:$0xff] %v7426_v38  ;;  %v7428_v4 = vmax.f32 %v1954_v16, 0.0  ;;  %v2513_v44 = vmul.f32 %v7405_v19, %v7405_v19  ;;  %v2609_v48 = vmul.f32 %v7426_v38, %v7426_v38 }
 0x141   : > { %2899 = vadd.xlane.f32.xlu1 %v2608_v46  ;;  %2893 = vadd.xlane.f32.xlu0 %v2605_v47  ;;  %12155 = vst [vmem:[#allocation12_spill] sm:$0xff] %v7375_v61  ;;  %12157 = vst [vmem:[#allocation14_spill] sm:$0xff] %v7391_v7  ;;  %v2516_v9 = vmul.f32 %v7375_v61, %v7375_v61  ;;  %v2612_v23 = vmul.f32 %v7391_v7, %v7391_v7 }
 0x142   : > { %v5665_v58 = vpop.f32.mrb[8].mxu0  ;;  %v5761_v15 = vpop.f32.mrb[8].mxu1  ;;  %12159 = vst [vmem:[#allocation16_spill] sm:$0xff] %v7407_v22  ;;  %12161 = vst [vmem:[#allocation18_spill] sm:$0xff] %v7428_v4  ;;  %v2514_v42 = vmul.f32 %v7407_v22, %v7407_v22  ;;  %v2610_v54 = vmul.f32 %v7428_v4, %v7428_v4 }
 0x143   : > { %v7380_v0 = vpop.f32.mrb[9].mxu0  ;;  %v7382_v1 = vpop.f32.mrb[9].mxu1  ;;  %v1591_v13 = vadd.f32 %v5665_v58, %v7323_v8  ;;  %v1975_v45 = vadd.f32 %v5761_v15, %v7323_v8 }
 0x144   : > { %v5666_v2 = vpop.f32.mrb[10].mxu0  ;;  %v5762_v3 = vpop.f32.mrb[10].mxu1  ;;  %v1583_v62 = vadd.f32 %v7323_v8, %v7380_v0 }
 0x145   : > { %2895 = vadd.xlane.f32.xlu1 %v2606_v57  ;;  %2703 = vadd.xlane.f32.xlu0 %v2510_v63  ;;  %v1585_v28 = vpop.f32.mrb[11].mxu0  ;;  %v7385_v31 = vpop.f32.mrb[11].mxu1  ;;  %v1594_v35 = vadd.f32 %v5666_v2, %v7323_v8  ;;  %v7445_v36 = vmax.f32 %v1591_v13, 0.0  ;;  %v1978_v53 = vadd.f32 %v5762_v3, %v7323_v8  ;;  %v7467_v63 = vmax.f32 %v1975_v45, 0.0 }
 0x146   : > { %v1586_v2 = vadd.f32 %v7323_v8, %v1585_v28  ;;  %v1970_v0 = vadd.f32 %v7323_v8, %v7385_v31  ;;  %v7484_v28 = vmax.f32 %v1583_v62, 0.0 }
 0x147   : > { %12162 = vst [vmem:[#allocation19_spill] sm:$0xff] %v7445_v36  ;;  %v7447_v52 = vmax.f32 %v1594_v35, 0.0  ;;  %12164 = vst [vmem:[#allocation21_spill] sm:$0xff] %v7467_v63  ;;  %v7470_v3 = vmax.f32 %v1978_v53, 0.0  ;;  %v2519_v59 = vmul.f32 %v7445_v36, %v7445_v36  ;;  %v2615_v16 = vmul.f32 %v7467_v63, %v7467_v63 }
 0x148   : > { %12166 = vst [vmem:[#allocation23_spill] sm:$0xff] %v7484_v28  ;;  %v7486_v14 = vmax.f32 %v1586_v2, 0.0  ;;  %v7506_v35 = vmax.f32 %v1970_v0, 0.0 }
 0x149   : > { %2715 = vadd.xlane.f32.xlu1 %v2516_v9  ;;  %2713 = vadd.xlane.f32.xlu0 %v2515_v10  ;;  %12163 = vst [vmem:[#allocation20_spill] sm:$0xff] %v7447_v52  ;;  %12165 = vst [vmem:[#allocation22_spill] sm:$0xff] %v7470_v3  ;;  %v2520_v5 = vmul.f32 %v7447_v52, %v7447_v52  ;;  %v1967_v9 = vadd.f32 %v7323_v8, %v7382_v1 }
 0x14a   : > { %v7401_v17 = vpop.f32.mrb[12].mxu0  ;;  %v7403_v18 = vpop.f32.mrb[12].mxu1  ;;  %12167 = vst [vmem:[#allocation24_spill] sm:$0xff] %v7486_v14  ;;  %v2616_v11 = vmul.f32 %v7470_v3, %v7470_v3  ;;  %12169 = vst [vmem:[#allocation26_spill] sm:$0xff] %v7506_v35  ;;  %v2518_v45 = vmul.f32 %v7486_v14, %v7486_v14 }
 0x14b   : > { %v7413_v26 = vpop.f32.mrb[13].mxu0  ;;  %v7415_v30 = vpop.f32.mrb[13].mxu1  ;;  %v7504_v13 = vmax.f32 %v1967_v9, 0.0  ;;  %v1991_v53 = vadd.f32 %v7403_v18, %v7323_v8 }
 0x14c   : > { %v5670_v27 = vpop.f32.mrb[14].mxu0  ;;  %v7419_v34 = vpop.f32.mrb[14].mxu1 }
 0x14d   : > { %2907 = vadd.xlane.f32.xlu1 %v2612_v23  ;;  %2905 = vadd.xlane.f32.xlu0 %v2611_v24  ;;  %v7422_v37 = vpop.f32.mrb[15].mxu0  ;;  %v7424_v56 = vpop.f32.mrb[15].mxu1  ;;  %12168 = vst [vmem:[#allocation25_spill] sm:$0xff] %v7504_v13 }
 0x151   : > { %2711 = vadd.xlane.f32.xlu1 %v2514_v42  ;;  %2709 = vadd.xlane.f32.xlu0 %v2513_v44  ;;  %v1607_v42 = vadd.f32 %v7401_v17, %v7323_v8  ;;  %v1610_v44 = vadd.f32 %v5670_v27, %v7323_v8 }
 0x152   : > { %v7441_v49 = vpop.f32.mrb[16].mxu0  ;;  %v7443_v50 = vpop.f32.mrb[16].mxu1 }
 0x153   : > { %v7452_v46 = vpop.f32.mrb[17].mxu0  ;;  %v7454_v47 = vpop.f32.mrb[17].mxu1  ;;  %v7523_v17 = vmax.f32 %v1607_v42, 0.0  ;;  %v7525_v27 = vmax.f32 %v1610_v44, 0.0  ;;  %v7545_v44 = vmax.f32 %v1991_v53, 0.0 }
 0x154   : > { %v7457_v55 = vpop.f32.mrb[18].mxu0  ;;  %v7459_v57 = vpop.f32.mrb[18].mxu1 }
 0x155   : > { %2903 = vadd.xlane.f32.xlu1 %v2610_v54  ;;  %2901 = vadd.xlane.f32.xlu0 %v2609_v48  ;;  %v7461_v58 = vpop.f32.mrb[19].mxu0  ;;  %v7463_v15 = vpop.f32.mrb[19].mxu1  ;;  %v2517_v48 = vmul.f32 %v7484_v28, %v7484_v28  ;;  %v2613_v54 = vmul.f32 %v7504_v13, %v7504_v13  ;;  %12170 = vst [vmem:[#allocation27_spill] sm:$0xff] %v7523_v17  ;;  %12171 = vst [vmem:[#allocation28_spill] sm:$0xff] %v7525_v27 }
 0x156   : > { %12172 = vst [vmem:[#allocation29_spill] sm:$0xff] %v7545_v44  ;;  %v2524_v13 = vmul.f32 %v7525_v27, %v7525_v27  ;;  %v1626_v14 = vadd.f32 %v7457_v55, %v7323_v8 }
 0x158   : > { %v7605_v55 = vmax.f32 %v1626_v14, 0.0 }
 0x159   : > { %2723 = vadd.xlane.f32.xlu1 %v2520_v5  ;;  %2721 = vadd.xlane.f32.xlu0 %v2519_v59  ;;  %v1994_v5 = vadd.f32 %v7419_v34, %v7323_v8  ;;  %v2614_v59 = vmul.f32 %v7506_v35, %v7506_v35  ;;  %v1599_v34 = vadd.f32 %v7323_v8, %v7413_v26 }
 0x15a   : > { %v7480_v10 = vpop.f32.mrb[20].mxu0  ;;  %v7482_v12 = vpop.f32.mrb[20].mxu1  ;;  %v1986_v26 = vadd.f32 %v7323_v8, %v7424_v56  ;;  %12179 = vst [vmem:[#allocation36_spill] sm:$0xff] %v7605_v55  ;;  %v2528_v38 = vmul.f32 %v7605_v55, %v7605_v55 }
 0x15b   : > { %v7492_v23 = vpop.f32.mrb[21].mxu0  ;;  %v7494_v1 = vpop.f32.mrb[21].mxu1 }
 0x15c   : > { %v7496_v24 = vpop.f32.mrb[22].mxu0  ;;  %v7498_v31 = vpop.f32.mrb[22].mxu1 }
 0x15d   : > { %2915 = vadd.xlane.f32.xlu1 %v2616_v11  ;;  %2913 = vadd.xlane.f32.xlu0 %v2615_v16  ;;  %v7500_v32 = vpop.f32.mrb[23].mxu0  ;;  %v7502_v39 = vpop.f32.mrb[23].mxu1  ;;  %v1642_v22 = vadd.f32 %v7496_v24, %v7323_v8 }
 0x15f   : > { %v7685_v24 = vmax.f32 %v1642_v22, 0.0 }
 0x161   : > { %2719 = vadd.xlane.f32.xlu1 %v2518_v45  ;;  %2717 = vadd.xlane.f32.xlu0 %v2517_v48  ;;  %v1602_v45 = vadd.f32 %v7323_v8, %v7422_v37  ;;  %v7549_v48 = vmax.f32 %v1994_v5, 0.0  ;;  %v7563_v37 = vmax.f32 %v1599_v34, 0.0  ;;  %12187 = vst [vmem:[#allocation44_spill] sm:$0xff] %v7685_v24  ;;  %v2532_v51 = vmul.f32 %v7685_v24, %v7685_v24 }
 0x162   : > { %v7519_v62 = vpop.f32.mrb[24].mxu0  ;;  %v7521_v2 = vpop.f32.mrb[24].mxu1 }
 0x163   : > { %v7531_v9 = vpop.f32.mrb[25].mxu0  ;;  %v7533_v18 = vpop.f32.mrb[25].mxu1  ;;  %12173 = vst [vmem:[#allocation30_spill] sm:$0xff] %v7549_v48  ;;  %12174 = vst [vmem:[#allocation31_spill] sm:$0xff] %v7563_v37  ;;  %v7565_v5 = vmax.f32 %v1602_v45, 0.0  ;;  %v2620_v27 = vmul.f32 %v7549_v48, %v7549_v48  ;;  %v7585_v48 = vmax.f32 %v1986_v26, 0.0 }
 0x164   : > { %v7535_v0 = vpop.f32.mrb[26].mxu0  ;;  %v7537_v11 = vpop.f32.mrb[26].mxu1 }
 0x165   : > { %2911 = vadd.xlane.f32.xlu1 %v2614_v59  ;;  %2909 = vadd.xlane.f32.xlu0 %v2613_v54  ;;  %v7539_v16 = vpop.f32.mrb[27].mxu0  ;;  %v7541_v42 = vpop.f32.mrb[27].mxu1  ;;  %v2523_v54 = vmul.f32 %v7523_v17, %v7523_v17  ;;  %v1983_v59 = vadd.f32 %v7323_v8, %v7415_v30  ;;  %12175 = vst [vmem:[#allocation32_spill] sm:$0xff] %v7565_v5  ;;  %12177 = vst [vmem:[#allocation34_spill] sm:$0xff] %v7585_v48 }
 0x166   : > { %v2522_v63 = vmul.f32 %v7565_v5, %v7565_v5  ;;  %v2010_v5 = vadd.f32 %v7459_v57, %v7323_v8  ;;  %v1615_v57 = vadd.f32 %v7323_v8, %v7452_v46  ;;  %v2002_v46 = vadd.f32 %v7323_v8, %v7463_v15 }
 0x167   : > { %v7583_v28 = vmax.f32 %v1983_v59, 0.0  ;;  %v2007_v59 = vadd.f32 %v7443_v50, %v7323_v8  ;;  %v1658_v41 = vadd.f32 %v7535_v0, %v7323_v8 }
 0x168   : > { %v7629_v52 = vmax.f32 %v2010_v5, 0.0 }
 0x169   : > { %2731 = vadd.xlane.f32.xlu1 %v2524_v13  ;;  %2729 = vadd.xlane.f32.xlu0 %v2523_v54  ;;  %v2619_v13 = vmul.f32 %v7545_v44, %v7545_v44  ;;  %12176 = vst [vmem:[#allocation33_spill] sm:$0xff] %v7583_v28  ;;  %v1623_v44 = vadd.f32 %v7441_v49, %v7323_v8  ;;  %v7625_v36 = vmax.f32 %v2007_v59, 0.0 }
 0x16a   : > { %v7559_v53 = vpop.f32.mrb[28].mxu0  ;;  %v7561_v35 = vpop.f32.mrb[28].mxu1  ;;  %v2617_v26 = vmul.f32 %v7583_v28, %v7583_v28  ;;  %12181 = vst [vmem:[#allocation38_spill] sm:$0xff] %v7629_v52  ;;  %v2624_v55 = vmul.f32 %v7629_v52, %v7629_v52  ;;  %v7665_v52 = vmax.f32 %v2002_v46, 0.0 }
 0x16b   : > { %v7571_v54 = vpop.f32.mrb[29].mxu0  ;;  %v7573_v30 = vpop.f32.mrb[29].mxu1  ;;  %v7603_v3 = vmax.f32 %v1623_v44, 0.0  ;;  %12180 = vst [vmem:[#allocation37_spill] sm:$0xff] %v7625_v36 }
 0x16c   : > { %v7575_v17 = vpop.f32.mrb[30].mxu0  ;;  %v7577_v56 = vpop.f32.mrb[30].mxu1  ;;  %12185 = vst [vmem:[#allocation42_spill] sm:$0xff] %v7665_v52 }
 0x16d   : > { %2923 = vadd.xlane.f32.xlu1 %v2620_v27  ;;  %2921 = vadd.xlane.f32.xlu0 %v2619_v13  ;;  %v7579_v34 = vpop.f32.mrb[31].mxu0  ;;  %v7581_v45 = vpop.f32.mrb[31].mxu1  ;;  %v2521_v27 = vmul.f32 %v7563_v37, %v7563_v37  ;;  %12178 = vst [vmem:[#allocation35_spill] sm:$0xff] %v7603_v3 }
 0x171   : > { %2727 = vadd.xlane.f32.xlu1 %v2522_v63  ;;  %2725 = vadd.xlane.f32.xlu0 %v2521_v27  ;;  %v2618_v63 = vmul.f32 %v7585_v48, %v7585_v48  ;;  %v1618_v48 = vadd.f32 %v7323_v8, %v7461_v58  ;;  %v7643_v58 = vmax.f32 %v1615_v57, 0.0 }
 0x172   : > { %v7599_v13 = vpop.f32.mrb[32].mxu0  ;;  %v7601_v49 = vpop.f32.mrb[32].mxu1 }
 0x173   : > { %v7611_v27 = vpop.f32.mrb[33].mxu0  ;;  %v7613_v50 = vpop.f32.mrb[33].mxu1  ;;  %12182 = vst [vmem:[#allocation39_spill] sm:$0xff] %v7643_v58  ;;  %v7645_v5 = vmax.f32 %v1618_v48, 0.0 }
 0x174   : > { %v7615_v37 = vpop.f32.mrb[34].mxu0  ;;  %v7617_v28 = vpop.f32.mrb[34].mxu1 }
 0x175   : > { %2919 = vadd.xlane.f32.xlu1 %v2618_v63  ;;  %2917 = vadd.xlane.f32.xlu0 %v2617_v26  ;;  %v7619_v44 = vpop.f32.mrb[35].mxu0  ;;  %v7621_v14 = vpop.f32.mrb[35].mxu1  ;;  %v2527_v26 = vmul.f32 %v7603_v3, %v7603_v3  ;;  %v1999_v63 = vadd.f32 %v7323_v8, %v7454_v47  ;;  %12183 = vst [vmem:[#allocation40_spill] sm:$0xff] %v7645_v5 }
 0x176   : > { %v2526_v6 = vmul.f32 %v7645_v5, %v7645_v5  ;;  %v2026_v5 = vadd.f32 %v7498_v31, %v7323_v8  ;;  %v1631_v31 = vadd.f32 %v7323_v8, %v7492_v23  ;;  %v2018_v23 = vadd.f32 %v7323_v8, %v7502_v39 }
 0x177   : > { %v7663_v19 = vmax.f32 %v1999_v63, 0.0  ;;  %v2023_v63 = vadd.f32 %v7482_v12, %v7323_v8 }
 0x178   : > { %v7709_v61 = vmax.f32 %v2026_v5, 0.0 }
 0x179   : > { %2739 = vadd.xlane.f32.xlu1 %v2528_v38  ;;  %2737 = vadd.xlane.f32.xlu0 %v2527_v26  ;;  %v2623_v38 = vmul.f32 %v7625_v36, %v7625_v36  ;;  %12184 = vst [vmem:[#allocation41_spill] sm:$0xff] %v7663_v19  ;;  %v1639_v36 = vadd.f32 %v7480_v10, %v7323_v8  ;;  %v7705_v60 = vmax.f32 %v2023_v63, 0.0 }
 0x17a   : > { %v7639_v59 = vpop.f32.mrb[36].mxu0  ;;  %v7641_v4 = vpop.f32.mrb[36].mxu1  ;;  %v2621_v46 = vmul.f32 %v7663_v19, %v7663_v19  ;;  %12189 = vst [vmem:[#allocation46_spill] sm:$0xff] %v7709_v61  ;;  %v2628_v24 = vmul.f32 %v7709_v61, %v7709_v61  ;;  %v7745_v61 = vmax.f32 %v2018_v23, 0.0 }
 0x17b   : > { %v7651_v26 = vpop.f32.mrb[37].mxu0  ;;  %v7653_v47 = vpop.f32.mrb[37].mxu1  ;;  %v7683_v7 = vmax.f32 %v1639_v36, 0.0  ;;  %12188 = vst [vmem:[#allocation45_spill] sm:$0xff] %v7705_v60 }
 0x17c   : > { %v7655_v3 = vpop.f32.mrb[38].mxu0  ;;  %v7657_v15 = vpop.f32.mrb[38].mxu1  ;;  %12193 = vst [vmem:[#allocation50_spill] sm:$0xff] %v7745_v61 }
 0x17d   : > { %2931 = vadd.xlane.f32.xlu1 %v2624_v55  ;;  %2929 = vadd.xlane.f32.xlu0 %v2623_v38  ;;  %v7659_v57 = vpop.f32.mrb[39].mxu0  ;;  %v7661_v48 = vpop.f32.mrb[39].mxu1  ;;  %v2525_v55 = vmul.f32 %v7643_v58, %v7643_v58  ;;  %12186 = vst [vmem:[#allocation43_spill] sm:$0xff] %v7683_v7 }
 0x181   : > { %2735 = vadd.xlane.f32.xlu1 %v2526_v6  ;;  %2733 = vadd.xlane.f32.xlu0 %v2525_v55  ;;  %v2622_v6 = vmul.f32 %v7665_v52, %v7665_v52  ;;  %v1634_v52 = vadd.f32 %v7323_v8, %v7500_v32  ;;  %v7723_v32 = vmax.f32 %v1631_v31, 0.0 }
 0x182   : > { %v7679_v38 = vpop.f32.mrb[40].mxu0  ;;  %v7681_v10 = vpop.f32.mrb[40].mxu1 }
 0x183   : > { %v7691_v55 = vpop.f32.mrb[41].mxu0  ;;  %v7693_v12 = vpop.f32.mrb[41].mxu1  ;;  %12190 = vst [vmem:[#allocation47_spill] sm:$0xff] %v7723_v32  ;;  %v7725_v5 = vmax.f32 %v1634_v52, 0.0 }
 0x184   : > { %v7695_v58 = vpop.f32.mrb[42].mxu0  ;;  %v7697_v19 = vpop.f32.mrb[42].mxu1 }
 0x185   : > { %2927 = vadd.xlane.f32.xlu1 %v2622_v6  ;;  %2925 = vadd.xlane.f32.xlu0 %v2621_v46  ;;  %v7699_v36 = vpop.f32.mrb[43].mxu0  ;;  %v7701_v22 = vpop.f32.mrb[43].mxu1  ;;  %v2531_v46 = vmul.f32 %v7683_v7, %v7683_v7  ;;  %v2015_v6 = vadd.f32 %v7323_v8, %v7494_v1  ;;  %12191 = vst [vmem:[#allocation48_spill] sm:$0xff] %v7725_v5 }
 0x186   : > { %v2530_v25 = vmul.f32 %v7725_v5, %v7725_v5 }
 0x187   : > { %v7743_v40 = vmax.f32 %v2015_v6, 0.0  ;;  %v11808_v6 = vunpack.c.l.bf16 %v7240_v29 }
 0x189   : > { %2747 = vadd.xlane.f32.xlu1 %v2532_v51  ;;  %2745 = vadd.xlane.f32.xlu0 %v2531_v46  ;;  %v2627_v51 = vmul.f32 %v7705_v60, %v7705_v60  ;;  %12192 = vst [vmem:[#allocation49_spill] sm:$0xff] %v7743_v40  ;;  %v1655_v60 = vadd.f32 %v7519_v62, %v7323_v8 }
 0x18a   : > { %v7719_v63 = vpop.f32.mrb[44].mxu0  ;;  %v7721_v43 = vpop.f32.mrb[44].mxu1  ;;  %v2039_v62 = vadd.f32 %v7521_v2, %v7323_v8  ;;  %v2625_v0 = vmul.f32 %v7743_v40, %v7743_v40 }
 0x18b   : > { %v7731_v46 = vpop.f32.mrb[45].mxu0  ;;  %v7733_v1 = vpop.f32.mrb[45].mxu1 }
 0x18c   : > { %v7735_v39 = vpop.f32.mrb[46].mxu0  ;;  %v7737_v7 = vpop.f32.mrb[46].mxu1 }
 0x18d   : > { %2939 = vadd.xlane.f32.xlu1 %v2628_v24  ;;  %2937 = vadd.xlane.f32.xlu0 %v2627_v51  ;;  %v7739_v31 = vpop.f32.mrb[47].mxu0  ;;  %v7741_v52 = vpop.f32.mrb[47].mxu1  ;;  %v2529_v24 = vmul.f32 %v7723_v32, %v7723_v32  ;;  %v6470_v51 = vld [vmem:[%s6685_s21 + $0x80] sm:$0xff]   ;;  %v7766_v32 = vmax.f32 %v1655_v60, 0.0  ;;  %v12201_v60 = vunpack.c.h.bf16 %v7240_v29 }
 0x18e   : > { %v4340_v33 = vunpack.c.l.bf16 %v6470_v51  ;;  %v4341_v20 = vunpack.c.h.bf16 %v6470_v51  ;;  %v7768_v51 = vmax.f32 %v1658_v41, 0.0 }
 0x18f   : > { %12196 = vst [vmem:[#allocation53_spill] sm:$0xff] %v7766_v32  ;;  %v2535_v29 = vmul.f32 %v7766_v32, %v7766_v32 }
 0x190   : > { %12197 = vst [vmem:[#allocation54_spill] sm:$0xff] %v7768_v51  ;;  %v7780_v40 = vsub.f32 %v4340_v33, %v11808_v6 }
 0x191   : > { %2743 = vadd.xlane.f32.xlu1 %v2530_v25  ;;  %2741 = vadd.xlane.f32.xlu0 %v2529_v24  ;;  %v2042_v25 = vadd.f32 %v7537_v11, %v7323_v8  ;;  %v2626_v24 = vmul.f32 %v7745_v61, %v7745_v61  ;;  %v7791_v11 = vld [vmem:[%s6685_s21 + $0x88] sm:$0xff]   ;;  %v1647_v61 = vadd.f32 %v7323_v8, %v7531_v9  ;;  %v7819_v9 = vld [vmem:[%s6685_s21 + $0x98] sm:$0xff]  }
 0x192   : > { %v7762_v5 = vpop.f32.mrb[48].mxu0  ;;  %v7764_v21 = vpop.f32.mrb[48].mxu1  ;;  %12200 = vst [vmem:[#allocation57_spill] sm:$0xff] %v7780_v40  ;;  %12203 = vst [vmem:[#allocation59_spill] sm:$0xff] %v7791_v11  ;;  %v2536_v11 = vmul.f32 %v7768_v51, %v7768_v51  ;;  %v2034_v51 = vadd.f32 %v7323_v8, %v7541_v42  ;;  %v7868_v40 = vld [vmem:[%s6680_s18 + $0x38] sm:$0xff]   ;;  %v2058_v42 = vadd.f32 %v7577_v56, %v7323_v8 }
 0x193   : > { %12194 = vst [vmem:[#allocation51_spill] sm:$0xff] %v7762_v5  ;;  %12195 = vst [vmem:[#allocation52_spill] sm:$0xff] %v7764_v21  ;;  %v7774_v23 = vpop.f32.mrb[49].mxu0  ;;  %v7776_v2 = vpop.f32.mrb[49].mxu1  ;;  %v7784_v21 = vsub.f32 %v4341_v20, %v12201_v60  ;;  %v7800_v20 = vld [vmem:[%s6685_s21 + $0x90] sm:$0xff]  }
 0x194   : > { %12198 = vst [vmem:[#allocation55_spill] sm:$0xff] %v7774_v23  ;;  %12199 = vst [vmem:[#allocation56_spill] sm:$0xff] %v7776_v2  ;;  %v7786_v41 = vpop.f32.mrb[50].mxu0  ;;  %v7788_v5 = vpop.f32.mrb[50].mxu1  ;;  %v7806_v23 = vmax.f32 %v2039_v62, 0.0 }
 0x195   : > { %12202 = vst [vmem:[#allocation58_spill] sm:$0xff] %v7784_v21  ;;  %2935 = vadd.xlane.f32.xlu1 %v2626_v24  ;;  %2933 = vadd.xlane.f32.xlu0 %v2625_v0  ;;  %v7795_v2 = vpop.f32.mrb[51].mxu0  ;;  %v7797_v33 = vpop.f32.mrb[51].mxu1  ;;  %12206 = vst [vmem:[#allocation62_spill] sm:$0xff] %v7800_v20  ;;  %v1650_v0 = vadd.f32 %v7323_v8, %v7539_v16  ;;  %v7810_v24 = vmax.f32 %v2042_v25, 0.0  ;;  %v7824_v16 = vld [vmem:[%s6680_s18 + $0x20] sm:$0xff]   ;;  %v2031_v25 = vadd.f32 %v7323_v8, %v7533_v18 }
 0x196   : > { %12204 = vst [vmem:[#allocation60_spill] sm:$0xff] %v7795_v2  ;;  %12205 = vst [vmem:[#allocation61_spill] sm:$0xff] %v7797_v33  ;;  %v7828_v33 = vld [vmem:[%s6680_s18 + $0x28] sm:$0xff]   ;;  %v7833_v2 = vld [vmem:[%s6685_s21 + $0xa0] sm:$0xff]   ;;  %v2631_v6 = vmul.f32 %v7806_v23, %v7806_v23 }
 0x197   : > { %12207 = vst [vmem:[#allocation63_spill] sm:$0xff] %v7806_v23  ;;  %12208 = vst [vmem:[#allocation64_spill] sm:$0xff] %v7810_v24  ;;  %v7838_v20 = vld [vmem:[%s6685_s21 + $0xa8] sm:$0xff]   ;;  %v2632_v60 = vmul.f32 %v7810_v24, %v7810_v24 }
 0x198   : > { %12209 = vst [vmem:[#allocation65_spill] sm:$0xff] %v7819_v9  ;;  %12210 = vst [vmem:[#allocation66_spill] sm:$0xff] %v7824_v16  ;;  %v7877_v16 = vld [vmem:[%s6685_s21 + $0xb0] sm:$0xff]  }
 0x199   : > { %12211 = vst [vmem:[#allocation67_spill] sm:$0xff] %v7828_v33  ;;  %12212 = vst [vmem:[#allocation68_spill] sm:$0xff] %v7833_v2  ;;  %2755 = vadd.xlane.f32.xlu1 %v2536_v11  ;;  %2753 = vadd.xlane.f32.xlu0 %v2535_v29  ;;  %v7849_v11 = vmax.f32 %v1647_v61, 0.0  ;;  %v7851_v29 = vmax.f32 %v1650_v0, 0.0  ;;  %v7863_v2 = vld [vmem:[%s6680_s18 + $0x30] sm:$0xff]   ;;  %v7882_v61 = vld [vmem:[%s6685_s21 + $0xb8] sm:$0xff]  }
 0x19a   : > { %12213 = vst [vmem:[#allocation69_spill] sm:$0xff] %v7838_v20  ;;  %v7845_v32 = vpop.f32.mrb[52].mxu0  ;;  %v7847_v9 = vpop.f32.mrb[52].mxu1  ;;  %12216 = vst [vmem:[#allocation72_spill] sm:$0xff] %v7863_v2  ;;  %v7894_v20 = vmax.f32 %v2031_v25, 0.0  ;;  %v7908_v25 = vld [vmem:[%s6680_s18 + $0x48] sm:$0xff]  }
 0x19b   : > { %12214 = vst [vmem:[#allocation70_spill] sm:$0xff] %v7849_v11  ;;  %12215 = vst [vmem:[#allocation71_spill] sm:$0xff] %v7851_v29  ;;  %v7857_v18 = vpop.f32.mrb[53].mxu0  ;;  %v7859_v62 = vpop.f32.mrb[53].mxu1  ;;  %v2534_v0 = vmul.f32 %v7851_v29, %v7851_v29  ;;  %v2533_v33 = vmul.f32 %v7849_v11, %v7849_v11 }
 0x19c   : > { %12217 = vst [vmem:[#allocation73_spill] sm:$0xff] %v7868_v40  ;;  %v7871_v24 = vpop.f32.mrb[54].mxu0  ;;  %v7873_v23 = vpop.f32.mrb[54].mxu1  ;;  %12219 = vst [vmem:[#allocation75_spill] sm:$0xff] %v7877_v16  ;;  %v7891_v40 = vld [vmem:[%s6680_s18 + $0x40] sm:$0xff]   ;;  %v7896_v16 = vmax.f32 %v2034_v51, 0.0  ;;  %v2629_v29 = vmul.f32 %v7894_v20, %v7894_v20 }
 0x19d   : > { %12218 = vst [vmem:[#allocation74_spill] sm:$0xff] %v7873_v23  ;;  %12220 = vst [vmem:[#allocation76_spill] sm:$0xff] %v7882_v61  ;;  %2947 = vadd.xlane.f32.xlu1 %v2632_v60  ;;  %2945 = vadd.xlane.f32.xlu0 %v2631_v6  ;;  %v7885_v21 = vpop.f32.mrb[55].mxu0  ;;  %v7887_v2 = vpop.f32.mrb[55].mxu1  ;;  %v1671_v6 = vadd.f32 %v7559_v53, %v7323_v8  ;;  %v1674_v60 = vadd.f32 %v7575_v17, %v7323_v8  ;;  %v7918_v23 = vld [vmem:[%s6685_s21 + $0xc8] sm:$0xff]   ;;  %v7928_v61 = vld [vmem:[%s6680_s18 + $0x58] sm:$0xff]  }
 0x19e   : > { %12221 = vst [vmem:[#allocation77_spill] sm:$0xff] %v7885_v21  ;;  %12222 = vst [vmem:[#allocation78_spill] sm:$0xff] %v7887_v2  ;;  %v7913_v2 = vld [vmem:[%s6685_s21 + $0xc0] sm:$0xff]   ;;  %v7923_v21 = vld [vmem:[%s6680_s18 + $0x50] sm:$0xff]   ;;  %v2055_v17 = vadd.f32 %v7561_v35, %v7323_v8  ;;  %v2630_v53 = vmul.f32 %v7896_v16, %v7896_v16 }
 0x19f   : > { %12223 = vst [vmem:[#allocation79_spill] sm:$0xff] %v7891_v40  ;;  %12224 = vst [vmem:[#allocation80_spill] sm:$0xff] %v7894_v20 }
 0x1a0   : > { %12225 = vst [vmem:[#allocation81_spill] sm:$0xff] %v7896_v16  ;;  %12226 = vst [vmem:[#allocation82_spill] sm:$0xff] %v7908_v25  ;;  %v7958_v25 = vld [vmem:[%s6685_s21 + $0xd8] sm:$0xff]  }
 0x1a1   : > { %12227 = vst [vmem:[#allocation83_spill] sm:$0xff] %v7913_v2  ;;  %12228 = vst [vmem:[#allocation84_spill] sm:$0xff] %v7918_v23  ;;  %2751 = vadd.xlane.f32.xlu1 %v2534_v0  ;;  %2749 = vadd.xlane.f32.xlu0 %v2533_v33  ;;  %v7939_v0 = vmax.f32 %v1671_v6, 0.0  ;;  %v7941_v33 = vmax.f32 %v1674_v60, 0.0  ;;  %v7972_v6 = vld [vmem:[%s6680_s18 + $0x68] sm:$0xff]  }
 0x1a2   : > { %12229 = vst [vmem:[#allocation85_spill] sm:$0xff] %v7923_v21  ;;  %12230 = vst [vmem:[#allocation86_spill] sm:$0xff] %v7928_v61  ;;  %v7935_v11 = vpop.f32.mrb[56].mxu0  ;;  %v7937_v23 = vpop.f32.mrb[56].mxu1  ;;  %v7953_v21 = vld [vmem:[%s6685_s21 + $0xd0] sm:$0xff]   ;;  %v1663_v61 = vadd.f32 %v7323_v8, %v7571_v54 }
 0x1a3   : > { %12231 = vst [vmem:[#allocation87_spill] sm:$0xff] %v7939_v0  ;;  %12232 = vst [vmem:[#allocation88_spill] sm:$0xff] %v7941_v33  ;;  %v7947_v35 = vpop.f32.mrb[57].mxu0  ;;  %v7949_v51 = vpop.f32.mrb[57].mxu1  ;;  %v2540_v60 = vmul.f32 %v7941_v33, %v7941_v33  ;;  %v2539_v16 = vmul.f32 %v7939_v0, %v7939_v0  ;;  %v2050_v33 = vadd.f32 %v7323_v8, %v7581_v45 }
 0x1a4   : > { %12233 = vst [vmem:[#allocation89_spill] sm:$0xff] %v7949_v51  ;;  %12234 = vst [vmem:[#allocation90_spill] sm:$0xff] %v7953_v21  ;;  %v7961_v40 = vpop.f32.mrb[58].mxu0  ;;  %v7963_v20 = vpop.f32.mrb[58].mxu1  ;;  %v7967_v51 = vld [vmem:[%s6680_s18 + $0x60] sm:$0xff]  }
 0x1a5   : > { %12235 = vst [vmem:[#allocation91_spill] sm:$0xff] %v7958_v25  ;;  %12236 = vst [vmem:[#allocation92_spill] sm:$0xff] %v7963_v20  ;;  %2943 = vadd.xlane.f32.xlu1 %v2630_v53  ;;  %2941 = vadd.xlane.f32.xlu0 %v2629_v29  ;;  %v7975_v56 = vpop.f32.mrb[59].mxu0  ;;  %v7977_v21 = vpop.f32.mrb[59].mxu1  ;;  %v7981_v25 = vld [vmem:[%s6685_s21 + $0xe0] sm:$0xff]   ;;  %v1666_v29 = vadd.f32 %v7323_v8, %v7579_v34  ;;  %v7990_v53 = vmax.f32 %v2058_v42, 0.0  ;;  %v2047_v42 = vadd.f32 %v7323_v8, %v7573_v30 }
 0x1a6   : > { %12237 = vst [vmem:[#allocation93_spill] sm:$0xff] %v7967_v51  ;;  %12238 = vst [vmem:[#allocation94_spill] sm:$0xff] %v7972_v6  ;;  %v7986_v51 = vmax.f32 %v2055_v17, 0.0  ;;  %v7998_v6 = vld [vmem:[%s6685_s21 + $0xe8] sm:$0xff]   ;;  %v8013_v20 = vld [vmem:[%s6685_s21 + $0xf0] sm:$0xff]  }
 0x1a7   : > { %12239 = vst [vmem:[#allocation95_spill] sm:$0xff] %v7975_v56  ;;  %12240 = vst [vmem:[#allocation96_spill] sm:$0xff] %v7977_v21  ;;  %v8003_v21 = vld [vmem:[%s6680_s18 + $0x70] sm:$0xff]   ;;  %v8008_v56 = vld [vmem:[%s6680_s18 + $0x78] sm:$0xff]   ;;  %v2636_v2 = vmul.f32 %v7990_v53, %v7990_v53 }
 0x1a8   : > { %12241 = vst [vmem:[#allocation97_spill] sm:$0xff] %v7981_v25  ;;  %12242 = vst [vmem:[#allocation98_spill] sm:$0xff] %v7986_v51  ;;  %v8018_v17 = vld [vmem:[%s6685_s21 + $0xf8] sm:$0xff]   ;;  %v2635_v34 = vmul.f32 %v7986_v51, %v7986_v51  ;;  %v8048_v25 = vld [vmem:[%s6680_s18 + $0x88] sm:$0xff]  }
 0x1a9   : > { %12243 = vst [vmem:[#allocation99_spill] sm:$0xff] %v7990_v53  ;;  %12244 = vst [vmem:[#allocation100_spill] sm:$0xff] %v7998_v6  ;;  %2763 = vadd.xlane.f32.xlu1 %v2540_v60  ;;  %2761 = vadd.xlane.f32.xlu0 %v2539_v16  ;;  %v8029_v60 = vmax.f32 %v1663_v61, 0.0  ;;  %v8031_v16 = vmax.f32 %v1666_v29, 0.0  ;;  %v8062_v61 = vld [vmem:[%s6680_s18 + $0x98] sm:$0xff]  }
 0x1aa   : > { %12245 = vst [vmem:[#allocation101_spill] sm:$0xff] %v8003_v21  ;;  %12246 = vst [vmem:[#allocation102_spill] sm:$0xff] %v8008_v56  ;;  %v8025_v0 = vpop.f32.mrb[60].mxu0  ;;  %v8027_v6 = vpop.f32.mrb[60].mxu1 }
 0x1ab   : > { %12247 = vst [vmem:[#allocation103_spill] sm:$0xff] %v8013_v20  ;;  %12248 = vst [vmem:[#allocation104_spill] sm:$0xff] %v8018_v17  ;;  %v8037_v30 = vpop.f32.mrb[61].mxu0  ;;  %v8039_v54 = vpop.f32.mrb[61].mxu1  ;;  %v8043_v20 = vld [vmem:[%s6680_s18 + $0x80] sm:$0xff]   ;;  %v8074_v17 = vmax.f32 %v2047_v42, 0.0  ;;  %v2538_v29 = vmul.f32 %v8031_v16, %v8031_v16  ;;  %v2537_v53 = vmul.f32 %v8029_v60, %v8029_v60  ;;  %v2074_v42 = vadd.f32 %v7617_v28, %v7323_v8 }
 0x1ac   : > { %12249 = vst [vmem:[#allocation105_spill] sm:$0xff] %v8029_v60  ;;  %12250 = vst [vmem:[#allocation106_spill] sm:$0xff] %v8031_v16  ;;  %v8051_v21 = vpop.f32.mrb[62].mxu0  ;;  %v8053_v51 = vpop.f32.mrb[62].mxu1  ;;  %v2071_v16 = vadd.f32 %v7601_v49, %v7323_v8  ;;  %v8146_v60 = vld [vmem:[%s6680_s18 + $0xc0] sm:$0xff]  }
 0x1ad   : > { %12251 = vst [vmem:[#allocation107_spill] sm:$0xff] %v8039_v54  ;;  %12252 = vst [vmem:[#allocation108_spill] sm:$0xff] %v8043_v20  ;;  %v8057_v54 = vld [vmem:[%s6680_s18 + $0x90] sm:$0xff]   ;;  %2955 = vadd.xlane.f32.xlu1 %v2636_v2  ;;  %2953 = vadd.xlane.f32.xlu0 %v2635_v34  ;;  %v8065_v56 = vpop.f32.mrb[63].mxu0  ;;  %v8067_v20 = vpop.f32.mrb[63].mxu1  ;;  %v1687_v2 = vadd.f32 %v7599_v13, %v7323_v8  ;;  %v1690_v34 = vadd.f32 %v7615_v37, %v7323_v8  ;;  %v8097_v37 = vld [vmem:[%s6690_s25 + $0x28] sm:$0xff]  }
 0x1ae   : > { %12253 = vst [vmem:[#allocation109_spill] sm:$0xff] %v8048_v25  ;;  %12254 = vst [vmem:[#allocation110_spill] sm:$0xff] %v8053_v51  ;;  %v8071_v25 = vld [vmem:[%s6680_s18 + $0xa0] sm:$0xff]   ;;  %v2633_v51 = vmul.f32 %v8074_v17, %v8074_v17 }
 0x1af   : > { %12255 = vst [vmem:[#allocation111_spill] sm:$0xff] %v8057_v54  ;;  %12256 = vst [vmem:[#allocation112_spill] sm:$0xff] %v8062_v61  ;;  %v8076_v54 = vmax.f32 %v2050_v33, 0.0  ;;  %v8088_v61 = vld [vmem:[%s6680_s18 + $0xa8] sm:$0xff]   ;;  %v8107_v33 = vld [vmem:[%s6680_s18 + $0xb8] sm:$0xff]  }
 0x1b0   : > { %12257 = vst [vmem:[#allocation113_spill] sm:$0xff] %v8065_v56  ;;  %12258 = vst [vmem:[#allocation114_spill] sm:$0xff] %v8067_v20  ;;  %v8093_v20 = vld [vmem:[%s6690_s25 + $0x20] sm:$0xff]   ;;  %v8102_v56 = vld [vmem:[%s6680_s18 + $0xb0] sm:$0xff]  }
 0x1b1   : > { %12259 = vst [vmem:[#allocation115_spill] sm:$0xff] %v8071_v25  ;;  %12260 = vst [vmem:[#allocation116_spill] sm:$0xff] %v8074_v17  ;;  %2759 = vadd.xlane.f32.xlu1 %v2538_v29  ;;  %2757 = vadd.xlane.f32.xlu0 %v2537_v53  ;;  %v8119_v29 = vmax.f32 %v1687_v2, 0.0  ;;  %v8121_v53 = vmax.f32 %v1690_v34, 0.0  ;;  %v2634_v13 = vmul.f32 %v8076_v54, %v8076_v54  ;;  %v8132_v17 = vld [vmem:[%s6690_s25 + $0x30] sm:$0xff]   ;;  %v8137_v34 = vld [vmem:[%s6690_s25 + $0x38] sm:$0xff]  }
 0x1b2   : > { %12261 = vst [vmem:[#allocation117_spill] sm:$0xff] %v8076_v54  ;;  %12262 = vst [vmem:[#allocation118_spill] sm:$0xff] %v8088_v61  ;;  %v8115_v61 = vpop.f32.mrb[64].mxu0  ;;  %v8117_v45 = vpop.f32.mrb[64].mxu1  ;;  %v8167_v2 = vld [vmem:[%s11756_s4] ss:$0 sm:$0xff] }
 0x1b3   : > { %12263 = vst [vmem:[#allocation119_spill] sm:$0xff] %v8093_v20  ;;  %12264 = vst [vmem:[#allocation120_spill] sm:$0xff] %v8097_v37  ;;  %v8127_v49 = vpop.f32.mrb[65].mxu0  ;;  %v8129_v25 = vpop.f32.mrb[65].mxu1  ;;  %v2544_v37 = vmul.f32 %v8121_v53, %v8121_v53  ;;  %v2543_v20 = vmul.f32 %v8119_v29, %v8119_v29 }
 0x1b4   : > { %12265 = vst [vmem:[#allocation121_spill] sm:$0xff] %v8102_v56  ;;  %12266 = vst [vmem:[#allocation122_spill] sm:$0xff] %v8107_v33  ;;  %v8141_v28 = vpop.f32.mrb[66].mxu0  ;;  %v8143_v54 = vpop.f32.mrb[66].mxu1  ;;  %v8151_v33 = vld [vmem:[%s6680_s18 + $0xc8] sm:$0xff]  }
 0x1b5   : > { %12267 = vst [vmem:[#allocation123_spill] sm:$0xff] %v8119_v29  ;;  %12268 = vst [vmem:[#allocation124_spill] sm:$0xff] %v8121_v53  ;;  %2951 = vadd.xlane.f32.xlu1 %v2634_v13  ;;  %2949 = vadd.xlane.f32.xlu0 %v2633_v51  ;;  %v8155_v56 = vpop.f32.mrb[67].mxu0  ;;  %v8157_v8 = vpop.f32.mrb[67].mxu1  ;;  %v1679_v51 = vadd.f32 %v8167_v2, %v7611_v27  ;;  %v8171_v13 = vmax.f32 %v2071_v16, 0.0  ;;  %v8187_v16 = vld [vmem:[%s6680_s18 + $0xd0] sm:$0xff]   ;;  %v2063_v53 = vadd.f32 %v8167_v2, %v7613_v50 }
 0x1b6   : > { %12269 = vst [vmem:[#allocation125_spill] sm:$0xff] %v8129_v25  ;;  %12270 = vst [vmem:[#allocation126_spill] sm:$0xff] %v8132_v17  ;;  %v1682_v17 = vadd.f32 %v8167_v2, %v7619_v44  ;;  %v8197_v29 = vld [vmem:[%s6690_s25 + $0x50] sm:$0xff]   ;;  %v8219_v44 = vld [vmem:[%s6680_s18 + $0xe0] sm:$0xff]  }
 0x1b7   : > { %12271 = vst [vmem:[#allocation127_spill] sm:$0xff] %v8137_v34  ;;  %12272 = vst [vmem:[#allocation128_spill] sm:$0xff] %v8143_v54  ;;  %v8160_v34 = vld [vmem:[%s6690_s25 + $0x40] sm:$0xff]   ;;  %v2066_v54 = vadd.f32 %v8167_v2, %v7621_v14  ;;  %v8210_v25 = vmax.f32 %v1679_v51, 0.0  ;;  %v8239_v50 = vld [vmem:[%s6680_s18 + $0xf0] sm:$0xff]  }
 0x1b8   : > { %12273 = vst [vmem:[#allocation129_spill] sm:$0xff] %v8146_v60  ;;  %12274 = vst [vmem:[#allocation130_spill] sm:$0xff] %v8151_v33  ;;  %v8175_v33 = vmax.f32 %v2074_v42, 0.0  ;;  %v8182_v60 = vld [vmem:[%s6690_s25 + $0x48] sm:$0xff]   ;;  %v8192_v42 = vld [vmem:[%s6680_s18 + $0xd8] sm:$0xff]  }
 0x1b9   : > { %12275 = vst [vmem:[#allocation131_spill] sm:$0xff] %v8157_v8  ;;  %12276 = vst [vmem:[#allocation132_spill] sm:$0xff] %v8160_v34  ;;  %2771 = vadd.xlane.f32.xlu1 %v2544_v37  ;;  %2769 = vadd.xlane.f32.xlu0 %v2543_v20  ;;  %v8202_v8 = vld [vmem:[%s6690_s25 + $0x58] sm:$0xff]   ;;  %v2639_v37 = vmul.f32 %v8171_v13, %v8171_v13  ;;  %v8224_v34 = vld [vmem:[%s6680_s18 + $0xe8] sm:$0xff]   ;;  %v2541_v14 = vmul.f32 %v8210_v25, %v8210_v25 }
 0x1ba   : > { %12277 = vst [vmem:[#allocation133_spill] sm:$0xff] %v8171_v13  ;;  %12278 = vst [vmem:[#allocation134_spill] sm:$0xff] %v8175_v33  ;;  %v2640_v20 = vmul.f32 %v8175_v33, %v8175_v33  ;;  %v8229_v51 = vld [vmem:[%s6690_s25 + $0x60] sm:$0xff]   ;;  %v8292_v27 = vpop.f32.mrb[68].mxu1  ;;  %v1695_v33 = vadd.f32 %v8167_v2, %v7651_v26 }
 0x1bb   : > { %12279 = vst [vmem:[#allocation135_spill] sm:$0xff] %v8182_v60  ;;  %12280 = vst [vmem:[#allocation136_spill] sm:$0xff] %v8187_v16  ;;  %v8243_v16 = vmax.f32 %v2063_v53, 0.0  ;;  %v1703_v60 = vadd.f32 %v8167_v2, %v7639_v59  ;;  %v8260_v53 = vld [vmem:[%s6680_s18 + $0xf8] sm:$0xff]   ;;  %v8321_v13 = vld [vmem:[%s6690_s25 + $0xa0] sm:$0xff]  }
 0x1bc   : > { %12281 = vst [vmem:[#allocation137_spill] sm:$0xff] %v8192_v42  ;;  %12282 = vst [vmem:[#allocation138_spill] sm:$0xff] %v8197_v29  ;;  %v8212_v42 = vmax.f32 %v1682_v17, 0.0  ;;  %v8234_v29 = vld [vmem:[%s6690_s25 + $0x68] sm:$0xff]  }
 0x1bd   : > { %12283 = vst [vmem:[#allocation139_spill] sm:$0xff] %v8202_v8  ;;  %12284 = vst [vmem:[#allocation140_spill] sm:$0xff] %v8210_v25  ;;  %2963 = vadd.xlane.f32.xlu1 %v2640_v20  ;;  %2961 = vadd.xlane.f32.xlu0 %v2639_v37  ;;  %v8245_v8 = vmax.f32 %v2066_v54, 0.0  ;;  %v1706_v20 = vadd.f32 %v8167_v2, %v7655_v3  ;;  %v8284_v3 = vld [vmem:[%s6690_s25 + $0x90] sm:$0xff]   ;;  %v2637_v54 = vmul.f32 %v8243_v16, %v8243_v16  ;;  %v8302_v25 = vpop.f32.mrb[69].mxu1 }
 0x1be   : > { %12285 = vst [vmem:[#allocation141_spill] sm:$0xff] %v8212_v42  ;;  %12286 = vst [vmem:[#allocation142_spill] sm:$0xff] %v8219_v44  ;;  %v2542_v37 = vmul.f32 %v8212_v42, %v8212_v42  ;;  %v8277_v42 = vld [vmem:[%s6690_s25 + $0x88] sm:$0xff]  }
 0x1bf   : > { %12287 = vst [vmem:[#allocation143_spill] sm:$0xff] %v8224_v34  ;;  %12288 = vst [vmem:[#allocation144_spill] sm:$0xff] %v8229_v51  ;;  %v8247_v34 = vpop.f32.mrb[68].mxu0  ;;  %v2087_v51 = vadd.f32 %v8167_v2, %v7641_v4  ;;  %v8305_v4 = vld [vmem:[%s6690_s25 + $0x98] sm:$0xff]  }
 0x1c0   : > { %12289 = vst [vmem:[#allocation145_spill] sm:$0xff] %v8234_v29  ;;  %12290 = vst [vmem:[#allocation146_spill] sm:$0xff] %v8239_v50  ;;  %v8257_v17 = vpop.f32.mrb[69].mxu0  ;;  %v8265_v50 = vld [vmem:[%s6690_s25 + $0x70] sm:$0xff]   ;;  %v8272_v29 = vld [vmem:[%s6690_s25 + $0x78] sm:$0xff]  }
 0x1c1   : > { %12291 = vst [vmem:[#allocation147_spill] sm:$0xff] %v8243_v16  ;;  %12292 = vst [vmem:[#allocation148_spill] sm:$0xff] %v8245_v8  ;;  %v8269_v44 = vpop.f32.mrb[70].mxu0  ;;  %2767 = vadd.xlane.f32.xlu1 %v2542_v37  ;;  %2765 = vadd.xlane.f32.xlu0 %v2541_v14  ;;  %v8294_v14 = vmax.f32 %v1703_v60, 0.0  ;;  %v8296_v37 = vmax.f32 %v1706_v20, 0.0  ;;  %v8317_v16 = vpop.f32.mrb[70].mxu1 }
 0x1c2   : > { %12293 = vst [vmem:[#allocation149_spill] sm:$0xff] %v8260_v53  ;;  %12294 = vst [vmem:[#allocation150_spill] sm:$0xff] %v8265_v50  ;;  %v8281_v59 = vpop.f32.mrb[71].mxu0  ;;  %v2638_v53 = vmul.f32 %v8245_v8, %v8245_v8  ;;  %v8310_v60 = vld [vmem:[%s6685_s21 + $0x24] sm:$0xf]  ;;  %v8314_v50 = vld [vmem:[%s6685_s21 + $0x28] sm:$0xff]  }
 0x1c3   : > { %12295 = vst [vmem:[#allocation151_spill] sm:$0xff] %v8272_v29  ;;  %12296 = vst [vmem:[#allocation152_spill] sm:$0xff] %v8277_v42  ;;  %v2090_v42 = vadd.f32 %v8167_v2, %v7657_v15  ;;  %v8326_v29 = vld [vmem:[%s6690_s25 + $0xa8] sm:$0xff]   ;;  %v8329_v20 = vpop.f32.mrb[71].mxu1  ;;  %v2548_v15 = vmul.f32 %v8296_v37, %v8296_v37  ;;  %v2547_v8 = vmul.f32 %v8294_v14, %v8294_v14 }
 0x1c4   : > { %12297 = vst [vmem:[#allocation153_spill] sm:$0xff] %v8284_v3  ;;  %12298 = vst [vmem:[#allocation154_spill] sm:$0xff] %v8294_v14  ;;  %v8338_v3 = vmax.f32 %v2087_v51, 0.0  ;;  %v8354_v51 = vld [vmem:[%s6685_s21 + $0x38] sm:$0xff]   ;;  %v2082_v14 = vadd.f32 %v8167_v2, %v7661_v48 }
 0x1c5   : > { %12299 = vst [vmem:[#allocation155_spill] sm:$0xff] %v8296_v37  ;;  %12300 = vst [vmem:[#allocation156_spill] sm:$0xff] %v8302_v25  ;;  %2959 = vadd.xlane.f32.xlu1 %v2638_v53  ;;  %2957 = vadd.xlane.f32.xlu0 %v2637_v54  ;;  %v1698_v54 = vadd.f32 %v8167_v2, %v7659_v57  ;;  %v8369_v25 = vld [vmem:[%s6685_s21 + $0x40] sm:$0xff]   ;;  %v2079_v37 = vadd.f32 %v8167_v2, %v7653_v47  ;;  %v8438_v48 = vld [vmem:[%s6690_s25 + $0xd8] sm:$0xff]  }
 0x1c6   : > { %12301 = vst [vmem:[#allocation157_spill] sm:$0xff] %v8305_v4  ;;  %12302 = vst [vmem:[#allocation158_spill] sm:$0xff] %v8310_v60  ;;  %v8333_v60 = vld [vmem:[%s6685_s21 + $0x30] sm:$0xff]   ;;  %v8342_v53 = vpop.xlane.xlu1 %2705  ;;  %v8346_v4 = vmax.f32 %v2090_v42, 0.0  ;;  %v2643_v57 = vmul.f32 %v8338_v3, %v8338_v3 }
 0x1c7   : > { %12303 = vst [vmem:[#allocation159_spill] sm:$0xff] %v8314_v50  ;;  %12304 = vst [vmem:[#allocation160_spill] sm:$0xff] %v8317_v16  ;;  %v8364_v16 = vld [vmem:[%s6690_s25 + $0xb8] sm:$0xff]   ;;  %v8374_v50 = vld [vmem:[%s6685_s21 + $0x48] sm:$0xff]  }
 0x1c8   : > { %12305 = vst [vmem:[#allocation161_spill] sm:$0xff] %v8321_v13  ;;  %12306 = vst [vmem:[#allocation162_spill] sm:$0xff] %v8326_v29  ;;  %v8340_v13 = vpop.xlane.xlu0 %2897  ;;  %v2644_v29 = vmul.f32 %v8346_v4, %v8346_v4 }
 0x1c9   : > { %12307 = vst [vmem:[#allocation163_spill] sm:$0xff] %v8329_v20  ;;  %12308 = vst [vmem:[#allocation164_spill] sm:$0xff] %v8333_v60  ;;  %v8359_v20 = vld [vmem:[%s6690_s25 + $0xb0] sm:$0xff]   ;;  %2779 = vadd.xlane.f32.xlu1 %v2548_v15  ;;  %2777 = vadd.xlane.f32.xlu0 %v2547_v8  ;;  %v8385_v8 = vmax.f32 %v1695_v33, 0.0  ;;  %v8387_v15 = vmax.f32 %v1698_v54, 0.0  ;;  %v8410_v60 = vld [vmem:[%s6685_s21 + $0x58] sm:$0xff]  }
 0x1ca   : > { %12309 = vst [vmem:[#allocation165_spill] sm:$0xff] %v8338_v3  ;;  %12310 = vst [vmem:[#allocation166_spill] sm:$0xff] %v8346_v4  ;;  %v8381_v42 = vpop.xlane.xlu1 %2707  ;;  %v8418_v54 = vmax.f32 %v2079_v37, 0.0  ;;  %v8434_v33 = vpop.f32.mrb[72].mxu0 }
 0x1cb   : > { %12311 = vst [vmem:[#allocation167_spill] sm:$0xff] %v8354_v51  ;;  %12312 = vst [vmem:[#allocation168_spill] sm:$0xff] %v8359_v20  ;;  %v8405_v51 = vld [vmem:[%s6685_s21 + $0x50] sm:$0xff]   ;;  %v2546_v47 = vmul.f32 %v8387_v15, %v8387_v15  ;;  %v2545_v37 = vmul.f32 %v8385_v8, %v8385_v8 }
 0x1cc   : > { %12313 = vst [vmem:[#allocation169_spill] sm:$0xff] %v8364_v16  ;;  %12314 = vst [vmem:[#allocation170_spill] sm:$0xff] %v8369_v25  ;;  %v8383_v26 = vpop.xlane.xlu0 %2701  ;;  %v8395_v16 = vld [vmem:[%s6690_s25 + $0xc0] sm:$0xff]   ;;  %v8400_v25 = vld [vmem:[%s6690_s25 + $0xc8] sm:$0xff]  }
 0x1cd   : > { %12315 = vst [vmem:[#allocation171_spill] sm:$0xff] %v8374_v50  ;;  %12316 = vst [vmem:[#allocation172_spill] sm:$0xff] %v8385_v8  ;;  %2971 = vadd.xlane.f32.xlu1 %v2644_v29  ;;  %2969 = vadd.xlane.f32.xlu0 %v2643_v57  ;;  %v8415_v20 = vld [vmem:[%s6690_s25 + $0xd0] sm:$0xff]   ;;  %v1719_v29 = vadd.f32 %v8167_v2, %v7679_v38  ;;  %v1722_v57 = vadd.f32 %v8167_v2, %v7695_v58  ;;  %v8452_v50 = vld [vmem:[%s6685_s21 + $0x68] sm:$0xff]  }
 0x1ce   : > { %12317 = vst [vmem:[#allocation173_spill] sm:$0xff] %v8387_v15  ;;  %12318 = vst [vmem:[#allocation174_spill] sm:$0xff] %v8395_v16  ;;  %v8422_v4 = vpop.xlane.xlu1 %2899  ;;  %v2103_v58 = vadd.f32 %v8167_v2, %v7681_v10  ;;  %v8447_v15 = vld [vmem:[%s6685_s21 + $0x60] sm:$0xff]   ;;  %v1711_v16 = vadd.f32 %v8167_v2, %v7691_v55  ;;  %v2106_v55 = vadd.f32 %v8167_v2, %v7697_v19 }
 0x1cf   : > { %12319 = vst [vmem:[#allocation175_spill] sm:$0xff] %v8400_v25  ;;  %12320 = vst [vmem:[#allocation176_spill] sm:$0xff] %v8405_v51  ;;  %v8420_v25 = vmax.f32 %v2082_v14, 0.0  ;;  %v2095_v51 = vadd.f32 %v8167_v2, %v7693_v12  ;;  %v2641_v8 = vmul.f32 %v8418_v54, %v8418_v54  ;;  %v8482_v12 = vpop.f32.mrb[72].mxu1 }
 0x1d0   : > { %12321 = vst [vmem:[#allocation177_spill] sm:$0xff] %v8410_v60  ;;  %12322 = vst [vmem:[#allocation178_spill] sm:$0xff] %v8415_v20  ;;  %v8424_v3 = vpop.xlane.xlu0 %2893  ;;  %v8444_v60 = vpop.f32.mrb[73].mxu0 }
 0x1d1   : > { %12323 = vst [vmem:[#allocation179_spill] sm:$0xff] %v8418_v54  ;;  %12324 = vst [vmem:[#allocation180_spill] sm:$0xff] %v8420_v25  ;;  %2775 = vadd.xlane.f32.xlu1 %v2546_v47  ;;  %2773 = vadd.xlane.f32.xlu0 %v2545_v37  ;;  %v8457_v38 = vpop.f32.mrb[74].mxu0  ;;  %v8472_v47 = vmax.f32 %v1719_v29, 0.0  ;;  %v8474_v37 = vmax.f32 %v1722_v57, 0.0  ;;  %v2642_v10 = vmul.f32 %v8420_v25, %v8420_v25  ;;  %v8490_v57 = vmax.f32 %v2103_v58, 0.0 }
 0x1d2   : > { %12325 = vst [vmem:[#allocation181_spill] sm:$0xff] %v8438_v48  ;;  %12326 = vst [vmem:[#allocation182_spill] sm:$0xff] %v8444_v60  ;;  %v8461_v48 = vld [vmem:[%s6690_s25 + $0xe0] sm:$0xff]   ;;  %v8466_v20 = vpop.xlane.xlu1 %2895  ;;  %v8492_v60 = vpop.f32.mrb[73].mxu1  ;;  %v8495_v25 = vld [vmem:[%s6685_s21 + $0x70] sm:$0xff]   ;;  %v8511_v54 = vmax.f32 %v2095_v51, 0.0 }
 0x1d3   : > { %12327 = vst [vmem:[#allocation183_spill] sm:$0xff] %v8447_v15  ;;  %12328 = vst [vmem:[#allocation184_spill] sm:$0xff] %v8452_v50  ;;  %v8480_v50 = vpop.f32.mrb[75].mxu0  ;;  %v2098_v15 = vadd.f32 %v8167_v2, %v7701_v22  ;;  %v8504_v19 = vpop.f32.mrb[74].mxu1  ;;  %v8508_v29 = vld [vmem:[%s6685_s21 + $0x78] sm:$0xff]   ;;  %v2552_v22 = vmul.f32 %v8474_v37, %v8474_v37  ;;  %v8531_v58 = vld [vmem:[%s6690_s25 + $0xf0] sm:$0xff]  }
 0x1d4   : > { %12329 = vst [vmem:[#allocation185_spill] sm:$0xff] %v8457_v38  ;;  %12330 = vst [vmem:[#allocation186_spill] sm:$0xff] %v8461_v48  ;;  %v8468_v14 = vpop.xlane.xlu0 %2703  ;;  %v8486_v38 = vld [vmem:[%s6690_s25 + $0xe8] sm:$0xff]   ;;  %v8527_v51 = vpop.f32.mrb[75].mxu1 }
 0x1d5   : > { %12331 = vst [vmem:[#allocation187_spill] sm:$0xff] %v8472_v47  ;;  %12332 = vst [vmem:[#allocation188_spill] sm:$0xff] %v8474_v37  ;;  %2967 = vadd.xlane.f32.xlu1 %v2642_v10  ;;  %2965 = vadd.xlane.f32.xlu0 %v2641_v8  ;;  %v2551_v8 = vmul.f32 %v8472_v47, %v8472_v47  ;;  %v1735_v10 = vadd.f32 %v8167_v2, %v7719_v63  ;;  %v8540_v63 = vmax.f32 %v2098_v15, 0.0 }
 0x1d6   : > { %12333 = vst [vmem:[#allocation189_spill] sm:$0xff] %v8480_v50  ;;  %12334 = vst [vmem:[#allocation190_spill] sm:$0xff] %v8482_v12  ;;  %v8498_v50 = vmax.f32 %v1711_v16, 0.0  ;;  %v1714_v12 = vadd.f32 %v8167_v2, %v7699_v36  ;;  %v8513_v16 = vmax.f32 %v2106_v55, 0.0  ;;  %v8515_v48 = vpop.xlane.xlu1 %2715  ;;  %v2647_v37 = vmul.f32 %v8490_v57, %v8490_v57 }
 0x1d7   : > { %12335 = vst [vmem:[#allocation191_spill] sm:$0xff] %v8486_v38  ;;  %12336 = vst [vmem:[#allocation192_spill] sm:$0xff] %v8490_v57  ;;  %v2119_v38 = vadd.f32 %v8167_v2, %v7721_v43  ;;  %v1727_v47 = vadd.f32 %v8167_v2, %v7731_v46  ;;  %v2111_v55 = vadd.f32 %v8167_v2, %v7733_v1 }
 0x1d8   : > { %12337 = vst [vmem:[#allocation193_spill] sm:$0xff] %v8492_v60  ;;  %12338 = vst [vmem:[#allocation194_spill] sm:$0xff] %v8495_v25  ;;  %v8517_v36 = vpop.xlane.xlu0 %2713  ;;  %v2549_v43 = vmul.f32 %v8498_v50, %v8498_v50  ;;  %v1738_v57 = vadd.f32 %v8167_v2, %v7735_v39  ;;  %v1730_v46 = vadd.f32 %v8167_v2, %v7739_v31 }
 0x1d9   : > { %12339 = vst [vmem:[#allocation195_spill] sm:$0xff] %v8498_v50  ;;  %12340 = vst [vmem:[#allocation196_spill] sm:$0xff] %v8504_v19  ;;  %v8538_v19 = vmax.f32 %v1714_v12, 0.0  ;;  %2787 = vadd.xlane.f32.xlu1 %v2552_v22  ;;  %2785 = vadd.xlane.f32.xlu0 %v2551_v8  ;;  %v2122_v15 = vadd.f32 %v8167_v2, %v7737_v7  ;;  %v2645_v12 = vmul.f32 %v8511_v54, %v8511_v54 }
 0x1da   : > { %12341 = vst [vmem:[#allocation197_spill] sm:$0xff] %v8508_v29  ;;  %12342 = vst [vmem:[#allocation198_spill] sm:$0xff] %v8511_v54  ;;  %v8546_v29 = vpop.xlane.xlu1 %2907  ;;  %v8558_v22 = vmax.f32 %v1735_v10, 0.0  ;;  %v2648_v1 = vmul.f32 %v8513_v16, %v8513_v16  ;;  %v8562_v8 = vmax.f32 %v2119_v38, 0.0  ;;  %v2114_v50 = vadd.f32 %v8167_v2, %v7741_v52 }
 0x1db   : > { %12343 = vst [vmem:[#allocation199_spill] sm:$0xff] %v8513_v16  ;;  %12344 = vst [vmem:[#allocation200_spill] sm:$0xff] %v8527_v51  ;;  %v8566_v39 = vmax.f32 %v1727_v47, 0.0  ;;  %v12353_v51 = vld [vmem:[#allocation55_spill] sm:$0xff]  ;;  %v2550_v38 = vmul.f32 %v8538_v19, %v8538_v19  ;;  %v8576_v54 = vmax.f32 %v2111_v55, 0.0  ;;  %v2646_v52 = vmul.f32 %v8540_v63, %v8540_v63  ;;  %v12356_v47 = vld [vmem:[#allocation56_spill] sm:$0xff] }
 0x1dc   : > { %12345 = vst [vmem:[#allocation201_spill] sm:$0xff] %v8531_v58  ;;  %12346 = vst [vmem:[#allocation202_spill] sm:$0xff] %v8538_v19  ;;  %v8548_v25 = vpop.xlane.xlu0 %2905  ;;  %v12352_v58 = vld [vmem:[#allocation51_spill] sm:$0xff]  ;;  %v1743_v7 = vadd.f32 %v8167_v2, %v12353_v51  ;;  %v2127_v16 = vadd.f32 %v8167_v2, %v12356_v47  ;;  %v8586_v51 = vmax.f32 %v1738_v57, 0.0  ;;  %v1754_v55 = vadd.f32 %v8167_v2, %v7786_v41 }
 0x1dd   : > { %12347 = vst [vmem:[#allocation203_spill] sm:$0xff] %v8540_v63  ;;  %12348 = vst [vmem:[#allocation204_spill] sm:$0xff] %v8548_v25  ;;  %v1751_v31 = vadd.f32 %v8167_v2, %v12352_v58  ;;  %v12354_v25 = vld [vmem:[#allocation52_spill] sm:$0xff]  ;;  %2979 = vadd.xlane.f32.xlu1 %v2648_v1  ;;  %2977 = vadd.xlane.f32.xlu0 %v2647_v37  ;;  %v8590_v37 = vmax.f32 %v2122_v15, 0.0  ;;  %v8596_v1 = vmul.f32 %v8562_v8, %v8562_v8  ;;  %v8604_v63 = vpop.f32.mrb[76].mxu0 }
 0x1de   : > { %12349 = vst [vmem:[#allocation205_spill] sm:$0xff] %v8558_v22  ;;  %12350 = vst [vmem:[#allocation206_spill] sm:$0xff] %v8562_v8  ;;  %v2135_v10 = vadd.f32 %v8167_v2, %v12354_v25  ;;  %v8582_v58 = vpop.xlane.xlu1 %2711  ;;  %v8588_v25 = vmax.f32 %v1730_v46, 0.0  ;;  %v8598_v19 = vmax.f32 %v2114_v50, 0.0  ;;  %v2555_v47 = vmul.f32 %v8558_v22, %v8558_v22  ;;  %v8616_v50 = vpop.f32.mrb[77].mxu0 }
 0x1df   : > { %12351 = vst [vmem:[#allocation207_spill] sm:$0xff] %v8566_v39  ;;  %12355 = vst [vmem:[#allocation51_spill] sm:$0xff] %v8576_v54  ;;  %v2138_v57 = vadd.f32 %v8167_v2, %v7788_v5  ;;  %v8608_v46 = vmul.f32 %v8566_v39, %v8566_v39  ;;  %v8610_v15 = vmax.f32 %v1751_v31, 0.0  ;;  %v8612_v41 = vmax.f32 %v1743_v7, 0.0  ;;  %v12367_v5 = vld [vmem:[#allocation60_spill] sm:$0xff]  ;;  %v12369_v39 = vld [vmem:[#allocation61_spill] sm:$0xff] }
 0x1e0   : > { %v8584_v60 = vpop.xlane.xlu0 %2709  ;;  %12358 = vst [vmem:[#allocation52_spill] sm:$0xff] %v8586_v51  ;;  %12359 = vst [vmem:[#allocation56_spill] sm:$0xff] %v8588_v25  ;;  %v8614_v8 = vmax.f32 %v2135_v10, 0.0  ;;  %v8620_v22 = vmul.f32 %v8576_v54, %v8576_v54  ;;  %v2130_v31 = vadd.f32 %v8167_v2, %v12369_v39  ;;  %v8628_v7 = vpop.f32.mrb[78].mxu0  ;;  %v2556_v10 = vmul.f32 %v8586_v51, %v8586_v51 }
 0x1e1   : > { %12357 = vst [vmem:[#allocation55_spill] sm:$0xff] %v8584_v60  ;;  %12360 = vst [vmem:[#allocation208_spill] sm:$0xff] %v8590_v37  ;;  %2783 = vadd.xlane.f32.xlu1 %v2550_v38  ;;  %2781 = vadd.xlane.f32.xlu0 %v2549_v43  ;;  %v8624_v60 = vmax.f32 %v2127_v16, 0.0  ;;  %v8634_v43 = vmul.f32 %v8588_v25, %v8588_v25  ;;  %v2652_v16 = vmul.f32 %v8590_v37, %v8590_v37 }
 0x1e2   : > { %12361 = vst [vmem:[#allocation209_spill] sm:$0xff] %v8598_v19  ;;  %12362 = vst [vmem:[#allocation210_spill] sm:$0xff] %v8604_v63  ;;  %v1746_v63 = vadd.f32 %v8167_v2, %v12367_v5  ;;  %v8636_v38 = vpop.xlane.xlu1 %2903  ;;  %v8642_v5 = vmax.f32 %v1754_v55, 0.0  ;;  %v8646_v39 = vmul.f32 %v8598_v19, %v8598_v19  ;;  %v1767_v51 = vadd.f32 %v8167_v2, %v7845_v32 }
 0x1e3   : > { %12363 = vst [vmem:[#allocation211_spill] sm:$0xff] %v8610_v15  ;;  %12364 = vst [vmem:[#allocation212_spill] sm:$0xff] %v8612_v41  ;;  %v2151_v25 = vadd.f32 %v8167_v2, %v7847_v9  ;;  %v8660_v55 = vmul.f32 %v8610_v15, %v8610_v15  ;;  %v8664_v19 = vmul.f32 %v8612_v41, %v8612_v41 }
 0x1e4   : > { %12365 = vst [vmem:[#allocation213_spill] sm:$0xff] %v8614_v8  ;;  %12366 = vst [vmem:[#allocation214_spill] sm:$0xff] %v8616_v50  ;;  %v8638_v54 = vpop.xlane.xlu0 %2901  ;;  %v8654_v50 = vpop.f32.mrb[79].mxu0  ;;  %v1759_v32 = vadd.f32 %v8167_v2, %v7857_v18  ;;  %v8674_v37 = vmax.f32 %v1746_v63, 0.0  ;;  %v8678_v15 = vmul.f32 %v8624_v60, %v8624_v60  ;;  %v2143_v41 = vadd.f32 %v8167_v2, %v7859_v62 }
 0x1e5   : > { %12368 = vst [vmem:[#allocation60_spill] sm:$0xff] %v8624_v60  ;;  %12370 = vst [vmem:[#allocation61_spill] sm:$0xff] %v8628_v7  ;;  %v8648_v7 = vmax.f32 %v2138_v57, 0.0  ;;  %v8668_v57 = vmul.f32 %v8614_v8, %v8614_v8  ;;  %2975 = vadd.xlane.f32.xlu1 %v2646_v52  ;;  %2973 = vadd.xlane.f32.xlu0 %v2645_v12  ;;  %v8692_v12 = vmul.f32 %v8642_v5, %v8642_v5  ;;  %v12383_v52 = vld [vmem:[#allocation77_spill] sm:$0xff]  ;;  %v12384_v60 = vld [vmem:[#allocation74_spill] sm:$0xff] }
 0x1e6   : > { %12371 = vst [vmem:[#allocation215_spill] sm:$0xff] %v8636_v38  ;;  %12372 = vst [vmem:[#allocation216_spill] sm:$0xff] %v8638_v54  ;;  %v8656_v54 = vpop.f32.mrb[76].mxu1  ;;  %v1770_v63 = vadd.f32 %v8167_v2, %v7871_v24  ;;  %v8712_v24 = vmax.f32 %v1759_v32, 0.0  ;;  %v12391_v32 = vld [vmem:[#allocation89_spill] sm:$0xff] }
 0x1e7   : > { %12373 = vst [vmem:[#allocation217_spill] sm:$0xff] %v8642_v5  ;;  %12374 = vst [vmem:[#allocation218_spill] sm:$0xff] %v8648_v7  ;;  %v8672_v9 = vpop.f32.mrb[77].mxu1  ;;  %v8702_v62 = vmul.f32 %v8648_v7, %v8648_v7  ;;  %v2167_v7 = vadd.f32 %v8167_v2, %v7937_v23 }
 0x1e8   : > { %12375 = vst [vmem:[#allocation219_spill] sm:$0xff] %v8654_v50  ;;  %12376 = vst [vmem:[#allocation220_spill] sm:$0xff] %v8656_v54  ;;  %v8680_v54 = vmax.f32 %v2130_v31, 0.0  ;;  %v8684_v8 = vpop.f32.mrb[78].mxu1  ;;  %v8686_v50 = vpop.xlane.xlu1 %2723  ;;  %v1762_v31 = vadd.f32 %v8167_v2, %v12383_v52  ;;  %v1783_v52 = vadd.f32 %v8167_v2, %v7935_v11  ;;  %v2159_v11 = vadd.f32 %v8167_v2, %v12391_v32 }
 0x1e9   : > { %12377 = vst [vmem:[#allocation221_spill] sm:$0xff] %v8672_v9  ;;  %12378 = vst [vmem:[#allocation222_spill] sm:$0xff] %v8674_v37  ;;  %v8688_v18 = vpop.xlane.xlu0 %2721  ;;  %v2154_v9 = vadd.f32 %v8167_v2, %v12384_v60  ;;  %v8710_v38 = vpop.f32.mrb[79].mxu1  ;;  %v1775_v60 = vadd.f32 %v8167_v2, %v7947_v35  ;;  %2795 = vadd.xlane.f32.xlu1 %v2556_v10  ;;  %2793 = vadd.xlane.f32.xlu0 %v2555_v47  ;;  %v8736_v23 = vmax.f32 %v1770_v63, 0.0 }
 0x1ea   : > { %12379 = vst [vmem:[#allocation223_spill] sm:$0xff] %v8680_v54  ;;  %12380 = vst [vmem:[#allocation224_spill] sm:$0xff] %v8684_v8  ;;  %v8704_v8 = vmax.f32 %v1767_v51, 0.0  ;;  %v8722_v51 = vmul.f32 %v8674_v37, %v8674_v37  ;;  %v8738_v47 = vmax.f32 %v1762_v31, 0.0  ;;  %v1786_v37 = vadd.f32 %v8167_v2, %v7961_v40 }
 0x1eb   : > { %12381 = vst [vmem:[#allocation225_spill] sm:$0xff] %v8686_v50  ;;  %12382 = vst [vmem:[#allocation226_spill] sm:$0xff] %v8688_v18  ;;  %v8706_v18 = vmax.f32 %v2151_v25, 0.0  ;;  %v12387_v50 = vld [vmem:[#allocation78_spill] sm:$0xff]  ;;  %v8726_v25 = vmul.f32 %v8680_v54, %v8680_v54  ;;  %v8740_v10 = vmax.f32 %v2154_v9, 0.0  ;;  %v8758_v9 = vmul.f32 %v8712_v24, %v8712_v24 }
 0x1ec   : > { %12385 = vst [vmem:[#allocation77_spill] sm:$0xff] %v8704_v8  ;;  %v2146_v5 = vadd.f32 %v8167_v2, %v12387_v50  ;;  %12388 = vst [vmem:[#allocation78_spill] sm:$0xff] %v8710_v38  ;;  %v8728_v50 = vmax.f32 %v2143_v41, 0.0  ;;  %v8732_v38 = vpop.xlane.xlu1 %2915  ;;  %v8746_v41 = vmul.f32 %v8704_v8, %v8704_v8  ;;  %v8760_v31 = vmax.f32 %v1783_v52, 0.0  ;;  %v12403_v8 = vld [vmem:[#allocation95_spill] sm:$0xff] }
 0x1ed   : > { %12386 = vst [vmem:[#allocation74_spill] sm:$0xff] %v8706_v18  ;;  %12389 = vst [vmem:[#allocation227_spill] sm:$0xff] %v8712_v24  ;;  %v8734_v35 = vpop.xlane.xlu0 %2913  ;;  %v8750_v32 = vmul.f32 %v8706_v18, %v8706_v18  ;;  %v8762_v40 = vmax.f32 %v1775_v60, 0.0  ;;  %2987 = vadd.xlane.f32.xlu1 %v2652_v16  ;;  %2985 = vadd.xlane.f32.xlu0 %v8596_v1  ;;  %v8773_v18 = vmax.f32 %v2159_v11, 0.0  ;;  %v12405_v24 = vld [vmem:[#allocation96_spill] sm:$0xff]  ;;  %v8793_v16 = vmax.f32 %v1786_v37, 0.0 }
 0x1ee   : > { %12390 = vst [vmem:[#allocation228_spill] sm:$0xff] %v8728_v50  ;;  %12392 = vst [vmem:[#allocation89_spill] sm:$0xff] %v8732_v38  ;;  %v8752_v54 = vmax.f32 %v2146_v5, 0.0  ;;  %v8764_v38 = vmax.f32 %v2167_v7, 0.0  ;;  %v8769_v5 = vmul.f32 %v8728_v50, %v8728_v50  ;;  %v2162_v52 = vadd.f32 %v8167_v2, %v12405_v24 }
 0x1ef   : > { %12393 = vst [vmem:[#allocation229_spill] sm:$0xff] %v8734_v35  ;;  %12394 = vst [vmem:[#allocation230_spill] sm:$0xff] %v8736_v23  ;;  %v12398_v35 = vld [vmem:[#allocation92_spill] sm:$0xff]  ;;  %v8783_v7 = vmul.f32 %v8736_v23, %v8736_v23  ;;  %v8787_v1 = vmul.f32 %v8738_v47, %v8738_v47  ;;  %v1799_v50 = vadd.f32 %v8167_v2, %v8025_v0 }
 0x1f0   : > { %12395 = vst [vmem:[#allocation231_spill] sm:$0xff] %v8738_v47  ;;  %12396 = vst [vmem:[#allocation232_spill] sm:$0xff] %v8740_v10  ;;  %v2170_v63 = vadd.f32 %v8167_v2, %v12398_v35  ;;  %v1778_v35 = vadd.f32 %v8167_v2, %v12403_v8  ;;  %v8791_v8 = vmul.f32 %v8740_v10, %v8740_v10  ;;  %v8805_v47 = vpop.f32.mrb[80].mxu0 }
 0x1f1   : > { %12397 = vst [vmem:[#allocation233_spill] sm:$0xff] %v8752_v54  ;;  %12399 = vst [vmem:[#allocation92_spill] sm:$0xff] %v8758_v9  ;;  %v8777_v9 = vpop.xlane.xlu1 %2719  ;;  %v8779_v60 = vpop.xlane.xlu0 %2717  ;;  %v8797_v24 = vmul.f32 %v8752_v54, %v8752_v54  ;;  %v2183_v23 = vadd.f32 %v8167_v2, %v8027_v6  ;;  %v8809_v10 = vmul.f32 %v8760_v31, %v8760_v31  ;;  %2791 = vadd.xlane.f32.xlu1 %v8634_v43 }
 0x1f2   : > { %12400 = vst [vmem:[#allocation234_spill] sm:$0xff] %v8760_v31  ;;  %12401 = vst [vmem:[#allocation235_spill] sm:$0xff] %v8762_v40  ;;  %v8799_v11 = vmax.f32 %v2170_v63, 0.0  ;;  %v8813_v37 = vmul.f32 %v8762_v40, %v8762_v40  ;;  %v8817_v63 = vmul.f32 %v8764_v38, %v8764_v38  ;;  %v1791_v0 = vadd.f32 %v8167_v2, %v8037_v30  ;;  %v8821_v54 = vpop.f32.mrb[81].mxu0 }
 0x1f3   : > { %12402 = vst [vmem:[#allocation236_spill] sm:$0xff] %v8764_v38  ;;  %12404 = vst [vmem:[#allocation95_spill] sm:$0xff] %v8773_v18  ;;  %2789 = vadd.xlane.f32.xlu0 %v8608_v46  ;;  %v8825_v6 = vmax.f32 %v1778_v35, 0.0  ;;  %v8829_v31 = vmul.f32 %v8773_v18, %v8773_v18  ;;  %v8831_v40 = vmax.f32 %v2162_v52, 0.0  ;;  %v8843_v46 = vmul.f32 %v8793_v16, %v8793_v16  ;;  %v12420_v35 = vld [vmem:[#allocation113_spill] sm:$0xff]  ;;  %v12421_v18 = vld [vmem:[#allocation110_spill] sm:$0xff] }
 0x1f4   : > { %12406 = vst [vmem:[#allocation96_spill] sm:$0xff] %v8779_v60  ;;  %12407 = vst [vmem:[#allocation237_spill] sm:$0xff] %v8793_v16  ;;  %v1802_v43 = vadd.f32 %v8167_v2, %v8051_v21  ;;  %v1794_v52 = vadd.f32 %v8167_v2, %v12420_v35  ;;  %v8863_v21 = vpop.f32.mrb[80].mxu1  ;;  %v8865_v60 = vmax.f32 %v1791_v0, 0.0  ;;  %v1807_v35 = vadd.f32 %v8167_v2, %v8127_v49 }
 0x1f5   : > { %12408 = vst [vmem:[#allocation238_spill] sm:$0xff] %v8799_v11  ;;  %12409 = vst [vmem:[#allocation239_spill] sm:$0xff] %v8805_v47  ;;  %v8835_v47 = vpop.f32.mrb[82].mxu0  ;;  %v8837_v30 = vpop.xlane.xlu1 %2911  ;;  %2983 = vadd.xlane.f32.xlu1 %v8646_v39  ;;  %v8883_v0 = vmul.f32 %v8831_v40, %v8831_v40  ;;  %v1810_v49 = vadd.f32 %v8167_v2, %v8155_v56 }
 0x1f6   : > { %12410 = vst [vmem:[#allocation240_spill] sm:$0xff] %v8813_v37  ;;  %12411 = vst [vmem:[#allocation241_spill] sm:$0xff] %v8817_v63  ;;  %v12416_v37 = vld [vmem:[#allocation107_spill] sm:$0xff]  ;;  %v8857_v63 = vmax.f32 %v2183_v23, 0.0  ;;  %v8873_v23 = vpop.f32.mrb[81].mxu1 }
 0x1f7   : > { %12412 = vst [vmem:[#allocation242_spill] sm:$0xff] %v8821_v54  ;;  %12413 = vst [vmem:[#allocation243_spill] sm:$0xff] %v8825_v6  ;;  %v2175_v38 = vadd.f32 %v8167_v2, %v12416_v37  ;;  %v8839_v54 = vpop.xlane.xlu0 %2909  ;;  %v8853_v37 = vmul.f32 %v8799_v11, %v8799_v11  ;;  %2981 = vadd.xlane.f32.xlu0 %v8620_v22  ;;  %v8895_v22 = vmax.f32 %v1802_v43, 0.0 }
 0x1f8   : > { %12414 = vst [vmem:[#allocation244_spill] sm:$0xff] %v8829_v31  ;;  %12415 = vst [vmem:[#allocation245_spill] sm:$0xff] %v8831_v40  ;;  %v2186_v31 = vadd.f32 %v8167_v2, %v12421_v18  ;;  %v1815_v18 = vadd.f32 %v8167_v2, %v8115_v61  ;;  %v2199_v40 = vadd.f32 %v8167_v2, %v8117_v45 }
 0x1f9   : > { %12417 = vst [vmem:[#allocation107_spill] sm:$0xff] %v8835_v47  ;;  %12418 = vst [vmem:[#allocation246_spill] sm:$0xff] %v8837_v30  ;;  %v8855_v47 = vmax.f32 %v1799_v50, 0.0  ;;  %v8861_v30 = vpop.f32.mrb[83].mxu0  ;;  %v1818_v50 = vadd.f32 %v8167_v2, %v8141_v28  ;;  %v8885_v61 = vmax.f32 %v2175_v38, 0.0  ;;  %v8889_v28 = vpop.f32.mrb[82].mxu1  ;;  %v8909_v56 = vmul.f32 %v8857_v63, %v8857_v63  ;;  %2803 = vadd.xlane.f32.xlu1 %v8692_v12 }
 0x1fa   : > { %12419 = vst [vmem:[#allocation247_spill] sm:$0xff] %v8839_v54  ;;  %12423 = vst [vmem:[#allocation110_spill] sm:$0xff] %v8857_v63  ;;  %v12424_v54 = vld [vmem:[#allocation114_spill] sm:$0xff]  ;;  %v8891_v11 = vpop.xlane.xlu1 %2731  ;;  %v8921_v45 = vmax.f32 %v1815_v18, 0.0  ;;  %v12442_v63 = vld [vmem:[#allocation128_spill] sm:$0xff]  ;;  %v8945_v12 = vmul.f32 %v8895_v22, %v8895_v22 }
 0x1fb   : > { %12422 = vst [vmem:[#allocation113_spill] sm:$0xff] %v8855_v47  ;;  %v2178_v16 = vadd.f32 %v8167_v2, %v12424_v54  ;;  %12425 = vst [vmem:[#allocation114_spill] sm:$0xff] %v8863_v21  ;;  %v8879_v54 = vmul.f32 %v8825_v6, %v8825_v6  ;;  %v8893_v39 = vpop.xlane.xlu0 %2729  ;;  %v8899_v6 = vmax.f32 %v2186_v31, 0.0  ;;  %v8905_v38 = vmul.f32 %v8855_v47, %v8855_v47 }
 0x1fc   : > { %12426 = vst [vmem:[#allocation248_spill] sm:$0xff] %v8865_v60  ;;  %12427 = vst [vmem:[#allocation249_spill] sm:$0xff] %v8873_v23  ;;  %v8897_v23 = vmax.f32 %v1794_v52, 0.0  ;;  %v8915_v52 = vpop.f32.mrb[83].mxu1  ;;  %v8919_v31 = vmul.f32 %v8865_v60, %v8865_v60  ;;  %v8923_v21 = vmax.f32 %v1807_v35, 0.0  ;;  %v8925_v47 = vmax.f32 %v1818_v50, 0.0  ;;  %2801 = vadd.xlane.f32.xlu0 %v8660_v55 }
 0x1fd   : > { %12428 = vst [vmem:[#allocation250_spill] sm:$0xff] %v8883_v0  ;;  %12429 = vst [vmem:[#allocation251_spill] sm:$0xff] %v8885_v61  ;;  %v8911_v0 = vmax.f32 %v2178_v16, 0.0  ;;  %v8931_v16 = vmul.f32 %v8885_v61, %v8885_v61  ;;  %v2202_v60 = vadd.f32 %v8167_v2, %v12442_v63  ;;  %v8955_v63 = vmax.f32 %v2199_v40, 0.0  ;;  %2995 = vadd.xlane.f32.xlu1 %v8702_v62 }
 0x1fe   : > { %12430 = vst [vmem:[#allocation252_spill] sm:$0xff] %v8889_v28  ;;  %12431 = vst [vmem:[#allocation253_spill] sm:$0xff] %v8895_v22  ;;  %v12435_v28 = vld [vmem:[#allocation125_spill] sm:$0xff]  ;;  %v8939_v35 = vpop.xlane.xlu1 %2923  ;;  %v8949_v55 = vmul.f32 %v8897_v23, %v8897_v23  ;;  %v1831_v22 = vadd.f32 %v8167_v2, %v8247_v34  ;;  %v8973_v40 = vmul.f32 %v8923_v21, %v8923_v21 }
 0x1ff   : > { %12432 = vst [vmem:[#allocation254_spill] sm:$0xff] %v8897_v23  ;;  %12433 = vst [vmem:[#allocation255_spill] sm:$0xff] %v8899_v6  ;;  %v2191_v43 = vadd.f32 %v8167_v2, %v12435_v28  ;;  %v8933_v28 = vmax.f32 %v1810_v49, 0.0  ;;  %v8941_v50 = vpop.xlane.xlu0 %2921  ;;  %v8953_v49 = vmul.f32 %v8899_v6, %v8899_v6  ;;  %v8960_v61 = vmul.f32 %v8911_v0, %v8911_v0 }
 0x200   : > { %12434 = vst [vmem:[#allocation256_spill] sm:$0xff] %v8911_v0  ;;  %12436 = vst [vmem:[#allocation125_spill] sm:$0xff] %v8919_v31  ;;  %v12443_v31 = vld [vmem:[#allocation131_spill] sm:$0xff]  ;;  %v3087_v23 = vadd.f32 1e-10, %v8342_v53  ;;  %2993 = vadd.xlane.f32.xlu0 %v8668_v57  ;;  %v8986_v53 = vmax.f32 %v2202_v60, 0.0  ;;  %v1823_v57 = vadd.f32 %v8167_v2, %v8257_v17  ;;  %v1834_v62 = vadd.f32 %v8167_v2, %v8269_v44 }
 0x201   : > { %12437 = vst [vmem:[#allocation257_spill] sm:$0xff] %v8921_v45  ;;  %12438 = vst [vmem:[#allocation258_spill] sm:$0xff] %v8923_v21  ;;  %v2194_v18 = vadd.f32 %v8167_v2, %v12443_v31  ;;  %v3183_v31 = vadd.f32 1e-10, %v8340_v13  ;;  %v8977_v13 = vmul.f32 %v8925_v47, %v8925_v47  ;;  %v8984_v34 = vmul.f32 %v8933_v28, %v8933_v28 }
 0x202   : > { %12439 = vst [vmem:[#allocation259_spill] sm:$0xff] %v8925_v47  ;;  %12440 = vst [vmem:[#allocation260_spill] sm:$0xff] %v8931_v16  ;;  %v8962_v16 = vmax.f32 %v2191_v43, 0.0  ;;  %v3088_v43 = vadd.f32 1e-10, %v8381_v42  ;;  %v8991_v21 = vpop.xlane.xlu1 %2727  ;;  %v8997_v42 = vmul.f32 %v8955_v63, %v8955_v63  ;;  %v2215_v17 = vadd.f32 %v8167_v2, %v8292_v27  ;;  %v12456_v47 = vld [vmem:[#allocation156_spill] sm:$0xff]  ;;  %2799 = vadd.xlane.f32.xlu1 %v8722_v51 }
 0x203   : > { %12441 = vst [vmem:[#allocation261_spill] sm:$0xff] %v8933_v28  ;;  %12444 = vst [vmem:[#allocation128_spill] sm:$0xff] %v8949_v55  ;;  %v8969_v55 = vmul.f32 %v8921_v45, %v8921_v45  ;;  %v8988_v0 = vmax.f32 %v2194_v18, 0.0  ;;  %v3085_v6 = vadd.f32 1e-10, %v8383_v26  ;;  %v8993_v45 = vpop.xlane.xlu0 %2725  ;;  %6086 = vrsqrt.f32 %v3183_v31  ;;  %v9011_v28 = vpop.f32.mrb[84].mxu0 }
 0x204   : > { %12445 = vst [vmem:[#allocation131_spill] sm:$0xff] %v8955_v63  ;;  %12446 = vst [vmem:[#allocation262_spill] sm:$0xff] %v8962_v16  ;;  %v9005_v60 = vmul.f32 %v8962_v16, %v8962_v16  ;;  %v9007_v26 = vmax.f32 %v1831_v22, 0.0  ;;  %v1826_v18 = vadd.f32 %v8167_v2, %v8281_v59  ;;  %6088 = vrsqrt.f32 %v3087_v23  ;;  %v9018_v31 = vpop.f32.mrb[85].mxu0  ;;  %2797 = vadd.xlane.f32.xlu0 %v8664_v19 }
 0x205   : > { %12447 = vst [vmem:[#allocation263_spill] sm:$0xff] %v8969_v55  ;;  %12448 = vst [vmem:[#allocation264_spill] sm:$0xff] %v8973_v40  ;;  %v3184_v63 = vadd.f32 1e-10, %v8422_v4  ;;  %v2207_v44 = vadd.f32 %v8167_v2, %v12456_v47  ;;  %6090 = vrsqrt.f32 %v3088_v43  ;;  %v3181_v22 = vadd.f32 1e-10, %v8424_v3 }
 0x206   : > { %12449 = vst [vmem:[#allocation265_spill] sm:$0xff] %v8977_v13  ;;  %12450 = vst [vmem:[#allocation266_spill] sm:$0xff] %v8984_v34  ;;  %v9025_v59 = vmul.f32 %v8986_v53, %v8986_v53  ;;  %v9029_v4 = vmul.f32 %v8988_v0, %v8988_v0  ;;  %v9031_v27 = vpop.f32.mrb[86].mxu0  ;;  %6092 = vrsqrt.f32 %v3085_v6  ;;  %v3182_v47 = vadd.f32 1e-10, %v8466_v20  ;;  %v9034_v23 = vpop.xlane.xlu1 %2919  ;;  %2991 = vadd.xlane.f32.xlu1 %v8726_v25 }
 0x207   : > { %12451 = vst [vmem:[#allocation267_spill] sm:$0xff] %v8986_v53  ;;  %12452 = vst [vmem:[#allocation268_spill] sm:$0xff] %v8988_v0  ;;  %v9036_v3 = vpop.xlane.xlu0 %2917  ;;  %v9038_v51 = vmax.f32 %v1823_v57, 0.0  ;;  %v9040_v19 = vmax.f32 %v1834_v62, 0.0  ;;  %v3086_v43 = vadd.f32 1e-10, %v8468_v14  ;;  %v9045_v16 = vmul.f32 %v9007_v26, %v9007_v26 }
 0x208   : > { %12453 = vst [vmem:[#allocation269_spill] sm:$0xff] %v8997_v42  ;;  %12454 = vst [vmem:[#allocation270_spill] sm:$0xff] %v9005_v60  ;;  %v9047_v0 = vmax.f32 %v1826_v18, 0.0  ;;  %v12463_v53 = vld [vmem:[#allocation160_spill] sm:$0xff]  ;;  %v9051_v20 = vpop.f32.mrb[87].mxu0  ;;  %v9053_v60 = vpop.f32.mrb[84].mxu1  ;;  %6094 = vrsqrt.f32 %v3184_v63  ;;  %2989 = vadd.xlane.f32.xlu0 %v8678_v15 }
 0x209   : > { %12455 = vst [vmem:[#allocation271_spill] sm:$0xff] %v9007_v26  ;;  %12457 = vst [vmem:[#allocation156_spill] sm:$0xff] %v9025_v59  ;;  %v2218_v6 = vadd.f32 %v8167_v2, %v12463_v53  ;;  %v9055_v57 = vmax.f32 %v2215_v17, 0.0  ;;  %v9057_v62 = vmax.f32 %v2207_v44, 0.0  ;;  %v9061_v40 = vpop.f32.mrb[85].mxu1  ;;  %6096 = vrsqrt.f32 %v3181_v22  ;;  %v12467_v18 = vld [vmem:[#allocation182_spill] sm:$0xff] }
 0x20a   : > { %12458 = vst [vmem:[#allocation272_spill] sm:$0xff] %v9029_v4  ;;  %12459 = vst [vmem:[#allocation273_spill] sm:$0xff] %v9038_v51  ;;  %v12466_v4 = vld [vmem:[#allocation163_spill] sm:$0xff]  ;;  %v1847_v53 = vadd.f32 %v8167_v2, %v8434_v33  ;;  %v1839_v63 = vadd.f32 %v8167_v2, %v12467_v18  ;;  %v12468_v17 = vld [vmem:[#allocation185_spill] sm:$0xff]  ;;  %v9071_v26 = vpop.f32.mrb[86].mxu1  ;;  %6098 = vrsqrt.f32 %v3182_v47  ;;  %v9080_v15 = vmul.f32 %v9038_v51, %v9038_v51 }
 0x20b   : > { %12460 = vst [vmem:[#allocation274_spill] sm:$0xff] %v9040_v19  ;;  %12461 = vst [vmem:[#allocation275_spill] sm:$0xff] %v9045_v16  ;;  %v2210_v14 = vadd.f32 %v8167_v2, %v12466_v4  ;;  %v1850_v44 = vadd.f32 %v8167_v2, %v12468_v17  ;;  %v3092_v4 = vadd.f32 1e-10, %v8515_v48  ;;  %v9074_v16 = vpop.xlane.xlu1 %2739  ;;  %v9076_v22 = vpop.xlane.xlu0 %2737  ;;  %v9084_v33 = vmul.f32 %v9040_v19, %v9040_v19  ;;  %v12486_v59 = vld [vmem:[#allocation4_spill] sm:$0xff] }
 0x20c   : > { %12462 = vst [vmem:[#allocation276_spill] sm:$0xff] %v9047_v0  ;;  %12464 = vst [vmem:[#allocation160_spill] sm:$0xff] %v9055_v57  ;;  %6100 = vrsqrt.f32 %v3086_v43  ;;  %v3091_v25 = vadd.f32 1e-10, %v8517_v36  ;;  %v9089_v47 = vmul.f32 %v9047_v0, %v9047_v0  ;;  %v9091_v48 = vmax.f32 %v2218_v6, 0.0  ;;  %v9093_v18 = vpop.f32.mrb[87].mxu1  ;;  %2811 = vadd.xlane.f32.xlu1 %v8783_v7  ;;  %2809 = vadd.xlane.f32.xlu0 %v8746_v41 }
 0x20d   : > { %12465 = vst [vmem:[#allocation277_spill] sm:$0xff] %v9057_v62  ;;  %12469 = vst [vmem:[#allocation163_spill] sm:$0xff] %v9080_v15  ;;  %v9097_v17 = vmul.f32 %v9055_v57, %v9055_v57  ;;  %v9101_v51 = vmul.f32 %v9057_v62, %v9057_v62  ;;  %v9103_v19 = vmax.f32 %v2210_v14, 0.0  ;;  %v12476_v43 = vld [vmem:[#allocation189_spill] sm:$0xff]  ;;  %v6087_v15 = vpop.eup %6086  ;;  %v9109_v6 = vmax.f32 %v1847_v53, 0.0  ;;  %v12482_v53 = vld [vmem:[#allocation196_spill] sm:$0xff] }
 0x20e   : > { %12470 = vst [vmem:[#allocation182_spill] sm:$0xff] %v9084_v33  ;;  %12471 = vst [vmem:[#allocation185_spill] sm:$0xff] %v9089_v47  ;;  %v1842_v36 = vadd.f32 %v8167_v2, %v12476_v43  ;;  %v9111_v0 = vmax.f32 %v1839_v63, 0.0  ;;  %v9113_v57 = vmax.f32 %v1850_v44, 0.0  ;;  %v12480_v47 = vld [vmem:[#allocation190_spill] sm:$0xff]  ;;  %6102 = vrsqrt.f32 %v3092_v4  ;;  %v12481_v7 = vld [vmem:[#allocation193_spill] sm:$0xff] }
 0x20f   : > { %12472 = vst [vmem:[#allocation278_spill] sm:$0xff] %v9091_v48  ;;  %12473 = vst [vmem:[#allocation279_spill] sm:$0xff] %v9097_v17  ;;  %v2231_v62 = vadd.f32 %v8167_v2, %v12480_v47  ;;  %v3188_v14 = vadd.f32 1e-10, %v8546_v29  ;;  %v9118_v17 = vpop.xlane.xlu1 %2931  ;;  %v9120_v43 = vpop.xlane.xlu0 %2929  ;;  %v2223_v41 = vadd.f32 %v8167_v2, %v12481_v7  ;;  %v2234_v63 = vadd.f32 %v8167_v2, %v12482_v53  ;;  %v12483_v44 = vld [vmem:[#allocation204_spill] sm:$0xff] }
 0x210   : > { %12474 = vst [vmem:[#allocation280_spill] sm:$0xff] %v9101_v51  ;;  %12475 = vst [vmem:[#allocation281_spill] sm:$0xff] %v9103_v19  ;;  %v6089_v51 = vpop.eup %6088  ;;  %6104 = vrsqrt.f32 %v3091_v25  ;;  %v3187_v34 = vadd.f32 1e-10, %v12483_v44  ;;  %v9129_v47 = vmul.f32 %v9091_v48, %v9091_v48  ;;  %v12485_v4 = vld [vmem:[#allocation200_spill] sm:$0xff]  ;;  %v9134_v55 = vmul.f32 %v6087_v15, %v12486_v59  ;;  %v12490_v44 = vld [vmem:[#allocation3_spill] sm:$0xff]  ;;  %3003 = vadd.xlane.f32.xlu1 %v8791_v8 }
 0x211   : > { %12477 = vst [vmem:[#allocation189_spill] sm:$0xff] %v9109_v6  ;;  %12478 = vst [vmem:[#allocation282_spill] sm:$0xff] %v9111_v0  ;;  %v6091_v33 = vpop.eup %6090  ;;  %v2226_v29 = vadd.f32 %v8167_v2, %v12485_v4  ;;  %v3090_v7 = vadd.f32 1e-10, %v8582_v58  ;;  %v9139_v53 = vmul.f32 %v9103_v19, %v9103_v19  ;;  %v9141_v25 = vmax.f32 %v1842_v36, 0.0  ;;  %3001 = vadd.xlane.f32.xlu0 %v8750_v32  ;;  %v12498_v19 = vld [vmem:[#allocation6_spill] sm:$0xff] }
 0x212   : > { %12479 = vst [vmem:[#allocation283_spill] sm:$0xff] %v9113_v57  ;;  %12484 = vst [vmem:[#allocation190_spill] sm:$0xff] %v9129_v47  ;;  %v6093_v42 = vpop.eup %6092  ;;  %v9144_v13 = vmul.f32 %v6089_v51, %v12490_v44  ;;  %v9150_v4 = vmul.f32 %v9109_v6, %v9109_v6  ;;  %v9154_v58 = vmul.f32 %v9111_v0, %v9111_v0  ;;  %v9156_v59 = vmax.f32 %v2231_v62, 0.0  ;;  %v12500_v62 = vld [vmem:[#allocation5_spill] sm:$0xff] }
 0x213   : > { %12487 = vst [vmem:[#allocation193_spill] sm:$0xff] %v9134_v55  ;;  %12488 = vst [vmem:[#allocation196_spill] sm:$0xff] %v9139_v53  ;;  %v6095_v15 = vpop.eup %6094  ;;  %6106 = vrsqrt.f32 %v3188_v14  ;;  %v9158_v36 = vpop.xlane.xlu1 %2735  ;;  %v9164_v8 = vmul.f32 %v9113_v57, %v9113_v57  ;;  %v9166_v32 = vmax.f32 %v2223_v41, 0.0  ;;  %v9168_v44 = vmax.f32 %v2234_v63, 0.0  ;;  %v12503_v57 = vld [vmem:[#allocation55_spill] sm:$0xff]  ;;  %v12505_v63 = vld [vmem:[#allocation210_spill] sm:$0xff] }
 0x214   : > { %12489 = vst [vmem:[#allocation204_spill] sm:$0xff] %v9141_v25  ;;  %12491 = vst [vmem:[#allocation200_spill] sm:$0xff] %v9144_v13  ;;  %v9160_v51 = vpop.xlane.xlu0 %2733  ;;  %v6097_v6 = vpop.eup %6096  ;;  %v9171_v0 = vmul.f32 %v6091_v33, %v12498_v19  ;;  %v9174_v48 = vmul.f32 %v6093_v42, %v12500_v62  ;;  %6108 = vrsqrt.f32 %v3187_v34  ;;  %v9176_v14 = vmax.f32 %v2226_v29, 0.0  ;;  %v12506_v62 = vld [vmem:[#allocation8_spill] sm:$0xff]  ;;  %v12508_v29 = vld [vmem:[#allocation215_spill] sm:$0xff]  ;;  %2807 = vadd.xlane.f32.xlu1 %v8787_v1 }
 0x215   : > { %12492 = vst [vmem:[#allocation4_spill] sm:$0xff] %v9150_v4  ;;  %12493 = vst [vmem:[#allocation3_spill] sm:$0xff] %v9154_v58  ;;  %v9178_v55 = vpop.f32.mrb[88].mxu0  ;;  %v6099_v58 = vpop.eup %6098  ;;  %6110 = vrsqrt.f32 %v3090_v7  ;;  %v3089_v13 = vadd.f32 1e-10, %v12503_v57  ;;  %v9183_v41 = vmul.f32 %v9141_v25, %v9141_v25  ;;  %v1863_v19 = vadd.f32 %v8167_v2, %v12505_v63  ;;  %v12509_v7 = vld [vmem:[#allocation92_spill] sm:$0xff] }
 0x216   : > { %12494 = vst [vmem:[#allocation284_spill] sm:$0xff] %v9156_v59  ;;  %12495 = vst [vmem:[#allocation285_spill] sm:$0xff] %v9164_v8  ;;  %v9187_v33 = vpop.f32.mrb[89].mxu0  ;;  %v6101_v42 = vpop.eup %6100  ;;  %v9190_v34 = vmul.f32 %v6095_v15, %v12506_v62  ;;  %2805 = vadd.xlane.f32.xlu0 %v12509_v7  ;;  %v9197_v57 = vmul.f32 %v9156_v59, %v9156_v59  ;;  %v12511_v25 = vld [vmem:[#allocation214_spill] sm:$0xff]  ;;  %v9210_v1 = vmul.f32 %v9166_v32, %v9166_v32 }
 0x217   : > { %12496 = vst [vmem:[#allocation286_spill] sm:$0xff] %v9166_v32  ;;  %12497 = vst [vmem:[#allocation287_spill] sm:$0xff] %v9168_v44  ;;  %v9201_v63 = vpop.f32.mrb[90].mxu0  ;;  %v9204_v8 = vpop.xlane.xlu1 %2927  ;;  %v9214_v62 = vmul.f32 %v9168_v44, %v9168_v44  ;;  %v9227_v47 = vmul.f32 %v9176_v14, %v9176_v14  ;;  %v12524_v44 = vld [vmem:[#allocation9_spill] sm:$0xff]  ;;  %6112 = vrsqrt.f32 %v3089_v13 }
 0x218   : > { %12499 = vst [vmem:[#allocation6_spill] sm:$0xff] %v9171_v0  ;;  %12501 = vst [vmem:[#allocation5_spill] sm:$0xff] %v9174_v48  ;;  %v3186_v48 = vadd.f32 1e-10, %v12508_v29  ;;  %v12513_v0 = vld [vmem:[#allocation216_spill] sm:$0xff]  ;;  %v9206_v15 = vpop.xlane.xlu0 %2925  ;;  %v12516_v29 = vld [vmem:[#allocation61_spill] sm:$0xff]  ;;  %2999 = vadd.xlane.f32.xlu1 %v8797_v24 }
 0x219   : > { %12502 = vst [vmem:[#allocation288_spill] sm:$0xff] %v9176_v14  ;;  %12504 = vst [vmem:[#allocation55_spill] sm:$0xff] %v9183_v41  ;;  %v1855_v41 = vadd.f32 %v8167_v2, %v12511_v25  ;;  %v3185_v4 = vadd.f32 1e-10, %v12513_v0  ;;  %v1866_v7 = vadd.f32 %v8167_v2, %v12516_v29  ;;  %v12517_v25 = vld [vmem:[#allocation7_spill] sm:$0xff]  ;;  %v9229_v32 = vpop.f32.mrb[91].mxu0 }
 0x21a   : > { %12507 = vst [vmem:[#allocation210_spill] sm:$0xff] %v9190_v34  ;;  %12510 = vst [vmem:[#allocation8_spill] sm:$0xff] %v9197_v57  ;;  %v9219_v59 = vmul.f32 %v6097_v6, %v12517_v25  ;;  %v12519_v34 = vld [vmem:[#allocation10_spill] sm:$0xff]  ;;  %v12521_v57 = vld [vmem:[#allocation225_spill] sm:$0xff]  ;;  %v9235_v6 = vmax.f32 %v1863_v19, 0.0  ;;  %6114 = vrsqrt.f32 %v3186_v48  ;;  %2997 = vadd.xlane.f32.xlu0 %v8769_v5 }
 0x21b   : > { %12512 = vst [vmem:[#allocation215_spill] sm:$0xff] %v9201_v63  ;;  %12514 = vst [vmem:[#allocation92_spill] sm:$0xff] %v9210_v1  ;;  %v9222_v0 = vmul.f32 %v6099_v58, %v12519_v34  ;;  %v3096_v53 = vadd.f32 1e-10, %v12521_v57  ;;  %v6103_v1 = vpop.eup %6102  ;;  %v12526_v2 = vld [vmem:[#allocation226_spill] sm:$0xff]  ;;  %v9239_v58 = vmax.f32 %v1855_v41, 0.0  ;;  %6116 = vrsqrt.f32 %v3185_v4 }
 0x21c   : > { %12515 = vst [vmem:[#allocation214_spill] sm:$0xff] %v9214_v62  ;;  %12518 = vst [vmem:[#allocation216_spill] sm:$0xff] %v9219_v59  ;;  %v9232_v62 = vmul.f32 %v6101_v42, %v12524_v44  ;;  %v3095_v29 = vadd.f32 1e-10, %v12526_v2  ;;  %v6105_v25 = vpop.eup %6104  ;;  %v9244_v34 = vld [vmem:[%s11756_s4] ss:$0 sm:$0xff]  ;;  %v9251_v2 = vpop.xlane.xlu1 %2747  ;;  %2819 = vadd.xlane.f32.xlu1 %v8843_v46 }
 0x21d   : > { %12520 = vst [vmem:[#allocation61_spill] sm:$0xff] %v9222_v0  ;;  %12522 = vst [vmem:[#allocation7_spill] sm:$0xff] %v9227_v47  ;;  %v12529_v44 = vld [vmem:[#allocation219_spill] sm:$0xff]  ;;  %v12530_v42 = vld [vmem:[#allocation220_spill] sm:$0xff]  ;;  %v9253_v24 = vpop.xlane.xlu0 %2745  ;;  %v9255_v5 = vmax.f32 %v1866_v7, 0.0  ;;  %6118 = vrsqrt.f32 %v3096_v53 }
 0x21e   : > { %12523 = vst [vmem:[#allocation10_spill] sm:$0xff] %v9229_v32  ;;  %12525 = vst [vmem:[#allocation225_spill] sm:$0xff] %v9232_v62  ;;  %v1858_v13 = vadd.f32 %v9244_v34, %v12529_v44  ;;  %v2247_v19 = vadd.f32 %v9244_v34, %v12530_v42  ;;  %v12531_v57 = vld [vmem:[#allocation89_spill] sm:$0xff]  ;;  %v12535_v59 = vld [vmem:[#allocation12_spill] sm:$0xff]  ;;  %v9265_v42 = vpop.f32.mrb[88].mxu1  ;;  %6120 = vrsqrt.f32 %v3095_v29  ;;  %2817 = vadd.xlane.f32.xlu0 %v8809_v10 }
 0x21f   : > { %12527 = vst [vmem:[#allocation9_spill] sm:$0xff] %v9235_v6  ;;  %12528 = vst [vmem:[#allocation226_spill] sm:$0xff] %v9239_v58  ;;  %v3192_v48 = vadd.f32 1e-10, %v12531_v57  ;;  %v12534_v41 = vld [vmem:[#allocation221_spill] sm:$0xff]  ;;  %v9260_v0 = vmul.f32 %v6103_v1, %v12535_v59  ;;  %v12538_v62 = vld [vmem:[#allocation224_spill] sm:$0xff]  ;;  %v6107_v57 = vpop.eup %6106  ;;  %v9279_v1 = vmul.f32 %v9235_v6, %v9235_v6  ;;  %v9298_v6 = vmul.f32 %v9255_v5, %v9255_v5 }
 0x220   : > { %12532 = vst [vmem:[#allocation219_spill] sm:$0xff] %v9253_v24  ;;  %12533 = vst [vmem:[#allocation220_spill] sm:$0xff] %v9255_v5  ;;  %v2239_v14 = vadd.f32 %v9244_v34, %v12534_v41  ;;  %v12537_v44 = vld [vmem:[#allocation229_spill] sm:$0xff]  ;;  %v2250_v4 = vadd.f32 %v9244_v34, %v12538_v62  ;;  %v12539_v32 = vld [vmem:[#allocation11_spill] sm:$0xff]  ;;  %v3094_v7 = vadd.f32 1e-10, %v8777_v9  ;;  %v6109_v53 = vpop.eup %6108  ;;  %3011 = vadd.xlane.f32.xlu1 %v8853_v37 }
 0x221   : > { %12536 = vst [vmem:[#allocation89_spill] sm:$0xff] %v9260_v0  ;;  %v3191_v47 = vadd.f32 1e-10, %v12537_v44  ;;  %v9268_v63 = vmul.f32 %v6105_v25, %v12539_v32  ;;  %v12541_v24 = vld [vmem:[#allocation78_spill] sm:$0xff]  ;;  %v9273_v59 = vpop.f32.mrb[89].mxu1  ;;  %12543 = vst [vmem:[#allocation229_spill] sm:$0xff] %v9279_v1  ;;  %v9283_v32 = vmul.f32 %v9239_v58, %v9239_v58  ;;  %v6111_v25 = vpop.eup %6110  ;;  %6122 = vrsqrt.f32 %v3192_v48 }
 0x222   : > { %v2242_v41 = vadd.f32 %v9244_v34, %v12541_v24  ;;  %12542 = vst [vmem:[#allocation12_spill] sm:$0xff] %v9273_v59  ;;  %v9285_v62 = vmax.f32 %v1858_v13, 0.0  ;;  %v9287_v9 = vmax.f32 %v2247_v19, 0.0  ;;  %v9289_v29 = vpop.f32.mrb[90].mxu1  ;;  %v12548_v24 = vld [vmem:[#allocation96_spill] sm:$0xff]  ;;  %v9292_v44 = vpop.xlane.xlu1 %2939  ;;  %12550 = vst [vmem:[#allocation290_spill] sm:$0xff] %v9298_v6 }
 0x223   : > { %12540 = vst [vmem:[#allocation221_spill] sm:$0xff] %v9268_v63  ;;  %12544 = vst [vmem:[#allocation224_spill] sm:$0xff] %v9283_v32  ;;  %v3093_v46 = vadd.f32 1e-10, %v12548_v24  ;;  %v9294_v10 = vpop.xlane.xlu0 %2937  ;;  %v9300_v58 = vmax.f32 %v2239_v14, 0.0  ;;  %v12552_v13 = vld [vmem:[#allocation14_spill] sm:$0xff]  ;;  %6124 = vrsqrt.f32 %v3191_v47 }
 0x224   : > { %12545 = vst [vmem:[#allocation11_spill] sm:$0xff] %v9285_v62  ;;  %12546 = vst [vmem:[#allocation78_spill] sm:$0xff] %v9287_v9  ;;  %v9303_v32 = vmul.f32 %v6107_v57, %v12552_v13  ;;  %v12554_v19 = vld [vmem:[#allocation246_spill] sm:$0xff]  ;;  %v9306_v0 = vmax.f32 %v2250_v4, 0.0  ;;  %v9308_v48 = vpop.f32.mrb[91].mxu1  ;;  %v12556_v24 = vld [vmem:[#allocation13_spill] sm:$0xff]  ;;  %6126 = vrsqrt.f32 %v3094_v7  ;;  %v9324_v4 = vmul.f32 %v9285_v62, %v9285_v62  ;;  %2815 = vadd.xlane.f32.xlu1 %v8879_v54 }
 0x225   : > { %12547 = vst [vmem:[#allocation289_spill] sm:$0xff] %v9289_v29  ;;  %12549 = vst [vmem:[#allocation96_spill] sm:$0xff] %v9294_v10  ;;  %v3190_v63 = vadd.f32 1e-10, %v12554_v19  ;;  %v9311_v1 = vmul.f32 %v6109_v53, %v12556_v24  ;;  %v12558_v10 = vld [vmem:[#allocation247_spill] sm:$0xff]  ;;  %v9314_v5 = vmax.f32 %v2242_v41, 0.0  ;;  %v9328_v7 = vmul.f32 %v9287_v9, %v9287_v9  ;;  %v6113_v53 = vpop.eup %6112 }
 0x226   : > { %12551 = vst [vmem:[#allocation291_spill] sm:$0xff] %v9300_v58  ;;  %12553 = vst [vmem:[#allocation14_spill] sm:$0xff] %v9303_v32  ;;  %v3189_v29 = vadd.f32 1e-10, %v12558_v10  ;;  %v12561_v59 = vld [vmem:[#allocation16_spill] sm:$0xff]  ;;  %v12563_v47 = vld [vmem:[#allocation241_spill] sm:$0xff]  ;;  %6128 = vrsqrt.f32 %v3093_v46  ;;  %v9330_v41 = vpop.xlane.xlu1 %2743  ;;  %v6115_v24 = vpop.eup %6114  ;;  %v9345_v46 = vmul.f32 %v9306_v0, %v9306_v0 }
 0x227   : > { %12555 = vst [vmem:[#allocation246_spill] sm:$0xff] %v9306_v0  ;;  %12557 = vst [vmem:[#allocation13_spill] sm:$0xff] %v9311_v1  ;;  %v9318_v57 = vmul.f32 %v6111_v25, %v12561_v59  ;;  %3009 = vadd.xlane.f32.xlu0 %v12563_v47  ;;  %v9332_v10 = vpop.xlane.xlu0 %2741  ;;  %v9336_v59 = vmul.f32 %v9300_v58, %v9300_v58  ;;  %v12567_v37 = vld [vmem:[#allocation239_spill] sm:$0xff]  ;;  %v12568_v13 = vld [vmem:[#allocation242_spill] sm:$0xff]  ;;  %6130 = vrsqrt.f32 %v3190_v63  ;;  %v3100_v47 = vadd.f32 1e-10, %v8891_v11  ;;  %v6117_v9 = vpop.eup %6116 }
 0x228   : > { %12559 = vst [vmem:[#allocation247_spill] sm:$0xff] %v9314_v5  ;;  %12564 = vst [vmem:[#allocation241_spill] sm:$0xff] %v9324_v4  ;;  %v1879_v25 = vadd.f32 %v9244_v34, %v12567_v37  ;;  %v1871_v19 = vadd.f32 %v9244_v34, %v12568_v13  ;;  %v12570_v6 = vld [vmem:[#allocation107_spill] sm:$0xff]  ;;  %v9349_v58 = vpop.f32.mrb[92].mxu0  ;;  %6132 = vrsqrt.f32 %v3189_v29  ;;  %v3099_v37 = vadd.f32 1e-10, %v8893_v39  ;;  %v6119_v0 = vpop.eup %6118 }
 0x229   : > { %12562 = vst [vmem:[#allocation16_spill] sm:$0xff] %v9318_v57  ;;  %12565 = vst [vmem:[#allocation292_spill] sm:$0xff] %v9328_v7  ;;  %v1882_v62 = vadd.f32 %v9244_v34, %v12570_v6  ;;  %v9354_v13 = vmul.f32 %v9314_v5, %v9314_v5  ;;  %v1874_v11 = vadd.f32 %v9244_v34, %v8861_v30  ;;  %v9358_v63 = vpop.f32.mrb[93].mxu0  ;;  %v9361_v1 = vld [vmem:[%s6690_s25 + $0xf8] sm:$0xff]   ;;  %v12573_v32 = vld [vmem:[#allocation15_spill] sm:$0xff]  ;;  %v6121_v57 = vpop.eup %6120  ;;  %6134 = vrsqrt.f32 %v3100_v47 }
 0x22a   : > { %12566 = vst [vmem:[#allocation293_spill] sm:$0xff] %v9336_v59  ;;  %12569 = vst [vmem:[#allocation239_spill] sm:$0xff] %v9345_v46  ;;  %v9365_v14 = vmul.f32 %v6113_v53, %v12573_v32  ;;  %v12575_v39 = vld [vmem:[#allocation240_spill] sm:$0xff]  ;;  %v12576_v29 = vld [vmem:[#allocation114_spill] sm:$0xff]  ;;  %v3196_v6 = vadd.f32 1e-10, %v8939_v35  ;;  %v9379_v32 = vpop.xlane.xlu1 %2935  ;;  %6136 = vrsqrt.f32 %v3099_v37 }
 0x22b   : > { %12571 = vst [vmem:[#allocation242_spill] sm:$0xff] %v9354_v13  ;;  %12572 = vst [vmem:[#allocation107_spill] sm:$0xff] %v9361_v1  ;;  %2813 = vadd.xlane.f32.xlu0 %v12575_v39  ;;  %v2263_v5 = vadd.f32 %v9244_v34, %v12576_v29  ;;  %v12577_v59 = vld [vmem:[#allocation249_spill] sm:$0xff]  ;;  %v9373_v13 = vpop.f32.mrb[94].mxu0  ;;  %v12579_v4 = vld [vmem:[#allocation18_spill] sm:$0xff]  ;;  %v9381_v53 = vpop.xlane.xlu0 %2933  ;;  %v9383_v54 = vmax.f32 %v1879_v25, 0.0 }
 0x22c   : > { %12574 = vst [vmem:[#allocation15_spill] sm:$0xff] %v9365_v14  ;;  %v2255_v30 = vadd.f32 %v9244_v34, %v12577_v59  ;;  %12578 = vst [vmem:[#allocation240_spill] sm:$0xff] %v9373_v13  ;;  %v9376_v7 = vmul.f32 %v6115_v24, %v12579_v4  ;;  %v9385_v39 = vmax.f32 %v1871_v19, 0.0  ;;  %v9387_v29 = vmax.f32 %v1882_v62, 0.0  ;;  %v12585_v59 = vld [vmem:[#allocation252_spill] sm:$0xff]  ;;  %v9393_v24 = vpop.f32.mrb[95].mxu0  ;;  %v6123_v35 = vpop.eup %6122 }
 0x22d   : > { %12581 = vst [vmem:[#allocation249_spill] sm:$0xff] %v9381_v53  ;;  %12582 = vst [vmem:[#allocation18_spill] sm:$0xff] %v9383_v54  ;;  %v2266_v14 = vadd.f32 %v9244_v34, %v12585_v59  ;;  %v2258_v4 = vadd.f32 %v9244_v34, %v8915_v52  ;;  %v3195_v25 = vadd.f32 1e-10, %v8941_v50  ;;  %v9399_v19 = vmax.f32 %v1874_v11, 0.0  ;;  %v6125_v47 = vpop.eup %6124  ;;  %v12590_v62 = vld [vmem:[#allocation20_spill] sm:$0xff] }
 0x22e   : > { %12580 = vst [vmem:[#allocation114_spill] sm:$0xff] %v9376_v7  ;;  %12583 = vst [vmem:[#allocation294_spill] sm:$0xff] %v9385_v39  ;;  %v12587_v7 = vld [vmem:[#allocation17_spill] sm:$0xff]  ;;  %v9402_v1 = vmul.f32 %v6119_v0, %v12590_v62  ;;  %v12591_v13 = vld [vmem:[#allocation19_spill] sm:$0xff]  ;;  %6138 = vrsqrt.f32 %v3196_v6  ;;  %v3098_v50 = vadd.f32 1e-10, %v8991_v21  ;;  %v9414_v37 = vpop.xlane.xlu1 %2755  ;;  %v9420_v0 = vmul.f32 %v9383_v54, %v9383_v54 }
 0x22f   : > { %12584 = vst [vmem:[#allocation295_spill] sm:$0xff] %v9387_v29  ;;  %12586 = vst [vmem:[#allocation252_spill] sm:$0xff] %v9393_v24  ;;  %v9396_v46 = vmul.f32 %v6117_v9, %v12587_v7  ;;  %v9405_v59 = vmul.f32 %v6121_v57, %v12591_v13  ;;  %v12592_v53 = vld [vmem:[#allocation250_spill] sm:$0xff]  ;;  %v12593_v52 = vld [vmem:[#allocation244_spill] sm:$0xff]  ;;  %v9409_v24 = vmax.f32 %v2263_v5, 0.0  ;;  %v9411_v9 = vmax.f32 %v2255_v30, 0.0  ;;  %v6127_v7 = vpop.eup %6126  ;;  %v9416_v11 = vpop.xlane.xlu0 %2753 }
 0x230   : > { %12589 = vst [vmem:[#allocation296_spill] sm:$0xff] %v9399_v19  ;;  %3007 = vadd.xlane.f32.xlu1 %v12592_v53  ;;  %3005 = vadd.xlane.f32.xlu0 %v12593_v52  ;;  %v9424_v57 = vmul.f32 %v9385_v39, %v9385_v39  ;;  %v12596_v5 = vld [vmem:[#allocation22_spill] sm:$0xff]  ;;  %v9431_v6 = vmul.f32 %v9387_v29, %v9387_v29  ;;  %v9433_v21 = vmax.f32 %v2266_v14, 0.0  ;;  %v9435_v30 = vmax.f32 %v2258_v4, 0.0  ;;  %v9437_v53 = vpop.f32.mrb[92].mxu1  ;;  %v6129_v62 = vpop.eup %6128  ;;  %v12600_v52 = vld [vmem:[#allocation21_spill] sm:$0xff] }
 0x231   : > { %12588 = vst [vmem:[#allocation17_spill] sm:$0xff] %v9396_v46  ;;  %12594 = vst [vmem:[#allocation20_spill] sm:$0xff] %v9409_v24  ;;  %v9427_v13 = vmul.f32 %v6123_v35, %v12596_v5  ;;  %v9440_v54 = vmul.f32 %v6125_v47, %v12600_v52  ;;  %6140 = vrsqrt.f32 %v3195_v25  ;;  %v3097_v39 = vadd.f32 1e-10, %v8993_v45  ;;  %v9447_v5 = vpop.f32.mrb[93].mxu1  ;;  %v6131_v29 = vpop.eup %6130  ;;  %v12602_v14 = vld [vmem:[#allocation24_spill] sm:$0xff] }
 0x232   : > { %12595 = vst [vmem:[#allocation19_spill] sm:$0xff] %v9411_v9  ;;  %12598 = vst [vmem:[#allocation244_spill] sm:$0xff] %v9433_v21  ;;  %v9445_v35 = vmul.f32 %v9399_v19, %v9399_v19  ;;  %v3194_v4 = vadd.f32 1e-10, %v9034_v23  ;;  %v9457_v25 = vmul.f32 %v9409_v24, %v9409_v24  ;;  %v9461_v45 = vmul.f32 %v9411_v9, %v9411_v9  ;;  %v9463_v47 = vpop.f32.mrb[94].mxu1  ;;  %v6133_v52 = vpop.eup %6132  ;;  %v12606_v46 = vld [vmem:[#allocation26_spill] sm:$0xff] }
 0x233   : > { %12597 = vst [vmem:[#allocation250_spill] sm:$0xff] %v9427_v13  ;;  %12599 = vst [vmem:[#allocation22_spill] sm:$0xff] %v9435_v30  ;;  %v9450_v13 = vmul.f32 %v6127_v7, %v12602_v14  ;;  %6142 = vrsqrt.f32 %v3098_v50  ;;  %v3193_v7 = vadd.f32 1e-10, %v9036_v3  ;;  %v9466_v14 = vpop.xlane.xlu1 %2947  ;;  %v9468_v23 = vpop.xlane.xlu0 %2945  ;;  %v3104_v19 = vadd.f32 1e-10, %v9074_v16 }
 0x234   : > { %12601 = vst [vmem:[#allocation21_spill] sm:$0xff] %v9440_v54  ;;  %2827 = vadd.xlane.f32.xlu1 %v8945_v12  ;;  %2825 = vadd.xlane.f32.xlu0 %v8905_v38  ;;  %12604 = vst [vmem:[#allocation297_spill] sm:$0xff] %v9461_v45  ;;  %v1895_v38 = vadd.f32 %v9244_v34, %v9011_v28  ;;  %v1887_v12 = vadd.f32 %v9244_v34, %v9018_v31  ;;  %v9485_v24 = vpop.f32.mrb[95].mxu1  ;;  %v12605_v54 = vld [vmem:[#allocation23_spill] sm:$0xff]  ;;  %6144 = vrsqrt.f32 %v3097_v39  ;;  %v12608_v45 = vld [vmem:[#allocation25_spill] sm:$0xff] }
 0x235   : > { %12603 = vst [vmem:[#allocation24_spill] sm:$0xff] %v9450_v13  ;;  %v9477_v9 = vmul.f32 %v9433_v21, %v9433_v21  ;;  %v9481_v50 = vmul.f32 %v9435_v30, %v9435_v30  ;;  %v1898_v3 = vadd.f32 %v9244_v34, %v9031_v27  ;;  %v9488_v28 = vmul.f32 %v6129_v62, %v12605_v54  ;;  %v6135_v21 = vpop.eup %6134 }
 0x236   : > { %v9491_v31 = vmul.f32 %v6131_v29, %v12606_v46  ;;  %v3103_v16 = vadd.f32 1e-10, %v9076_v22  ;;  %v9495_v13 = vmul.f32 %v6133_v52, %v12608_v45  ;;  %6146 = vrsqrt.f32 %v3194_v4  ;;  %v6137_v54 = vpop.eup %6136  ;;  %v12613_v52 = vld [vmem:[#allocation28_spill] sm:$0xff] }
 0x237   : > { %v3200_v30 = vadd.f32 1e-10, %v9118_v17  ;;  %v1890_v27 = vadd.f32 %v9244_v34, %v9051_v20  ;;  %6148 = vrsqrt.f32 %v3193_v7  ;;  %v3199_v46 = vadd.f32 1e-10, %v9120_v43  ;;  %v9503_v39 = vpop.xlane.xlu1 %2751  ;;  %v9505_v22 = vpop.xlane.xlu0 %2749  ;;  %v12614_v7 = vld [vmem:[#allocation27_spill] sm:$0xff] }
 0x238   : > { %12607 = vst [vmem:[#allocation23_spill] sm:$0xff] %v9491_v31  ;;  %12609 = vst [vmem:[#allocation26_spill] sm:$0xff] %v9495_v13  ;;  %3019 = vadd.xlane.f32.xlu1 %v8953_v49  ;;  %3017 = vadd.xlane.f32.xlu0 %v8909_v56  ;;  %v9507_v29 = vmax.f32 %v1895_v38, 0.0  ;;  %v9509_v62 = vmax.f32 %v1887_v12, 0.0  ;;  %6150 = vrsqrt.f32 %v3104_v19  ;;  %v9511_v17 = vmax.f32 %v1898_v3, 0.0  ;;  %v6139_v20 = vpop.eup %6138  ;;  %v12640_v31 = vld [vmem:[#allocation31_spill] sm:$0xff] }
 0x239   : > { %v2279_v56 = vadd.f32 %v9244_v34, %v9053_v60  ;;  %v2271_v49 = vadd.f32 %v9244_v34, %v9061_v40  ;;  %6152 = vrsqrt.f32 %v3103_v16  ;;  %v3102_v43 = vadd.f32 1e-10, %v9158_v36  ;;  %v12615_v60 = vld [vmem:[#allocation128_spill] sm:$0xff]  ;;  %v12616_v40 = vld [vmem:[#allocation125_spill] sm:$0xff]  ;;  %v12619_v16 = vld [vmem:[#allocation30_spill] sm:$0xff] }
 0x23a   : > { %12610 = vst [vmem:[#allocation25_spill] sm:$0xff] %v9507_v29  ;;  %12611 = vst [vmem:[#allocation298_spill] sm:$0xff] %v9509_v62  ;;  %v2282_v4 = vadd.f32 %v9244_v34, %v9071_v26  ;;  %v2274_v45 = vadd.f32 %v9244_v34, %v9093_v18  ;;  %v9523_v19 = vmul.f32 %v6135_v21, %v12613_v52  ;;  %6154 = vrsqrt.f32 %v3200_v30 }
 0x23b   : > { %12612 = vst [vmem:[#allocation299_spill] sm:$0xff] %v9511_v17  ;;  %v9526_v38 = vmul.f32 %v6137_v54, %v12614_v7  ;;  %v9530_v12 = vmax.f32 %v1890_v27, 0.0  ;;  %v6141_v36 = vpop.eup %6140  ;;  %6156 = vrsqrt.f32 %v3199_v46  ;;  %v3101_v26 = vadd.f32 1e-10, %v9160_v51  ;;  %v9533_v3 = vpop.xlane.xlu1 %2943 }
 0x23c   : > { %2823 = vadd.xlane.f32.xlu1 %v12615_v60  ;;  %2821 = vadd.xlane.f32.xlu0 %v12616_v40  ;;  %v9535_v18 = vpop.xlane.xlu0 %2941  ;;  %v9539_v21 = vmul.f32 %v9507_v29, %v9507_v29  ;;  %v9543_v30 = vmul.f32 %v9509_v62, %v9509_v62  ;;  %v9546_v54 = vmul.f32 %v6139_v20, %v12619_v16  ;;  %v3198_v27 = vadd.f32 1e-10, %v9204_v8  ;;  %v12625_v62 = vld [vmem:[#allocation29_spill] sm:$0xff]  ;;  %v12627_v8 = vld [vmem:[#allocation260_spill] sm:$0xff] }
 0x23d   : > { %12617 = vst [vmem:[#allocation28_spill] sm:$0xff] %v9530_v12  ;;  %v9551_v51 = vmul.f32 %v9511_v17, %v9511_v17  ;;  %v9553_v46 = vmax.f32 %v2279_v56, 0.0  ;;  %v6143_v52 = vpop.eup %6142  ;;  %6158 = vrsqrt.f32 %v3102_v43  ;;  %v9555_v7 = vmax.f32 %v2271_v49, 0.0 }
 0x23e   : > { %12618 = vst [vmem:[#allocation27_spill] sm:$0xff] %v9543_v30  ;;  %12620 = vst [vmem:[#allocation128_spill] sm:$0xff] %v9546_v54  ;;  %v9557_v60 = vmax.f32 %v2282_v4, 0.0  ;;  %v9559_v40 = vmax.f32 %v2274_v45, 0.0  ;;  %v9562_v29 = vmul.f32 %v6141_v36, %v12625_v62  ;;  %v3197_v20 = vadd.f32 1e-10, %v9206_v15  ;;  %v6145_v43 = vpop.eup %6144 }
 0x23f   : > { %12621 = vst [vmem:[#allocation125_spill] sm:$0xff] %v9553_v46  ;;  %12622 = vst [vmem:[#allocation30_spill] sm:$0xff] %v9555_v7  ;;  %v9569_v56 = vmul.f32 %v9530_v12, %v9530_v12  ;;  %v1911_v49 = vadd.f32 %v9244_v34, %v9178_v55  ;;  %6160 = vrsqrt.f32 %v3101_v26  ;;  %v3108_v4 = vadd.f32 1e-10, %v9251_v2  ;;  %v9574_v45 = vpop.xlane.xlu1 %2763  ;;  %v12629_v15 = vld [vmem:[#allocation215_spill] sm:$0xff]  ;;  %v12650_v30 = vld [vmem:[#allocation36_spill] sm:$0xff] }
 0x240   : > { %12623 = vst [vmem:[#allocation300_spill] sm:$0xff] %v9557_v60  ;;  %12624 = vst [vmem:[#allocation301_spill] sm:$0xff] %v9559_v40  ;;  %3015 = vadd.xlane.f32.xlu1 %v8960_v61  ;;  %3013 = vadd.xlane.f32.xlu0 %v12627_v8  ;;  %v9576_v62 = vpop.xlane.xlu0 %2761  ;;  %v1903_v61 = vadd.f32 %v9244_v34, %v9187_v33  ;;  %v1914_v36 = vadd.f32 %v9244_v34, %v12629_v15  ;;  %v6147_v16 = vpop.eup %6146  ;;  %v12630_v8 = vld [vmem:[#allocation32_spill] sm:$0xff]  ;;  %6162 = vrsqrt.f32 %v3198_v27  ;;  %v12632_v55 = vld [vmem:[#allocation219_spill] sm:$0xff] }
 0x241   : > { %12626 = vst [vmem:[#allocation29_spill] sm:$0xff] %v9562_v29  ;;  %12628 = vst [vmem:[#allocation260_spill] sm:$0xff] %v9569_v56  ;;  %v9583_v12 = vmul.f32 %v6143_v52, %v12630_v8  ;;  %v3107_v17 = vadd.f32 1e-10, %v12632_v55  ;;  %v9588_v2 = vmul.f32 %v9553_v46, %v9553_v46  ;;  %v6149_v26 = vpop.eup %6148  ;;  %v9592_v29 = vmul.f32 %v9555_v7, %v9555_v7  ;;  %v12636_v27 = vld [vmem:[#allocation10_spill] sm:$0xff]  ;;  %v12637_v46 = vld [vmem:[#allocation265_spill] sm:$0xff] }
 0x242   : > { %v9596_v33 = vmul.f32 %v9557_v60, %v9557_v60  ;;  %v9600_v52 = vmul.f32 %v9559_v40, %v9559_v40  ;;  %v1906_v15 = vadd.f32 %v9244_v34, %v12636_v27  ;;  %v6151_v8 = vpop.eup %6150  ;;  %6164 = vrsqrt.f32 %v3197_v20  ;;  %v12638_v54 = vld [vmem:[#allocation263_spill] sm:$0xff] }
 0x243   : > { %12631 = vst [vmem:[#allocation215_spill] sm:$0xff] %v9583_v12  ;;  %12633 = vst [vmem:[#allocation32_spill] sm:$0xff] %v9588_v2  ;;  %v3204_v55 = vadd.f32 1e-10, %v9292_v44  ;;  %v9607_v7 = vmax.f32 %v1911_v49, 0.0  ;;  %v2295_v60 = vadd.f32 %v9244_v34, %v9265_v42  ;;  %v6153_v13 = vpop.eup %6152  ;;  %v9612_v40 = vmul.f32 %v6145_v43, %v12640_v31  ;;  %v9614_v12 = vpop.xlane.xlu1 %2955 }
 0x244   : > { %12634 = vst [vmem:[#allocation219_spill] sm:$0xff] %v9592_v29  ;;  %12635 = vst [vmem:[#allocation302_spill] sm:$0xff] %v9600_v52  ;;  %2835 = vadd.xlane.f32.xlu1 %v12637_v46  ;;  %2833 = vadd.xlane.f32.xlu0 %v12638_v54  ;;  %6166 = vrsqrt.f32 %v3108_v4  ;;  %v9616_v27 = vpop.xlane.xlu0 %2953  ;;  %v9618_v20 = vmax.f32 %v1903_v61, 0.0  ;;  %v9620_v44 = vmax.f32 %v1914_v36, 0.0  ;;  %v6155_v46 = vpop.eup %6154  ;;  %v12644_v54 = vld [vmem:[#allocation34_spill] sm:$0xff]  ;;  %v12646_v29 = vld [vmem:[#allocation12_spill] sm:$0xff]  ;;  %v9633_v61 = vmul.f32 %v6151_v8, %v12650_v30 }
 0x245   : > { %12639 = vst [vmem:[#allocation10_spill] sm:$0xff] %v9607_v7  ;;  %12641 = vst [vmem:[#allocation265_spill] sm:$0xff] %v9612_v40  ;;  %v9623_v49 = vmul.f32 %v6147_v16, %v12644_v54  ;;  %6168 = vrsqrt.f32 %v3107_v17  ;;  %v2287_v42 = vadd.f32 %v9244_v34, %v12646_v29  ;;  %v12647_v52 = vld [vmem:[#allocation289_spill] sm:$0xff]  ;;  %v6157_v43 = vpop.eup %6156  ;;  %v12652_v36 = vld [vmem:[#allocation96_spill] sm:$0xff]  ;;  %v9636_v2 = vmax.f32 %v1906_v15, 0.0 }
 0x246   : > { %12642 = vst [vmem:[#allocation263_spill] sm:$0xff] %v9618_v20  ;;  %12643 = vst [vmem:[#allocation31_spill] sm:$0xff] %v9620_v44  ;;  %v2298_v31 = vadd.f32 %v9244_v34, %v12647_v52  ;;  %v12648_v4 = vld [vmem:[#allocation33_spill] sm:$0xff]  ;;  %v3203_v56 = vadd.f32 1e-10, %v12652_v36  ;;  %v12654_v16 = vld [vmem:[#allocation35_spill] sm:$0xff]  ;;  %6170 = vrsqrt.f32 %v3204_v55  ;;  %v9645_v52 = vmul.f32 %v9607_v7, %v9607_v7 }
 0x247   : > { %12645 = vst [vmem:[#allocation34_spill] sm:$0xff] %v9623_v49  ;;  %v9630_v40 = vmul.f32 %v6149_v26, %v12648_v4  ;;  %12651 = vst [vmem:[#allocation289_spill] sm:$0xff] %v9633_v61  ;;  %v9639_v54 = vmul.f32 %v6153_v13, %v12654_v16  ;;  %v12656_v17 = vld [vmem:[#allocation156_spill] sm:$0xff]  ;;  %v12657_v29 = vld [vmem:[#allocation269_spill] sm:$0xff]  ;;  %v9647_v26 = vmax.f32 %v2295_v60, 0.0  ;;  %v6159_v30 = vpop.eup %6158  ;;  %v9650_v4 = vpop.xlane.xlu1 %2759  ;;  %v9656_v13 = vmul.f32 %v9618_v20, %v9618_v20 }
 0x248   : > { %12653 = vst [vmem:[#allocation33_spill] sm:$0xff] %v9636_v2  ;;  %3027 = vadd.xlane.f32.xlu1 %v12656_v17  ;;  %3025 = vadd.xlane.f32.xlu0 %v12657_v29  ;;  %v3106_v8 = vadd.f32 1e-10, %v9330_v41  ;;  %v9652_v15 = vpop.xlane.xlu0 %2757  ;;  %v9660_v55 = vmul.f32 %v9620_v44, %v9620_v44  ;;  %v2290_v36 = vadd.f32 %v9244_v34, %v9308_v48  ;;  %v12659_v60 = vld [vmem:[#allocation38_spill] sm:$0xff]  ;;  %v12661_v17 = vld [vmem:[#allocation37_spill] sm:$0xff]  ;;  %v9670_v29 = vmax.f32 %v2287_v42, 0.0 }
 0x249   : > { %12649 = vst [vmem:[#allocation12_spill] sm:$0xff] %v9630_v40  ;;  %12655 = vst [vmem:[#allocation36_spill] sm:$0xff] %v9639_v54  ;;  %v9665_v16 = vmul.f32 %v6155_v46, %v12659_v60  ;;  %v9668_v41 = vmul.f32 %v6157_v43, %v12661_v17  ;;  %v9672_v7 = vmax.f32 %v2298_v31, 0.0  ;;  %v6161_v40 = vpop.eup %6160  ;;  %6172 = vrsqrt.f32 %v3203_v56  ;;  %v12665_v60 = vld [vmem:[#allocation40_spill] sm:$0xff]  ;;  %v12667_v43 = vld [vmem:[#allocation266_spill] sm:$0xff] }
 0x24a   : > { %12658 = vst [vmem:[#allocation96_spill] sm:$0xff] %v9647_v26  ;;  %12663 = vst [vmem:[#allocation269_spill] sm:$0xff] %v9670_v29  ;;  %v3105_v20 = vadd.f32 1e-10, %v9332_v10  ;;  %v9677_v44 = vmul.f32 %v9636_v2, %v9636_v2  ;;  %v1927_v48 = vadd.f32 %v9244_v34, %v9349_v58  ;;  %v6163_v46 = vpop.eup %6162  ;;  %v3202_v42 = vadd.f32 1e-10, %v9379_v32 }
 0x24b   : > { %12660 = vst [vmem:[#allocation35_spill] sm:$0xff] %v9665_v16  ;;  %12662 = vst [vmem:[#allocation156_spill] sm:$0xff] %v9668_v41  ;;  %v9682_v16 = vmul.f32 %v6159_v30, %v12665_v60  ;;  %v12668_v31 = vld [vmem:[#allocation264_spill] sm:$0xff]  ;;  %v9689_v10 = vmul.f32 %v9647_v26, %v9647_v26  ;;  %v1919_v56 = vadd.f32 %v9244_v34, %v9358_v63  ;;  %6174 = vrsqrt.f32 %v3106_v8  ;;  %v12669_v17 = vld [vmem:[#allocation249_spill] sm:$0xff]  ;;  %v9694_v2 = vpop.xlane.xlu1 %2951 }
 0x24c   : > { %12664 = vst [vmem:[#allocation38_spill] sm:$0xff] %v9672_v7  ;;  %2831 = vadd.xlane.f32.xlu1 %v12667_v43  ;;  %2829 = vadd.xlane.f32.xlu0 %v12668_v31  ;;  %v3201_v58 = vadd.f32 1e-10, %v12669_v17  ;;  %v9696_v30 = vpop.xlane.xlu0 %2949  ;;  %v9698_v60 = vmax.f32 %v2290_v36, 0.0  ;;  %v12671_v32 = vld [vmem:[#allocation240_spill] sm:$0xff]  ;;  %v6165_v31 = vpop.eup %6164  ;;  %v12672_v41 = vld [vmem:[#allocation39_spill] sm:$0xff]  ;;  %v9708_v63 = vmul.f32 %v9670_v29, %v9670_v29  ;;  %v9712_v8 = vmul.f32 %v9672_v7, %v9672_v7 }
 0x24d   : > { %12666 = vst [vmem:[#allocation37_spill] sm:$0xff] %v9682_v16  ;;  %v1930_v43 = vadd.f32 %v9244_v34, %v12671_v32  ;;  %v9703_v49 = vmul.f32 %v6161_v40, %v12672_v41  ;;  %v3112_v26 = vadd.f32 1e-10, %v9414_v37  ;;  %v12674_v36 = vld [vmem:[#allocation42_spill] sm:$0xff]  ;;  %6176 = vrsqrt.f32 %v3105_v20  ;;  %v12677_v41 = vld [vmem:[#allocation272_spill] sm:$0xff] }
 0x24e   : > { %12670 = vst [vmem:[#allocation40_spill] sm:$0xff] %v9698_v60  ;;  %v6167_v17 = vpop.eup %6166  ;;  %v9715_v16 = vmul.f32 %v6163_v46, %v12674_v36  ;;  %v3111_v32 = vadd.f32 1e-10, %v9416_v11  ;;  %v9718_v54 = vmax.f32 %v1927_v48, 0.0  ;;  %6178 = vrsqrt.f32 %v3202_v42  ;;  %v12678_v29 = vld [vmem:[#allocation270_spill] sm:$0xff]  ;;  %v12680_v7 = vld [vmem:[#allocation252_spill] sm:$0xff] }
 0x24f   : > { %12673 = vst [vmem:[#allocation266_spill] sm:$0xff] %v9703_v49  ;;  %v6169_v40 = vpop.eup %6168  ;;  %v3208_v37 = vadd.f32 1e-10, %v9466_v14  ;;  %v9723_v49 = vmax.f32 %v1919_v56, 0.0  ;;  %v1922_v61 = vadd.f32 %v9244_v34, %v12680_v7  ;;  %6180 = vrsqrt.f32 %v3201_v58  ;;  %v9728_v46 = vpop.xlane.xlu1 %2771  ;;  %v12684_v36 = vld [vmem:[#allocation44_spill] sm:$0xff]  ;;  %v12686_v7 = vld [vmem:[#allocation43_spill] sm:$0xff] }
 0x250   : > { %12675 = vst [vmem:[#allocation264_spill] sm:$0xff] %v9715_v16  ;;  %12676 = vst [vmem:[#allocation249_spill] sm:$0xff] %v9718_v54  ;;  %3023 = vadd.xlane.f32.xlu1 %v12677_v41  ;;  %3021 = vadd.xlane.f32.xlu0 %v12678_v29  ;;  %v3207_v20 = vadd.f32 1e-10, %v9468_v23  ;;  %v9730_v11 = vpop.xlane.xlu0 %2769  ;;  %v9734_v48 = vmul.f32 %v9698_v60, %v9698_v60  ;;  %v9736_v14 = vmax.f32 %v1930_v43, 0.0  ;;  %v6171_v42 = vpop.eup %6170  ;;  %v12682_v29 = vld [vmem:[#allocation41_spill] sm:$0xff]  ;;  %6182 = vrsqrt.f32 %v3112_v26 }
 0x251   : > { %12679 = vst [vmem:[#allocation240_spill] sm:$0xff] %v9723_v49  ;;  %v9739_v56 = vmul.f32 %v6165_v31, %v12682_v29  ;;  %v9742_v41 = vmul.f32 %v6167_v17, %v12684_v36  ;;  %v3110_v23 = vadd.f32 1e-10, %v9503_v39  ;;  %v9746_v58 = vmul.f32 %v6169_v40, %v12686_v7  ;;  %v12688_v60 = vld [vmem:[#allocation182_spill] sm:$0xff]  ;;  %v12689_v31 = vld [vmem:[#allocation275_spill] sm:$0xff] }
 0x252   : > { %12681 = vst [vmem:[#allocation39_spill] sm:$0xff] %v9736_v14  ;;  %6184 = vrsqrt.f32 %v3111_v32  ;;  %v3109_v16 = vadd.f32 1e-10, %v9505_v22  ;;  %v2311_v43 = vadd.f32 %v9244_v34, %v9437_v53  ;;  %v9755_v17 = vmul.f32 %v9718_v54, %v9718_v54  ;;  %v12693_v22 = vld [vmem:[#allocation46_spill] sm:$0xff] }
 0x253   : > { %12683 = vst [vmem:[#allocation42_spill] sm:$0xff] %v9739_v56  ;;  %12685 = vst [vmem:[#allocation272_spill] sm:$0xff] %v9742_v41  ;;  %6186 = vrsqrt.f32 %v3208_v37  ;;  %v9759_v39 = vmul.f32 %v9723_v49, %v9723_v49  ;;  %v9761_v26 = vmax.f32 %v1922_v61, 0.0  ;;  %v6173_v32 = vpop.eup %6172  ;;  %v9764_v40 = vmul.f32 %v6171_v42, %v12693_v22  ;;  %v2964_v53 = vpop.xlane.xlu1 %2963  ;;  %v12696_v49 = vld [vmem:[#allocation45_spill] sm:$0xff] }
 0x254   : > { %12687 = vst [vmem:[#allocation270_spill] sm:$0xff] %v9746_v58  ;;  %2843 = vadd.xlane.f32.xlu1 %v12688_v60  ;;  %2841 = vadd.xlane.f32.xlu0 %v12689_v31  ;;  %12690 = vst [vmem:[#allocation252_spill] sm:$0xff] %v9755_v17  ;;  %6188 = vrsqrt.f32 %v3207_v20  ;;  %v2962_v37 = vpop.xlane.xlu0 %2961  ;;  %v9768_v60 = vmul.f32 %v9736_v14, %v9736_v14  ;;  %v2303_v29 = vadd.f32 %v9244_v34, %v9447_v5  ;;  %v12698_v5 = vld [vmem:[#allocation190_spill] sm:$0xff] }
 0x255   : > { %12691 = vst [vmem:[#allocation41_spill] sm:$0xff] %v9759_v39  ;;  %12692 = vst [vmem:[#allocation44_spill] sm:$0xff] %v9761_v26  ;;  %6190 = vrsqrt.f32 %v3110_v23  ;;  %v3206_v36 = vadd.f32 1e-10, %v9533_v3  ;;  %v3216_v7 = vadd.f32 1e-10, %v2964_v53  ;;  %v6175_v31 = vpop.eup %6174  ;;  %v2314_v20 = vadd.f32 %v9244_v34, %v9463_v47 }
 0x256   : > { %12694 = vst [vmem:[#allocation43_spill] sm:$0xff] %v9764_v40  ;;  %v3215_v61 = vadd.f32 1e-10, %v2962_v37  ;;  %6192 = vrsqrt.f32 %v3109_v16  ;;  %v3205_v42 = vadd.f32 1e-10, %v9535_v18  ;;  %v9774_v22 = vmax.f32 %v2311_v43, 0.0 }
 0x257   : > { %v9779_v54 = vmul.f32 %v6173_v32, %v12696_v49  ;;  %v3116_v14 = vadd.f32 1e-10, %v9574_v45  ;;  %6194 = vrsqrt.f32 %v3216_v7  ;;  %v12699_v3 = vld [vmem:[#allocation279_spill] sm:$0xff]  ;;  %v9786_v16 = vmul.f32 %v9761_v26, %v9761_v26  ;;  %v6177_v18 = vpop.eup %6176  ;;  %v9789_v43 = vpop.xlane.xlu1 %2767  ;;  %v12702_v53 = vld [vmem:[#allocation48_spill] sm:$0xff]  ;;  %v12731_v39 = vld [vmem:[#allocation50_spill] sm:$0xff] }
 0x258   : > { %12695 = vst [vmem:[#allocation182_spill] sm:$0xff] %v9774_v22  ;;  %3035 = vadd.xlane.f32.xlu1 %v12698_v5  ;;  %3033 = vadd.xlane.f32.xlu0 %v12699_v3  ;;  %v3115_v23 = vadd.f32 1e-10, %v9576_v62  ;;  %6196 = vrsqrt.f32 %v3215_v61  ;;  %v9791_v47 = vpop.xlane.xlu0 %2765  ;;  %v9793_v49 = vmax.f32 %v2303_v29, 0.0  ;;  %v2306_v45 = vadd.f32 %v9244_v34, %v9485_v24  ;;  %v6179_v32 = vpop.eup %6178  ;;  %v12704_v7 = vld [vmem:[#allocation119_spill] sm:$0xff]  ;;  %v12706_v3 = vld [vmem:[#allocation66_spill] sm:$0xff] }
 0x259   : > { %12697 = vst [vmem:[#allocation275_spill] sm:$0xff] %v9779_v54  ;;  %12700 = vst [vmem:[#allocation46_spill] sm:$0xff] %v9786_v16  ;;  %v9798_v37 = vmul.f32 %v6175_v31, %v12702_v53  ;;  %6198 = vrsqrt.f32 %v3206_v36  ;;  %v12705_v5 = vunpack.c.h.bf16 %v12704_v7  ;;  %v12707_v26 = vunpack.c.h.bf16 %v12706_v3  ;;  %v12709_v54 = vld [vmem:[#allocation158_spill] sm:$0xff]  ;;  %v6181_v29 = vpop.eup %6180  ;;  %v12713_v31 = vld [vmem:[#allocation47_spill] sm:$0xff] }
 0x25a   : > { %12701 = vst [vmem:[#allocation45_spill] sm:$0xff] %v9793_v49  ;;  %v12710_v40 = vunpack.c.l.bf16 %v12709_v54  ;;  %6200 = vrsqrt.f32 %v3205_v42  ;;  %v3212_v58 = vadd.f32 1e-10, %v9614_v12  ;;  %v9811_v34 = vmul.f32 %v9774_v22, %v9774_v22  ;;  %v6183_v36 = vpop.eup %6182  ;;  %v12716_v7 = vld [vmem:[#allocation163_spill] sm:$0xff] }
 0x25b   : > { %12703 = vst [vmem:[#allocation190_spill] sm:$0xff] %v9798_v37  ;;  %v4509_v62 = vsub.f32 %v12707_v26, %v12705_v5  ;;  %v12708_v61 = vmov %v12705_v5  ;;  %v9813_v24 = vmax.f32 %v2314_v20, 0.0  ;;  %v9816_v53 = vmul.f32 %v6177_v18, %v12713_v31  ;;  %v12715_v26 = vld [vmem:[#allocation185_spill] sm:$0xff]  ;;  %v2960_v5 = vpop.xlane.xlu1 %2959  ;;  %v12725_v37 = vld [vmem:[#allocation159_spill] sm:$0xff] }
 0x25c   : > { %v4637_v56 = vsub.f32 %v12710_v40, %v12708_v61  ;;  %12711 = vst [vmem:[#allocation279_spill] sm:$0xff] %v9811_v34  ;;  %6202 = vrsqrt.f32 %v3116_v14  ;;  %2839 = vadd.xlane.f32.xlu1 %v12715_v26  ;;  %2837 = vadd.xlane.f32.xlu0 %v12716_v7  ;;  %v6185_v42 = vpop.eup %6184  ;;  %v3211_v12 = vadd.f32 1e-10, %v9616_v27  ;;  %v2958_v3 = vpop.xlane.xlu0 %2957  ;;  %v9823_v20 = vmul.f32 %v9793_v49, %v9793_v49  ;;  %v12720_v7 = vld [vmem:[#allocation120_spill] sm:$0xff] }
 0x25d   : > { %12712 = vst [vmem:[#allocation48_spill] sm:$0xff] %v9813_v24  ;;  %12714 = vst [vmem:[#allocation119_spill] sm:$0xff] %v9816_v53  ;;  %v4573_v54 = vand.u32 2147483647, %v4509_v62  ;;  %6204 = vrsqrt.f32 %v3115_v23  ;;  %v9825_v61 = vmax.f32 %v2306_v45, 0.0  ;;  %v6187_v18 = vpop.eup %6186  ;;  %v12721_v62 = vunpack.c.h.bf16 %v12720_v7 }
 0x25e   : > { %v4701_v40 = vand.u32 2147483647, %v4637_v56  ;;  %12717 = vst [vmem:[#allocation66_spill] sm:$0xff] %v9823_v20  ;;  %v3214_v14 = vadd.f32 1e-10, %v2960_v5  ;;  %v12722_v56 = vld [vmem:[#allocation67_spill] sm:$0xff]  ;;  %v6189_v53 = vpop.eup %6188  ;;  %6206 = vrsqrt.f32 %v3212_v58  ;;  %v12726_v41 = vunpack.c.h.bf16 %v12725_v37 }
 0x25f   : > { %12718 = vst [vmem:[#allocation158_spill] sm:$0xff] %v9825_v61  ;;  %v3213_v31 = vadd.f32 1e-10, %v2958_v3  ;;  %v12723_v22 = vunpack.c.h.bf16 %v12722_v56  ;;  %v12724_v27 = vmov %v12721_v62  ;;  %v12727_v45 = vunpack.c.l.bf16 %v12720_v7  ;;  %v12733_v58 = vld [vmem:[#allocation196_spill] sm:$0xff]  ;;  %v9854_v7 = vpop.xlane.xlu1 %2779 }
 0x260   : > { %v9827_v26 = vadd.f32 %v4701_v40, %v4573_v54  ;;  %v4639_v49 = vsub.f32 %v12726_v41, %v12724_v27  ;;  %v12728_v20 = vunpack.c.l.bf16 %v12722_v56  ;;  %v12730_v40 = vunpack.c.l.bf16 %v12725_v37  ;;  %3031 = vadd.xlane.f32.xlu1 %v12733_v58  ;;  %v9856_v37 = vpop.xlane.xlu0 %2777 }
 0x261   : > { %v4511_v23 = vsub.f32 %v12723_v22, %v12721_v62  ;;  %v12729_v54 = vmov %v12727_v45  ;;  %v9846_v22 = vmul.f32 %v6179_v32, %v12731_v39  ;;  %6208 = vrsqrt.f32 %v3214_v14  ;;  %v12734_v62 = vld [vmem:[#allocation280_spill] sm:$0xff]  ;;  %v12736_v14 = vld [vmem:[#allocation49_spill] sm:$0xff] }
 0x262   : > { %12719 = vst [vmem:[#allocation47_spill] sm:$0xff] %v9827_v26  ;;  %v4510_v5 = vsub.f32 %v12728_v20, %v12727_v45  ;;  %v4638_v3 = vsub.f32 %v12730_v40, %v12729_v54  ;;  %v6191_v26 = vpop.eup %6190  ;;  %3029 = vadd.xlane.f32.xlu0 %v12734_v62  ;;  %v9852_v41 = vmul.f32 %v9813_v24, %v9813_v24  ;;  %6210 = vrsqrt.f32 %v3213_v31  ;;  %v12738_v40 = vld [vmem:[#allocation54_spill] sm:$0xff] }
 0x263   : > { %12732 = vst [vmem:[#allocation185_spill] sm:$0xff] %v9846_v22  ;;  %v4575_v56 = vand.u32 2147483647, %v4511_v23  ;;  %v6193_v20 = vpop.eup %6192  ;;  %v4703_v27 = vand.u32 2147483647, %v4639_v49  ;;  %v9859_v54 = vmul.f32 %v6181_v29, %v12736_v14  ;;  %v9862_v58 = vmul.f32 %v6183_v36, %v12738_v40  ;;  %v12741_v24 = vld [vmem:[#allocation134_spill] sm:$0xff] }
 0x264   : > { %12735 = vst [vmem:[#allocation163_spill] sm:$0xff] %v9852_v41  ;;  %v4574_v45 = vand.u32 2147483647, %v4510_v5  ;;  %v4702_v39 = vand.u32 2147483647, %v4638_v3  ;;  %v6195_v32 = vpop.eup %6194  ;;  %6212 = vrsqrt.f32 %v3211_v12  ;;  %v9866_v23 = vmul.f32 %v9825_v61, %v9825_v61  ;;  %v12746_v36 = vld [vmem:[#allocation53_spill] sm:$0xff] }
 0x265   : > { %12737 = vst [vmem:[#allocation120_spill] sm:$0xff] %v9859_v54  ;;  %12739 = vst [vmem:[#allocation67_spill] sm:$0xff] %v9862_v58  ;;  %v6197_v31 = vpop.eup %6196  ;;  %v3114_v62 = vadd.f32 1e-10, %v9650_v4  ;;  %v9870_v22 = vmul.f32 %v6195_v32, %v12741_v24  ;;  %v9872_v49 = vadd.f32 %v4703_v27, %v4575_v56  ;;  %v9878_v40 = vmul.f32 %v6185_v42, %v12746_v36  ;;  %v12748_v12 = vld [vmem:[#allocation64_spill] sm:$0xff]  ;;  %v12750_v61 = vld [vmem:[#allocation133_spill] sm:$0xff]  ;;  %v2972_v32 = vpop.xlane.xlu1 %2971 }
 0x266   : > { %12740 = vst [vmem:[#allocation159_spill] sm:$0xff] %v9866_v23  ;;  %v9874_v5 = vadd.f32 %v4702_v39, %v4574_v45  ;;  %v6199_v29 = vpop.eup %6198  ;;  %v9881_v54 = vmul.f32 %v6187_v18, %v12748_v12  ;;  %v9884_v58 = vmul.f32 %v6197_v31, %v12750_v61  ;;  %v12752_v4 = vld [vmem:[#allocation285_spill] sm:$0xff]  ;;  %v12753_v24 = vld [vmem:[#allocation4_spill] sm:$0xff]  ;;  %v3113_v27 = vadd.f32 1e-10, %v9652_v15  ;;  %v12754_v45 = vld [vmem:[#allocation6_spill] sm:$0xff]  ;;  %v2970_v42 = vpop.xlane.xlu0 %2969 }
 0x267   : > { %12742 = vst [vmem:[#allocation50_spill] sm:$0xff] %v9870_v22  ;;  %12743 = vst [vmem:[#allocation196_spill] sm:$0xff] %v9872_v49  ;;  %2851 = vadd.xlane.f32.xlu1 %v12752_v4  ;;  %2849 = vadd.xlane.f32.xlu0 %v12753_v24  ;;  %v6201_v56 = vpop.eup %6200  ;;  %v9891_v39 = vsub.f32 %v12754_v45, %v9870_v22  ;;  %v12755_v36 = vld [vmem:[#allocation126_spill] sm:$0xff]  ;;  %v12757_v18 = vld [vmem:[#allocation72_spill] sm:$0xff]  ;;  %v3220_v49 = vadd.f32 1e-10, %v2972_v32  ;;  %6214 = vrsqrt.f32 %v3114_v62 }
 0x268   : > { %12744 = vst [vmem:[#allocation280_spill] sm:$0xff] %v9874_v5  ;;  %12747 = vst [vmem:[#allocation49_spill] sm:$0xff] %v9878_v40  ;;  %v12756_v14 = vunpack.c.h.bf16 %v12755_v36  ;;  %v12758_v12 = vunpack.c.h.bf16 %v12757_v18  ;;  %v12760_v31 = vld [vmem:[#allocation164_spill] sm:$0xff]  ;;  %v6203_v24 = vpop.eup %6202  ;;  %v3219_v45 = vadd.f32 1e-10, %v2970_v42  ;;  %v12763_v22 = vunpack.c.l.bf16 %v12755_v36  ;;  %v12765_v41 = vld [vmem:[#allocation63_spill] sm:$0xff] }
 0x269   : > { %12749 = vst [vmem:[#allocation54_spill] sm:$0xff] %v9881_v54  ;;  %12751 = vst [vmem:[#allocation134_spill] sm:$0xff] %v9884_v58  ;;  %v12761_v4 = vunpack.c.h.bf16 %v12760_v31  ;;  %v12762_v5 = vld [vmem:[#allocation200_spill] sm:$0xff]  ;;  %v12764_v40 = vunpack.c.l.bf16 %v12757_v18  ;;  %v6205_v16 = vpop.eup %6204  ;;  %6216 = vrsqrt.f32 %v3220_v49  ;;  %v12769_v32 = vld [vmem:[#allocation214_spill] sm:$0xff]  ;;  %v9919_v62 = vpop.xlane.xlu1 %2775 }
 0x26a   : > { %v4513_v54 = vsub.f32 %v12758_v12, %v12756_v14  ;;  %v12759_v61 = vmov %v12756_v14  ;;  %v9903_v15 = vsub.f32 %v12762_v5, %v9884_v58  ;;  %v3120_v14 = vadd.f32 1e-10, %v9728_v46  ;;  %v12770_v42 = vld [vmem:[#allocation8_spill] sm:$0xff]  ;;  %v9921_v46 = vpop.xlane.xlu0 %2773  ;;  %v12773_v49 = vld [vmem:[#allocation70_spill] sm:$0xff]  ;;  %v12775_v18 = vld [vmem:[#allocation81_spill] sm:$0xff] }
 0x26b   : > { %v4641_v3 = vsub.f32 %v12761_v4, %v12759_v61  ;;  %v4512_v23 = vsub.f32 %v12764_v40, %v12763_v22  ;;  %v9911_v61 = vmul.f32 %v6189_v53, %v12765_v41  ;;  %v12767_v4 = vld [vmem:[#allocation71_spill] sm:$0xff]  ;;  %v3119_v5 = vadd.f32 1e-10, %v9730_v11  ;;  %3043 = vadd.xlane.f32.xlu1 %v12769_v32  ;;  %3041 = vadd.xlane.f32.xlu0 %v12770_v42  ;;  %v6207_v22 = vpop.eup %6206  ;;  %v12825_v58 = vld [vmem:[#allocation290_spill] sm:$0xff] }
 0x26c   : > { %v4577_v12 = vand.u32 2147483647, %v4513_v54  ;;  %v9914_v17 = vmul.f32 %v6191_v26, %v12767_v4  ;;  %6218 = vrsqrt.f32 %v3219_v45  ;;  %v12771_v41 = vunpack.c.l.bf16 %v12755_v36  ;;  %v6209_v11 = vpop.eup %6208  ;;  %v12777_v45 = vld [vmem:[#allocation80_spill] sm:$0xff] }
 0x26d   : > { %v4705_v34 = vand.u32 2147483647, %v4641_v3  ;;  %12766 = vst [vmem:[#allocation53_spill] sm:$0xff] %v9911_v61  ;;  %v4576_v53 = vand.u32 2147483647, %v4512_v23  ;;  %v12772_v26 = vunpack.c.l.bf16 %v12760_v31  ;;  %v9930_v40 = vmul.f32 %v6193_v20, %v12773_v49  ;;  %v6211_v42 = vpop.eup %6210  ;;  %v12779_v23 = vld [vmem:[#allocation148_spill] sm:$0xff] }
 0x26e   : > { %12768 = vst [vmem:[#allocation64_spill] sm:$0xff] %v9914_v17  ;;  %v9933_v4 = vmul.f32 %v6199_v29, %v12775_v18  ;;  %v9936_v32 = vmul.f32 %v6201_v56, %v12777_v45  ;;  %6220 = vrsqrt.f32 %v3113_v27  ;;  %v9940_v36 = vmul.f32 %v6209_v11, %v12779_v23  ;;  %v12783_v29 = vld [vmem:[#allocation147_spill] sm:$0xff]  ;;  %v2968_v11 = vpop.xlane.xlu1 %2967 }
 0x26f   : > { %v9923_v54 = vadd.f32 %v4705_v34, %v4577_v12  ;;  %v4640_v3 = vsub.f32 %v12772_v26, %v12771_v41  ;;  %12774 = vst [vmem:[#allocation133_spill] sm:$0xff] %v9930_v40  ;;  %v3210_v34 = vadd.f32 1e-10, %v9694_v2  ;;  %6222 = vrsqrt.f32 %v3120_v14  ;;  %v6213_v12 = vpop.eup %6212  ;;  %v12781_v41 = vld [vmem:[#allocation88_spill] sm:$0xff]  ;;  %v12785_v27 = vld [vmem:[#allocation55_spill] sm:$0xff]  ;;  %v12787_v14 = vld [vmem:[#allocation225_spill] sm:$0xff] }
 0x270   : > { %12776 = vst [vmem:[#allocation285_spill] sm:$0xff] %v9933_v4  ;;  %12778 = vst [vmem:[#allocation4_spill] sm:$0xff] %v9936_v32  ;;  %v9943_v26 = vmul.f32 %v6203_v24, %v12781_v41  ;;  %v9946_v20 = vadd.f32 1e-10, %v9696_v30  ;;  %6224 = vrsqrt.f32 %v3119_v5  ;;  %v9949_v56 = vmul.f32 %v6211_v42, %v12783_v29  ;;  %2847 = vadd.xlane.f32.xlu1 %v12785_v27  ;;  %v12786_v49 = vld [vmem:[#allocation3_spill] sm:$0xff]  ;;  %v2966_v24 = vpop.xlane.xlu0 %2965  ;;  %v12791_v5 = vld [vmem:[#allocation73_spill] sm:$0xff] }
 0x271   : > { %12780 = vst [vmem:[#allocation6_spill] sm:$0xff] %v9940_v36  ;;  %v4704_v31 = vand.u32 2147483647, %v4640_v3  ;;  %2845 = vadd.xlane.f32.xlu0 %v12786_v49  ;;  %v3118_v2 = vadd.f32 1e-10, %v9789_v43  ;;  %v9956_v3 = vsub.f32 %v12787_v14, %v9940_v36  ;;  %v12789_v30 = vld [vmem:[#allocation127_spill] sm:$0xff]  ;;  %v12792_v23 = vunpack.c.h.bf16 %v12791_v5 }
 0x272   : > { %12782 = vst [vmem:[#allocation126_spill] sm:$0xff] %v9943_v26  ;;  %12784 = vst [vmem:[#allocation72_spill] sm:$0xff] %v9949_v56  ;;  %v12790_v45 = vunpack.c.h.bf16 %v12789_v30  ;;  %v12793_v41 = vld [vmem:[#allocation5_spill] sm:$0xff]  ;;  %v3218_v27 = vadd.f32 1e-10, %v2968_v11  ;;  %v12795_v32 = vld [vmem:[#allocation167_spill] sm:$0xff]  ;;  %6226 = vrsqrt.f32 %v3210_v34  ;;  %v9987_v34 = vpop.xlane.xlu1 %2787 }
 0x273   : > { %v9958_v18 = vadd.f32 %v4704_v31, %v4576_v53  ;;  %v9966_v29 = vsub.f32 %v12793_v41, %v9949_v56  ;;  %v3217_v49 = vadd.f32 1e-10, %v2966_v24  ;;  %v12796_v14 = vunpack.c.h.bf16 %v12795_v32  ;;  %v12797_v61 = vld [vmem:[#allocation87_spill] sm:$0xff]  ;;  %v12803_v11 = vld [vmem:[#allocation98_spill] sm:$0xff] }
 0x274   : > { %v4515_v42 = vsub.f32 %v12792_v23, %v12790_v45  ;;  %v12794_v43 = vmov %v12790_v45  ;;  %v9973_v26 = vmul.f32 %v6205_v16, %v12797_v61  ;;  %v12799_v31 = vunpack.c.l.bf16 %v12789_v30  ;;  %v12801_v40 = vld [vmem:[#allocation99_spill] sm:$0xff]  ;;  %v6215_v61 = vpop.eup %6214 }
 0x275   : > { %12788 = vst [vmem:[#allocation164_spill] sm:$0xff] %v9958_v18  ;;  %v4643_v4 = vsub.f32 %v12796_v14, %v12794_v43  ;;  %v12800_v45 = vunpack.c.l.bf16 %v12791_v5  ;;  %v9980_v41 = vmul.f32 %v6207_v22, %v12801_v40  ;;  %v9983_v24 = vmul.f32 %v6213_v12, %v12803_v11  ;;  %v12805_v17 = vld [vmem:[#allocation7_spill] sm:$0xff]  ;;  %v12806_v43 = vld [vmem:[#allocation92_spill] sm:$0xff]  ;;  %v6217_v11 = vpop.eup %6216 }
 0x276   : > { %12798 = vst [vmem:[#allocation200_spill] sm:$0xff] %v9973_v26  ;;  %v4579_v53 = vand.u32 2147483647, %v4515_v42  ;;  %6228 = vrsqrt.f32 %v3218_v27  ;;  %3039 = vadd.xlane.f32.xlu1 %v12805_v17  ;;  %3037 = vadd.xlane.f32.xlu0 %v12806_v43  ;;  %v9989_v42 = vpop.xlane.xlu0 %2785  ;;  %v12807_v14 = vmov %v12799_v31  ;;  %v12808_v22 = vunpack.c.l.bf16 %v12795_v32  ;;  %v12809_v12 = vld [vmem:[#allocation132_spill] sm:$0xff]  ;;  %v12811_v27 = vld [vmem:[#allocation79_spill] sm:$0xff]  ;;  %v6219_v30 = vpop.eup %6218  ;;  %v12817_v26 = vld [vmem:[#allocation166_spill] sm:$0xff] }
 0x277   : > { %v4514_v23 = vsub.f32 %v12800_v45, %v12799_v31  ;;  %12802 = vst [vmem:[#allocation63_spill] sm:$0xff] %v9980_v41  ;;  %12804 = vst [vmem:[#allocation71_spill] sm:$0xff] %v9983_v24  ;;  %v4707_v16 = vand.u32 2147483647, %v4643_v4  ;;  %6230 = vrsqrt.f32 %v3217_v49  ;;  %v12810_v31 = vunpack.c.h.bf16 %v12809_v12  ;;  %v12815_v24 = vld [vmem:[#allocation170_spill] sm:$0xff] }
 0x278   : > { %v4642_v40 = vsub.f32 %v12808_v22, %v12807_v14  ;;  %v12812_v45 = vunpack.c.h.bf16 %v12811_v27  ;;  %6232 = vrsqrt.f32 %v3118_v2  ;;  %v3117_v4 = vadd.f32 1e-10, %v9791_v47  ;;  %v12821_v47 = vld [vmem:[#allocation106_spill] sm:$0xff] }
 0x279   : > { %v4578_v5 = vand.u32 2147483647, %v4514_v23  ;;  %v10000_v49 = vadd.f32 %v4707_v16, %v4579_v53  ;;  %v12814_v43 = vmov %v12810_v31  ;;  %v12816_v23 = vunpack.c.h.bf16 %v12815_v24  ;;  %v12823_v16 = vld [vmem:[#allocation165_spill] sm:$0xff] }
 0x27a   : > { %v4517_v17 = vsub.f32 %v12812_v45, %v12810_v31  ;;  %v10007_v32 = vmul.f32 %v6217_v11, %v12817_v26  ;;  %v4706_v14 = vand.u32 2147483647, %v4642_v40  ;;  %v12819_v56 = vunpack.c.l.bf16 %v12809_v12  ;;  %v6221_v45 = vpop.eup %6220  ;;  %2859 = vadd.xlane.f32.xlu1 %v12825_v58 }
 0x27b   : > { %12813 = vst [vmem:[#allocation214_spill] sm:$0xff] %v10000_v49  ;;  %v4645_v41 = vsub.f32 %v12816_v23, %v12814_v43  ;;  %v12820_v31 = vunpack.c.l.bf16 %v12811_v27  ;;  %v10014_v53 = vmul.f32 %v6215_v61, %v12821_v47  ;;  %v10017_v36 = vmul.f32 %v6219_v30, %v12823_v16  ;;  %v12826_v43 = vld [vmem:[#allocation229_spill] sm:$0xff]  ;;  %v6223_v23 = vpop.eup %6222  ;;  %v2978_v30 = vpop.xlane.xlu0 %2977  ;;  %v12837_v49 = vld [vmem:[#allocation82_spill] sm:$0xff] }
 0x27c   : > { %12818 = vst [vmem:[#allocation8_spill] sm:$0xff] %v10007_v32  ;;  %v4581_v22 = vand.u32 2147483647, %v4517_v17  ;;  %2857 = vadd.xlane.f32.xlu0 %v12826_v43  ;;  %v12827_v40 = vmov %v12819_v56  ;;  %v12828_v17 = vunpack.c.l.bf16 %v12815_v24  ;;  %v12829_v27 = vld [vmem:[#allocation89_spill] sm:$0xff]  ;;  %v10030_v47 = vadd.f32 %v4706_v14, %v4578_v5  ;;  %v6225_v16 = vpop.eup %6224 }
 0x27d   : > { %v4516_v2 = vsub.f32 %v12820_v31, %v12819_v56  ;;  %12822 = vst [vmem:[#allocation70_spill] sm:$0xff] %v10014_v53  ;;  %12824 = vst [vmem:[#allocation81_spill] sm:$0xff] %v10017_v36  ;;  %v4709_v26 = vand.u32 2147483647, %v4645_v41  ;;  %v3124_v56 = vadd.f32 1e-10, %v9854_v7  ;;  %v10028_v61 = vsub.f32 %v12829_v27, %v10007_v32  ;;  %v2980_v31 = vpop.xlane.xlu1 %2979 }
 0x27e   : > { %v4644_v11 = vsub.f32 %v12828_v17, %v12827_v40  ;;  %12830 = vst [vmem:[#allocation80_spill] sm:$0xff] %v10030_v47  ;;  %v12831_v41 = vld [vmem:[#allocation221_spill] sm:$0xff]  ;;  %v3224_v12 = vadd.f32 1e-10, %v2980_v31  ;;  %v3223_v24 = vadd.f32 1e-10, %v2978_v30  ;;  %6234 = vrsqrt.f32 %v3117_v4  ;;  %v10055_v30 = vpop.eup %6226 }
 0x27f   : > { %v4580_v58 = vand.u32 2147483647, %v4516_v2  ;;  %v10034_v43 = vsub.f32 %v12831_v41, %v10017_v36  ;;  %v10036_v40 = vadd.f32 %v4709_v26, %v4581_v22  ;;  %v12833_v17 = vld [vmem:[#allocation105_spill] sm:$0xff]  ;;  %v12835_v53 = vld [vmem:[#allocation135_spill] sm:$0xff]  ;;  %v12838_v5 = vunpack.c.h.bf16 %v12837_v49  ;;  %v12839_v2 = vld [vmem:[#allocation124_spill] sm:$0xff]  ;;  %12846 = vst [vmem:[#allocation55_spill] sm:$0xff] %v10055_v30 }
 0x280   : > { %v10039_v7 = vmul.f32 %v6221_v45, %v12833_v17  ;;  %v4708_v27 = vand.u32 2147483647, %v4644_v11  ;;  %v12836_v32 = vunpack.c.h.bf16 %v12835_v53  ;;  %v10046_v47 = vmul.f32 %v6223_v23, %v12839_v2  ;;  %v12841_v31 = vld [vmem:[#allocation239_spill] sm:$0xff]  ;;  %v12842_v22 = vld [vmem:[#allocation292_spill] sm:$0xff] }
 0x281   : > { %12832 = vst [vmem:[#allocation148_spill] sm:$0xff] %v10036_v40  ;;  %v3123_v41 = vadd.f32 1e-10, %v9856_v37  ;;  %6236 = vrsqrt.f32 %v3224_v12  ;;  %3051 = vadd.xlane.f32.xlu1 %v12841_v31  ;;  %3049 = vadd.xlane.f32.xlu0 %v12842_v22  ;;  %v12844_v26 = vld [vmem:[#allocation171_spill] sm:$0xff]  ;;  %v10057_v17 = vpop.xlane.xlu1 %2783  ;;  %v12848_v12 = vunpack.c.l.bf16 %v12835_v53  ;;  %v6229_v31 = vpop.eup %6228 }
 0x282   : > { %12834 = vst [vmem:[#allocation88_spill] sm:$0xff] %v10039_v7  ;;  %v4519_v14 = vsub.f32 %v12838_v5, %v12836_v32  ;;  %12840 = vst [vmem:[#allocation147_spill] sm:$0xff] %v10046_v47  ;;  %v12843_v45 = vmov %v12836_v32  ;;  %v12845_v4 = vunpack.c.h.bf16 %v12844_v26  ;;  %6238 = vrsqrt.f32 %v3223_v24  ;;  %v10059_v32 = vpop.xlane.xlu0 %2781  ;;  %v12850_v22 = vld [vmem:[#allocation123_spill] sm:$0xff]  ;;  %v6231_v36 = vpop.eup %6230  ;;  %v12856_v47 = vld [vmem:[#allocation138_spill] sm:$0xff] }
 0x283   : > { %v10061_v23 = vadd.f32 %v4708_v27, %v4580_v58  ;;  %v12849_v5 = vunpack.c.l.bf16 %v12837_v49  ;;  %v10068_v7 = vmul.f32 %v6225_v16, %v12850_v22  ;;  %6240 = vrsqrt.f32 %v3124_v56  ;;  %v12854_v58 = vld [vmem:[#allocation180_spill] sm:$0xff]  ;;  %v12858_v49 = vld [vmem:[#allocation85_spill] sm:$0xff]  ;;  %v12863_v53 = vld [vmem:[#allocation179_spill] sm:$0xff] }
 0x284   : > { %v4647_v11 = vsub.f32 %v12845_v4, %v12843_v45  ;;  %v4583_v37 = vand.u32 2147483647, %v4519_v14  ;;  %v12852_v24 = vmov %v12848_v12  ;;  %v12853_v4 = vunpack.c.l.bf16 %v12844_v26  ;;  %v12861_v22 = vld [vmem:[#allocation176_spill] sm:$0xff] }
 0x285   : > { %12847 = vst [vmem:[#allocation3_spill] sm:$0xff] %v10061_v23  ;;  %v4518_v2 = vsub.f32 %v12849_v5, %v12848_v12  ;;  %12851 = vst [vmem:[#allocation225_spill] sm:$0xff] %v10068_v7  ;;  %v10075_v27 = vmul.f32 %v6229_v31, %v12854_v58  ;;  %v12857_v23 = vunpack.c.h.bf16 %v12856_v47  ;;  %v12859_v12 = vunpack.c.h.bf16 %v12858_v49  ;;  %v6233_v7 = vpop.eup %6232  ;;  %v12866_v31 = vld [vmem:[#allocation224_spill] sm:$0xff]  ;;  %v2976_v40 = vpop.xlane.xlu1 %2975 }
 0x286   : > { %v4711_v45 = vand.u32 2147483647, %v4647_v11  ;;  %v4646_v30 = vsub.f32 %v12853_v4, %v12852_v24  ;;  %v12862_v56 = vunpack.c.h.bf16 %v12861_v22  ;;  %6242 = vrsqrt.f32 %v3123_v41  ;;  %v12865_v24 = vld [vmem:[#allocation241_spill] sm:$0xff]  ;;  %2853 = vadd.xlane.f32.xlu0 %v12866_v31 }
 0x287   : > { %12855 = vst [vmem:[#allocation127_spill] sm:$0xff] %v10075_v27  ;;  %v4582_v14 = vand.u32 2147483647, %v4518_v2  ;;  %v4521_v5 = vsub.f32 %v12859_v12, %v12857_v23  ;;  %v12860_v16 = vmov %v12857_v23  ;;  %v10086_v26 = vmul.f32 %v6231_v36, %v12863_v53  ;;  %2855 = vadd.xlane.f32.xlu1 %v12865_v24  ;;  %v12867_v23 = vld [vmem:[#allocation16_spill] sm:$0xff]  ;;  %v12868_v36 = vld [vmem:[#allocation15_spill] sm:$0xff] }
 0x288   : > { %v4649_v11 = vsub.f32 %v12862_v56, %v12860_v16  ;;  %v10090_v2 = vadd.f32 %v4711_v45, %v4583_v37  ;;  %v4710_v4 = vand.u32 2147483647, %v4646_v30  ;;  %v3122_v58 = vadd.f32 1e-10, %v9919_v62  ;;  %v2974_v16 = vpop.xlane.xlu0 %2973  ;;  %v12870_v62 = vld [vmem:[#allocation141_spill] sm:$0xff] }
 0x289   : > { %12864 = vst [vmem:[#allocation73_spill] sm:$0xff] %v10086_v26  ;;  %v10095_v12 = vsub.f32 %v12867_v23, %v10075_v27  ;;  %v4585_v56 = vand.u32 2147483647, %v4521_v5  ;;  %v10099_v53 = vsub.f32 %v12868_v36, %v10086_v26  ;;  %v3222_v24 = vadd.f32 1e-10, %v2976_v40 }
 0x28a   : > { %v4713_v41 = vand.u32 2147483647, %v4649_v11  ;;  %v3221_v18 = vadd.f32 1e-10, %v2974_v16  ;;  %v10101_v31 = vadd.f32 %v4710_v4, %v4582_v14  ;;  %v10105_v30 = vmul.f32 %v9891_v39, %v9891_v39  ;;  %v12876_v4 = vld [vmem:[#allocation242_spill] sm:$0xff]  ;;  %v12877_v39 = vld [vmem:[#allocation293_spill] sm:$0xff] }
 0x28b   : > { %v10108_v37 = vmul.f32 %v6233_v7, %v12870_v62  ;;  %v12873_v5 = vunpack.c.l.bf16 %v12856_v47  ;;  %v12874_v11 = vunpack.c.l.bf16 %v12858_v49  ;;  %v10118_v40 = vmul.f32 %v9903_v15, %v9903_v15  ;;  %3047 = vadd.xlane.f32.xlu1 %v12876_v4  ;;  %3045 = vadd.xlane.f32.xlu0 %v12877_v39  ;;  %v10127_v49 = vpop.xlane.xlu1 %2795  ;;  %v12880_v62 = vld [vmem:[#allocation139_spill] sm:$0xff]  ;;  %v12885_v39 = vld [vmem:[#allocation177_spill] sm:$0xff] }
 0x28c   : > { %12869 = vst [vmem:[#allocation5_spill] sm:$0xff] %v10101_v31  ;;  %v10110_v45 = vadd.f32 %v4713_v41, %v4585_v56  ;;  %v3121_v14 = vadd.f32 1e-10, %v9921_v46  ;;  %6244 = vrsqrt.f32 %v3222_v24  ;;  %v12879_v16 = vunpack.c.l.bf16 %v12861_v22  ;;  %v6235_v41 = vpop.eup %6234  ;;  %v10129_v36 = vpop.xlane.xlu0 %2793  ;;  %v12882_v46 = vld [vmem:[#allocation86_spill] sm:$0xff] }
 0x28d   : > { %12871 = vst [vmem:[#allocation167_spill] sm:$0xff] %v10108_v37  ;;  %v4520_v23 = vsub.f32 %v12874_v11, %v12873_v5  ;;  %12875 = vst [vmem:[#allocation99_spill] sm:$0xff] %v10118_v40  ;;  %v12878_v7 = vmov %v12873_v5  ;;  %6246 = vrsqrt.f32 %v3221_v18  ;;  %v12881_v5 = vunpack.c.h.bf16 %v12880_v62  ;;  %v6237_v27 = vpop.eup %6236 }
 0x28e   : > { %12872 = vst [vmem:[#allocation87_spill] sm:$0xff] %v10110_v45  ;;  %v4648_v56 = vsub.f32 %v12879_v16, %v12878_v7  ;;  %v12883_v24 = vunpack.c.h.bf16 %v12882_v46  ;;  %v12886_v26 = vunpack.c.h.bf16 %v12885_v39  ;;  %6248 = vrsqrt.f32 %v3122_v58  ;;  %v6239_v37 = vpop.eup %6238  ;;  %v12889_v45 = vld [vmem:[#allocation199_spill] sm:$0xff] }
 0x28f   : > { %v4584_v15 = vand.u32 2147483647, %v4520_v23  ;;  %v12884_v4 = vmov %v12881_v5  ;;  %v3128_v22 = vadd.f32 1e-10, %v9987_v34  ;;  %v12887_v7 = vunpack.c.l.bf16 %v12880_v62  ;;  %v6241_v58 = vpop.eup %6240  ;;  %v12893_v34 = vld [vmem:[#allocation192_spill] sm:$0xff]  ;;  %2867 = vadd.xlane.f32.xlu1 %v9431_v6  ;;  %2865 = vadd.xlane.f32.xlu0 %v9420_v0 }
 0x290   : > { %v4523_v11 = vsub.f32 %v12883_v24, %v12881_v5  ;;  %v4651_v47 = vsub.f32 %v12886_v26, %v12884_v4  ;;  %v4712_v18 = vand.u32 2147483647, %v4648_v56  ;;  %v12888_v16 = vunpack.c.l.bf16 %v12882_v46 }
 0x291   : > { %v10145_v31 = vmul.f32 %v6237_v27, %v12889_v45  ;;  %v12891_v40 = vmov %v12887_v7  ;;  %v12892_v26 = vunpack.c.l.bf16 %v12885_v39  ;;  %6250 = vrsqrt.f32 %v3121_v14 }
 0x292   : > { %v4522_v23 = vsub.f32 %v12888_v16, %v12887_v7  ;;  %v4587_v5 = vand.u32 2147483647, %v4523_v11  ;;  %v4715_v24 = vand.u32 2147483647, %v4651_v47  ;;  %v10152_v56 = vmul.f32 %v6239_v37, %v12893_v34  ;;  %v2988_v11 = vpop.xlane.xlu1 %2987  ;;  %v6243_v37 = vpop.eup %6242  ;;  %v12895_v47 = vld [vmem:[#allocation144_spill] sm:$0xff]  ;;  %v12897_v7 = vld [vmem:[#allocation93_spill] sm:$0xff] }
 0x293   : > { %12890 = vst [vmem:[#allocation98_spill] sm:$0xff] %v10145_v31  ;;  %v4650_v4 = vsub.f32 %v12892_v26, %v12891_v40  ;;  %v10156_v46 = vadd.f32 %v4712_v18, %v4584_v15  ;;  %v3127_v45 = vadd.f32 1e-10, %v9989_v42  ;;  %v10161_v62 = vsub.f32 %v9402_v1, %v10145_v31  ;;  %v2986_v40 = vpop.xlane.xlu0 %2985  ;;  %3059 = vadd.xlane.f32.xlu1 %v9477_v9 }
 0x294   : > { %12894 = vst [vmem:[#allocation7_spill] sm:$0xff] %v10152_v56  ;;  %v4586_v27 = vand.u32 2147483647, %v4522_v23  ;;  %v10163_v39 = vadd.f32 %v4715_v24, %v4587_v5  ;;  %v10167_v6 = vsub.f32 %v9405_v59, %v10152_v56  ;;  %v3228_v0 = vadd.f32 1e-10, %v2988_v11  ;;  %v12899_v23 = vld [vmem:[#allocation140_spill] sm:$0xff]  ;;  %3057 = vadd.xlane.f32.xlu0 %v9457_v25 }
 0x295   : > { %v4714_v14 = vand.u32 2147483647, %v4650_v4  ;;  %v3227_v15 = vadd.f32 1e-10, %v2986_v40  ;;  %v12896_v18 = vunpack.c.h.bf16 %v12895_v47  ;;  %v12898_v42 = vunpack.c.h.bf16 %v12897_v7  ;;  %v12902_v24 = vld [vmem:[#allocation183_spill] sm:$0xff]  ;;  %v12915_v56 = vld [vmem:[#allocation184_spill] sm:$0xff] }
 0x296   : > { %v10174_v1 = vmul.f32 %v6235_v41, %v12899_v23  ;;  %6252 = vrsqrt.f32 %v3128_v22  ;;  %v12903_v4 = vunpack.c.h.bf16 %v12902_v24  ;;  %v10184_v59 = vmul.f32 %v9956_v3, %v9956_v3  ;;  %v12904_v11 = vld [vmem:[#allocation155_spill] sm:$0xff]  ;;  %v10191_v22 = vpop.xlane.xlu1 %2791  ;;  %v6245_v9 = vpop.eup %6244 }
 0x297   : > { %v4525_v16 = vsub.f32 %v12898_v42, %v12896_v18  ;;  %v10176_v26 = vadd.f32 %v4714_v14, %v4586_v27  ;;  %v12901_v5 = vmov %v12896_v18  ;;  %v10187_v40 = vmul.f32 %v6241_v58, %v12904_v11  ;;  %v10193_v27 = vpop.xlane.xlu0 %2789  ;;  %2863 = vadd.xlane.f32.xlu1 %v9445_v35 }
 0x298   : > { %v4653_v34 = vsub.f32 %v12903_v4, %v12901_v5  ;;  %6254 = vrsqrt.f32 %v3228_v0  ;;  %v12906_v18 = vunpack.c.l.bf16 %v12895_v47  ;;  %v12907_v3 = vunpack.c.l.bf16 %v12897_v7  ;;  %v12912_v5 = vld [vmem:[#allocation94_spill] sm:$0xff]  ;;  %2861 = vadd.xlane.f32.xlu0 %v9424_v57 }
 0x299   : > { %12900 = vst [vmem:[#allocation92_spill] sm:$0xff] %v10176_v26  ;;  %12905 = vst [vmem:[#allocation132_spill] sm:$0xff] %v10187_v40  ;;  %v4589_v41 = vand.u32 2147483647, %v4525_v16  ;;  %6256 = vrsqrt.f32 %v3227_v15  ;;  %v12909_v0 = vunpack.c.l.bf16 %v12902_v24  ;;  %v3126_v25 = vadd.f32 1e-10, %v10057_v17 }
 0x29a   : > { %v4717_v14 = vand.u32 2147483647, %v4653_v34  ;;  %v4524_v42 = vsub.f32 %v12907_v3, %v12906_v18  ;;  %v12908_v58 = vmov %v12906_v18  ;;  %6258 = vrsqrt.f32 %v3127_v45  ;;  %v12910_v15 = vld [vmem:[#allocation145_spill] sm:$0xff]  ;;  %v6247_v18 = vpop.eup %6246  ;;  %v12917_v3 = vld [vmem:[#allocation203_spill] sm:$0xff]  ;;  %v12919_v40 = vld [vmem:[#allocation198_spill] sm:$0xff] }
 0x29b   : > { %v4652_v23 = vsub.f32 %v12909_v0, %v12908_v58  ;;  %v12911_v16 = vunpack.c.h.bf16 %v12910_v15  ;;  %v12913_v4 = vunpack.c.h.bf16 %v12912_v5  ;;  %v12916_v31 = vunpack.c.h.bf16 %v12915_v56  ;;  %v6249_v0 = vpop.eup %6248  ;;  %3055 = vadd.xlane.f32.xlu1 %v9481_v50 }
 0x29c   : > { %v10213_v47 = vmul.f32 %v6245_v9, %v12917_v3  ;;  %v10215_v24 = vadd.f32 %v4717_v14, %v4589_v41  ;;  %v4588_v58 = vand.u32 2147483647, %v4524_v42  ;;  %v3125_v17 = vadd.f32 1e-10, %v10059_v32  ;;  %v2984_v14 = vpop.xlane.xlu1 %2983  ;;  %v2982_v42 = vpop.xlane.xlu0 %2981 }
 0x29d   : > { %v4527_v11 = vsub.f32 %v12913_v4, %v12911_v16  ;;  %v12914_v34 = vmov %v12911_v16  ;;  %v4716_v45 = vand.u32 2147483647, %v4652_v23  ;;  %v10219_v26 = vmul.f32 %v6247_v18, %v12919_v40  ;;  %v12921_v4 = vld [vmem:[#allocation24_spill] sm:$0xff]  ;;  %v6251_v35 = vpop.eup %6250  ;;  %v12925_v18 = vld [vmem:[#allocation154_spill] sm:$0xff] }
 0x29e   : > { %v4655_v7 = vsub.f32 %v12916_v31, %v12914_v34  ;;  %12918 = vst [vmem:[#allocation79_spill] sm:$0xff] %v10213_v47  ;;  %v10225_v9 = vsub.f32 %v12921_v4, %v10213_v47  ;;  %v3132_v41 = vadd.f32 1e-10, %v10127_v49  ;;  %v12922_v32 = vunpack.c.l.bf16 %v12910_v15 }
 0x29f   : > { %12920 = vst [vmem:[#allocation170_spill] sm:$0xff] %v10219_v26  ;;  %v4591_v16 = vand.u32 2147483647, %v4527_v11  ;;  %v10228_v23 = vadd.f32 %v4716_v45, %v4588_v58  ;;  %v12923_v40 = vunpack.c.l.bf16 %v12912_v5  ;;  %v10236_v57 = vmul.f32 %v9966_v29, %v9966_v29  ;;  %2875 = vadd.xlane.f32.xlu1 %v9551_v51 }
 0x2a0   : > { %v4719_v31 = vand.u32 2147483647, %v4655_v7  ;;  %v10240_v11 = vsub.f32 %v9488_v28, %v10219_v26  ;;  %v3131_v49 = vadd.f32 1e-10, %v10129_v36  ;;  %v10246_v3 = vmul.f32 %v6243_v37, %v12925_v18  ;;  %v12930_v28 = vld [vmem:[#allocation173_spill] sm:$0xff]  ;;  %v12933_v37 = vld [vmem:[#allocation150_spill] sm:$0xff] }
 0x2a1   : > { %v4526_v34 = vsub.f32 %v12923_v40, %v12922_v32  ;;  %6260 = vrsqrt.f32 %v3126_v25  ;;  %v12927_v5 = vmov %v12922_v32  ;;  %v12928_v45 = vunpack.c.l.bf16 %v12915_v56  ;;  %v12932_v36 = vld [vmem:[#allocation297_spill] sm:$0xff]  ;;  %v6253_v40 = vpop.eup %6252  ;;  %v10265_v56 = vpop.xlane.xlu1 %2803  ;;  %v12938_v18 = vld [vmem:[#allocation194_spill] sm:$0xff] }
 0x2a2   : > { %v10243_v7 = vadd.f32 %v4719_v31, %v4591_v16  ;;  %12926 = vst [vmem:[#allocation106_spill] sm:$0xff] %v10246_v3  ;;  %v10254_v29 = vmul.f32 %v10028_v61, %v10028_v61  ;;  %v10257_v32 = vmul.f32 %v6249_v0, %v12930_v28  ;;  %6262 = vrsqrt.f32 %v3125_v17  ;;  %3053 = vadd.xlane.f32.xlu0 %v12932_v36  ;;  %v12935_v16 = vld [vmem:[#allocation101_spill] sm:$0xff]  ;;  %v6255_v36 = vpop.eup %6254 }
 0x2a3   : > { %v4590_v58 = vand.u32 2147483647, %v4526_v34  ;;  %v4654_v4 = vsub.f32 %v12928_v45, %v12927_v5  ;;  %v12934_v25 = vunpack.c.h.bf16 %v12933_v37  ;;  %v12936_v31 = vunpack.c.h.bf16 %v12935_v16  ;;  %v10267_v34 = vpop.xlane.xlu0 %2801  ;;  %3067 = vadd.xlane.f32.xlu1 %v9596_v33  ;;  %v12963_v33 = vld [vmem:[#allocation2_spill] sm:$0xff] }
 0x2a4   : > { %12924 = vst [vmem:[#allocation166_spill] sm:$0xff] %v10243_v7  ;;  %12929 = vst [vmem:[#allocation165_spill] sm:$0xff] %v10254_v29  ;;  %6264 = vrsqrt.f32 %v3132_v41  ;;  %v12939_v17 = vunpack.c.h.bf16 %v12938_v18  ;;  %v12940_v50 = vunpack.c.l.bf16 %v12933_v37  ;;  %v12941_v45 = vunpack.c.l.bf16 %v12935_v16  ;;  %v12948_v37 = vld [vmem:[#allocation151_spill] sm:$0xff] }
 0x2a5   : > { %12931 = vst [vmem:[#allocation290_spill] sm:$0xff] %v10257_v32  ;;  %v4529_v15 = vsub.f32 %v12936_v31, %v12934_v25  ;;  %v4718_v61 = vand.u32 2147483647, %v4654_v4  ;;  %v12937_v0 = vmov %v12934_v25  ;;  %6266 = vrsqrt.f32 %v3131_v49  ;;  %v6257_v4 = vpop.eup %6256  ;;  %v12944_v32 = vld [vmem:[#allocation208_spill] sm:$0xff] }
 0x2a6   : > { %v4657_v5 = vsub.f32 %v12939_v17, %v12937_v0  ;;  %v4528_v28 = vsub.f32 %v12941_v45, %v12940_v50  ;;  %v3226_v25 = vadd.f32 1e-10, %v2984_v14  ;;  %v12942_v41 = vmov %v12940_v50  ;;  %v6259_v29 = vpop.eup %6258  ;;  %v12946_v14 = vld [vmem:[#allocation206_spill] sm:$0xff]  ;;  %2873 = vadd.xlane.f32.xlu0 %v9539_v21 }
 0x2a7   : > { %v4593_v31 = vand.u32 2147483647, %v4529_v15  ;;  %v12943_v26 = vunpack.c.l.bf16 %v12938_v18  ;;  %v10282_v3 = vmul.f32 %v6255_v36, %v12944_v32  ;;  %v10284_v7 = vadd.f32 %v4718_v61, %v4590_v58  ;;  %v12950_v15 = vld [vmem:[#allocation102_spill] sm:$0xff]  ;;  %v2994_v50 = vpop.xlane.xlu0 %2993  ;;  %v12955_v36 = vld [vmem:[#allocation172_spill] sm:$0xff] }
 0x2a8   : > { %v4721_v0 = vand.u32 2147483647, %v4657_v5  ;;  %v4592_v17 = vand.u32 2147483647, %v4528_v28  ;;  %v10288_v16 = vmul.f32 %v10034_v43, %v10034_v43  ;;  %v10291_v49 = vmul.f32 %v6257_v4, %v12946_v14  ;;  %v2996_v5 = vpop.xlane.xlu1 %2995  ;;  %v12953_v28 = vld [vmem:[#allocation197_spill] sm:$0xff] }
 0x2a9   : > { %v4656_v47 = vsub.f32 %v12943_v26, %v12942_v41  ;;  %12945 = vst [vmem:[#allocation229_spill] sm:$0xff] %v10282_v3  ;;  %v12949_v32 = vunpack.c.h.bf16 %v12948_v37  ;;  %v12951_v58 = vunpack.c.h.bf16 %v12950_v15  ;;  %v10301_v18 = vsub.f32 %v9523_v19, %v10282_v3  ;;  %v12981_v3 = vld [vmem:[#allocation195_spill] sm:$0xff] }
 0x2aa   : > { %12947 = vst [vmem:[#allocation89_spill] sm:$0xff] %v10291_v49  ;;  %v3130_v43 = vadd.f32 1e-10, %v10191_v22  ;;  %v10304_v45 = vadd.f32 %v4721_v0, %v4593_v31  ;;  %v12954_v21 = vunpack.c.h.bf16 %v12953_v28  ;;  %v10311_v41 = vmul.f32 %v6251_v35, %v12955_v36  ;;  %v12956_v35 = vld [vmem:[#allocation188_spill] sm:$0xff] }
 0x2ab   : > { %v4720_v26 = vand.u32 2147483647, %v4656_v47  ;;  %v4531_v61 = vsub.f32 %v12951_v58, %v12949_v32  ;;  %v12952_v51 = vmov %v12949_v32  ;;  %v10315_v4 = vsub.f32 %v9526_v38, %v10291_v49  ;;  %v12958_v38 = vld [vmem:[#allocation32_spill] sm:$0xff] }
 0x2ac   : > { %v4659_v47 = vsub.f32 %v12954_v21, %v12952_v51  ;;  %v3129_v19 = vadd.f32 1e-10, %v10193_v27  ;;  %6268 = vrsqrt.f32 %v3226_v25  ;;  %v3225_v22 = vadd.f32 1e-10, %v2982_v42  ;;  %3065 = vadd.xlane.f32.xlu0 %v12958_v38 }
 0x2ad   : > { %v10318_v14 = vadd.f32 %v4720_v26, %v4592_v17  ;;  %v4595_v31 = vand.u32 2147483647, %v4531_v61  ;;  %6270 = vrsqrt.f32 %v9946_v20  ;;  %v10323_v32 = vmul.f32 %v10095_v12, %v10095_v12  ;;  %v6261_v17 = vpop.eup %6260  ;;  %v2800_v26 = vpop.xlane.xlu1 %2799 }
 0x2ae   : > { %v4723_v0 = vand.u32 2147483647, %v4659_v47  ;;  %v10326_v58 = vmul.f32 %v6253_v40, %v12956_v35  ;;  %v12959_v27 = vunpack.c.l.bf16 %v12948_v37  ;;  %v12960_v25 = vunpack.c.l.bf16 %v12950_v15  ;;  %v10334_v20 = vpop.xlane.xlu0 %2797  ;;  %v12965_v47 = vld [vmem:[#allocation108_spill] sm:$0xff]  ;;  %v6263_v38 = vpop.eup %6262 }
 0x2af   : > { %6272 = vrsqrt.f32 %v3130_v43  ;;  %v12962_v40 = vunpack.c.l.bf16 %v12953_v28  ;;  %v12964_v21 = vunpack.c.h.bf16 %v12963_v33  ;;  %v12966_v36 = vunpack.c.h.bf16 %v12965_v47  ;;  %v12967_v43 = vld [vmem:[#allocation187_spill] sm:$0xff] }
 0x2b0   : > { %12957 = vst [vmem:[#allocation221_spill] sm:$0xff] %v10326_v58  ;;  %v4530_v42 = vsub.f32 %v12960_v25, %v12959_v27  ;;  %v10336_v61 = vadd.f32 %v4723_v0, %v4595_v31  ;;  %v12961_v12 = vmov %v12959_v27  ;;  %v10348_v15 = vmul.f32 %v10099_v53, %v10099_v53  ;;  %v6265_v0 = vpop.eup %6264  ;;  %v12972_v53 = vld [vmem:[#allocation202_spill] sm:$0xff]  ;;  %v13010_v58 = vld [vmem:[#allocation209_spill] sm:$0xff] }
 0x2b1   : > { %v4658_v51 = vsub.f32 %v12962_v40, %v12961_v12  ;;  %v4533_v35 = vsub.f32 %v12966_v36, %v12964_v21  ;;  %v10351_v27 = vmul.f32 %v6259_v29, %v12967_v43  ;;  %6274 = vrsqrt.f32 %v3129_v19  ;;  %v6267_v21 = vpop.eup %6266  ;;  %v12974_v43 = vld [vmem:[#allocation260_spill] sm:$0xff]  ;;  %v12975_v19 = vld [vmem:[#allocation27_spill] sm:$0xff] }
 0x2b2   : > { %v12969_v31 = vunpack.c.l.bf16 %v12963_v33  ;;  %v12970_v37 = vunpack.c.l.bf16 %v12965_v47  ;;  %v10359_v25 = vmul.f32 %v10161_v62, %v10161_v62  ;;  %6276 = vrsqrt.f32 %v3225_v22  ;;  %2871 = vadd.xlane.f32.xlu1 %v12974_v43  ;;  %2869 = vadd.xlane.f32.xlu0 %v12975_v19  ;;  %v2990_v22 = vpop.xlane.xlu0 %2989 }
 0x2b3   : > { %12968 = vst [vmem:[#allocation105_spill] sm:$0xff] %v10351_v27  ;;  %v4594_v12 = vand.u32 2147483647, %v4530_v42  ;;  %v4722_v40 = vand.u32 2147483647, %v4658_v51  ;;  %v10362_v36 = vmul.f32 %v6261_v17, %v12972_v53  ;;  %v12977_v51 = vld [vmem:[#allocation152_spill] sm:$0xff]  ;;  %v10377_v43 = vmul.f32 %v6263_v38, %v12981_v3 }
 0x2b4   : > { %v4532_v28 = vsub.f32 %v12970_v37, %v12969_v31  ;;  %12971 = vst [vmem:[#allocation135_spill] sm:$0xff] %v10359_v25  ;;  %v3232_v29 = vadd.f32 1e-10, %v2996_v5  ;;  %v4597_v33 = vand.u32 2147483647, %v4533_v35  ;;  %v10368_v31 = vmul.f32 %v10167_v6, %v10167_v6  ;;  %v2992_v37 = vpop.xlane.xlu1 %2991  ;;  %v12979_v17 = vld [vmem:[#allocation109_spill] sm:$0xff] }
 0x2b5   : > { %12973 = vst [vmem:[#allocation82_spill] sm:$0xff] %v10362_v36  ;;  %v3231_v62 = vadd.f32 1e-10, %v2994_v50  ;;  %v10370_v42 = vadd.f32 %v4722_v40, %v4594_v12  ;;  %v12978_v49 = vunpack.c.h.bf16 %v12977_v51  ;;  %v12980_v53 = vunpack.c.h.bf16 %v12979_v17  ;;  %12982 = vst [vmem:[#allocation239_spill] sm:$0xff] %v10377_v43  ;;  %v12987_v40 = vld [vmem:[#allocation52_spill] sm:$0xff]  ;;  %v13008_v27 = vld [vmem:[#allocation62_spill] sm:$0xff] }
 0x2b6   : > { %v4596_v47 = vand.u32 2147483647, %v4532_v28  ;;  %12976 = vst [vmem:[#allocation124_spill] sm:$0xff] %v10368_v31  ;;  %v10381_v35 = vmul.f32 %v10225_v9, %v10225_v9  ;;  %v3136_v6 = vadd.f32 1e-10, %v10265_v56  ;;  %v12984_v28 = vld [vmem:[#allocation58_spill] sm:$0xff]  ;;  %v10390_v12 = vmul.f32 %v10240_v11, %v10240_v11 }
 0x2b7   : > { %v4535_v5 = vsub.f32 %v12980_v53, %v12978_v49  ;;  %v12985_v50 = vand.u32 2147483647, %v12984_v28  ;;  %v10393_v36 = vmul.f32 %v6265_v0, %v12987_v40  ;;  %v3135_v3 = vadd.f32 1e-10, %v10267_v34  ;;  %v12989_v49 = vld [vmem:[#allocation57_spill] sm:$0xff]  ;;  %v12993_v56 = vld [vmem:[#allocation302_spill] sm:$0xff] }
 0x2b8   : > { %12983 = vst [vmem:[#allocation292_spill] sm:$0xff] %v10381_v35  ;;  %12986 = vst [vmem:[#allocation171_spill] sm:$0xff] %v10390_v12  ;;  %v12990_v38 = vand.u32 2147483647, %v12989_v49  ;;  %v12991_v9 = vld [vmem:[#allocation205_spill] sm:$0xff]  ;;  %6278 = vrsqrt.f32 %v3232_v29  ;;  %3063 = vadd.xlane.f32.xlu1 %v12993_v56  ;;  %v12995_v11 = vunpack.c.h.bf16 %v12977_v51  ;;  %v2812_v34 = vpop.xlane.xlu1 %2811  ;;  %v10409_v49 = vpop.xlane.xlu0 %2809 }
 0x2b9   : > { %v10386_v19 = vadd.f32 %v12985_v50, %v4597_v33  ;;  %12988 = vst [vmem:[#allocation123_spill] sm:$0xff] %v10393_v36  ;;  %v10401_v35 = vmul.f32 %v6267_v21, %v12991_v9  ;;  %v12994_v33 = vld [vmem:[#allocation219_spill] sm:$0xff]  ;;  %v4599_v28 = vand.u32 2147483647, %v4535_v5  ;;  %v6269_v36 = vpop.eup %6268  ;;  %6280 = vrsqrt.f32 %v3231_v62  ;;  %v13002_v56 = vld [vmem:[#allocation153_spill] sm:$0xff] }
 0x2ba   : > { %v10398_v53 = vadd.f32 %v12990_v38, %v4596_v47  ;;  %3061 = vadd.xlane.f32.xlu0 %v12994_v33  ;;  %v12996_v50 = vld [vmem:[#allocation59_spill] sm:$0xff]  ;;  %v12998_v47 = vunpack.c.l.bf16 %v12977_v51  ;;  %v12999_v21 = vunpack.c.l.bf16 %v12979_v17  ;;  %v13003_v33 = vunpack.c.h.bf16 %v13002_v56 }
 0x2bb   : > { %12992 = vst [vmem:[#allocation180_spill] sm:$0xff] %v10401_v35  ;;  %v12997_v0 = vunpack.c.h.bf16 %v12996_v50  ;;  %v13001_v9 = vunpack.c.l.bf16 %v12996_v50  ;;  %v13004_v35 = vld [vmem:[#allocation111_spill] sm:$0xff]  ;;  %6282 = vrsqrt.f32 %v3136_v6  ;;  %v3230_v62 = vadd.f32 1e-10, %v2992_v37 }
 0x2bc   : > { %v4534_v29 = vsub.f32 %v12999_v21, %v12998_v47  ;;  %v13000_v38 = vmov %v12998_v47  ;;  %v13005_v12 = vunpack.c.h.bf16 %v13004_v35  ;;  %v13007_v31 = vmov %v13003_v33  ;;  %2883 = vadd.xlane.f32.xlu1 %v9660_v55 }
 0x2bd   : > { %v4663_v40 = vsub.f32 %v12997_v0, %v12995_v11  ;;  %v4662_v5 = vsub.f32 %v13001_v9, %v13000_v38  ;;  %v10423_v0 = vpop.eup %6270  ;;  %v13009_v17 = vunpack.c.h.bf16 %v13008_v27  ;;  %6284 = vrsqrt.f32 %v3135_v3 }
 0x2be   : > { %v4537_v11 = vsub.f32 %v13005_v12, %v13003_v33  ;;  %13006 = vst [vmem:[#allocation138_spill] sm:$0xff] %v10423_v0  ;;  %v6273_v21 = vpop.eup %6272  ;;  %v4598_v51 = vand.u32 2147483647, %v4534_v29  ;;  %v10430_v25 = vmul.f32 %v6269_v36, %v13010_v58  ;;  %v3134_v12 = vadd.f32 1e-10, %v2800_v26  ;;  %2881 = vadd.xlane.f32.xlu0 %v9645_v52  ;;  %v3004_v29 = vpop.xlane.xlu1 %3003  ;;  %v13016_v36 = vld [vmem:[#allocation56_spill] sm:$0xff] }
 0x2bf   : > { %v4727_v43 = vand.u32 2147483647, %v4663_v40  ;;  %v4665_v47 = vsub.f32 %v13009_v17, %v13007_v31  ;;  %v4726_v50 = vand.u32 2147483647, %v4662_v5  ;;  %v6275_v9 = vpop.eup %6274  ;;  %v10438_v31 = vmul.f32 %v10301_v18, %v10301_v18  ;;  %v3002_v5 = vpop.xlane.xlu0 %3001 }
 0x2c0   : > { %v4601_v38 = vand.u32 2147483647, %v4537_v11  ;;  %13011 = vst [vmem:[#allocation85_spill] sm:$0xff] %v10430_v25  ;;  %v6277_v40 = vpop.eup %6276  ;;  %v3229_v3 = vadd.f32 1e-10, %v2990_v22  ;;  %v13013_v58 = vunpack.c.l.bf16 %v13002_v56  ;;  %v13014_v26 = vunpack.c.l.bf16 %v13004_v35  ;;  %v13018_v22 = vld [vmem:[#allocation207_spill] sm:$0xff]  ;;  %3075 = vadd.xlane.f32.xlu1 %v9712_v8 }
 0x2c1   : > { %v10434_v37 = vadd.f32 %v4727_v43, %v4599_v28  ;;  %v4729_v6 = vand.u32 2147483647, %v4665_v47  ;;  %13012 = vst [vmem:[#allocation176_spill] sm:$0xff] %v10438_v31  ;;  %v10440_v33 = vadd.f32 %v4726_v50, %v4598_v51  ;;  %v10448_v52 = vmul.f32 %v10315_v4, %v10315_v4  ;;  %v13022_v4 = vld [vmem:[#allocation215_spill] sm:$0xff]  ;;  %v13100_v31 = vld [vmem:[#allocation232_spill] sm:$0xff] }
 0x2c2   : > { %v4536_v55 = vsub.f32 %v13014_v26, %v13013_v58  ;;  %v10451_v43 = vmul.f32 %v6273_v21, %v13016_v36  ;;  %v3133_v18 = vadd.f32 1e-10, %v10334_v20  ;;  %v10457_v11 = vmul.f32 %v6275_v9, %v13018_v22  ;;  %3073 = vadd.xlane.f32.xlu0 %v9689_v10  ;;  %v13025_v20 = vld [vmem:[#allocation157_spill] sm:$0xff]  ;;  %v2808_v56 = vpop.xlane.xlu1 %2807 }
 0x2c3   : > { %13015 = vst [vmem:[#allocation179_spill] sm:$0xff] %v10448_v52  ;;  %v10454_v28 = vadd.f32 %v4729_v6, %v4601_v38  ;;  %6286 = vrsqrt.f32 %v3230_v62  ;;  %v13020_v47 = vmov %v13013_v58  ;;  %v13021_v35 = vunpack.c.l.bf16 %v13008_v27  ;;  %v13023_v58 = vld [vmem:[#allocation51_spill] sm:$0xff]  ;;  %v13027_v62 = vld [vmem:[#allocation112_spill] sm:$0xff]  ;;  %v10474_v27 = vpop.xlane.xlu0 %2805  ;;  %v13030_v36 = vld [vmem:[#allocation65_spill] sm:$0xff] }
 0x2c4   : > { %13017 = vst [vmem:[#allocation241_spill] sm:$0xff] %v10451_v43  ;;  %13019 = vst [vmem:[#allocation224_spill] sm:$0xff] %v10457_v11  ;;  %v4600_v17 = vand.u32 2147483647, %v4536_v55  ;;  %v3674_v50 = vsub.f32 %v13022_v4, %v10430_v25  ;;  %v10466_v21 = vmul.f32 %v6277_v40, %v13023_v58  ;;  %6288 = vrsqrt.f32 %v3134_v12  ;;  %v13036_v43 = vld [vmem:[#allocation265_spill] sm:$0xff]  ;;  %2879 = vadd.xlane.f32.xlu1 %v9677_v44 }
 0x2c5   : > { %v4664_v51 = vsub.f32 %v13021_v35, %v13020_v47  ;;  %v13026_v38 = vunpack.c.h.bf16 %v13025_v20  ;;  %v13028_v9 = vunpack.c.h.bf16 %v13027_v62  ;;  %6290 = vrsqrt.f32 %v3229_v3  ;;  %v6279_v47 = vpop.eup %6278 }
 0x2c6   : > { %13024 = vst [vmem:[#allocation16_spill] sm:$0xff] %v10466_v21  ;;  %v13031_v40 = vunpack.c.h.bf16 %v13030_v36  ;;  %v13032_v12 = vunpack.c.l.bf16 %v13025_v20  ;;  %v13033_v8 = vunpack.c.l.bf16 %v13027_v62  ;;  %6292 = vrsqrt.f32 %v3133_v18  ;;  %2877 = vadd.xlane.f32.xlu0 %v9656_v13  ;;  %v13037_v18 = vld [vmem:[#allocation161_spill] sm:$0xff] }
 0x2c7   : > { %v4539_v6 = vsub.f32 %v13028_v9, %v13026_v38  ;;  %v4728_v26 = vand.u32 2147483647, %v4664_v51  ;;  %v13029_v55 = vmov %v13026_v38  ;;  %v3236_v35 = vadd.f32 1e-10, %v3004_v29  ;;  %v6281_v51 = vpop.eup %6280 }
 0x2c8   : > { %v4667_v22 = vsub.f32 %v13031_v40, %v13029_v55  ;;  %v4538_v10 = vsub.f32 %v13033_v8, %v13032_v12  ;;  %v13034_v3 = vmov %v13032_v12  ;;  %v13035_v58 = vunpack.c.l.bf16 %v13030_v36  ;;  %v6283_v40 = vpop.eup %6282  ;;  %3071 = vadd.xlane.f32.xlu1 %v9734_v48 }
 0x2c9   : > { %v4603_v4 = vand.u32 2147483647, %v4539_v6  ;;  %v3235_v9 = vadd.f32 1e-10, %v3002_v5  ;;  %v10488_v0 = vadd.f32 %v4728_v26, %v4600_v17  ;;  %v3673_v62 = vsub.f32 %v13036_v43, %v10466_v21  ;;  %v13039_v6 = vld [vmem:[#allocation115_spill] sm:$0xff]  ;;  %v6285_v5 = vpop.eup %6284  ;;  %v13041_v17 = vld [vmem:[#allocation218_spill] sm:$0xff] }
 0x2ca   : > { %v4666_v38 = vsub.f32 %v13035_v58, %v13034_v3  ;;  %v4731_v11 = vand.u32 2147483647, %v4667_v22  ;;  %v4602_v55 = vand.u32 2147483647, %v4538_v10  ;;  %v3140_v12 = vadd.f32 1e-10, %v2812_v34  ;;  %v3000_v10 = vpop.xlane.xlu1 %2999  ;;  %v2998_v3 = vpop.xlane.xlu0 %2997  ;;  %3069 = vadd.xlane.f32.xlu0 %v9708_v63 }
 0x2cb   : > { %v13038_v20 = vunpack.c.h.bf16 %v13037_v18  ;;  %v13040_v36 = vunpack.c.h.bf16 %v13039_v6  ;;  %v10499_v26 = vmul.f32 %v6279_v47, %v13041_v17  ;;  %v3139_v22 = vadd.f32 1e-10, %v10409_v49  ;;  %v13044_v34 = vld [vmem:[#allocation68_spill] sm:$0xff]  ;;  %v13047_v21 = vld [vmem:[#allocation213_spill] sm:$0xff]  ;;  %v13052_v17 = vld [vmem:[#allocation211_spill] sm:$0xff] }
 0x2cc   : > { %v4730_v29 = vand.u32 2147483647, %v4666_v38  ;;  %v10502_v43 = vadd.f32 %v4731_v11, %v4603_v4  ;;  %v13045_v13 = vunpack.c.h.bf16 %v13044_v34  ;;  %v10508_v38 = vmul.f32 %v3674_v50, %v3674_v50  ;;  %v13049_v47 = vld [vmem:[#allocation217_spill] sm:$0xff]  ;;  %2891 = vadd.xlane.f32.xlu1 %v9768_v60 }
 0x2cd   : > { %v4541_v8 = vsub.f32 %v13040_v36, %v13038_v20  ;;  %13042 = vst [vmem:[#allocation15_spill] sm:$0xff] %v10499_v26  ;;  %v13043_v44 = vmov %v13038_v20  ;;  %v10511_v25 = vmul.f32 %v6281_v51, %v13047_v21  ;;  %6294 = vrsqrt.f32 %v3236_v35  ;;  %v6287_v51 = vpop.eup %6286 }
 0x2ce   : > { %v4669_v58 = vsub.f32 %v13045_v13, %v13043_v44  ;;  %13046 = vst [vmem:[#allocation141_spill] sm:$0xff] %v10508_v38  ;;  %v10513_v20 = vadd.f32 %v4730_v29, %v4602_v55  ;;  %v10516_v36 = vmul.f32 %v6283_v40, %v13049_v47  ;;  %6296 = vrsqrt.f32 %v3235_v9  ;;  %v13056_v9 = vld [vmem:[#allocation289_spill] sm:$0xff]  ;;  %v2820_v40 = vpop.xlane.xlu1 %2819  ;;  %v6289_v63 = vpop.eup %6288  ;;  %v13060_v13 = vld [vmem:[#allocation162_spill] sm:$0xff] }
 0x2cf   : > { %13048 = vst [vmem:[#allocation242_spill] sm:$0xff] %v10511_v25  ;;  %v4605_v49 = vand.u32 2147483647, %v4541_v8  ;;  %v10518_v4 = vmul.f32 %v3673_v62, %v3673_v62  ;;  %v10521_v52 = vmul.f32 %v6285_v5, %v13052_v17  ;;  %6298 = vrsqrt.f32 %v3140_v12  ;;  %v2818_v62 = vpop.xlane.xlu0 %2817  ;;  %v13059_v5 = vld [vmem:[#allocation36_spill] sm:$0xff]  ;;  %v13062_v47 = vld [vmem:[#allocation118_spill] sm:$0xff] }
 0x2d0   : > { %13050 = vst [vmem:[#allocation293_spill] sm:$0xff] %v10516_v36  ;;  %v4733_v11 = vand.u32 2147483647, %v4669_v58  ;;  %v13054_v50 = vunpack.c.l.bf16 %v13037_v18  ;;  %v13055_v21 = vunpack.c.l.bf16 %v13039_v6  ;;  %v3680_v55 = vsub.f32 %v13056_v9, %v10499_v26  ;;  %v6291_v9 = vpop.eup %6290  ;;  %v13069_v36 = vld [vmem:[#allocation223_spill] sm:$0xff] }
 0x2d1   : > { %13051 = vst [vmem:[#allocation139_spill] sm:$0xff] %v10518_v4  ;;  %13053 = vst [vmem:[#allocation86_spill] sm:$0xff] %v10521_v52  ;;  %6300 = vrsqrt.f32 %v3139_v22  ;;  %v13058_v48 = vunpack.c.l.bf16 %v13044_v34  ;;  %v3679_v44 = vsub.f32 %v13059_v5, %v10511_v25  ;;  %v3234_v6 = vadd.f32 1e-10, %v3000_v10  ;;  %v6293_v10 = vpop.eup %6292 }
 0x2d2   : > { %v4540_v35 = vsub.f32 %v13055_v21, %v13054_v50  ;;  %v10531_v29 = vadd.f32 %v4733_v11, %v4605_v49  ;;  %v13057_v12 = vmov %v13054_v50  ;;  %v13061_v58 = vunpack.c.h.bf16 %v13060_v13  ;;  %v13065_v21 = vld [vmem:[#allocation69_spill] sm:$0xff] }
 0x2d3   : > { %v4668_v8 = vsub.f32 %v13058_v48, %v13057_v12  ;;  %v13063_v17 = vunpack.c.h.bf16 %v13062_v47  ;;  %v13066_v49 = vunpack.c.h.bf16 %v13065_v21  ;;  %v3233_v18 = vadd.f32 1e-10, %v2998_v3  ;;  %v13073_v3 = vld [vmem:[#allocation222_spill] sm:$0xff] }
 0x2d4   : > { %v13064_v22 = vmov %v13061_v58  ;;  %v4604_v52 = vand.u32 2147483647, %v4540_v35  ;;  %v13067_v12 = vunpack.c.l.bf16 %v13060_v13  ;;  %v13068_v48 = vunpack.c.l.bf16 %v13062_v47  ;;  %v3012_v47 = vpop.xlane.xlu1 %3011 }
 0x2d5   : > { %v4543_v50 = vsub.f32 %v13063_v17, %v13061_v58  ;;  %v4671_v11 = vsub.f32 %v13066_v49, %v13064_v22  ;;  %v4732_v34 = vand.u32 2147483647, %v4668_v8  ;;  %v10552_v25 = vmul.f32 %v6287_v51, %v13069_v36  ;;  %v13071_v58 = vld [vmem:[#allocation252_spill] sm:$0xff] }
 0x2d6   : > { %v4542_v5 = vsub.f32 %v13068_v48, %v13067_v12  ;;  %v3138_v26 = vadd.f32 1e-10, %v2808_v56  ;;  %2889 = vadd.xlane.f32.xlu0 %v13071_v58  ;;  %v10556_v49 = vmul.f32 %v3680_v55, %v3680_v55  ;;  %v10559_v35 = vmul.f32 %v6289_v63, %v13073_v3  ;;  %v3010_v12 = vpop.xlane.xlu0 %3009  ;;  %v13077_v56 = vld [vmem:[#allocation60_spill] sm:$0xff]  ;;  %v13084_v3 = vld [vmem:[#allocation121_spill] sm:$0xff] }
 0x2d7   : > { %13070 = vst [vmem:[#allocation177_spill] sm:$0xff] %v10552_v25  ;;  %v4607_v17 = vand.u32 2147483647, %v4543_v50  ;;  %v4735_v22 = vand.u32 2147483647, %v4671_v11  ;;  %v10562_v48 = vadd.f32 %v4732_v34, %v4604_v52  ;;  %v10564_v36 = vmul.f32 %v3679_v44, %v3679_v44  ;;  %v6295_v44 = vpop.eup %6294 }
 0x2d8   : > { %13072 = vst [vmem:[#allocation199_spill] sm:$0xff] %v10556_v49  ;;  %13074 = vst [vmem:[#allocation192_spill] sm:$0xff] %v10559_v35  ;;  %v3137_v8 = vadd.f32 1e-10, %v10474_v27  ;;  %v10567_v51 = vmul.f32 %v6291_v9, %v13077_v56  ;;  %6302 = vrsqrt.f32 %v3234_v6  ;;  %v4606_v55 = vand.u32 2147483647, %v4542_v5  ;;  %v6297_v56 = vpop.eup %6296 }
 0x2d9   : > { %13075 = vst [vmem:[#allocation144_spill] sm:$0xff] %v10562_v48  ;;  %13076 = vst [vmem:[#allocation93_spill] sm:$0xff] %v10564_v36  ;;  %v10569_v60 = vadd.f32 %v4735_v22, %v4607_v17  ;;  %6304 = vrsqrt.f32 %v3233_v18  ;;  %v13080_v50 = vunpack.c.l.bf16 %v13060_v13  ;;  %v13081_v63 = vunpack.c.l.bf16 %v13065_v21  ;;  %v13082_v27 = vld [vmem:[#allocation168_spill] sm:$0xff]  ;;  %v13088_v6 = vld [vmem:[#allocation37_spill] sm:$0xff] }
 0x2da   : > { %13078 = vst [vmem:[#allocation140_spill] sm:$0xff] %v10567_v51  ;;  %v13083_v58 = vunpack.c.h.bf16 %v13082_v27  ;;  %v13085_v52 = vunpack.c.h.bf16 %v13084_v3  ;;  %v13086_v35 = vld [vmem:[#allocation212_spill] sm:$0xff]  ;;  %v3678_v9 = vsub.f32 %v13088_v6, %v10552_v25  ;;  %6306 = vrsqrt.f32 %v3138_v26  ;;  %v13089_v18 = vld [vmem:[#allocation163_spill] sm:$0xff]  ;;  %v6299_v6 = vpop.eup %6298 }
 0x2db   : > { %13079 = vst [vmem:[#allocation183_spill] sm:$0xff] %v10569_v60  ;;  %v4670_v11 = vsub.f32 %v13081_v63, %v13080_v50  ;;  %v10580_v36 = vmul.f32 %v6293_v10, %v13086_v35  ;;  %3083 = vadd.xlane.f32.xlu1 %v13089_v18  ;;  %v13090_v5 = vld [vmem:[#allocation279_spill] sm:$0xff]  ;;  %6308 = vrsqrt.f32 %v3137_v8  ;;  %v2816_v50 = vpop.xlane.xlu1 %2815  ;;  %v2814_v63 = vpop.xlane.xlu0 %2813  ;;  %v13094_v35 = vunpack.c.l.bf16 %v13082_v27  ;;  %v13096_v18 = vld [vmem:[#allocation266_spill] sm:$0xff]  ;;  %v13106_v27 = vld [vmem:[#allocation169_spill] sm:$0xff] }
 0x2dc   : > { %v4545_v34 = vsub.f32 %v13085_v52, %v13083_v58  ;;  %3081 = vadd.xlane.f32.xlu0 %v13090_v5  ;;  %v13091_v13 = vmov %v13083_v58  ;;  %v13092_v21 = vld [vmem:[#allocation75_spill] sm:$0xff]  ;;  %v13095_v52 = vunpack.c.l.bf16 %v13084_v3  ;;  %v3677_v5 = vsub.f32 %v13096_v18, %v10567_v51  ;;  %v13104_v18 = vld [vmem:[#allocation46_spill] sm:$0xff] }
 0x2dd   : > { %13087 = vst [vmem:[#allocation155_spill] sm:$0xff] %v10580_v36  ;;  %v13093_v17 = vunpack.c.h.bf16 %v13092_v21  ;;  %v4734_v58 = vand.u32 2147483647, %v4670_v11  ;;  %v3144_v36 = vadd.f32 1e-10, %v2820_v40  ;;  %v13097_v49 = vmov %v13094_v35  ;;  %v13105_v40 = vld [vmem:[#allocation41_spill] sm:$0xff] }
 0x2de   : > { %v4609_v10 = vand.u32 2147483647, %v4545_v34  ;;  %v4544_v26 = vsub.f32 %v13095_v52, %v13094_v35  ;;  %v3143_v25 = vadd.f32 1e-10, %v2818_v62  ;;  %v3240_v4 = vadd.f32 1e-10, %v3012_v47 }
 0x2df   : > { %v4673_v22 = vsub.f32 %v13093_v17, %v13091_v13  ;;  %v13098_v13 = vunpack.c.l.bf16 %v13092_v21  ;;  %v6301_v17 = vpop.eup %6300  ;;  %v10600_v11 = vadd.f32 %v4734_v58, %v4606_v55  ;;  %v10603_v3 = vmul.f32 %v6295_v44, %v13100_v31  ;;  %v13102_v35 = vld [vmem:[#allocation74_spill] sm:$0xff]  ;;  %2887 = vadd.xlane.f32.xlu1 %v13104_v18  ;;  %v3008_v58 = vpop.xlane.xlu1 %3007 }
 0x2e0   : > { %v4608_v38 = vand.u32 2147483647, %v4544_v26  ;;  %v10606_v52 = vmul.f32 %v6297_v56, %v13102_v35  ;;  %2885 = vadd.xlane.f32.xlu0 %v13105_v40  ;;  %v13107_v21 = vunpack.c.h.bf16 %v13106_v27  ;;  %v10614_v55 = vmul.f32 %v3678_v9, %v3678_v9  ;;  %v3006_v26 = vpop.xlane.xlu0 %3005  ;;  %v13113_v56 = vld [vmem:[#allocation76_spill] sm:$0xff]  ;;  %v13119_v9 = vld [vmem:[#allocation77_spill] sm:$0xff] }
 0x2e1   : > { %v4672_v8 = vsub.f32 %v13098_v13, %v13097_v49  ;;  %13099 = vst [vmem:[#allocation145_spill] sm:$0xff] %v10600_v11  ;;  %v4737_v34 = vand.u32 2147483647, %v4673_v22  ;;  %13101 = vst [vmem:[#allocation94_spill] sm:$0xff] %v10603_v3  ;;  %v13108_v49 = vld [vmem:[#allocation122_spill] sm:$0xff]  ;;  %v13114_v35 = vunpack.c.h.bf16 %v13113_v56  ;;  %v10622_v51 = vmul.f32 %v3677_v5, %v3677_v5 }
 0x2e2   : > { %13103 = vst [vmem:[#allocation184_spill] sm:$0xff] %v10606_v52  ;;  %v13109_v13 = vunpack.c.h.bf16 %v13108_v49  ;;  %13110 = vst [vmem:[#allocation203_spill] sm:$0xff] %v10614_v55  ;;  %v3239_v22 = vadd.f32 1e-10, %v3010_v12  ;;  %v13112_v44 = vmov %v13107_v21  ;;  %6310 = vrsqrt.f32 %v3144_v36 }
 0x2e3   : > { %v4736_v62 = vand.u32 2147483647, %v4672_v8  ;;  %v10616_v31 = vadd.f32 %v4737_v34, %v4609_v10  ;;  %v4675_v18 = vsub.f32 %v13114_v35, %v13112_v44  ;;  %13115 = vst [vmem:[#allocation24_spill] sm:$0xff] %v10622_v51  ;;  %v13116_v8 = vld [vmem:[#allocation230_spill] sm:$0xff]  ;;  %6312 = vrsqrt.f32 %v3240_v4  ;;  %v6303_v34 = vpop.eup %6302  ;;  %v13123_v35 = vld [vmem:[#allocation159_spill] sm:$0xff]  ;;  %v13137_v51 = vld [vmem:[#allocation233_spill] sm:$0xff] }
 0x2e4   : > { %v4547_v47 = vsub.f32 %v13109_v13, %v13107_v21  ;;  %v10625_v40 = vmul.f32 %v6299_v6, %v13116_v8  ;;  %v10630_v21 = vmul.f32 %v6301_v17, %v13119_v9  ;;  %v13121_v13 = vld [vmem:[#allocation272_spill] sm:$0xff]  ;;  %v13122_v44 = vld [vmem:[#allocation270_spill] sm:$0xff]  ;;  %6314 = vrsqrt.f32 %v3143_v25  ;;  %3079 = vadd.xlane.f32.xlu1 %v13123_v35  ;;  %v6305_v4 = vpop.eup %6304  ;;  %v13132_v35 = vld [vmem:[#allocation129_spill] sm:$0xff] }
 0x2e5   : > { %13111 = vst [vmem:[#allocation198_spill] sm:$0xff] %v10616_v31  ;;  %v10627_v11 = vadd.f32 %v4736_v62, %v4608_v38  ;;  %v4739_v10 = vand.u32 2147483647, %v4675_v18  ;;  %v3684_v55 = vsub.f32 %v13121_v13, %v10603_v3  ;;  %v3683_v5 = vsub.f32 %v13122_v44, %v10606_v52  ;;  %v13124_v6 = vld [vmem:[#allocation66_spill] sm:$0xff]  ;;  %v2828_v62 = vpop.xlane.xlu1 %2827 }
 0x2e6   : > { %13117 = vst [vmem:[#allocation154_spill] sm:$0xff] %v10625_v40  ;;  %13120 = vst [vmem:[#allocation297_spill] sm:$0xff] %v10630_v21  ;;  %v4611_v12 = vand.u32 2147483647, %v4547_v47  ;;  %3077 = vadd.xlane.f32.xlu0 %v13124_v6  ;;  %v13125_v38 = vunpack.c.l.bf16 %v13106_v27  ;;  %v13126_v36 = vunpack.c.l.bf16 %v13108_v49  ;;  %6316 = vrsqrt.f32 %v3239_v22  ;;  %v2826_v47 = vpop.xlane.xlu0 %2825  ;;  %v13130_v13 = vld [vmem:[#allocation174_spill] sm:$0xff]  ;;  %v6307_v40 = vpop.eup %6306 }
 0x2e7   : > { %13118 = vst [vmem:[#allocation173_spill] sm:$0xff] %v10627_v11  ;;  %v13129_v9 = vunpack.c.l.bf16 %v13113_v56  ;;  %v13131_v44 = vunpack.c.h.bf16 %v13130_v13  ;;  %v13133_v6 = vunpack.c.h.bf16 %v13132_v35  ;;  %v3142_v52 = vadd.f32 1e-10, %v2816_v50 }
 0x2e8   : > { %v4546_v17 = vsub.f32 %v13126_v36, %v13125_v38  ;;  %v10642_v18 = vadd.f32 %v4739_v10, %v4611_v12  ;;  %v13128_v8 = vmov %v13125_v38  ;;  %v3141_v49 = vadd.f32 1e-10, %v2814_v63  ;;  %v13135_v36 = vld [vmem:[#allocation83_spill] sm:$0xff]  ;;  %v6309_v10 = vpop.eup %6308 }
 0x2e9   : > { %v4674_v25 = vsub.f32 %v13129_v9, %v13128_v8  ;;  %v4549_v21 = vsub.f32 %v13133_v6, %v13131_v44  ;;  %v13134_v22 = vmov %v13131_v44  ;;  %v13136_v3 = vunpack.c.h.bf16 %v13135_v36  ;;  %v13141_v6 = vld [vmem:[#allocation228_spill] sm:$0xff] }
 0x2ea   : > { %13127 = vst [vmem:[#allocation150_spill] sm:$0xff] %v10642_v18  ;;  %v4610_v38 = vand.u32 2147483647, %v4546_v17  ;;  %v10657_v27 = vmul.f32 %v6303_v34, %v13137_v51  ;;  %v13139_v9 = vunpack.c.l.bf16 %v13130_v13  ;;  %v13140_v18 = vunpack.c.l.bf16 %v13132_v35  ;;  %v13146_v51 = vld [vmem:[#allocation231_spill] sm:$0xff] }
 0x2eb   : > { %v4677_v12 = vsub.f32 %v13136_v3, %v13134_v22  ;;  %v4738_v56 = vand.u32 2147483647, %v4674_v25  ;;  %v4613_v8 = vand.u32 2147483647, %v4549_v21  ;;  %v10664_v50 = vmul.f32 %v6305_v4, %v13141_v6  ;;  %v3020_v21 = vpop.xlane.xlu1 %3019  ;;  %v3018_v25 = vpop.xlane.xlu0 %3017  ;;  %v13151_v13 = vld [vmem:[#allocation227_spill] sm:$0xff] }
 0x2ec   : > { %13138 = vst [vmem:[#allocation101_spill] sm:$0xff] %v10657_v27  ;;  %v4548_v44 = vsub.f32 %v13140_v18, %v13139_v9  ;;  %v3238_v63 = vadd.f32 1e-10, %v3008_v58  ;;  %v13143_v11 = vmov %v13139_v9  ;;  %v13144_v3 = vunpack.c.l.bf16 %v13135_v36 }
 0x2ed   : > { %13142 = vst [vmem:[#allocation194_spill] sm:$0xff] %v10664_v50  ;;  %v4741_v17 = vand.u32 2147483647, %v4677_v12  ;;  %v10670_v31 = vmul.f32 %v3684_v55, %v3684_v55  ;;  %v10673_v34 = vmul.f32 %v6307_v40, %v13146_v51  ;;  %v10675_v60 = vadd.f32 %v4738_v56, %v4610_v38  ;;  %v13153_v55 = vld [vmem:[#allocation175_spill] sm:$0xff]  ;;  %v13155_v40 = vld [vmem:[#allocation130_spill] sm:$0xff] }
 0x2ee   : > { %v4676_v22 = vsub.f32 %v13144_v3, %v13143_v11  ;;  %v4612_v18 = vand.u32 2147483647, %v4548_v44  ;;  %v10677_v35 = vmul.f32 %v3683_v5, %v3683_v5  ;;  %6318 = vrsqrt.f32 %v3142_v52  ;;  %v6311_v3 = vpop.eup %6310  ;;  %v13157_v38 = vld [vmem:[#allocation190_spill] sm:$0xff]  ;;  %v13158_v5 = vld [vmem:[#allocation119_spill] sm:$0xff] }
 0x2ef   : > { %13145 = vst [vmem:[#allocation208_spill] sm:$0xff] %v10670_v31  ;;  %13147 = vst [vmem:[#allocation206_spill] sm:$0xff] %v10673_v34  ;;  %v3237_v58 = vadd.f32 1e-10, %v3006_v26  ;;  %v10679_v4 = vadd.f32 %v4741_v17, %v4613_v8  ;;  %v10682_v12 = vmul.f32 %v6309_v10, %v13151_v13  ;;  %6320 = vrsqrt.f32 %v3141_v49  ;;  %v13160_v8 = vld [vmem:[#allocation84_spill] sm:$0xff]  ;;  %v6313_v49 = vpop.eup %6312  ;;  %v2822_v51 = vpop.xlane.xlu0 %2821 }
 0x2f0   : > { %13148 = vst [vmem:[#allocation151_spill] sm:$0xff] %v10675_v60  ;;  %13149 = vst [vmem:[#allocation102_spill] sm:$0xff] %v10677_v35  ;;  %v4740_v11 = vand.u32 2147483647, %v4676_v22  ;;  %v13154_v36 = vunpack.c.h.bf16 %v13153_v55  ;;  %v13156_v9 = vunpack.c.h.bf16 %v13155_v40  ;;  %v3682_v56 = vsub.f32 %v13157_v38, %v10657_v27  ;;  %v2824_v22 = vpop.xlane.xlu1 %2823  ;;  %v6315_v34 = vpop.eup %6314  ;;  %v13178_v60 = vld [vmem:[#allocation237_spill] sm:$0xff] }
 0x2f1   : > { %13150 = vst [vmem:[#allocation197_spill] sm:$0xff] %v10679_v4  ;;  %13152 = vst [vmem:[#allocation172_spill] sm:$0xff] %v10682_v12  ;;  %v3681_v52 = vsub.f32 %v13158_v5, %v10664_v50  ;;  %6322 = vrsqrt.f32 %v3238_v63  ;;  %v13161_v10 = vunpack.c.h.bf16 %v13160_v8  ;;  %v3148_v17 = vadd.f32 1e-10, %v2828_v62  ;;  %v6317_v62 = vpop.eup %6316 }
 0x2f2   : > { %v4551_v6 = vsub.f32 %v13156_v9, %v13154_v36  ;;  %v13159_v26 = vmov %v13154_v36  ;;  %v10696_v13 = vadd.f32 %v4740_v11, %v4612_v18  ;;  %v13163_v9 = vunpack.c.l.bf16 %v13153_v55  ;;  %v13167_v18 = vld [vmem:[#allocation178_spill] sm:$0xff] }
 0x2f3   : > { %v4679_v44 = vsub.f32 %v13161_v10, %v13159_v26  ;;  %v13164_v38 = vunpack.c.l.bf16 %v13155_v40  ;;  %6324 = vrsqrt.f32 %v3237_v58  ;;  %v3147_v63 = vadd.f32 1e-10, %v2826_v47  ;;  %v13174_v47 = vld [vmem:[#allocation238_spill] sm:$0xff] }
 0x2f4   : > { %13162 = vst [vmem:[#allocation188_spill] sm:$0xff] %v10696_v13  ;;  %v4615_v36 = vand.u32 2147483647, %v4551_v6  ;;  %v13165_v50 = vmov %v13163_v9  ;;  %v13166_v26 = vunpack.c.l.bf16 %v13160_v8  ;;  %v3244_v27 = vadd.f32 1e-10, %v3020_v21  ;;  %v13169_v6 = vld [vmem:[#allocation136_spill] sm:$0xff]  ;;  %v3016_v21 = vpop.xlane.xlu1 %3015 }
 0x2f5   : > { %v4550_v12 = vsub.f32 %v13164_v38, %v13163_v9  ;;  %v4743_v5 = vand.u32 2147483647, %v4679_v44  ;;  %v13168_v11 = vunpack.c.h.bf16 %v13167_v18  ;;  %v13170_v31 = vunpack.c.h.bf16 %v13169_v6  ;;  %v13172_v9 = vld [vmem:[#allocation90_spill] sm:$0xff] }
 0x2f6   : > { %v4678_v10 = vsub.f32 %v13166_v26, %v13165_v50  ;;  %v13173_v38 = vunpack.c.h.bf16 %v13172_v9  ;;  %v10715_v44 = vmul.f32 %v6313_v49, %v13174_v47  ;;  %v3243_v55 = vadd.f32 1e-10, %v3018_v25  ;;  %v13180_v25 = vld [vmem:[#allocation234_spill] sm:$0xff] }
 0x2f7   : > { %v4614_v35 = vand.u32 2147483647, %v4550_v12  ;;  %v4553_v13 = vsub.f32 %v13170_v31, %v13168_v11  ;;  %v13171_v40 = vmov %v13168_v11  ;;  %v10717_v4 = vadd.f32 %v4743_v5, %v4615_v36  ;;  %v10721_v12 = vpop.xlane.xlu0 %3013 }
 0x2f8   : > { %v4681_v58 = vsub.f32 %v13173_v38, %v13171_v40  ;;  %13175 = vst [vmem:[#allocation32_spill] sm:$0xff] %v10715_v44  ;;  %v4742_v50 = vand.u32 2147483647, %v4678_v10  ;;  %v10719_v8 = vmul.f32 %v3682_v56, %v3682_v56  ;;  %6326 = vrsqrt.f32 %v3148_v17  ;;  %v6319_v10 = vpop.eup %6318 }
 0x2f9   : > { %v4617_v26 = vand.u32 2147483647, %v4553_v13  ;;  %v10723_v11 = vmul.f32 %v3681_v52, %v3681_v52  ;;  %v10726_v48 = vmul.f32 %v6311_v3, %v13178_v60  ;;  %6328 = vrsqrt.f32 %v3147_v63  ;;  %v13184_v52 = vld [vmem:[#allocation67_spill] sm:$0xff]  ;;  %v13185_v60 = vld [vmem:[#allocation236_spill] sm:$0xff]  ;;  %v6321_v63 = vpop.eup %6320 }
 0x2fa   : > { %13176 = vst [vmem:[#allocation2_spill] sm:$0xff] %v10719_v8  ;;  %v4745_v31 = vand.u32 2147483647, %v4681_v58  ;;  %v10728_v49 = vadd.f32 %v4742_v50, %v4614_v35  ;;  %v10731_v36 = vmul.f32 %v6315_v34, %v13180_v25  ;;  %6330 = vrsqrt.f32 %v3244_v27  ;;  %v2836_v58 = vpop.xlane.xlu1 %2835  ;;  %v13192_v25 = vld [vmem:[#allocation137_spill] sm:$0xff] }
 0x2fb   : > { %13177 = vst [vmem:[#allocation108_spill] sm:$0xff] %v10723_v11  ;;  %13179 = vst [vmem:[#allocation187_spill] sm:$0xff] %v10726_v48  ;;  %v13182_v17 = vunpack.c.l.bf16 %v13167_v18  ;;  %v13183_v5 = vunpack.c.l.bf16 %v13169_v6  ;;  %v3688_v40 = vsub.f32 %v13184_v52, %v10715_v44  ;;  %v10742_v3 = vmul.f32 %v6317_v62, %v13185_v60  ;;  %v2834_v47 = vpop.xlane.xlu0 %2833  ;;  %v13189_v6 = vld [vmem:[#allocation47_spill] sm:$0xff] }
 0x2fc   : > { %13181 = vst [vmem:[#allocation202_spill] sm:$0xff] %v10731_v36  ;;  %v10733_v56 = vadd.f32 %v4745_v31, %v4617_v26  ;;  %6332 = vrsqrt.f32 %v3243_v55  ;;  %v13188_v34 = vunpack.c.l.bf16 %v13172_v9  ;;  %v3146_v38 = vadd.f32 1e-10, %v2824_v22  ;;  %4902 = vrot.lane.b32.xlu1 %v13189_v6, %s6598_s14  ;;  %v13190_v26 = vld [vmem:[#allocation181_spill] sm:$0xff]  ;;  %v6323_v9 = vpop.eup %6322 }
 0x2fd   : > { %v4552_v13 = vsub.f32 %v13183_v5, %v13182_v17  ;;  %13186 = vst [vmem:[#allocation260_spill] sm:$0xff] %v10742_v3  ;;  %v13187_v35 = vmov %v13182_v17  ;;  %v13191_v31 = vunpack.c.h.bf16 %v13190_v26  ;;  %v13193_v17 = vunpack.c.h.bf16 %v13192_v25  ;;  %v13195_v5 = vld [vmem:[#allocation91_spill] sm:$0xff]  ;;  %v10766_v8 = vpop.eup %6324 }
 0x2fe   : > { %v4680_v27 = vsub.f32 %v13188_v34, %v13187_v35  ;;  %v13196_v18 = vunpack.c.h.bf16 %v13195_v5  ;;  %v3152_v60 = vadd.f32 1e-10, %v2836_v58  ;;  %v3151_v35 = vadd.f32 1e-10, %v2834_v47 }
 0x2ff   : > { %v4616_v50 = vand.u32 2147483647, %v4552_v13  ;;  %v4555_v62 = vsub.f32 %v13193_v17, %v13191_v31  ;;  %v13194_v55 = vmov %v13191_v31  ;;  %v13197_v34 = vunpack.c.l.bf16 %v13190_v26 }
 0x300   : > { %v4683_v52 = vsub.f32 %v13196_v18, %v13194_v55  ;;  %v4744_v22 = vand.u32 2147483647, %v4680_v27  ;;  %v13198_v36 = vunpack.c.l.bf16 %v13192_v25  ;;  %v3145_v13 = vadd.f32 1e-10, %v2822_v51  ;;  %v13201_v55 = vld [vmem:[#allocation49_spill] sm:$0xff]  ;;  %v3028_v51 = vpop.xlane.xlu1 %3027  ;;  %v13203_v25 = vld [vmem:[#allocation196_spill] sm:$0xff] }
 0x301   : > { %v4619_v48 = vand.u32 2147483647, %v4555_v62  ;;  %v13199_v11 = vmov %v13197_v34  ;;  %v13200_v31 = vunpack.c.l.bf16 %v13195_v5  ;;  %v3687_v58 = vsub.f32 %v13201_v55, %v10742_v3  ;;  %4906 = vrot.lane.b32.xlu1 %v13203_v25, %s6598_s14  ;;  %v13235_v3 = vld [vmem:[#allocation245_spill] sm:$0xff] }
 0x302   : > { %v4554_v6 = vsub.f32 %v13198_v36, %v13197_v34  ;;  %v4747_v44 = vand.u32 2147483647, %v4683_v52  ;;  %6334 = vrsqrt.f32 %v3152_v60  ;;  %v10770_v27 = vadd.f32 %v4744_v22, %v4616_v50  ;;  %v3026_v36 = vpop.xlane.xlu0 %3025  ;;  %v13204_v52 = vld [vmem:[#allocation280_spill] sm:$0xff]  ;;  %v13205_v50 = vld [vmem:[#allocation186_spill] sm:$0xff] }
 0x303   : > { %v4682_v17 = vsub.f32 %v13200_v31, %v13199_v11  ;;  %v10772_v18 = vmul.f32 %v3688_v40, %v3688_v40  ;;  %6336 = vrsqrt.f32 %v3151_v35  ;;  %v3248_v62 = vadd.f32 1e-10, %v3028_v51  ;;  %4904 = vrot.lane.b32.xlu0 %v13204_v52, %s6598_s14  ;;  %v13207_v22 = vld [vmem:[#allocation142_spill] sm:$0xff]  ;;  %v10784_v35 = vpop.eup %6326 }
 0x304   : > { %v4618_v47 = vand.u32 2147483647, %v4554_v6  ;;  %v10776_v26 = vadd.f32 %v4747_v44, %v4619_v48  ;;  %6338 = vrsqrt.f32 %v3146_v38  ;;  %v3247_v5 = vadd.f32 1e-10, %v3026_v36  ;;  %13209 = vst [vmem:[#allocation152_spill] sm:$0xff] %v10784_v35  ;;  %v13210_v6 = vld [vmem:[#allocation243_spill] sm:$0xff]  ;;  %v10795_v51 = vpop.eup %6328 }
 0x305   : > { %13202 = vst [vmem:[#allocation27_spill] sm:$0xff] %v10772_v18  ;;  %v4746_v11 = vand.u32 2147483647, %v4682_v17  ;;  %v13206_v60 = vunpack.c.h.bf16 %v13205_v50  ;;  %v13208_v40 = vunpack.c.h.bf16 %v13207_v22  ;;  %v10787_v31 = vmul.f32 %v6319_v10, %v13210_v6  ;;  %v13214_v38 = vld [vmem:[#allocation97_spill] sm:$0xff]  ;;  %13216 = vst [vmem:[#allocation58_spill] sm:$0xff] %v10795_v51  ;;  %v2832_v10 = vpop.xlane.xlu1 %2831  ;;  %4910 = vrot.lane.b32.xlu1 %v9923_v54, %s6598_s14  ;;  %v13225_v51 = vld [vmem:[#allocation191_spill] sm:$0xff] }
 0x306   : > { %6340 = vrsqrt.f32 %v3145_v13  ;;  %v13215_v17 = vunpack.c.h.bf16 %v13214_v38  ;;  %v10797_v36 = vmul.f32 %v3687_v58, %v3687_v58  ;;  %v3242_v25 = vadd.f32 1e-10, %v3016_v21 }
 0x307   : > { %v4557_v34 = vsub.f32 %v13208_v40, %v13206_v60  ;;  %13211 = vst [vmem:[#allocation109_spill] sm:$0xff] %v10787_v31  ;;  %v10789_v48 = vadd.f32 %v4746_v11, %v4618_v47  ;;  %v13213_v44 = vmov %v13206_v60  ;;  %6342 = vrsqrt.f32 %v3248_v62  ;;  %v10799_v60 = vpop.eup %6330  ;;  %v2830_v40 = vpop.xlane.xlu0 %2829 }
 0x308   : > { %v4685_v55 = vsub.f32 %v13215_v17, %v13213_v44  ;;  %13217 = vst [vmem:[#allocation52_spill] sm:$0xff] %v10797_v36  ;;  %13218 = vst [vmem:[#allocation57_spill] sm:$0xff] %v10799_v60  ;;  %6344 = vrsqrt.f32 %v3247_v5  ;;  %v13219_v47 = vunpack.c.l.bf16 %v13205_v50  ;;  %v13220_v11 = vunpack.c.l.bf16 %v13207_v22  ;;  %v13224_v17 = vld [vmem:[#allocation164_spill] sm:$0xff] }
 0x309   : > { %13212 = vst [vmem:[#allocation195_spill] sm:$0xff] %v10789_v48  ;;  %v4621_v52 = vand.u32 2147483647, %v4557_v34  ;;  %v13222_v21 = vunpack.c.l.bf16 %v13214_v38  ;;  %v10811_v34 = vpop.eup %6332  ;;  %v3150_v44 = vadd.f32 1e-10, %v2832_v10  ;;  %4908 = vrot.lane.b32.xlu0 %v13224_v17, %s6598_s14  ;;  %v13226_v54 = vunpack.c.h.bf16 %v13225_v51 }
 0x30a   : > { %v4749_v13 = vand.u32 2147483647, %v4685_v55  ;;  %v4556_v6 = vsub.f32 %v13220_v11, %v13219_v47  ;;  %v13221_v58 = vmov %v13219_v47  ;;  %13223 = vst [vmem:[#allocation205_spill] sm:$0xff] %v10811_v34  ;;  %v3149_v5 = vadd.f32 1e-10, %v2830_v40  ;;  %v13227_v55 = vld [vmem:[#allocation143_spill] sm:$0xff] }
 0x30b   : > { %v4684_v62 = vsub.f32 %v13222_v21, %v13221_v58  ;;  %v13228_v35 = vunpack.c.h.bf16 %v13227_v55  ;;  %v13229_v22 = vmov %v13226_v54  ;;  %v13230_v47 = vld [vmem:[#allocation100_spill] sm:$0xff]  ;;  %v3241_v38 = vadd.f32 1e-10, %v10721_v12  ;;  %v13233_v40 = vld [vmem:[#allocation235_spill] sm:$0xff] }
 0x30c   : > { %v13231_v11 = vunpack.c.h.bf16 %v13230_v47  ;;  %v10824_v58 = vadd.f32 %v4749_v13, %v4621_v52  ;;  %v4620_v21 = vand.u32 2147483647, %v4556_v6  ;;  %v10827_v36 = vmul.f32 %v6321_v63, %v13233_v40  ;;  %v6335_v6 = vpop.eup %6334 }
 0x30d   : > { %v4559_v31 = vsub.f32 %v13228_v35, %v13226_v54  ;;  %v4748_v10 = vand.u32 2147483647, %v4684_v62  ;;  %6346 = vrsqrt.f32 %v3150_v44  ;;  %v10830_v34 = vmul.f32 %v6323_v9, %v13235_v3  ;;  %v3024_v35 = vpop.xlane.xlu1 %3023  ;;  %v3022_v54 = vpop.xlane.xlu0 %3021  ;;  %v13240_v3 = vld [vmem:[#allocation80_spill] sm:$0xff] }
 0x30e   : > { %v4687_v50 = vsub.f32 %v13231_v11, %v13229_v22  ;;  %13232 = vst [vmem:[#allocation302_spill] sm:$0xff] %v10824_v58  ;;  %13234 = vst [vmem:[#allocation219_spill] sm:$0xff] %v10827_v36  ;;  %6348 = vrsqrt.f32 %v3149_v5  ;;  %v13236_v22 = vld [vmem:[#allocation214_spill] sm:$0xff]  ;;  %v13238_v52 = vunpack.c.l.bf16 %v13225_v51  ;;  %v13239_v13 = vunpack.c.l.bf16 %v13227_v55  ;;  %4912 = vrot.lane.b32.xlu0 %v13240_v3, %s6598_s14  ;;  %v6337_v44 = vpop.eup %6336  ;;  %v13242_v5 = vld [vmem:[#allocation259_spill] sm:$0xff] }
 0x30f   : > { %v4623_v17 = vand.u32 2147483647, %v4559_v31  ;;  %4914 = vrot.lane.b32.xlu1 %v13236_v22, %s6598_s14  ;;  %v10834_v12 = vadd.f32 %v4748_v10, %v4620_v21  ;;  %6350 = vrsqrt.f32 %v3242_v25  ;;  %v3246_v31 = vadd.f32 1e-10, %v3024_v35  ;;  %v10849_v40 = vpop.eup %6338  ;;  %v13246_v25 = vld [vmem:[#allocation95_spill] sm:$0xff]  ;;  %v13253_v51 = vld [vmem:[#allocation50_spill] sm:$0xff] }
 0x310   : > { %v4751_v18 = vand.u32 2147483647, %v4687_v50  ;;  %v4558_v63 = vsub.f32 %v13239_v13, %v13238_v52  ;;  %v3245_v62 = vadd.f32 1e-10, %v3022_v54  ;;  %6352 = vrsqrt.f32 %v3241_v38  ;;  %13245 = vst [vmem:[#allocation111_spill] sm:$0xff] %v10849_v40  ;;  %v13247_v54 = vld [vmem:[#allocation257_spill] sm:$0xff] }
 0x311   : > { %13237 = vst [vmem:[#allocation59_spill] sm:$0xff] %v10834_v12  ;;  %v3536_v11 = vmul.f32 %v6335_v6, %v13242_v5  ;;  %v13243_v21 = vmov %v13238_v52  ;;  %v13244_v10 = vunpack.c.l.bf16 %v13230_v47  ;;  %v10853_v35 = vmul.f32 %v10766_v8, %v13246_v25  ;;  %v13250_v38 = vld [vmem:[#allocation146_spill] sm:$0xff]  ;;  %v2844_v6 = vpop.xlane.xlu1 %2843  ;;  %v2842_v3 = vpop.xlane.xlu0 %2841  ;;  %v13254_v5 = vld [vmem:[#allocation148_spill] sm:$0xff]  ;;  %v13271_v12 = vld [vmem:[#allocation261_spill] sm:$0xff] }
 0x312   : > { %v10842_v9 = vadd.f32 %v4751_v18, %v4623_v17  ;;  %v4622_v50 = vand.u32 2147483647, %v4558_v63  ;;  %v3535_v22 = vmul.f32 %v6337_v44, %v13247_v54  ;;  %6354 = vrsqrt.f32 %v3246_v31  ;;  %v13248_v18 = vld [vmem:[#allocation201_spill] sm:$0xff]  ;;  %v10862_v63 = vpop.eup %6340  ;;  %v13256_v31 = vld [vmem:[#allocation103_spill] sm:$0xff]  ;;  %v13258_v54 = vld [vmem:[#allocation134_spill] sm:$0xff] }
 0x313   : > { %v4686_v55 = vsub.f32 %v13244_v10, %v13243_v21  ;;  %v13249_v17 = vunpack.c.h.bf16 %v13248_v18  ;;  %v13251_v52 = vunpack.c.h.bf16 %v13250_v38  ;;  %13252 = vst [vmem:[#allocation62_spill] sm:$0xff] %v10862_v63  ;;  %v3792_v47 = vsub.f32 %v3536_v11, %v13253_v51  ;;  %4918 = vrot.lane.b32.xlu1 %v13254_v5, %s6598_s14  ;;  %v6343_v25 = vpop.eup %6342  ;;  %v13259_v11 = vld [vmem:[#allocation3_spill] sm:$0xff] }
 0x314   : > { %13241 = vst [vmem:[#allocation153_spill] sm:$0xff] %v10842_v9  ;;  %6356 = vrsqrt.f32 %v3245_v62  ;;  %v13257_v21 = vunpack.c.h.bf16 %v13256_v31  ;;  %v3155_v63 = vadd.f32 1e-10, %v2842_v3  ;;  %4916 = vrot.lane.b32.xlu0 %v13259_v11, %s6598_s14  ;;  %v6345_v51 = vpop.eup %6344  ;;  %v13260_v5 = vld [vmem:[#allocation267_spill] sm:$0xff] }
 0x315   : > { %v10860_v13 = vsub.f32 %v13251_v52, %v13249_v17  ;;  %v4750_v8 = vand.u32 2147483647, %v4686_v55  ;;  %v13255_v44 = vmov %v13249_v17  ;;  %v3791_v17 = vsub.f32 %v3535_v22, %v13258_v54  ;;  %v10884_v22 = vld [vmem:[%s11757_s5] ss:$0 sm:$0xff]  ;;  %v13262_v3 = vld [vmem:[#allocation131_spill] sm:$0xff]  ;;  %v3036_v62 = vpop.xlane.xlu1 %3035  ;;  %v3034_v60 = vpop.xlane.xlu0 %3033 }
 0x316   : > { %v10871_v10 = vsub.f32 %v13257_v21, %v13255_v44  ;;  %v3156_v52 = vadd.f32 1e-10, %v2844_v6  ;;  %v3856_v40 = vmul.f32 %v3792_v47, %v3792_v47  ;;  %v3632_v55 = vmul.f32 %v6343_v25, %v13260_v5  ;;  %v13266_v5 = vld [vmem:[#allocation210_spill] sm:$0xff] }
 0x317   : > { %v10878_v36 = vadd.f32 %v4750_v8, %v4622_v50  ;;  %v3855_v6 = vmul.f32 %v3791_v17, %v3791_v17  ;;  %v3631_v21 = vmul.f32 %v6345_v51, %v13262_v3  ;;  %v13263_v54 = vunpack.c.l.bf16 %v13248_v18  ;;  %v13265_v8 = vld [vmem:[#allocation147_spill] sm:$0xff]  ;;  %4922 = vrot.lane.b32.xlu1 %v10090_v2, %s6598_s14  ;;  %v6347_v17 = vpop.eup %6346 }
 0x318   : > { %6358 = vrsqrt.f32 %v3156_v52  ;;  %v13264_v47 = vunpack.c.l.bf16 %v13250_v38  ;;  %v3920_v50 = vadd.f32 %v3856_v40, %v10105_v30  ;;  %v3696_v25 = vsub.f32 %v13265_v8, %v3632_v55  ;;  %v4055_v52 = vld [vmem:[%s6675_s15 + $0x18] sm:$0xff]  ;;  %v13267_v51 = vld [vmem:[#allocation99_spill] sm:$0xff]  ;;  %v6349_v8 = vpop.eup %6348 }
 0x319   : > { %13261 = vst [vmem:[#allocation209_spill] sm:$0xff] %v10878_v36  ;;  %v3824_v44 = vsub.f32 %v13266_v5, %v3632_v55  ;;  %6360 = vrsqrt.f32 %v3155_v63  ;;  %v3919_v3 = vadd.f32 %v3855_v6, %v13267_v51  ;;  %v13268_v38 = vld [vmem:[#allocation225_spill] sm:$0xff]  ;;  %v3252_v30 = vadd.f32 1e-10, %v3036_v62  ;;  %v4054_v55 = vld [vmem:[%s6675_s15 + $0x10] sm:$0xff]  ;;  %v10907_v58 = vpop.eup %6350 }
 0x31a   : > { %v10891_v11 = vsub.f32 %v13264_v47, %v13263_v54  ;;  %v3695_v54 = vsub.f32 %v13268_v38, %v3631_v21  ;;  %v13269_v47 = vld [vmem:[#allocation193_spill] sm:$0xff]  ;;  %v3991_v63 = vmul.f32 %v10884_v22, %v3920_v50  ;;  %v3760_v5 = vmul.f32 %v3696_v25, %v3696_v25  ;;  %13272 = vst [vmem:[#allocation56_spill] sm:$0xff] %v10907_v58  ;;  %v13275_v50 = vld [vmem:[#allocation6_spill] sm:$0xff] }
 0x31b   : > { %v3823_v36 = vsub.f32 %v13269_v47, %v3631_v21  ;;  %v13270_v40 = vld [vmem:[#allocation5_spill] sm:$0xff]  ;;  %v3888_v9 = vmul.f32 %v3824_v44, %v3824_v44  ;;  %v3534_v2 = vmul.f32 %v6347_v17, %v13271_v12  ;;  %v3990_v6 = vmul.f32 %v10884_v22, %v3919_v3  ;;  %v13273_v21 = vld [vmem:[#allocation258_spill] sm:$0xff]  ;;  %v10911_v47 = vpop.eup %6352  ;;  %v2840_v44 = vpop.xlane.xlu1 %2839  ;;  %v13276_v17 = vld [vmem:[#allocation87_spill] sm:$0xff] }
 0x31c   : > { %4920 = vrot.lane.b32.xlu0 %v13270_v40, %s6598_s14  ;;  %v3759_v51 = vmul.f32 %v3695_v54, %v3695_v54  ;;  %v3533_v62 = vmul.f32 %v6349_v8, %v13273_v21  ;;  %13274 = vst [vmem:[#allocation207_spill] sm:$0xff] %v10911_v47  ;;  %v4119_v40 = vadd.f32 %v4055_v52, %v3991_v63  ;;  %6362 = vrsqrt.f32 %v3252_v30  ;;  %v2838_v12 = vpop.xlane.xlu0 %2837  ;;  %v6355_v3 = vpop.eup %6354  ;;  %v13277_v8 = vld [vmem:[#allocation72_spill] sm:$0xff] }
 0x31d   : > { %v3887_v38 = vmul.f32 %v3823_v36, %v3823_v36  ;;  %v3952_v48 = vadd.f32 %v3888_v9, %v3760_v5  ;;  %v3790_v25 = vsub.f32 %v3534_v2, %v13275_v50  ;;  %4926 = vrot.lane.b32.xlu1 %v13276_v17, %s6598_s14  ;;  %v4118_v54 = vadd.f32 %v4054_v55, %v3990_v6  ;;  %v4087_v36 = vld [vmem:[%s6675_s15 + $0x118] sm:$0xff]  ;;  %v4086_v30 = vld [vmem:[%s6675_s15 + $0x110] sm:$0xff] }
 0x31e   : > { %v3789_v21 = vsub.f32 %v3533_v62, %v13277_v8  ;;  %v3251_v47 = vadd.f32 1e-10, %v3034_v60  ;;  %v6357_v9 = vpop.eup %6356  ;;  %4183 = vst [vmem:[%s6675_s15 + $0x18] sm:$0xff] %v4119_v40  ;;  %v13278_v5 = vld [vmem:[#allocation268_spill] sm:$0xff]  ;;  %v3154_v50 = vadd.f32 1e-10, %v2840_v44 }
 0x31f   : > { %v3951_v58 = vadd.f32 %v3887_v38, %v3759_v51  ;;  %v4023_v52 = vmul.f32 %v10884_v22, %v3952_v48  ;;  %v3854_v63 = vmul.f32 %v3790_v25, %v3790_v25  ;;  %v3630_v2 = vmul.f32 %v6355_v3, %v13278_v5  ;;  %4182 = vst [vmem:[%s6675_s15 + $0x10] sm:$0xff] %v4118_v54  ;;  %v13279_v51 = vld [vmem:[#allocation262_spill] sm:$0xff]  ;;  %v13280_v62 = vld [vmem:[#allocation167_spill] sm:$0xff]  ;;  %v13281_v40 = vld [vmem:[#allocation61_spill] sm:$0xff]  ;;  %v3032_v17 = vpop.xlane.xlu1 %3031 }
 0x320   : > { %4924 = vrot.lane.b32.xlu0 %v10156_v46, %s6598_s14  ;;  %v3853_v6 = vmul.f32 %v3789_v21, %v3789_v21  ;;  %v3629_v38 = vmul.f32 %v6357_v9, %v13279_v51  ;;  %6364 = vrsqrt.f32 %v3251_v47  ;;  %v3030_v3 = vpop.xlane.xlu0 %3029  ;;  %v4053_v54 = vld [vmem:[%s6675_s15 + $0x8] sm:$0xff]  ;;  %v13282_v8 = vld [vmem:[#allocation216_spill] sm:$0xff] }
 0x321   : > { %v4022_v55 = vmul.f32 %v10884_v22, %v3951_v58  ;;  %v4151_v60 = vadd.f32 %v4087_v36, %v4023_v52  ;;  %v3918_v46 = vadd.f32 %v3854_v63, %v10184_v59  ;;  %v3694_v48 = vsub.f32 %v13280_v62, %v3630_v2  ;;  %4930 = vrot.lane.b32.xlu1 %v10163_v39, %s6598_s14  ;;  %v13283_v21 = vld [vmem:[#allocation92_spill] sm:$0xff]  ;;  %v4052_v63 = vld [vmem:[%s6675_s15] sm:$0xff] }
 0x322   : > { %v3822_v25 = vsub.f32 %v13281_v40, %v3630_v2  ;;  %v6359_v58 = vpop.eup %6358  ;;  %v3917_v47 = vadd.f32 %v3853_v6, %v10236_v57  ;;  %v3693_v36 = vsub.f32 %v10174_v1, %v3629_v38  ;;  %v3821_v59 = vsub.f32 %v13282_v8, %v3629_v38  ;;  %v13284_v2 = vld [vmem:[#allocation274_spill] sm:$0xff]  ;;  %v13285_v6 = vld [vmem:[#allocation271_spill] sm:$0xff] }
 0x323   : > { %v4150_v44 = vadd.f32 %v4086_v30, %v4022_v55  ;;  %v6361_v9 = vpop.eup %6360  ;;  %4215 = vst [vmem:[%s6675_s15 + $0x118] sm:$0xff] %v4151_v60  ;;  %v3989_v52 = vmul.f32 %v10884_v22, %v3918_v46  ;;  %v3758_v5 = vmul.f32 %v3694_v48, %v3694_v48  ;;  %v3540_v30 = vmul.f32 %v6359_v58, %v13284_v2  ;;  %v13286_v60 = vld [vmem:[#allocation8_spill] sm:$0xff]  ;;  %v2852_v46 = vpop.xlane.xlu1 %2851  ;;  %v4085_v58 = vld [vmem:[%s6675_s15 + $0x108] sm:$0xff]  ;;  %v13289_v2 = vld [vmem:[#allocation165_spill] sm:$0xff] }
 0x324   : > { %4928 = vrot.lane.b32.xlu0 %v13283_v21, %s6598_s14  ;;  %v3886_v39 = vmul.f32 %v3822_v25, %v3822_v25  ;;  %v3988_v57 = vmul.f32 %v10884_v22, %v3917_v47  ;;  %v3757_v55 = vmul.f32 %v3693_v36, %v3693_v36  ;;  %v3885_v1 = vmul.f32 %v3821_v59, %v3821_v59  ;;  %v2850_v48 = vpop.xlane.xlu0 %2849  ;;  %v13287_v47 = vld [vmem:[#allocation81_spill] sm:$0xff] }
 0x325   : > { %4214 = vst [vmem:[%s6675_s15 + $0x110] sm:$0xff] %v4150_v44  ;;  %v3539_v51 = vmul.f32 %v6361_v9, %v13285_v6  ;;  %v4117_v38 = vadd.f32 %v4053_v54, %v3989_v52  ;;  %v3796_v40 = vsub.f32 %v3540_v30, %v13286_v60  ;;  %6366 = vrsqrt.f32 %v3154_v50  ;;  %4934 = vrot.lane.b32.xlu1 %v10215_v24, %s6598_s14  ;;  %v4084_v50 = vld [vmem:[%s6675_s15 + $0x100] sm:$0xff]  ;;  %v4059_v6 = vld [vmem:[%s6675_s15 + $0x38] sm:$0xff] }
 0x326   : > { %v3950_v62 = vadd.f32 %v3886_v39, %v3758_v5  ;;  %v4116_v25 = vadd.f32 %v4052_v63, %v3988_v57  ;;  %v3949_v44 = vadd.f32 %v3885_v1, %v3757_v55  ;;  %v3153_v8 = vadd.f32 1e-10, %v2838_v12  ;;  %v6363_v54 = vpop.eup %6362  ;;  %v13288_v5 = vld [vmem:[#allocation278_spill] sm:$0xff] }
 0x327   : > { %v3795_v36 = vsub.f32 %v3539_v51, %v13287_v47  ;;  %4181 = vst [vmem:[%s6675_s15 + $0x8] sm:$0xff] %v4117_v38  ;;  %v3860_v21 = vmul.f32 %v3796_v40, %v3796_v40  ;;  %v3250_v9 = vadd.f32 1e-10, %v3032_v17  ;;  %v3249_v52 = vadd.f32 1e-10, %v3030_v3  ;;  %v3044_v57 = vpop.xlane.xlu1 %3043  ;;  %v13290_v17 = vld [vmem:[#allocation166_spill] sm:$0xff] }
 0x328   : > { %4932 = vrot.lane.b32.xlu0 %v10228_v23, %s6598_s14  ;;  %v4021_v59 = vmul.f32 %v10884_v22, %v3950_v62  ;;  %4180 = vst [vmem:[%s6675_s15] sm:$0xff] %v4116_v25  ;;  %v4020_v24 = vmul.f32 %v10884_v22, %v3949_v44  ;;  %v3636_v39 = vmul.f32 %v6363_v54, %v13288_v5  ;;  %6368 = vrsqrt.f32 %v3153_v8  ;;  %v3042_v55 = vpop.xlane.xlu0 %3041  ;;  %v13291_v38 = vld [vmem:[#allocation132_spill] sm:$0xff]  ;;  %v13292_v60 = vld [vmem:[#allocation14_spill] sm:$0xff] }
 0x329   : > { %v3859_v63 = vmul.f32 %v3795_v36, %v3795_v36  ;;  %v3924_v23 = vadd.f32 %v3860_v21, %v13289_v2  ;;  %6370 = vrsqrt.f32 %v3250_v9  ;;  %v3160_v30 = vadd.f32 1e-10, %v2852_v46  ;;  %4938 = vrot.lane.b32.xlu1 %v13290_v17, %s6598_s14  ;;  %v4058_v25 = vld [vmem:[%s6675_s15 + $0x30] sm:$0xff] }
 0x32a   : > { %v4149_v12 = vadd.f32 %v4085_v58, %v4021_v59  ;;  %v6365_v3 = vpop.eup %6364  ;;  %v4148_v1 = vadd.f32 %v4084_v50, %v4020_v24  ;;  %v3700_v62 = vsub.f32 %v13291_v38, %v3636_v39  ;;  %v3828_v40 = vsub.f32 %v13292_v60, %v3636_v39  ;;  %v13293_v58 = vld [vmem:[#allocation160_spill] sm:$0xff]  ;;  %v13294_v59 = vld [vmem:[#allocation106_spill] sm:$0xff] }
 0x32b   : > { %v3923_v51 = vadd.f32 %v3859_v63, %v10288_v16  ;;  %v3995_v46 = vmul.f32 %v10884_v22, %v3924_v23  ;;  %v3635_v44 = vmul.f32 %v6365_v3, %v13293_v58  ;;  %6372 = vrsqrt.f32 %v3249_v52  ;;  %v2848_v9 = vpop.xlane.xlu1 %2847  ;;  %v13301_v58 = vld [vmem:[#allocation127_spill] sm:$0xff] }
 0x32c   : > { %4936 = vrot.lane.b32.xlu0 %v10284_v7, %s6598_s14  ;;  %4213 = vst [vmem:[%s6675_s15 + $0x108] sm:$0xff] %v4149_v12  ;;  %v3159_v47 = vadd.f32 1e-10, %v2850_v48  ;;  %4212 = vst [vmem:[%s6675_s15 + $0x100] sm:$0xff] %v4148_v1  ;;  %v3764_v8 = vmul.f32 %v3700_v62, %v3700_v62  ;;  %v3892_v16 = vmul.f32 %v3828_v40, %v3828_v40  ;;  %6374 = vrsqrt.f32 %v3160_v30  ;;  %v13295_v7 = vld [vmem:[#allocation13_spill] sm:$0xff]  ;;  %v2846_v24 = vpop.xlane.xlu0 %2845  ;;  %v13296_v1 = vld [vmem:[#allocation276_spill] sm:$0xff] }
 0x32d   : > { %v3994_v36 = vmul.f32 %v10884_v22, %v3923_v51  ;;  %v4123_v54 = vadd.f32 %v4059_v6, %v3995_v46  ;;  %v3699_v50 = vsub.f32 %v13294_v59, %v3635_v44  ;;  %v3827_v21 = vsub.f32 %v13295_v7, %v3635_v44  ;;  %4942 = vrot.lane.b32.xlu1 %v10304_v45, %s6598_s14  ;;  %v4091_v12 = vld [vmem:[%s6675_s15 + $0x138] sm:$0xff] }
 0x32e   : > { %6376 = vrsqrt.f32 %v3159_v47  ;;  %v3956_v52 = vadd.f32 %v3892_v16, %v3764_v8  ;;  %v3256_v63 = vadd.f32 1e-10, %v3044_v57  ;;  %v3255_v5 = vadd.f32 1e-10, %v3042_v55  ;;  %v13302_v8 = vld [vmem:[#allocation273_spill] sm:$0xff] }
 0x32f   : > { %v4122_v48 = vadd.f32 %v4058_v25, %v3994_v36  ;;  %v6367_v39 = vpop.eup %6366  ;;  %4187 = vst [vmem:[%s6675_s15 + $0x38] sm:$0xff] %v4123_v54  ;;  %v3763_v2 = vmul.f32 %v3699_v50, %v3699_v50  ;;  %v3891_v23 = vmul.f32 %v3827_v21, %v3827_v21  ;;  %v3158_v30 = vadd.f32 1e-10, %v2848_v9  ;;  %v3040_v51 = vpop.xlane.xlu1 %3039  ;;  %v4090_v25 = vld [vmem:[%s6675_s15 + $0x130] sm:$0xff]  ;;  %v13303_v54 = vld [vmem:[#allocation281_spill] sm:$0xff] }
 0x330   : > { %4940 = vrot.lane.b32.xlu0 %v10318_v14, %s6598_s14  ;;  %v3157_v17 = vadd.f32 1e-10, %v2846_v24  ;;  %v4027_v3 = vmul.f32 %v10884_v22, %v3956_v52  ;;  %v3538_v45 = vmul.f32 %v6367_v39, %v13296_v1  ;;  %6378 = vrsqrt.f32 %v3256_v63  ;;  %v3038_v38 = vpop.xlane.xlu0 %3037  ;;  %v13304_v9 = vld [vmem:[#allocation73_spill] sm:$0xff]  ;;  %v13305_v52 = vld [vmem:[#allocation107_spill] sm:$0xff] }
 0x331   : > { %4186 = vst [vmem:[%s6675_s15 + $0x30] sm:$0xff] %v4122_v48  ;;  %v13297_v57 = vand.u32 2147483647, %v10860_v13  ;;  %v13298_v55 = vand.u32 2147483647, %v10871_v10  ;;  %v3955_v14 = vadd.f32 %v3891_v23, %v3763_v2  ;;  %6380 = vrsqrt.f32 %v3255_v5  ;;  %4946 = vrot.lane.b32.xlu1 %v10336_v61, %s6598_s14  ;;  %v13307_v5 = vld [vmem:[#allocation149_spill] sm:$0xff] }
 0x332   : > { %v4624_v62 = vand.u32 2147483647, %v10891_v11  ;;  %v13299_v60 = vunpack.c.l.bf16 %v13248_v18  ;;  %v13300_v40 = vunpack.c.l.bf16 %v13256_v31  ;;  %v6369_v13 = vpop.eup %6368  ;;  %v4155_v10 = vadd.f32 %v4091_v12, %v4027_v3  ;;  %v13310_v3 = vld [vmem:[#allocation114_spill] sm:$0xff] }
 0x333   : > { %v10988_v6 = vadd.f32 %v13298_v55, %v13297_v57  ;;  %v3794_v44 = vsub.f32 %v3538_v45, %v13301_v58  ;;  %6382 = vrsqrt.f32 %v3158_v30  ;;  %v3254_v47 = vadd.f32 1e-10, %v3040_v51  ;;  %v6371_v36 = vpop.eup %6370  ;;  %v2860_v24 = vpop.xlane.xlu1 %2859  ;;  %v13309_v30 = vld [vmem:[#allocation290_spill] sm:$0xff]  ;;  %v13311_v45 = vld [vmem:[#allocation277_spill] sm:$0xff]  ;;  %v13312_v51 = vld [vmem:[#allocation283_spill] sm:$0xff] }
 0x334   : > { %v10997_v46 = vsub.f32 %v13300_v40, %v13299_v60  ;;  %4944 = vrot.lane.b32.xlu0 %v10370_v42, %s6598_s14  ;;  %v4026_v61 = vmul.f32 %v10884_v22, %v3955_v14  ;;  %v3537_v16 = vmul.f32 %v6369_v13, %v13302_v8  ;;  %6384 = vrsqrt.f32 %v3157_v17  ;;  %4219 = vst [vmem:[%s6675_s15 + $0x138] sm:$0xff] %v4155_v10  ;;  %v2858_v48 = vpop.xlane.xlu0 %2857 }
 0x335   : > { %v3253_v18 = vadd.f32 1e-10, %v3038_v38  ;;  %v3858_v31 = vmul.f32 %v3794_v44, %v3794_v44  ;;  %v3634_v59 = vmul.f32 %v6371_v36, %v13303_v54  ;;  %6386 = vrsqrt.f32 %v3254_v47  ;;  %v6373_v7 = vpop.eup %6372  ;;  %4950 = vrot.lane.b32.xlu1 %v10386_v19, %s6598_s14  ;;  %v4057_v19 = vld [vmem:[%s6675_s15 + $0x28] sm:$0xff]  ;;  %v13313_v44 = vld [vmem:[#allocation17_spill] sm:$0xff]  ;;  %v13314_v47 = vld [vmem:[#allocation98_spill] sm:$0xff] }
 0x336   : > { %v4752_v50 = vand.u32 2147483647, %v10997_v46  ;;  %v4154_v21 = vadd.f32 %v4090_v25, %v4026_v61  ;;  %v3793_v42 = vsub.f32 %v3537_v16, %v13304_v9  ;;  %v13306_v63 = vunpack.c.h.bf16 %v13305_v52  ;;  %v6375_v2 = vpop.eup %6374  ;;  %v13315_v61 = vld [vmem:[#allocation189_spill] sm:$0xff]  ;;  %v4089_v9 = vld [vmem:[%s6675_s15 + $0x128] sm:$0xff] }
 0x337   : > { %6388 = vrsqrt.f32 %v3253_v18  ;;  %v13308_v39 = vunpack.c.h.bf16 %v13307_v5  ;;  %v3922_v23 = vadd.f32 %v3858_v31, %v10323_v32  ;;  %v3698_v17 = vsub.f32 %v13309_v30, %v3634_v59  ;;  %v11032_v16 = vpop.xlane.xlu1 %3051  ;;  %v13318_v30 = vld [vmem:[#allocation284_spill] sm:$0xff] }
 0x338   : > { %v3826_v1 = vsub.f32 %v13310_v3, %v3634_v59  ;;  %v3633_v57 = vmul.f32 %v6373_v7, %v13311_v45  ;;  %4948 = vrot.lane.b32.xlu0 %v10398_v53, %s6598_s14  ;;  %v6377_v55 = vpop.eup %6376  ;;  %4218 = vst [vmem:[%s6675_s15 + $0x130] sm:$0xff] %v4154_v21  ;;  %v3857_v14 = vmul.f32 %v3793_v42, %v3793_v42  ;;  %v3164_v60 = vadd.f32 1e-10, %v2860_v24  ;;  %v11034_v18 = vpop.xlane.xlu0 %3049  ;;  %v13319_v45 = vld [vmem:[#allocation135_spill] sm:$0xff] }
 0x339   : > { %v11015_v12 = vsub.f32 %v13308_v39, %v13306_v63  ;;  %v3544_v38 = vmul.f32 %v6375_v2, %v13312_v51  ;;  %v3163_v40 = vadd.f32 1e-10, %v2858_v48  ;;  %v3993_v32 = vmul.f32 %v10884_v22, %v3922_v23  ;;  %4954 = vrot.lane.b32.xlu1 %v10434_v37, %s6598_s14  ;;  %v13316_v48 = vld [vmem:[#allocation7_spill] sm:$0xff] }
 0x33a   : > { %v3762_v13 = vmul.f32 %v3698_v17, %v3698_v17  ;;  %v3890_v10 = vmul.f32 %v3826_v1, %v3826_v1  ;;  %v3697_v25 = vsub.f32 %v10311_v41, %v3633_v57  ;;  %v3921_v58 = vadd.f32 %v3857_v14, %v10348_v15  ;;  %v6379_v31 = vpop.eup %6378  ;;  %v4056_v41 = vld [vmem:[%s6675_s15 + $0x20] sm:$0xff]  ;;  %v13317_v2 = vld [vmem:[#allocation287_spill] sm:$0xff] }
 0x33b   : > { %v3825_v53 = vsub.f32 %v13313_v44, %v3633_v57  ;;  %v3800_v36 = vsub.f32 %v3544_v38, %v13314_v47  ;;  %v3543_v8 = vmul.f32 %v6377_v55, %v13315_v61  ;;  %v4121_v54 = vadd.f32 %v4057_v19, %v3993_v32  ;;  %v6381_v7 = vpop.eup %6380  ;;  %v11049_v19 = vpop.xlane.xlu1 %2855  ;;  %v13320_v32 = vld [vmem:[#allocation221_spill] sm:$0xff] }
 0x33c   : > { %v3954_v59 = vadd.f32 %v3890_v10, %v3762_v13  ;;  %v3761_v15 = vmul.f32 %v3697_v25, %v3697_v25  ;;  %6390 = vrsqrt.f32 %v3164_v60  ;;  %4952 = vrot.lane.b32.xlu0 %v10440_v33, %s6598_s14  ;;  %v3992_v21 = vmul.f32 %v10884_v22, %v3921_v58  ;;  %v11051_v14 = vpop.xlane.xlu0 %2853  ;;  %v4088_v60 = vld [vmem:[%s6675_s15 + $0x120] sm:$0xff]  ;;  %v13322_v58 = vld [vmem:[#allocation105_spill] sm:$0xff] }
 0x33d   : > { %v3889_v42 = vmul.f32 %v3825_v53, %v3825_v53  ;;  %v3864_v24 = vmul.f32 %v3800_v36, %v3800_v36  ;;  %v3799_v63 = vsub.f32 %v3543_v8, %v13316_v48  ;;  %v6383_v39 = vpop.eup %6382  ;;  %4185 = vst [vmem:[%s6675_s15 + $0x28] sm:$0xff] %v4121_v54  ;;  %v3640_v23 = vmul.f32 %v6379_v31, %v13317_v2  ;;  %v13321_v10 = vld [vmem:[#allocation250_spill] sm:$0xff]  ;;  %v13323_v36 = vld [vmem:[#allocation124_spill] sm:$0xff]  ;;  %v13324_v8 = vld [vmem:[#allocation21_spill] sm:$0xff] }
 0x33e   : > { %v4025_v37 = vmul.f32 %v10884_v22, %v3954_v59  ;;  %v3639_v17 = vmul.f32 %v6381_v7, %v13318_v30  ;;  %6392 = vrsqrt.f32 %v3163_v40  ;;  %v6385_v33 = vpop.eup %6384  ;;  %v4120_v3 = vadd.f32 %v4056_v41, %v3992_v21  ;;  %4958 = vrot.lane.b32.xlu1 %v10454_v28, %s6598_s14  ;;  %v4063_v40 = vld [vmem:[%s6675_s15 + $0x58] sm:$0xff]  ;;  %v4062_v54 = vld [vmem:[%s6675_s15 + $0x50] sm:$0xff]  ;;  %v13326_v2 = vld [vmem:[#allocation79_spill] sm:$0xff] }
 0x33f   : > { %v3953_v1 = vadd.f32 %v3889_v42, %v3761_v15  ;;  %v3928_v57 = vadd.f32 %v3864_v24, %v13319_v45  ;;  %v3863_v55 = vmul.f32 %v3799_v63, %v3799_v63  ;;  %v6387_v51 = vpop.eup %6386  ;;  %v3704_v13 = vsub.f32 %v13320_v32, %v3640_v23  ;;  %v13325_v7 = vld [vmem:[#allocation204_spill] sm:$0xff]  ;;  %v11071_v48 = vpop.xlane.xlu1 %3047  ;;  %v13327_v30 = vld [vmem:[#allocation282_spill] sm:$0xff]  ;;  %v4095_v45 = vld [vmem:[%s6675_s15 + $0x158] sm:$0xff] }
 0x340   : > { %v4153_v38 = vadd.f32 %v4089_v9, %v4025_v37  ;;  %v3832_v25 = vsub.f32 %v13321_v10, %v3640_v23  ;;  %v3703_v44 = vsub.f32 %v13322_v58, %v3639_v17  ;;  %4956 = vrot.lane.b32.xlu0 %v10488_v0, %s6598_s14  ;;  %4184 = vst [vmem:[%s6675_s15 + $0x20] sm:$0xff] %v4120_v3  ;;  %v11073_v63 = vpop.xlane.xlu0 %3045  ;;  %v4094_v32 = vld [vmem:[%s6675_s15 + $0x150] sm:$0xff]  ;;  %v13332_v58 = vld [vmem:[#allocation23_spill] sm:$0xff] }
 0x341   : > { %v6389_v53 = vpop.eup %6388  ;;  %v4024_v47 = vmul.f32 %v10884_v22, %v3953_v1  ;;  %v3999_v28 = vmul.f32 %v10884_v22, %v3928_v57  ;;  %v3927_v61 = vadd.f32 %v3863_v55, %v13323_v36  ;;  %v3831_v31 = vsub.f32 %v13324_v8, %v3639_v17  ;;  %v13329_v55 = vld [vmem:[#allocation286_spill] sm:$0xff] }
 0x342   : > { %4217 = vst [vmem:[%s6675_s15 + $0x128] sm:$0xff] %v4153_v38  ;;  %v3768_v41 = vmul.f32 %v3704_v13, %v3704_v13  ;;  %v3896_v59 = vmul.f32 %v3832_v25, %v3832_v25  ;;  %v3767_v15 = vmul.f32 %v3703_v44, %v3703_v44  ;;  %v3542_v21 = vmul.f32 %v6383_v39, %v13325_v7  ;;  %v13328_v39 = vld [vmem:[#allocation288_spill] sm:$0xff]  ;;  %v13330_v13 = vld [vmem:[#allocation170_spill] sm:$0xff] }
 0x343   : > { %v4152_v0 = vadd.f32 %v4088_v60, %v4024_v47  ;;  %v4127_v9 = vadd.f32 %v4063_v40, %v3999_v28  ;;  %v3998_v42 = vmul.f32 %v10884_v22, %v3927_v61  ;;  %v3895_v24 = vmul.f32 %v3831_v31, %v3831_v31  ;;  %4962 = vrot.lane.b32.xlu1 %v10502_v43, %s6598_s14  ;;  %v13333_v47 = vld [vmem:[#allocation239_spill] sm:$0xff]  ;;  %v2868_v36 = vpop.xlane.xlu1 %2867  ;;  %v13336_v7 = vld [vmem:[#allocation144_spill] sm:$0xff] }
 0x344   : > { %v3960_v37 = vadd.f32 %v3896_v59, %v3768_v41  ;;  %v3798_v23 = vsub.f32 %v3542_v21, %v13326_v2  ;;  %v3541_v17 = vmul.f32 %v6385_v33, %v13327_v30  ;;  %v3638_v3 = vmul.f32 %v6387_v51, %v13328_v39  ;;  %4960 = vrot.lane.b32.xlu0 %v10513_v20, %s6598_s14  ;;  %v13331_v51 = vld [vmem:[#allocation82_spill] sm:$0xff]  ;;  %v2866_v61 = vpop.xlane.xlu0 %2865 }
 0x345   : > { %4216 = vst [vmem:[%s6675_s15 + $0x120] sm:$0xff] %v4152_v0  ;;  %4191 = vst [vmem:[%s6675_s15 + $0x58] sm:$0xff] %v4127_v9  ;;  %v4126_v1 = vadd.f32 %v4062_v54, %v3998_v42  ;;  %v3959_v57 = vadd.f32 %v3895_v24, %v3767_v15  ;;  %v3637_v38 = vmul.f32 %v6389_v53, %v13329_v55  ;;  %v3260_v43 = vadd.f32 1e-10, %v11032_v16  ;;  %v13334_v53 = vld [vmem:[#allocation26_spill] sm:$0xff]  ;;  %v13335_v54 = vld [vmem:[#allocation292_spill] sm:$0xff] }
 0x346   : > { %v6391_v60 = vpop.eup %6390  ;;  %v4031_v40 = vmul.f32 %v10884_v22, %v3960_v37  ;;  %v3862_v33 = vmul.f32 %v3798_v23, %v3798_v23  ;;  %v3797_v10 = vsub.f32 %v3541_v17, %v13330_v13  ;;  %v3702_v25 = vsub.f32 %v13331_v51, %v3638_v3  ;;  %v4061_v0 = vld [vmem:[%s6675_s15 + $0x48] sm:$0xff]  ;;  %v13338_v23 = vld [vmem:[#allocation220_spill] sm:$0xff]  ;;  %v13339_v17 = vld [vmem:[#allocation9_spill] sm:$0xff] }
 0x347   : > { %4190 = vst [vmem:[%s6675_s15 + $0x50] sm:$0xff] %v4126_v1  ;;  %v4030_v20 = vmul.f32 %v10884_v22, %v3959_v57  ;;  %v3830_v44 = vsub.f32 %v13332_v58, %v3638_v3  ;;  %v3701_v28 = vsub.f32 %v13333_v47, %v3637_v38  ;;  %v3829_v16 = vsub.f32 %v13334_v53, %v3637_v38  ;;  %v13337_v37 = vld [vmem:[#allocation171_spill] sm:$0xff]  ;;  %v4060_v3 = vld [vmem:[%s6675_s15 + $0x40] sm:$0xff]  ;;  %v3060_v55 = vpop.xlane.xlu1 %3059  ;;  %v13343_v58 = vld [vmem:[#allocation145_spill] sm:$0xff] }
 0x348   : > { %4966 = vrot.lane.b32.xlu1 %v10531_v29, %s6598_s14  ;;  %v6393_v8 = vpop.eup %6392  ;;  %v4159_v31 = vadd.f32 %v4095_v45, %v4031_v40  ;;  %v3926_v41 = vadd.f32 %v3862_v33, %v13335_v54  ;;  %v3861_v59 = vmul.f32 %v3797_v10, %v3797_v10  ;;  %v3766_v15 = vmul.f32 %v3702_v25, %v3702_v25  ;;  %v3058_v38 = vpop.xlane.xlu0 %3057  ;;  %v13340_v40 = vld [vmem:[#allocation183_spill] sm:$0xff]  ;;  %v13341_v10 = vld [vmem:[#allocation229_spill] sm:$0xff] }
 0x349   : > { %4964 = vrot.lane.b32.xlu0 %v13336_v7, %s6598_s14  ;;  %v4158_v21 = vadd.f32 %v4094_v32, %v4030_v20  ;;  %v3894_v9 = vmul.f32 %v3830_v44, %v3830_v44  ;;  %v3765_v42 = vmul.f32 %v3701_v28, %v3701_v28  ;;  %v3893_v24 = vmul.f32 %v3829_v16, %v3829_v16  ;;  %v4093_v13 = vld [vmem:[%s6675_s15 + $0x148] sm:$0xff]  ;;  %v13342_v25 = vld [vmem:[#allocation89_spill] sm:$0xff]  ;;  %v13345_v7 = vld [vmem:[#allocation176_spill] sm:$0xff] }
 0x34a   : > { %4223 = vst [vmem:[%s6675_s15 + $0x158] sm:$0xff] %v4159_v31  ;;  %v3997_v29 = vmul.f32 %v10884_v22, %v3926_v41  ;;  %v3925_v2 = vadd.f32 %v3861_v59, %v13337_v37  ;;  %v3548_v30 = vmul.f32 %v6391_v60, %v13338_v23  ;;  %v3547_v39 = vmul.f32 %v6393_v8, %v13339_v17  ;;  %v4092_v60 = vld [vmem:[%s6675_s15 + $0x140] sm:$0xff]  ;;  %v13348_v17 = vld [vmem:[#allocation64_spill] sm:$0xff] }
 0x34b   : > { %4222 = vst [vmem:[%s6675_s15 + $0x150] sm:$0xff] %v4158_v21  ;;  %v3958_v1 = vadd.f32 %v3894_v9, %v3766_v15  ;;  %v3957_v45 = vadd.f32 %v3893_v24, %v3765_v42  ;;  %6394 = vrsqrt.f32 %v3260_v43  ;;  %v3259_v57 = vadd.f32 1e-10, %v11034_v18  ;;  %v2864_v41 = vpop.xlane.xlu1 %2863  ;;  %v13344_v15 = vld [vmem:[#allocation198_spill] sm:$0xff]  ;;  %v13346_v9 = vld [vmem:[#allocation179_spill] sm:$0xff]  ;;  %v13347_v24 = vld [vmem:[#allocation173_spill] sm:$0xff] }
 0x34c   : > { %4970 = vrot.lane.b32.xlu1 %v13340_v40, %s6598_s14  ;;  %v4125_v32 = vadd.f32 %v4061_v0, %v3997_v29  ;;  %v3996_v33 = vmul.f32 %v10884_v22, %v3925_v2  ;;  %v3804_v51 = vsub.f32 %v3548_v30, %v13341_v10  ;;  %v3803_v20 = vsub.f32 %v3547_v39, %v13342_v25  ;;  %v2862_v59 = vpop.xlane.xlu0 %2861  ;;  %v4066_v0 = vld [vmem:[%s6675_s15 + $0x70] sm:$0xff] }
 0x34d   : > { %4968 = vrot.lane.b32.xlu0 %v13343_v58, %s6598_s14  ;;  %v4029_v43 = vmul.f32 %v10884_v22, %v3958_v1  ;;  %v4028_v18 = vmul.f32 %v10884_v22, %v3957_v45  ;;  %6396 = vrsqrt.f32 %v3259_v57  ;;  %v3162_v44 = vadd.f32 1e-10, %v11049_v19  ;;  %v4067_v19 = vld [vmem:[%s6675_s15 + $0x78] sm:$0xff]  ;;  %v13349_v45 = vld [vmem:[#allocation150_spill] sm:$0xff] }
 0x34e   : > { %4189 = vst [vmem:[%s6675_s15 + $0x48] sm:$0xff] %v4125_v32  ;;  %v4124_v47 = vadd.f32 %v4060_v3, %v3996_v33  ;;  %v3868_v28 = vmul.f32 %v3804_v51, %v3804_v51  ;;  %v3867_v53 = vmul.f32 %v3803_v20, %v3803_v20  ;;  %v3161_v16 = vadd.f32 1e-10, %v11051_v14 }
 0x34f   : > { %v4157_v8 = vadd.f32 %v4093_v13, %v4029_v43  ;;  %v4156_v31 = vadd.f32 %v4092_v60, %v4028_v18  ;;  %6398 = vrsqrt.f32 %v3162_v44  ;;  %v3258_v54 = vadd.f32 1e-10, %v11071_v48  ;;  %v3056_v3 = vpop.xlane.xlu1 %3055  ;;  %v13352_v60 = vld [vmem:[#allocation104_spill] sm:$0xff]  ;;  %v13359_v18 = vld [vmem:[#allocation133_spill] sm:$0xff] }
 0x350   : > { %4974 = vrot.lane.b32.xlu1 %v13344_v15, %s6598_s14  ;;  %4188 = vst [vmem:[%s6675_s15 + $0x40] sm:$0xff] %v4124_v47  ;;  %v3932_v21 = vadd.f32 %v3868_v28, %v13345_v7  ;;  %v3931_v42 = vadd.f32 %v3867_v53, %v13346_v9  ;;  %6400 = vrsqrt.f32 %v3161_v16  ;;  %v3257_v14 = vadd.f32 1e-10, %v11073_v63  ;;  %v3054_v1 = vpop.xlane.xlu0 %3053  ;;  %v13360_v16 = vld [vmem:[#allocation197_spill] sm:$0xff]  ;;  %v13364_v15 = vld [vmem:[#allocation188_spill] sm:$0xff] }
 0x351   : > { %4972 = vrot.lane.b32.xlu0 %v13347_v24, %s6598_s14  ;;  %4221 = vst [vmem:[%s6675_s15 + $0x148] sm:$0xff] %v4157_v8  ;;  %4220 = vst [vmem:[%s6675_s15 + $0x140] sm:$0xff] %v4156_v31  ;;  %6402 = vrsqrt.f32 %v3258_v54  ;;  %v3168_v48 = vadd.f32 1e-10, %v2868_v36  ;;  %v3167_v29 = vadd.f32 1e-10, %v2866_v61  ;;  %v3686_v39 = vsub.f32 %v13348_v17, %v10830_v34 }
 0x352   : > { %v3264_v37 = vadd.f32 1e-10, %v3060_v55  ;;  %v4003_v2 = vmul.f32 %v10884_v22, %v3932_v21  ;;  %v4002_v23 = vmul.f32 %v10884_v22, %v3931_v42  ;;  %6404 = vrsqrt.f32 %v3257_v14  ;;  %v13361_v8 = vld [vmem:[#allocation123_spill] sm:$0xff]  ;;  %v13365_v24 = vld [vmem:[#allocation180_spill] sm:$0xff]  ;;  %v13368_v17 = vld [vmem:[#allocation226_spill] sm:$0xff] }
 0x353   : > { %v3263_v30 = vadd.f32 1e-10, %v3058_v38  ;;  %6406 = vrsqrt.f32 %v3168_v48  ;;  %v3166_v63 = vadd.f32 1e-10, %v2864_v41  ;;  %v11147_v36 = vadd.f32 %v4752_v50, %v4624_v62  ;;  %v13350_v38 = vld [vmem:[#allocation151_spill] sm:$0xff]  ;;  %v13354_v62 = vld [vmem:[#allocation246_spill] sm:$0xff]  ;;  %v2876_v28 = vpop.xlane.xlu1 %2875 }
 0x354   : > { %4978 = vrot.lane.b32.xlu1 %v13349_v45, %s6598_s14  ;;  %v4131_v61 = vadd.f32 %v4067_v19, %v4003_v2  ;;  %v4130_v57 = vadd.f32 %v4066_v0, %v4002_v23  ;;  %6408 = vrsqrt.f32 %v3167_v29  ;;  %v3165_v55 = vadd.f32 1e-10, %v2862_v59  ;;  %v2874_v53 = vpop.xlane.xlu0 %2873  ;;  %v13363_v41 = vld [vmem:[#allocation78_spill] sm:$0xff]  ;;  %v13366_v29 = vld [vmem:[#allocation29_spill] sm:$0xff]  ;;  %v13367_v23 = vld [vmem:[#allocation11_spill] sm:$0xff] }
 0x355   : > { %4976 = vrot.lane.b32.xlu0 %v13350_v38, %s6598_s14  ;;  %v6395_v40 = vpop.eup %6394  ;;  %6410 = vrsqrt.f32 %v3264_v37  ;;  %v3262_v32 = vadd.f32 1e-10, %v3056_v3  ;;  %v4627_v33 = vand.u32 2147483647, %v11015_v12  ;;  %v13351_v13 = vunpack.c.h.bf16 %v13305_v52  ;;  %v13369_v38 = vld [vmem:[#allocation247_spill] sm:$0xff] }
 0x356   : > { %v13353_v11 = vunpack.c.h.bf16 %v13352_v60  ;;  %4195 = vst [vmem:[%s6675_s15 + $0x78] sm:$0xff] %v4131_v61  ;;  %4194 = vst [vmem:[%s6675_s15 + $0x70] sm:$0xff] %v4130_v57  ;;  %v3644_v46 = vmul.f32 %v6395_v40, %v13354_v62  ;;  %6412 = vrsqrt.f32 %v3263_v30  ;;  %v13355_v50 = vunpack.c.l.bf16 %v13305_v52  ;;  %v13362_v52 = vld [vmem:[#allocation128_spill] sm:$0xff]  ;;  %v13372_v62 = vld [vmem:[#allocation291_spill] sm:$0xff] }
 0x357   : > { %v13356_v51 = vunpack.c.l.bf16 %v13307_v5  ;;  %v13358_v12 = vunpack.c.l.bf16 %v13352_v60  ;;  %v6397_v43 = vpop.eup %6396  ;;  %v11173_v44 = vsub.f32 %v13359_v18, %v10853_v35  ;;  %6414 = vrsqrt.f32 %v3166_v63  ;;  %v11192_v3 = vpop.xlane.xlu1 %3067 }
 0x358   : > { %v4691_v10 = vsub.f32 %v13353_v11, %v13351_v13  ;;  %v13357_v20 = vmov %v13355_v50  ;;  %v3261_v47 = vadd.f32 1e-10, %v3054_v1  ;;  %4982 = vrot.lane.b32.xlu1 %v13360_v16, %s6598_s14  ;;  %v3708_v31 = vsub.f32 %v13361_v8, %v3644_v46  ;;  %v11194_v1 = vpop.xlane.xlu0 %3065  ;;  %v13370_v13 = vld [vmem:[#allocation85_spill] sm:$0xff]  ;;  %v13371_v11 = vld [vmem:[#allocation16_spill] sm:$0xff] }
 0x359   : > { %v11163_v25 = vsub.f32 %v13356_v51, %v13355_v50  ;;  %v11169_v58 = vsub.f32 %v13358_v12, %v13357_v20  ;;  %v3836_v54 = vsub.f32 %v13362_v52, %v3644_v46  ;;  %v3643_v59 = vmul.f32 %v6397_v43, %v13363_v41  ;;  %4980 = vrot.lane.b32.xlu0 %v13364_v15, %s6598_s14  ;;  %v6399_v19 = vpop.eup %6398  ;;  %v13373_v20 = vld [vmem:[#allocation241_spill] sm:$0xff]  ;;  %v13374_v43 = vld [vmem:[#allocation34_spill] sm:$0xff]  ;;  %v13375_v16 = vld [vmem:[#allocation224_spill] sm:$0xff] }
 0x35a   : > { %v4755_v5 = vand.u32 2147483647, %v4691_v10  ;;  %6416 = vrsqrt.f32 %v3165_v55  ;;  %v11182_v7 = vmul.f32 %v3686_v39, %v3686_v39  ;;  %v3172_v21 = vadd.f32 1e-10, %v2876_v28  ;;  %v6401_v9 = vpop.eup %6400  ;;  %v4098_v28 = vld [vmem:[%s6675_s15 + $0x170] sm:$0xff] }
 0x35b   : > { %6418 = vrsqrt.f32 %v3262_v32  ;;  %v3772_v42 = vmul.f32 %v3708_v31, %v3708_v31  ;;  %v3900_v14 = vmul.f32 %v3836_v54, %v3836_v54  ;;  %v3707_v48 = vsub.f32 %v13365_v24, %v3643_v59  ;;  %v6403_v2 = vpop.eup %6402  ;;  %v13376_v8 = vld [vmem:[#allocation12_spill] sm:$0xff]  ;;  %v11211_v52 = vpop.xlane.xlu1 %2871  ;;  %v13378_v24 = vld [vmem:[#allocation139_spill] sm:$0xff] }
 0x35c   : > { %v11184_v0 = vadd.f32 %v4755_v5, %v4627_v33  ;;  %v3835_v37 = vsub.f32 %v13366_v29, %v3643_v59  ;;  %v3546_v30 = vmul.f32 %v6399_v19, %v13367_v23  ;;  %v3545_v63 = vmul.f32 %v6401_v9, %v13368_v17  ;;  %4986 = vrot.lane.b32.xlu1 %v10717_v4, %s6598_s14  ;;  %v6405_v45 = vpop.eup %6404  ;;  %v4099_v33 = vld [vmem:[%s6675_s15 + $0x178] sm:$0xff]  ;;  %v11213_v54 = vpop.xlane.xlu0 %2869  ;;  %v4065_v23 = vld [vmem:[%s6675_s15 + $0x68] sm:$0xff] }
 0x35d   : > { %6420 = vrsqrt.f32 %v3261_v47  ;;  %v11190_v39 = vadd.f32 1e-10, %v2874_v53  ;;  %v3964_v61 = vadd.f32 %v3900_v14, %v3772_v42  ;;  %v3771_v57 = vmul.f32 %v3707_v48, %v3707_v48  ;;  %4984 = vrot.lane.b32.xlu0 %v10728_v49, %s6598_s14  ;;  %v6407_v32 = vpop.eup %6406  ;;  %v13377_v42 = vld [vmem:[#allocation141_spill] sm:$0xff] }
 0x35e   : > { %v3899_v55 = vmul.f32 %v3835_v37, %v3835_v37  ;;  %v3642_v40 = vmul.f32 %v6403_v2, %v13369_v38  ;;  %v3802_v60 = vsub.f32 %v3546_v30, %v13370_v13  ;;  %v3801_v10 = vsub.f32 %v3545_v63, %v13371_v11  ;;  %v6409_v4 = vpop.eup %6408  ;;  %v4064_v30 = vld [vmem:[%s6675_s15 + $0x60] sm:$0xff]  ;;  %v13379_v63 = vld [vmem:[#allocation295_spill] sm:$0xff]  ;;  %v13381_v13 = vld [vmem:[#allocation244_spill] sm:$0xff] }
 0x35f   : > { %v3641_v46 = vmul.f32 %v6405_v45, %v13372_v62  ;;  %6422 = vrsqrt.f32 %v3172_v21  ;;  %v4035_v50 = vmul.f32 %v10884_v22, %v3964_v61  ;;  %v6411_v47 = vpop.eup %6410  ;;  %v3552_v45 = vmul.f32 %v6407_v32, %v13379_v63  ;;  %v13380_v61 = vld [vmem:[#allocation18_spill] sm:$0xff]  ;;  %v11231_v11 = vpop.xlane.xlu1 %3063 }
 0x360   : > { %v3963_v51 = vadd.f32 %v3899_v55, %v3771_v57  ;;  %v3706_v12 = vsub.f32 %v13373_v20, %v3642_v40  ;;  %v3834_v18 = vsub.f32 %v13374_v43, %v3642_v40  ;;  %v3866_v49 = vmul.f32 %v3802_v60, %v3802_v60  ;;  %4990 = vrot.lane.b32.xlu1 %v10733_v56, %s6598_s14  ;;  %v6413_v41 = vpop.eup %6412  ;;  %v4097_v40 = vld [vmem:[%s6675_s15 + $0x168] sm:$0xff]  ;;  %v4096_v62 = vld [vmem:[%s6675_s15 + $0x160] sm:$0xff]  ;;  %v13384_v20 = vld [vmem:[#allocation20_spill] sm:$0xff] }
 0x361   : > { %v3865_v53 = vmul.f32 %v3801_v10, %v3801_v10  ;;  %v3705_v5 = vsub.f32 %v13375_v16, %v3641_v46  ;;  %v3833_v31 = vsub.f32 %v13376_v8, %v3641_v46  ;;  %v4163_v59 = vadd.f32 %v4099_v33, %v4035_v50  ;;  %4988 = vrot.lane.b32.xlu0 %v10770_v27, %s6598_s14  ;;  %v6415_v9 = vpop.eup %6414  ;;  %v11233_v10 = vpop.xlane.xlu0 %3061  ;;  %v13382_v46 = vld [vmem:[#allocation15_spill] sm:$0xff]  ;;  %v13383_v50 = vld [vmem:[#allocation242_spill] sm:$0xff] }
 0x362   : > { %v4034_v15 = vmul.f32 %v10884_v22, %v3963_v51  ;;  %v3770_v19 = vmul.f32 %v3706_v12, %v3706_v12  ;;  %v3898_v21 = vmul.f32 %v3834_v18, %v3834_v18  ;;  %v3930_v14 = vadd.f32 %v3866_v49, %v13377_v42  ;;  %v13385_v43 = vld [vmem:[#allocation195_spill] sm:$0xff]  ;;  %v13386_v49 = vld [vmem:[#allocation293_spill] sm:$0xff] }
 0x363   : > { %v3929_v48 = vadd.f32 %v3865_v53, %v13378_v24  ;;  %v3769_v29 = vmul.f32 %v3705_v5, %v3705_v5  ;;  %v3897_v37 = vmul.f32 %v3833_v31, %v3833_v31  ;;  %4227 = vst [vmem:[%s6675_s15 + $0x178] sm:$0xff] %v4163_v59  ;;  %v3551_v27 = vmul.f32 %v6409_v4, %v13380_v61  ;;  %v13387_v31 = vld [vmem:[#allocation35_spill] sm:$0xff] }
 0x364   : > { %v6417_v2 = vpop.eup %6416  ;;  %v4162_v56 = vadd.f32 %v4098_v28, %v4034_v15  ;;  %v3962_v17 = vadd.f32 %v3898_v21, %v3770_v19  ;;  %v4001_v55 = vmul.f32 %v10884_v22, %v3930_v14  ;;  %v3648_v60 = vmul.f32 %v6411_v47, %v13381_v13  ;;  %4994 = vrot.lane.b32.xlu1 %v10776_v26, %s6598_s14  ;;  %v13388_v21 = vld [vmem:[#allocation86_spill] sm:$0xff]  ;;  %v13389_v14 = vld [vmem:[#allocation156_spill] sm:$0xff] }
 0x365   : > { %v6419_v57 = vpop.eup %6418  ;;  %v4000_v38 = vmul.f32 %v10884_v22, %v3929_v48  ;;  %v3961_v33 = vadd.f32 %v3897_v37, %v3769_v29  ;;  %v3808_v4 = vsub.f32 %v3552_v45, %v13382_v46  ;;  %v3807_v51 = vsub.f32 %v3551_v27, %v13383_v50  ;;  %4992 = vrot.lane.b32.xlu0 %v13385_v43, %s6598_s14  ;;  %v11252_v48 = vpop.xlane.xlu1 %2883  ;;  %v13390_v37 = vld [vmem:[#allocation302_spill] sm:$0xff]  ;;  %v13393_v45 = vld [vmem:[#allocation296_spill] sm:$0xff]  ;;  %v13394_v27 = vld [vmem:[#allocation59_spill] sm:$0xff] }
 0x366   : > { %4226 = vst [vmem:[%s6675_s15 + $0x170] sm:$0xff] %v4162_v56  ;;  %v4033_v32 = vmul.f32 %v10884_v22, %v3962_v17  ;;  %v3647_v12 = vmul.f32 %v6413_v41, %v13384_v20  ;;  %v4129_v47 = vadd.f32 %v4065_v23, %v4001_v55  ;;  %v3712_v53 = vsub.f32 %v13386_v49, %v3648_v60  ;;  %v11254_v29 = vpop.xlane.xlu0 %2881  ;;  %v13391_v56 = vld [vmem:[#allocation199_spill] sm:$0xff]  ;;  %v4071_v55 = vld [vmem:[%s6675_s15 + $0x98] sm:$0xff]  ;;  %v13395_v13 = vld [vmem:[#allocation294_spill] sm:$0xff] }
 0x367   : > { %v6421_v18 = vpop.eup %6420  ;;  %v4128_v28 = vadd.f32 %v4064_v30, %v4000_v38  ;;  %v4032_v26 = vmul.f32 %v10884_v22, %v3961_v33  ;;  %v3872_v5 = vmul.f32 %v3808_v4, %v3808_v4  ;;  %v3871_v8 = vmul.f32 %v3807_v51, %v3807_v51  ;;  %v13392_v30 = vld [vmem:[#allocation93_spill] sm:$0xff]  ;;  %v4070_v38 = vld [vmem:[%s6675_s15 + $0x90] sm:$0xff] }
 0x368   : > { %v4161_v16 = vadd.f32 %v4097_v40, %v4033_v32  ;;  %v3840_v59 = vsub.f32 %v13387_v31, %v3648_v60  ;;  %4193 = vst [vmem:[%s6675_s15 + $0x68] sm:$0xff] %v4129_v47  ;;  %v3776_v19 = vmul.f32 %v3712_v53, %v3712_v53  ;;  %v3711_v42 = vsub.f32 %v13388_v21, %v3647_v12  ;;  %v13396_v32 = vld [vmem:[#allocation22_spill] sm:$0xff]  ;;  %v13397_v51 = vld [vmem:[#allocation177_spill] sm:$0xff]  ;;  %v13398_v43 = vld [vmem:[#allocation140_spill] sm:$0xff] }
 0x369   : > { %v6423_v15 = vpop.eup %6422  ;;  %4192 = vst [vmem:[%s6675_s15 + $0x60] sm:$0xff] %v4128_v28  ;;  %v4160_v41 = vadd.f32 %v4096_v62, %v4032_v26  ;;  %v3839_v24 = vsub.f32 %v13389_v14, %v3647_v12  ;;  %4998 = vrot.lane.b32.xlu1 %v13390_v37, %s6598_s14  ;;  %v3936_v23 = vadd.f32 %v3872_v5, %v13391_v56  ;;  %v4103_v20 = vld [vmem:[%s6675_s15 + $0x198] sm:$0xff]  ;;  %v13399_v28 = vld [vmem:[#allocation192_spill] sm:$0xff]  ;;  %v13403_v56 = vld [vmem:[#allocation203_spill] sm:$0xff]  ;;  %6424 = vrsqrt.f32 %v11190_v39 }
 0x36a   : > { %4225 = vst [vmem:[%s6675_s15 + $0x168] sm:$0xff] %v4161_v16  ;;  %v3935_v17 = vadd.f32 %v3871_v8, %v13392_v30  ;;  %v3904_v63 = vmul.f32 %v3840_v59, %v3840_v59  ;;  %v3550_v61 = vmul.f32 %v6415_v9, %v13393_v45  ;;  %4996 = vrot.lane.b32.xlu0 %v13394_v27, %s6598_s14  ;;  %v13400_v49 = vld [vmem:[#allocation264_spill] sm:$0xff]  ;;  %v13401_v16 = vld [vmem:[#allocation153_spill] sm:$0xff]  ;;  %v11285_v8 = vld [vmem:[%s11757_s5] ss:$0 sm:$0xff] }
 0x36b   : > { %4224 = vst [vmem:[%s6675_s15 + $0x160] sm:$0xff] %v4160_v41  ;;  %v3775_v40 = vmul.f32 %v3711_v42, %v3711_v42  ;;  %v3903_v33 = vmul.f32 %v3839_v24, %v3839_v24  ;;  %v3549_v60 = vmul.f32 %v6417_v2, %v13395_v13  ;;  %v3646_v62 = vmul.f32 %v6419_v57, %v13396_v32  ;;  %v11276_v2 = vpop.xlane.xlu1 %3075  ;;  %v11278_v57 = vpop.xlane.xlu0 %3073  ;;  %v4102_v59 = vld [vmem:[%s6675_s15 + $0x190] sm:$0xff]  ;;  %v13404_v30 = vld [vmem:[#allocation19_spill] sm:$0xff]  ;;  %v4068_v32 = vld [vmem:[%s6675_s15 + $0x80] sm:$0xff] }
 0x36c   : > { %v4007_v46 = vmul.f32 %v10884_v22, %v3936_v23  ;;  %v4006_v4 = vmul.f32 %v10884_v22, %v3935_v17  ;;  %v3968_v50 = vadd.f32 %v3904_v63, %v3776_v19  ;;  %v3806_v9 = vsub.f32 %v3550_v61, %v13397_v51  ;;  %v13402_v19 = vld [vmem:[#allocation209_spill] sm:$0xff]  ;;  %v13405_v63 = vld [vmem:[#allocation299_spill] sm:$0xff] }
 0x36d   : > { %v3967_v12 = vadd.f32 %v3903_v33, %v3775_v40  ;;  %v3805_v47 = vsub.f32 %v3549_v60, %v13398_v43  ;;  %v3710_v26 = vsub.f32 %v13399_v28, %v3646_v62  ;;  %v3838_v53 = vsub.f32 %v13400_v49, %v3646_v62  ;;  %5002 = vrot.lane.b32.xlu1 %v13401_v16, %s6598_s14  ;;  %v4069_v27 = vld [vmem:[%s6675_s15 + $0x88] sm:$0xff] }
 0x36e   : > { %v4135_v22 = vadd.f32 %v4071_v55, %v4007_v46  ;;  %v4134_v5 = vadd.f32 %v4070_v38, %v4006_v4  ;;  %v4039_v31 = vmul.f32 %v11285_v8, %v3968_v50  ;;  %v3870_v41 = vmul.f32 %v3806_v9, %v3806_v9  ;;  %5000 = vrot.lane.b32.xlu0 %v13402_v19, %s6598_s14  ;;  %v13406_v55 = vld [vmem:[#allocation24_spill] sm:$0xff]  ;;  %v13407_v62 = vld [vmem:[#allocation155_spill] sm:$0xff]  ;;  %v13408_v46 = vld [vmem:[#allocation42_spill] sm:$0xff] }
 0x36f   : > { %v4038_v21 = vmul.f32 %v11285_v8, %v3967_v12  ;;  %v3869_v42 = vmul.f32 %v3805_v47, %v3805_v47  ;;  %v3774_v14 = vmul.f32 %v3710_v26, %v3710_v26  ;;  %v3902_v24 = vmul.f32 %v3838_v53, %v3838_v53  ;;  %v2880_v33 = vpop.xlane.xlu1 %2879  ;;  %v2878_v13 = vpop.xlane.xlu0 %2877  ;;  %v13409_v50 = vld [vmem:[#allocation94_spill] sm:$0xff] }
 0x370   : > { %4199 = vst [vmem:[%s6675_s15 + $0x98] sm:$0xff] %v4135_v22  ;;  %4198 = vst [vmem:[%s6675_s15 + $0x90] sm:$0xff] %v4134_v5  ;;  %v4167_v37 = vadd.f32 %v4103_v20, %v4039_v31  ;;  %v3934_v23 = vadd.f32 %v3870_v41, %v13403_v56  ;;  %v3645_v17 = vmul.f32 %v6421_v18, %v13404_v30  ;;  %v4101_v18 = vld [vmem:[%s6675_s15 + $0x188] sm:$0xff]  ;;  %v3268_v9 = vadd.f32 1e-10, %v11192_v3  ;;  %v4100_v3 = vld [vmem:[%s6675_s15 + $0x180] sm:$0xff] }
 0x371   : > { %v3556_v45 = vmul.f32 %v6423_v15, %v13405_v63  ;;  %v4166_v61 = vadd.f32 %v4102_v59, %v4038_v21  ;;  %v3933_v38 = vadd.f32 %v3869_v42, %v13406_v55  ;;  %v3966_v40 = vadd.f32 %v3902_v24, %v3774_v14  ;;  %5006 = vrot.lane.b32.xlu1 %v10988_v6, %s6598_s14  ;;  %v13410_v5 = vld [vmem:[#allocation208_spill] sm:$0xff]  ;;  %v13411_v14 = vld [vmem:[#allocation255_spill] sm:$0xff]  ;;  %v13412_v24 = vld [vmem:[#allocation57_spill] sm:$0xff] }
 0x372   : > { %4231 = vst [vmem:[%s6675_s15 + $0x198] sm:$0xff] %v4167_v37  ;;  %v4005_v60 = vmul.f32 %v11285_v8, %v3934_v23  ;;  %v3709_v15 = vsub.f32 %v13407_v62, %v3645_v17  ;;  %v3837_v4 = vsub.f32 %v13408_v46, %v3645_v17  ;;  %5004 = vrot.lane.b32.xlu0 %v11147_v36, %s6598_s14  ;;  %v3267_v20 = vadd.f32 1e-10, %v11194_v1  ;;  %v4075_v1 = vld [vmem:[%s6675_s15 + $0xb8] sm:$0xff]  ;;  %v13413_v37 = vld [vmem:[#allocation110_spill] sm:$0xff]  ;;  %v13418_v62 = vld [vmem:[#allocation256_spill] sm:$0xff] }
 0x373   : > { %v3812_v51 = vsub.f32 %v3556_v45, %v13409_v50  ;;  %4230 = vst [vmem:[%s6675_s15 + $0x190] sm:$0xff] %v4166_v61  ;;  %v4004_v39 = vmul.f32 %v11285_v8, %v3933_v38  ;;  %v4037_v6 = vmul.f32 %v11285_v8, %v3966_v40  ;;  %6426 = vrsqrt.f32 %v3268_v9  ;;  %v3072_v53 = vpop.xlane.xlu1 %3071  ;;  %v3070_v16 = vpop.xlane.xlu0 %3069  ;;  %v13414_v56 = vld [vmem:[#allocation205_spill] sm:$0xff] }
 0x374   : > { %v4133_v12 = vadd.f32 %v4069_v27, %v4005_v60  ;;  %v3773_v43 = vmul.f32 %v3709_v15, %v3709_v15  ;;  %v3901_v47 = vmul.f32 %v3837_v4, %v3837_v4  ;;  %v3170_v49 = vadd.f32 1e-10, %v11211_v52  ;;  %v6425_v63 = vpop.eup %6424  ;;  %v13415_v55 = vld [vmem:[#allocation25_spill] sm:$0xff]  ;;  %v13416_v60 = vld [vmem:[#allocation126_spill] sm:$0xff]  ;;  %v13419_v15 = vld [vmem:[#allocation56_spill] sm:$0xff] }
 0x375   : > { %v3876_v28 = vmul.f32 %v3812_v51, %v3812_v51  ;;  %v4132_v26 = vadd.f32 %v4068_v32, %v4004_v39  ;;  %v4165_v36 = vadd.f32 %v4101_v18, %v4037_v6  ;;  %5010 = vrot.lane.b32.xlu1 %v11184_v0, %s6598_s14  ;;  %6428 = vrsqrt.f32 %v3267_v20  ;;  %v13417_v32 = vld [vmem:[#allocation200_spill] sm:$0xff]  ;;  %v13420_v4 = vld [vmem:[#allocation251_spill] sm:$0xff] }
 0x376   : > { %4197 = vst [vmem:[%s6675_s15 + $0x88] sm:$0xff] %v4133_v12  ;;  %v3965_v22 = vadd.f32 %v3901_v47, %v3773_v43  ;;  %v3169_v59 = vadd.f32 1e-10, %v11213_v54  ;;  %6430 = vrsqrt.f32 %v3170_v49  ;;  %v3266_v41 = vadd.f32 1e-10, %v11231_v11  ;;  %v13423_v47 = vld [vmem:[#allocation300_spill] sm:$0xff] }
 0x377   : > { %v3940_v31 = vadd.f32 %v3876_v28, %v13410_v5  ;;  %4196 = vst [vmem:[%s6675_s15 + $0x80] sm:$0xff] %v4132_v26  ;;  %4229 = vst [vmem:[%s6675_s15 + $0x188] sm:$0xff] %v4165_v36  ;;  %v3265_v52 = vadd.f32 1e-10, %v11233_v10  ;;  %v3176_v19 = vadd.f32 1e-10, %v11252_v48  ;;  %v11334_v54 = vmul.f32 %v13412_v24, %v13411_v14  ;;  %v2892_v48 = vpop.xlane.xlu1 %2891  ;;  %v2890_v23 = vpop.xlane.xlu0 %2889 }
 0x378   : > { %v4036_v0 = vmul.f32 %v11285_v8, %v3965_v22  ;;  %6432 = vrsqrt.f32 %v3169_v59  ;;  %v3175_v42 = vadd.f32 1e-10, %v11254_v29  ;;  %v11338_v11 = vmul.f32 %v13414_v56, %v13413_v37  ;;  %v13424_v49 = vld [vmem:[#allocation125_spill] sm:$0xff]  ;;  %v4074_v24 = vld [vmem:[%s6675_s15 + $0xb0] sm:$0xff] }
 0x379   : > { %v4011_v21 = vmul.f32 %v11285_v8, %v3940_v31  ;;  %6434 = vrsqrt.f32 %v3266_v41  ;;  %v3272_v10 = vadd.f32 1e-10, %v11276_v2  ;;  %v3271_v29 = vadd.f32 1e-10, %v11278_v57  ;;  %v13425_v31 = vld [vmem:[#allocation102_spill] sm:$0xff]  ;;  %v13429_v37 = vld [vmem:[#allocation297_spill] sm:$0xff] }
 0x37a   : > { %v4164_v30 = vadd.f32 %v4100_v3, %v4036_v0  ;;  %6436 = vrsqrt.f32 %v3265_v52  ;;  %v11344_v45 = vmul.f32 %v11173_v44, %v11173_v44  ;;  %v3174_v61 = vadd.f32 1e-10, %v2880_v33  ;;  %v13426_v41 = vld [vmem:[#allocation154_spill] sm:$0xff] }
 0x37b   : > { %v4139_v17 = vadd.f32 %v4075_v1, %v4011_v21  ;;  %6438 = vrsqrt.f32 %v3176_v19  ;;  %v4626_v27 = vand.u32 2147483647, %v11163_v25  ;;  %v3555_v2 = vmul.f32 %v6425_v63, %v13415_v55  ;;  %v3084_v18 = vpop.xlane.xlu1 %3083  ;;  %v3082_v25 = vpop.xlane.xlu0 %3081  ;;  %v13427_v19 = vld [vmem:[#allocation43_spill] sm:$0xff]  ;;  %v13428_v21 = vld [vmem:[#allocation28_spill] sm:$0xff] }
 0x37c   : > { %4228 = vst [vmem:[%s6675_s15 + $0x180] sm:$0xff] %v4164_v30  ;;  %6440 = vrsqrt.f32 %v3175_v42  ;;  %v3173_v38 = vadd.f32 1e-10, %v2878_v13  ;;  %v4754_v40 = vand.u32 2147483647, %v11169_v58  ;;  %v11353_v57 = vsub.f32 %v13416_v60, %v11334_v54  ;;  %v13421_v13 = vld [vmem:[#allocation207_spill] sm:$0xff] }
 0x37d   : > { %4203 = vst [vmem:[%s6675_s15 + $0xb8] sm:$0xff] %v4139_v17  ;;  %v11357_v44 = vsub.f32 %v13417_v32, %v11338_v11  ;;  %6442 = vrsqrt.f32 %v3272_v10  ;;  %v3270_v33 = vadd.f32 1e-10, %v3072_v53  ;;  %v11361_v46 = vmul.f32 %v13419_v15, %v13418_v62  ;;  %v13422_v58 = vld [vmem:[#allocation184_spill] sm:$0xff]  ;;  %v6427_v39 = vpop.eup %6426  ;;  %v13430_v10 = vld [vmem:[#allocation275_spill] sm:$0xff]  ;;  %v13433_v60 = vld [vmem:[#allocation194_spill] sm:$0xff] }
 0x37e   : > { %v11365_v50 = vmul.f32 %v13421_v13, %v13420_v4  ;;  %v3811_v51 = vsub.f32 %v3555_v2, %v13422_v58  ;;  %6444 = vrsqrt.f32 %v3271_v29  ;;  %v3269_v6 = vadd.f32 1e-10, %v3070_v16 }
 0x37f   : > { %6446 = vrsqrt.f32 %v3174_v61  ;;  %v11368_v9 = vadd.f32 1e-10, %v2892_v48  ;;  %v4818_v20 = vadd.f32 %v4754_v40, %v4626_v27  ;;  %v6429_v12 = vpop.eup %6428  ;;  %v3652_v28 = vmul.f32 %v6427_v39, %v13423_v47  ;;  %v11378_v16 = vpop.xlane.xlu1 %2887  ;;  %v13432_v27 = vld [vmem:[#allocation101_spill] sm:$0xff]  ;;  %v13436_v47 = vld [vmem:[#allocation206_spill] sm:$0xff] }
 0x380   : > { %v3875_v43 = vmul.f32 %v3811_v51, %v3811_v51  ;;  %6448 = vrsqrt.f32 %v3173_v38  ;;  %v11371_v26 = vadd.f32 1e-10, %v2890_v23  ;;  %v6431_v36 = vpop.eup %6430  ;;  %v3651_v53 = vmul.f32 %v6429_v12, %v13424_v49  ;;  %v11380_v1 = vpop.xlane.xlu0 %2885  ;;  %v13431_v23 = vld [vmem:[#allocation298_spill] sm:$0xff] }
 0x381   : > { %6450 = vrsqrt.f32 %v3270_v33  ;;  %v11374_v3 = vadd.f32 1e-10, %v3084_v18  ;;  %v11376_v22 = vadd.f32 1e-10, %v3082_v25  ;;  %5008 = vrot.lane.b32.xlu0 %v4818_v20, %s6598_s14  ;;  %v3716_v52 = vsub.f32 %v13426_v41, %v3652_v28  ;;  %v13434_v33 = vld [vmem:[#allocation301_spill] sm:$0xff]  ;;  %v13435_v51 = vld [vmem:[#allocation30_spill] sm:$0xff] }
 0x382   : > { %v6433_v5 = vpop.eup %6432  ;;  %v3939_v59 = vadd.f32 %v3875_v43, %v13425_v31  ;;  %v3844_v0 = vsub.f32 %v13427_v19, %v3652_v28  ;;  %v3554_v42 = vmul.f32 %v6431_v36, %v13428_v21  ;;  %v3715_v56 = vsub.f32 %v13429_v37, %v3651_v53  ;;  %v4107_v20 = vld [vmem:[%s6675_s15 + $0x1b8] sm:$0xff]  ;;  %v4106_v31 = vld [vmem:[%s6675_s15 + $0x1b0] sm:$0xff] }
 0x383   : > { %v6435_v14 = vpop.eup %6434  ;;  %v3843_v48 = vsub.f32 %v13430_v10, %v3651_v53  ;;  %v3553_v30 = vmul.f32 %v6433_v5, %v13431_v23  ;;  %6452 = vrsqrt.f32 %v3269_v6  ;;  %v3780_v63 = vmul.f32 %v3716_v52, %v3716_v52  ;;  %v11395_v25 = vpop.xlane.xlu1 %3079  ;;  %v13437_v36 = vld [vmem:[#allocation185_spill] sm:$0xff]  ;;  %v13439_v52 = vld [vmem:[#allocation172_spill] sm:$0xff] }
 0x384   : > { %v6437_v17 = vpop.eup %6436  ;;  %v4010_v29 = vmul.f32 %v11285_v8, %v3939_v59  ;;  %v3908_v61 = vmul.f32 %v3844_v0, %v3844_v0  ;;  %v3810_v55 = vsub.f32 %v3554_v42, %v13432_v27  ;;  %v3779_v38 = vmul.f32 %v3715_v56, %v3715_v56  ;;  %v11397_v62 = vpop.xlane.xlu0 %3077  ;;  %v13438_v59 = vld [vmem:[#allocation2_spill] sm:$0xff]  ;;  %v13440_v0 = vld [vmem:[#allocation120_spill] sm:$0xff] }
 0x385   : > { %v6439_v2 = vpop.eup %6438  ;;  %v3907_v40 = vmul.f32 %v3843_v48, %v3843_v48  ;;  %v3809_v32 = vsub.f32 %v3553_v30, %v13433_v60  ;;  %v3650_v18 = vmul.f32 %v6435_v14, %v13434_v33  ;;  %v3649_v39 = vmul.f32 %v6437_v17, %v13435_v51  ;;  %v13441_v37 = vld [vmem:[#allocation108_spill] sm:$0xff]  ;;  %v13442_v33 = vld [vmem:[#allocation31_spill] sm:$0xff]  ;;  %v13443_v51 = vld [vmem:[#allocation10_spill] sm:$0xff] }
 0x386   : > { %v6441_v15 = vpop.eup %6440  ;;  %v4138_v4 = vadd.f32 %v4074_v24, %v4010_v29  ;;  %v3972_v13 = vadd.f32 %v3908_v61, %v3780_v63  ;;  %v3874_v58 = vmul.f32 %v3810_v55, %v3810_v55  ;;  %v4073_v24 = vld [vmem:[%s6675_s15 + $0xa8] sm:$0xff]  ;;  %v4072_v61 = vld [vmem:[%s6675_s15 + $0xa0] sm:$0xff]  ;;  %6454 = vrsqrt.f32 %v11368_v9 }
 0x387   : > { %v6443_v6 = vpop.eup %6442  ;;  %v3971_v12 = vadd.f32 %v3907_v40, %v3779_v38  ;;  %v3873_v43 = vmul.f32 %v3809_v32, %v3809_v32  ;;  %v3714_v28 = vsub.f32 %v13436_v47, %v3650_v18  ;;  %v3842_v49 = vsub.f32 %v13437_v36, %v3650_v18  ;;  %v11412_v23 = vpop.permute.xlu1 %4902  ;;  %v4104_v36 = vld [vmem:[%s6675_s15 + $0x1a0] sm:$0xff] }
 0x388   : > { %v6445_v53 = vpop.eup %6444  ;;  %4202 = vst [vmem:[%s6675_s15 + $0xb0] sm:$0xff] %v4138_v4  ;;  %v4043_v5 = vmul.f32 %v11285_v8, %v3972_v13  ;;  %v3938_v41 = vadd.f32 %v3874_v58, %v13438_v59  ;;  %v3713_v19 = vsub.f32 %v13439_v52, %v3649_v39  ;;  %v3841_v21 = vsub.f32 %v13440_v0, %v3649_v39  ;;  %v11414_v30 = vpop.permute.xlu0 %4904  ;;  %v4105_v13 = vld [vmem:[%s6675_s15 + $0x1a8] sm:$0xff]  ;;  %v13447_v52 = vld [vmem:[#allocation260_spill] sm:$0xff] }
 0x389   : > { %v6447_v42 = vpop.eup %6446  ;;  %v4042_v14 = vmul.f32 %v11285_v8, %v3971_v12  ;;  %v3937_v56 = vadd.f32 %v3873_v43, %v13441_v37  ;;  %v3778_v10 = vmul.f32 %v3714_v28, %v3714_v28  ;;  %v3906_v48 = vmul.f32 %v3842_v49, %v3842_v49  ;;  %v13445_v49 = vld [vmem:[#allocation32_spill] sm:$0xff] }
 0x38a   : > { %v6449_v17 = vpop.eup %6448  ;;  %v4171_v29 = vadd.f32 %v4107_v20, %v4043_v5  ;;  %v4009_v63 = vmul.f32 %v11285_v8, %v3938_v41  ;;  %v3777_v27 = vmul.f32 %v3713_v19, %v3713_v19  ;;  %v3905_v55 = vmul.f32 %v3841_v21, %v3841_v21  ;;  %v13444_v20 = vld [vmem:[#allocation38_spill] sm:$0xff]  ;;  %v13448_v19 = vld [vmem:[#allocation187_spill] sm:$0xff] }
 0x38b   : > { %v6451_v38 = vpop.eup %6450  ;;  %v4170_v40 = vadd.f32 %v4106_v31, %v4042_v14  ;;  %v4008_v60 = vmul.f32 %v11285_v8, %v3937_v56  ;;  %v3970_v32 = vadd.f32 %v3906_v48, %v3778_v10  ;;  %v3560_v18 = vmul.f32 %v6439_v2, %v13442_v33  ;;  %v13446_v31 = vld [vmem:[#allocation96_spill] sm:$0xff]  ;;  %v11429_v59 = vpop.permute.xlu1 %4906  ;;  %v13449_v21 = vld [vmem:[#allocation54_spill] sm:$0xff]  ;;  %v13451_v10 = vld [vmem:[#allocation53_spill] sm:$0xff] }
 0x38c   : > { %4235 = vst [vmem:[%s6675_s15 + $0x1b8] sm:$0xff] %v4171_v29  ;;  %v4137_v4 = vadd.f32 %v4073_v24, %v4009_v63  ;;  %v3969_v58 = vadd.f32 %v3905_v55, %v3777_v27  ;;  %v3559_v39 = vmul.f32 %v6441_v15, %v13443_v51  ;;  %v3656_v12 = vmul.f32 %v6443_v6, %v13444_v20  ;;  %v11431_v41 = vpop.permute.xlu0 %4908  ;;  %v13452_v55 = vld [vmem:[#allocation27_spill] sm:$0xff]  ;;  %v13453_v33 = vld [vmem:[#allocation33_spill] sm:$0xff]  ;;  %v13454_v51 = vld [vmem:[#allocation52_spill] sm:$0xff] }
 0x38d   : > { %v6453_v43 = vpop.eup %6452  ;;  %4234 = vst [vmem:[%s6675_s15 + $0x1b0] sm:$0xff] %v4170_v40  ;;  %v4136_v47 = vadd.f32 %v4072_v61, %v4008_v60  ;;  %v4041_v28 = vmul.f32 %v11285_v8, %v3970_v32  ;;  %v3816_v5 = vsub.f32 %v3560_v18, %v13445_v49  ;;  %v3655_v2 = vmul.f32 %v6445_v53, %v13446_v31  ;;  %v13450_v53 = vld [vmem:[#allocation202_spill] sm:$0xff]  ;;  %v4111_v31 = vld [vmem:[%s6675_s15 + $0x1d8] sm:$0xff] }
 0x38e   : > { %4201 = vst [vmem:[%s6675_s15 + $0xa8] sm:$0xff] %v4137_v4  ;;  %v4040_v15 = vmul.f32 %v11285_v8, %v3969_v58  ;;  %v3815_v6 = vsub.f32 %v3559_v39, %v13447_v52  ;;  %v3720_v0 = vsub.f32 %v13448_v19, %v3656_v12  ;;  %v3848_v14 = vsub.f32 %v13449_v21, %v3656_v12  ;;  %v4079_v58 = vld [vmem:[%s6675_s15 + $0xd8] sm:$0xff]  ;;  %v13455_v12 = vld [vmem:[#allocation263_spill] sm:$0xff] }
 0x38f   : > { %4200 = vst [vmem:[%s6675_s15 + $0xa0] sm:$0xff] %v4136_v47  ;;  %v4169_v24 = vadd.f32 %v4105_v13, %v4041_v28  ;;  %v3880_v37 = vmul.f32 %v3816_v5, %v3816_v5  ;;  %v3719_v56 = vsub.f32 %v13450_v53, %v3655_v2  ;;  %v3847_v48 = vsub.f32 %v13451_v10, %v3655_v2  ;;  %v11444_v4 = vpop.permute.xlu1 %4910  ;;  %v13456_v28 = vld [vmem:[#allocation40_spill] sm:$0xff] }
 0x390   : > { %v4168_v29 = vadd.f32 %v4104_v36, %v4040_v15  ;;  %v3879_v63 = vmul.f32 %v3815_v6, %v3815_v6  ;;  %v3784_v61 = vmul.f32 %v3720_v0, %v3720_v0  ;;  %v3912_v27 = vmul.f32 %v3848_v14, %v3848_v14  ;;  %v11446_v13 = vpop.permute.xlu0 %4912  ;;  %v4078_v5 = vld [vmem:[%s6675_s15 + $0xd0] sm:$0xff]  ;;  %v13457_v15 = vld [vmem:[#allocation269_spill] sm:$0xff] }
 0x391   : > { %4233 = vst [vmem:[%s6675_s15 + $0x1a8] sm:$0xff] %v4169_v24  ;;  %v3944_v40 = vadd.f32 %v3880_v37, %v13452_v55  ;;  %v3783_v60 = vmul.f32 %v3719_v56, %v3719_v56  ;;  %v3911_v32 = vmul.f32 %v3847_v48, %v3847_v48  ;;  %v3558_v18 = vmul.f32 %v6447_v42, %v13453_v33  ;;  %v4110_v0 = vld [vmem:[%s6675_s15 + $0x1d0] sm:$0xff]  ;;  %v13460_v55 = vld [vmem:[#allocation219_spill] sm:$0xff] }
 0x392   : > { %4232 = vst [vmem:[%s6675_s15 + $0x1a0] sm:$0xff] %v4168_v29  ;;  %v3943_v39 = vadd.f32 %v3879_v63, %v13454_v51  ;;  %v3976_v20 = vadd.f32 %v3912_v27, %v3784_v61  ;;  %v3557_v47 = vmul.f32 %v6449_v17, %v13455_v12  ;;  %v3654_v36 = vmul.f32 %v6451_v38, %v13456_v28  ;;  %v13458_v17 = vld [vmem:[#allocation109_spill] sm:$0xff]  ;;  %v13461_v33 = vld [vmem:[#allocation4_spill] sm:$0xff]  ;;  %v4076_v51 = vld [vmem:[%s6675_s15 + $0xc0] sm:$0xff] }
 0x393   : > { %v4015_v49 = vmul.f32 %v11285_v8, %v3944_v40  ;;  %v3975_v2 = vadd.f32 %v3911_v32, %v3783_v60  ;;  %v3814_v42 = vsub.f32 %v3558_v18, %v10830_v34  ;;  %v3653_v52 = vmul.f32 %v6453_v43, %v13457_v15  ;;  %v13459_v34 = vld [vmem:[#allocation285_spill] sm:$0xff]  ;;  %v11465_v43 = vpop.permute.xlu1 %4914  ;;  %v4077_v60 = vld [vmem:[%s6675_s15 + $0xc8] sm:$0xff] }
 0x394   : > { %v4014_v6 = vmul.f32 %v11285_v8, %v3943_v39  ;;  %v4047_v19 = vmul.f32 %v11285_v8, %v3976_v20  ;;  %v3813_v21 = vsub.f32 %v3557_v47, %v10853_v35  ;;  %v3718_v14 = vsub.f32 %v13458_v17, %v3654_v36  ;;  %v11467_v56 = vpop.permute.xlu0 %4916  ;;  %v4109_v28 = vld [vmem:[%s6675_s15 + $0x1c8] sm:$0xff] }
 0x395   : > { %v4143_v38 = vadd.f32 %v4079_v58, %v4015_v49  ;;  %v4046_v24 = vmul.f32 %v11285_v8, %v3975_v2  ;;  %v3878_v37 = vmul.f32 %v3814_v42, %v3814_v42  ;;  %v3846_v53 = vsub.f32 %v13459_v34, %v3654_v36  ;;  %v4445_v36 = vld [vmem:[%s6695_s10 + $0x48] sm:$0xff]  ;;  %v4447_v49 = vld [vmem:[%s6695_s10 + $0x58] sm:$0xff]  ;;  %v4446_v42 = vld [vmem:[%s6695_s10 + $0x50] sm:$0xff] }
 0x396   : > { %v4142_v10 = vadd.f32 %v4078_v5, %v4014_v6  ;;  %v4175_v48 = vadd.f32 %v4111_v31, %v4047_v19  ;;  %v3877_v29 = vmul.f32 %v3813_v21, %v3813_v21  ;;  %v3782_v35 = vmul.f32 %v3718_v14, %v3718_v14  ;;  %v4108_v31 = vld [vmem:[%s6675_s15 + $0x1c0] sm:$0xff]  ;;  %v4451_v19 = vld [vmem:[%s6695_s10 + $0x78] sm:$0xff]  ;;  %v4453_v17 = vld [vmem:[%s6695_s10 + $0x88] sm:$0xff] }
 0x397   : > { %4207 = vst [vmem:[%s6675_s15 + $0xd8] sm:$0xff] %v4143_v38  ;;  %v4174_v63 = vadd.f32 %v4110_v0, %v4046_v24  ;;  %v3942_v61 = vadd.f32 %v3878_v37, %v11182_v7  ;;  %v3910_v27 = vmul.f32 %v3846_v53, %v3846_v53  ;;  %v3717_v40 = vsub.f32 %v13460_v55, %v3653_v52  ;;  %v4448_v6 = vld [vmem:[%s6695_s10 + $0x60] sm:$0xff]  ;;  %v4450_v0 = vld [vmem:[%s6695_s10 + $0x70] sm:$0xff]  ;;  %v4455_v38 = vld [vmem:[%s6695_s10 + $0x98] sm:$0xff] }
 0x398   : > { %4206 = vst [vmem:[%s6675_s15 + $0xd0] sm:$0xff] %v4142_v10  ;;  %4239 = vst [vmem:[%s6675_s15 + $0x1d8] sm:$0xff] %v4175_v48  ;;  %v3941_v32 = vadd.f32 %v3877_v29, %v11344_v45  ;;  %v3845_v18 = vsub.f32 %v13461_v33, %v3653_v52  ;;  %v3178_v58 = vadd.f32 1e-10, %v11378_v16  ;;  %6456 = vrsqrt.f32 %v11371_v26  ;;  %v4919_v45 = vpop.permute.xlu1 %4918  ;;  %v4921_v12 = vpop.permute.xlu0 %4920  ;;  %v4452_v14 = vld [vmem:[%s6695_s10 + $0x80] sm:$0xff]  ;;  %v4454_v53 = vld [vmem:[%s6695_s10 + $0x90] sm:$0xff] }
 0x399   : > { %4238 = vst [vmem:[%s6675_s15 + $0x1d0] sm:$0xff] %v4174_v63  ;;  %v4013_v7 = vmul.f32 %v11285_v8, %v3942_v61  ;;  %v3974_v39 = vadd.f32 %v3910_v27, %v3782_v35  ;;  %v3781_v20 = vmul.f32 %v3717_v40, %v3717_v40  ;;  %6458 = vrsqrt.f32 %v11374_v3  ;;  %v4449_v3 = vld [vmem:[%s6695_s10 + $0x68] sm:$0xff]  ;;  %v4458_v35 = vld [vmem:[%s6695_s10 + $0xb0] sm:$0xff]  ;;  %v6455_v33 = vpop.eup %6454 }
 0x39a   : > { %v4012_v47 = vmul.f32 %v11285_v8, %v3941_v32  ;;  %v3909_v9 = vmul.f32 %v3845_v18, %v3845_v18  ;;  %v3177_v16 = vadd.f32 1e-10, %v11380_v1  ;;  %6460 = vrsqrt.f32 %v11376_v22  ;;  %v13464_v18 = vld [vmem:[#allocation117_spill] sm:$0xff] }
 0x39b   : > { %v4141_v5 = vadd.f32 %v4077_v60, %v4013_v7  ;;  %v4045_v26 = vmul.f32 %v11285_v8, %v3974_v39  ;;  %v3274_v2 = vadd.f32 1e-10, %v11395_v25  ;;  %6462 = vrsqrt.f32 %v3178_v58  ;;  %v13465_v58 = vld [vmem:[#allocation55_spill] sm:$0xff]  ;;  %v13467_v39 = vld [vmem:[#allocation138_spill] sm:$0xff] }
 0x39c   : > { %v4140_v15 = vadd.f32 %v4076_v51, %v4012_v47  ;;  %v3973_v52 = vadd.f32 %v3909_v9, %v3781_v20  ;;  %v3273_v1 = vadd.f32 1e-10, %v11397_v62  ;;  %6464 = vrsqrt.f32 %v3177_v16  ;;  %v4923_v24 = vpop.permute.xlu1 %4922  ;;  %v4925_v62 = vpop.permute.xlu0 %4924  ;;  %v13466_v51 = vld [vmem:[#allocation116_spill] sm:$0xff] }
 0x39d   : > { %4205 = vst [vmem:[%s6675_s15 + $0xc8] sm:$0xff] %v4141_v5  ;;  %v4173_v22 = vadd.f32 %v4109_v28, %v4045_v26  ;;  %v5085_v25 = vadd.f32 %v11412_v23, %v4445_v36  ;;  %v5087_v21 = vadd.f32 %v11429_v59, %v4447_v49  ;;  %6466 = vrsqrt.f32 %v3274_v2  ;;  %v4456_v59 = vld [vmem:[%s6695_s10 + $0xa0] sm:$0xff]  ;;  %v13468_v28 = vld [vmem:[#allocation253_spill] sm:$0xff]  ;;  %v13469_v9 = vld [vmem:[#allocation152_spill] sm:$0xff] }
 0x39e   : > { %4204 = vst [vmem:[%s6675_s15 + $0xc0] sm:$0xff] %v4140_v15  ;;  %v4044_v37 = vmul.f32 %v11285_v8, %v3973_v52  ;;  %v5086_v34 = vadd.f32 %v11414_v30, %v4446_v42  ;;  %v5089_v23 = vadd.f32 %v11444_v4, %v4449_v3  ;;  %6468 = vrsqrt.f32 %v3273_v1  ;;  %v4457_v30 = vld [vmem:[%s6695_s10 + $0xa8] sm:$0xff]  ;;  %v13470_v36 = vld [vmem:[#allocation113_spill] sm:$0xff]  ;;  %v13471_v49 = vld [vmem:[#allocation58_spill] sm:$0xff] }
 0x39f   : > { %4237 = vst [vmem:[%s6675_s15 + $0x1c8] sm:$0xff] %v4173_v22  ;;  %5150 = vst.msk [vmem:[%s6695_s10 + $0x48] sm:$0xff] %vm5140_vm4, %v5085_v25  ;;  %v5088_v10 = vadd.f32 %v11431_v41, %v4448_v6  ;;  %v5091_v48 = vadd.f32 %v11465_v43, %v4451_v19  ;;  %v5090_v29 = vadd.f32 %v11446_v13, %v4450_v0  ;;  %v13462_v41 = vld [vmem:[#allocation70_spill] sm:$0xff]  ;;  %v13463_v13 = vld [vmem:[#allocation88_spill] sm:$0xff] }
 0x3a0   : > { %5152 = vst.msk [vmem:[%s6695_s10 + $0x58] sm:$0xff] %vm5140_vm4, %v5087_v21  ;;  %v4172_v4 = vadd.f32 %v4108_v31, %v4044_v37  ;;  %5151 = vst.msk [vmem:[%s6695_s10 + $0x50] sm:$0xff] %vm5140_vm4, %v5086_v34  ;;  %v5093_v63 = vadd.f32 %v4919_v45, %v4453_v17  ;;  %v5092_v61 = vadd.f32 %v11467_v56, %v4452_v14  ;;  %v4927_v60 = vpop.permute.xlu1 %4926  ;;  %v4929_v56 = vpop.permute.xlu0 %4928  ;;  %v13472_v31 = vld [vmem:[#allocation39_spill] sm:$0xff]  ;;  %v4459_v42 = vld [vmem:[%s6695_s10 + $0xb8] sm:$0xff] }
 0x3a1   : > { %5154 = vst.msk [vmem:[%s6695_s10 + $0x68] sm:$0xff] %vm5140_vm4, %v5089_v23  ;;  %v5095_v27 = vadd.f32 %v4923_v24, %v4455_v38  ;;  %v3690_v43 = vsub.f32 %v13462_v41, %v11361_v46  ;;  %v3689_v55 = vsub.f32 %v13463_v13, %v11365_v50  ;;  %5153 = vst.msk [vmem:[%s6695_s10 + $0x60] sm:$0xff] %vm5140_vm4, %v5088_v10  ;;  %v4460_v3 = vld [vmem:[%s6695_s10 + $0xc0] sm:$0xff]  ;;  %v13474_v6 = vld [vmem:[#allocation111_spill] sm:$0xff] }
 0x3a2   : > { %5156 = vst.msk [vmem:[%s6695_s10 + $0x78] sm:$0xff] %vm5140_vm4, %v5091_v48  ;;  %5155 = vst.msk [vmem:[%s6695_s10 + $0x70] sm:$0xff] %vm5140_vm4, %v5090_v29  ;;  %v5094_v40 = vadd.f32 %v4921_v12, %v4454_v53  ;;  %v5096_v32 = vadd.f32 %v4925_v62, %v4456_v59  ;;  %v11538_v7 = vmul.f32 %v13465_v58, %v13464_v18  ;;  %v6457_v47 = vpop.eup %6456  ;;  %v13473_v1 = vld [vmem:[#allocation254_spill] sm:$0xff]  ;;  %v13475_v0 = vld [vmem:[#allocation248_spill] sm:$0xff] }
 0x3a3   : > { %v11542_v20 = vmul.f32 %v13467_v39, %v13466_v51  ;;  %4236 = vst [vmem:[%s6675_s15 + $0x1c0] sm:$0xff] %v4172_v4  ;;  %5158 = vst.msk [vmem:[%s6695_s10 + $0x88] sm:$0xff] %vm5140_vm4, %v5093_v63  ;;  %v5097_v45 = vadd.f32 %v4927_v60, %v4457_v30  ;;  %v5098_v12 = vadd.f32 %v4929_v56, %v4458_v35  ;;  %v6459_v15 = vpop.eup %6458  ;;  %v13476_v22 = vld [vmem:[#allocation62_spill] sm:$0xff]  ;;  %v13478_v62 = vld [vmem:[#allocation48_spill] sm:$0xff] }
 0x3a4   : > { %5157 = vst.msk [vmem:[%s6695_s10 + $0x80] sm:$0xff] %vm5140_vm4, %v5092_v61  ;;  %5160 = vst.msk [vmem:[%s6695_s10 + $0x98] sm:$0xff] %vm5140_vm4, %v5095_v27  ;;  %v3532_v16 = vmul.f32 %v13469_v9, %v13468_v28  ;;  %v3531_v5 = vmul.f32 %v13471_v49, %v13470_v36  ;;  %v3756_v26 = vmul.f32 %v11353_v57, %v11353_v57  ;;  %v13477_v57 = vld [vmem:[#allocation249_spill] sm:$0xff]  ;;  %v6461_v17 = vpop.eup %6460  ;;  %v4931_v37 = vpop.permute.xlu1 %4930  ;;  %v13479_v59 = vld [vmem:[#allocation182_spill] sm:$0xff] }
 0x3a5   : > { %v3564_v2 = vmul.f32 %v6455_v33, %v13472_v31  ;;  %5159 = vst.msk [vmem:[%s6695_s10 + $0x90] sm:$0xff] %vm5140_vm4, %v5094_v40  ;;  %5161 = vst.msk [vmem:[%s6695_s10 + $0xa0] sm:$0xff] %vm5140_vm4, %v5096_v32  ;;  %v3755_v52 = vmul.f32 %v11357_v44, %v11357_v44  ;;  %v3530_v19 = vmul.f32 %v13474_v6, %v13473_v1  ;;  %v4933_v34 = vpop.permute.xlu0 %4932  ;;  %v6463_v23 = vpop.eup %6462  ;;  %v13480_v63 = vld [vmem:[#allocation63_spill] sm:$0xff]  ;;  %v13481_v27 = vld [vmem:[#allocation44_spill] sm:$0xff] }
 0x3a6   : > { %v11570_v25 = vmul.f32 %v13476_v22, %v13475_v0  ;;  %v3563_v21 = vmul.f32 %v6457_v47, %v13477_v57  ;;  %5162 = vst.msk [vmem:[%s6695_s10 + $0xa8] sm:$0xff] %vm5140_vm4, %v5097_v45  ;;  %5163 = vst.msk [vmem:[%s6695_s10 + $0xb0] sm:$0xff] %vm5140_vm4, %v5098_v12  ;;  %v3754_v14 = vmul.f32 %v3690_v43, %v3690_v43  ;;  %v6465_v30 = vpop.eup %6464  ;;  %v13483_v60 = vld [vmem:[#allocation240_spill] sm:$0xff]  ;;  %v4083_v45 = vld [vmem:[%s6675_s15 + $0xf8] sm:$0xff] }
 0x3a7   : > { %v3753_v38 = vmul.f32 %v3689_v55, %v3689_v55  ;;  %v3820_v24 = vsub.f32 %v3564_v2, %v11334_v54  ;;  %v3660_v44 = vmul.f32 %v6459_v15, %v13478_v62  ;;  %v3659_v10 = vmul.f32 %v6461_v17, %v13479_v59  ;;  %v6467_v41 = vpop.eup %6466  ;;  %v13482_v55 = vld [vmem:[#allocation71_spill] sm:$0xff]  ;;  %v4082_v36 = vld [vmem:[%s6675_s15 + $0xf0] sm:$0xff]  ;;  %v13485_v15 = vld [vmem:[#allocation45_spill] sm:$0xff] }
 0x3a8   : > { %v3819_v53 = vsub.f32 %v3563_v21, %v11338_v11  ;;  %v5099_v48 = vadd.f32 %v4931_v37, %v4459_v42  ;;  %v5100_v29 = vadd.f32 %v4933_v34, %v4460_v3  ;;  %v3562_v54 = vmul.f32 %v6463_v23, %v13481_v27  ;;  %v6469_v11 = vpop.eup %6468  ;;  %v4935_v51 = vpop.permute.xlu1 %4934  ;;  %v4114_v6 = vld [vmem:[%s6675_s15 + $0x1f0] sm:$0xff]  ;;  %v4081_v62 = vld [vmem:[%s6675_s15 + $0xe8] sm:$0xff]  ;;  %v4463_v23 = vld [vmem:[%s6695_s10 + $0xd8] sm:$0xff] }
 0x3a9   : > { %v3884_v35 = vmul.f32 %v3820_v24, %v3820_v24  ;;  %v3724_v4 = vsub.f32 %v3532_v16, %v3660_v44  ;;  %v3852_v61 = vsub.f32 %v13480_v63, %v3660_v44  ;;  %v3723_v13 = vsub.f32 %v3531_v5, %v3659_v10  ;;  %v4937_v39 = vpop.permute.xlu0 %4936  ;;  %v4461_v34 = vld [vmem:[%s6695_s10 + $0xc8] sm:$0xff]  ;;  %v4466_v63 = vld [vmem:[%s6695_s10 + $0xf0] sm:$0xff] }
 0x3aa   : > { %v3883_v43 = vmul.f32 %v3819_v53, %v3819_v53  ;;  %v3851_v40 = vsub.f32 %v13482_v55, %v3659_v10  ;;  %v3561_v32 = vmul.f32 %v6465_v30, %v13483_v60  ;;  %5164 = vst.msk [vmem:[%s6695_s10 + $0xb8] sm:$0xff] %vm5140_vm4, %v5099_v48  ;;  %5165 = vst.msk [vmem:[%s6695_s10 + $0xc0] sm:$0xff] %vm5140_vm4, %v5100_v29  ;;  %v4080_v53 = vld [vmem:[%s6675_s15 + $0xe0] sm:$0xff]  ;;  %v4462_v48 = vld [vmem:[%s6695_s10 + $0xd0] sm:$0xff] }
 0x3ab   : > { %v3948_v56 = vadd.f32 %v3884_v35, %v3756_v26  ;;  %v3788_v33 = vmul.f32 %v3724_v4, %v3724_v4  ;;  %v3916_v18 = vmul.f32 %v3852_v61, %v3852_v61  ;;  %v3818_v58 = vsub.f32 %v3562_v54, %v11361_v46  ;;  %v13484_v26 = vld [vmem:[#allocation158_spill] sm:$0xff]  ;;  %v4115_v46 = vld [vmem:[%s6675_s15 + $0x1f8] sm:$0xff]  ;;  %v4465_v35 = vld [vmem:[%s6695_s10 + $0xe8] sm:$0xff] }
 0x3ac   : > { %v3947_v12 = vadd.f32 %v3883_v43, %v3755_v52  ;;  %v3787_v47 = vmul.f32 %v3723_v13, %v3723_v13  ;;  %v3915_v28 = vmul.f32 %v3851_v40, %v3851_v40  ;;  %v3817_v9 = vsub.f32 %v3561_v32, %v11365_v50  ;;  %v4939_v57 = vpop.permute.xlu1 %4938  ;;  %v4464_v4 = vld [vmem:[%s6695_s10 + $0xe0] sm:$0xff]  ;;  %v4113_v60 = vld [vmem:[%s6675_s15 + $0x1e8] sm:$0xff] }
 0x3ad   : > { %v4019_v16 = vmul.f32 %v11285_v8, %v3948_v56  ;;  %v3980_v49 = vadd.f32 %v3916_v18, %v3788_v33  ;;  %v3882_v5 = vmul.f32 %v3818_v58, %v3818_v58  ;;  %v3658_v31 = vmul.f32 %v6467_v41, %v13484_v26  ;;  %v4941_v21 = vpop.permute.xlu0 %4940  ;;  %v4467_v56 = vld [vmem:[%s6695_s10 + $0xf8] sm:$0xff]  ;;  %v4468_v18 = vld [vmem:[%s6695_s10 + $0x100] sm:$0xff] }
 0x3ae   : > { %v4018_v2 = vmul.f32 %v11285_v8, %v3947_v12  ;;  %v3979_v42 = vadd.f32 %v3915_v28, %v3787_v47  ;;  %v3881_v3 = vmul.f32 %v3817_v9, %v3817_v9  ;;  %v3657_v52 = vmul.f32 %v6469_v11, %v13485_v15 }
 0x3af   : > { %v4147_v1 = vadd.f32 %v4083_v45, %v4019_v16  ;;  %v4051_v50 = vmul.f32 %v11285_v8, %v3980_v49  ;;  %v3946_v0 = vadd.f32 %v3882_v5, %v3754_v14  ;;  %v3722_v22 = vsub.f32 %v3530_v19, %v3658_v31  ;;  %v4470_v49 = vld [vmem:[%s6695_s10 + $0x110] sm:$0xff] }
 0x3b0   : > { %v4146_v17 = vadd.f32 %v4082_v36, %v4018_v2  ;;  %v4050_v24 = vmul.f32 %v11285_v8, %v3979_v42  ;;  %v3945_v44 = vadd.f32 %v3881_v3, %v3753_v38  ;;  %v3850_v37 = vsub.f32 %v11538_v7, %v3658_v31  ;;  %v4943_v41 = vpop.permute.xlu1 %4942  ;;  %v4469_v36 = vld [vmem:[%s6695_s10 + $0x108] sm:$0xff]  ;;  %v4472_v42 = vld [vmem:[%s6695_s10 + $0x120] sm:$0xff] }
 0x3b1   : > { %4211 = vst [vmem:[%s6675_s15 + $0xf8] sm:$0xff] %v4147_v1  ;;  %v4179_v14 = vadd.f32 %v4115_v46, %v4051_v50  ;;  %v4017_v19 = vmul.f32 %v11285_v8, %v3946_v0  ;;  %v3786_v59 = vmul.f32 %v3722_v22, %v3722_v22  ;;  %v3721_v10 = vsub.f32 %v11570_v25, %v3657_v52  ;;  %v4945_v43 = vpop.permute.xlu0 %4944  ;;  %v4471_v46 = vld [vmem:[%s6695_s10 + $0x118] sm:$0xff]  ;;  %v4473_v50 = vld [vmem:[%s6695_s10 + $0x128] sm:$0xff] }
 0x3b2   : > { %4210 = vst [vmem:[%s6675_s15 + $0xf0] sm:$0xff] %v4146_v17  ;;  %v4178_v38 = vadd.f32 %v4114_v6, %v4050_v24  ;;  %v4016_v29 = vmul.f32 %v11285_v8, %v3945_v44  ;;  %v3914_v7 = vmul.f32 %v3850_v37, %v3850_v37  ;;  %v3849_v30 = vsub.f32 %v11542_v20, %v3657_v52  ;;  %v4474_v6 = vld [vmem:[%s6695_s10 + $0x130] sm:$0xff]  ;;  %v4475_v17 = vld [vmem:[%s6695_s10 + $0x138] sm:$0xff]  ;;  %v4476_v24 = vld [vmem:[%s6695_s10 + $0x140] sm:$0xff] }
 0x3b3   : > { %4243 = vst [vmem:[%s6675_s15 + $0x1f8] sm:$0xff] %v4179_v14  ;;  %v4145_v61 = vadd.f32 %v4081_v62, %v4017_v19  ;;  %v3785_v27 = vmul.f32 %v3721_v10, %v3721_v10  ;;  %v5101_v25 = vadd.f32 %v4935_v51, %v4461_v34  ;;  %v5103_v54 = vadd.f32 %v4939_v57, %v4463_v23  ;;  %v4477_v23 = vld [vmem:[%s6695_s10 + $0x148] sm:$0xff]  ;;  %v4478_v14 = vld [vmem:[%s6695_s10 + $0x150] sm:$0xff] }
 0x3b4   : > { %4242 = vst [vmem:[%s6675_s15 + $0x1f0] sm:$0xff] %v4178_v38  ;;  %v4144_v13 = vadd.f32 %v4080_v53, %v4016_v29  ;;  %v3978_v20 = vadd.f32 %v3914_v7, %v3786_v59  ;;  %v3913_v55 = vmul.f32 %v3849_v30, %v3849_v30  ;;  %v5102_v40 = vadd.f32 %v4937_v39, %v4462_v48  ;;  %v4112_v39 = vld [vmem:[%s6675_s15 + $0x1e0] sm:$0xff]  ;;  %v4947_v45 = vpop.permute.xlu1 %4946  ;;  %v4479_v48 = vld [vmem:[%s6695_s10 + $0x158] sm:$0xff] }
 0x3b5   : > { %4209 = vst [vmem:[%s6675_s15 + $0xe8] sm:$0xff] %v4145_v61  ;;  %5166 = vst.msk [vmem:[%s6695_s10 + $0xc8] sm:$0xff] %vm5140_vm4, %v5101_v25  ;;  %v5105_v32 = vadd.f32 %v4943_v41, %v4465_v35  ;;  %v5104_v11 = vadd.f32 %v4941_v21, %v4464_v4  ;;  %v5106_v33 = vadd.f32 %v4945_v43, %v4466_v63  ;;  %v4949_v12 = vpop.permute.xlu0 %4948  ;;  %v4480_v38 = vld [vmem:[%s6695_s10 + $0x160] sm:$0xff]  ;;  %v4481_v4 = vld [vmem:[%s6695_s10 + $0x168] sm:$0xff] }
 0x3b6   : > { %5168 = vst.msk [vmem:[%s6695_s10 + $0xd8] sm:$0xff] %vm5140_vm4, %v5103_v54  ;;  %4208 = vst [vmem:[%s6675_s15 + $0xe0] sm:$0xff] %v4144_v13  ;;  %v4049_v58 = vmul.f32 %v11285_v8, %v3978_v20  ;;  %v3977_v51 = vadd.f32 %v3913_v55, %v3785_v27  ;;  %v5107_v9 = vadd.f32 %v4947_v45, %v4467_v56  ;;  %v4482_v63 = vld [vmem:[%s6695_s10 + $0x170] sm:$0xff]  ;;  %v4483_v41 = vld [vmem:[%s6695_s10 + $0x178] sm:$0xff] }
 0x3b7   : > { %5167 = vst.msk [vmem:[%s6695_s10 + $0xd0] sm:$0xff] %vm5140_vm4, %v5102_v40  ;;  %5170 = vst.msk [vmem:[%s6695_s10 + $0xe8] sm:$0xff] %vm5140_vm4, %v5105_v32  ;;  %v5108_v16 = vadd.f32 %v4949_v12, %v4468_v18  ;;  %v4484_v43 = vld [vmem:[%s6695_s10 + $0x180] sm:$0xff]  ;;  %v4486_v32 = vld [vmem:[%s6695_s10 + $0x190] sm:$0xff] }
 0x3b8   : > { %5169 = vst.msk [vmem:[%s6695_s10 + $0xe0] sm:$0xff] %vm5140_vm4, %v5104_v11  ;;  %5171 = vst.msk [vmem:[%s6695_s10 + $0xf0] sm:$0xff] %vm5140_vm4, %v5106_v33  ;;  %v4177_v47 = vadd.f32 %v4113_v60, %v4049_v58  ;;  %v4048_v28 = vmul.f32 %v11285_v8, %v3977_v51  ;;  %v4951_v26 = vpop.permute.xlu1 %4950  ;;  %v4485_v60 = vld [vmem:[%s6695_s10 + $0x188] sm:$0xff]  ;;  %v4487_v58 = vld [vmem:[%s6695_s10 + $0x198] sm:$0xff] }
 0x3b9   : > { %5172 = vst.msk [vmem:[%s6695_s10 + $0xf8] sm:$0xff] %vm5140_vm4, %v5107_v9  ;;  %5173 = vst.msk [vmem:[%s6695_s10 + $0x100] sm:$0xff] %vm5140_vm4, %v5108_v16  ;;  %v4953_v31 = vpop.permute.xlu0 %4952  ;;  %v5109_v8 = vadd.f32 %v4951_v26, %v4469_v36  ;;  %v4488_v51 = vld [vmem:[%s6695_s10 + $0x1a0] sm:$0xff]  ;;  %v4490_v9 = vld [vmem:[%s6695_s10 + $0x1b0] sm:$0xff] }
 0x3ba   : > { %4241 = vst [vmem:[%s6675_s15 + $0x1e8] sm:$0xff] %v4177_v47  ;;  %v4176_v5 = vadd.f32 %v4112_v39, %v4048_v28  ;;  %v5110_v2 = vadd.f32 %v4953_v31, %v4470_v49  ;;  %v4489_v28 = vld [vmem:[%s6695_s10 + $0x1a8] sm:$0xff]  ;;  %v4491_v26 = vld [vmem:[%s6695_s10 + $0x1b8] sm:$0xff]  ;;  %v4492_v31 = vld [vmem:[%s6695_s10 + $0x1c0] sm:$0xff] }
 0x3bb   : > { %5174 = vst.msk [vmem:[%s6695_s10 + $0x108] sm:$0xff] %vm5140_vm4, %v5109_v8 }
 0x3bc   : > { %4240 = vst [vmem:[%s6675_s15 + $0x1e0] sm:$0xff] %v4176_v5  ;;  %5175 = vst.msk [vmem:[%s6695_s10 + $0x110] sm:$0xff] %vm5140_vm4, %v5110_v2  ;;  %v4955_v3 = vpop.permute.xlu1 %4954 }
 0x3bd   : > { %v4957_v15 = vpop.permute.xlu0 %4956  ;;  %v5111_v52 = vadd.f32 %v4955_v3, %v4471_v46  ;;  %v4493_v3 = vld [vmem:[%s6695_s10 + $0x1c8] sm:$0xff] }
 0x3be   : > { %v5112_v1 = vadd.f32 %v4957_v15, %v4472_v42  ;;  %v4494_v15 = vld [vmem:[%s6695_s10 + $0x1d0] sm:$0xff] }
 0x3bf   : > { %5176 = vst.msk [vmem:[%s6695_s10 + $0x118] sm:$0xff] %vm5140_vm4, %v5111_v52 }
 0x3c0   : > { %5177 = vst.msk [vmem:[%s6695_s10 + $0x120] sm:$0xff] %vm5140_vm4, %v5112_v1  ;;  %v4959_v0 = vpop.permute.xlu1 %4958 }
 0x3c1   : > { %v4961_v22 = vpop.permute.xlu0 %4960  ;;  %v5113_v57 = vadd.f32 %v4959_v0, %v4473_v50  ;;  %v4495_v0 = vld [vmem:[%s6695_s10 + $0x1d8] sm:$0xff] }
 0x3c2   : > { %v5114_v21 = vadd.f32 %v4961_v22, %v4474_v6  ;;  %v4496_v22 = vld [vmem:[%s6695_s10 + $0x1e0] sm:$0xff] }
 0x3c3   : > { %5178 = vst.msk [vmem:[%s6695_s10 + $0x128] sm:$0xff] %vm5140_vm4, %v5113_v57 }
 0x3c4   : > { %5179 = vst.msk [vmem:[%s6695_s10 + $0x130] sm:$0xff] %vm5140_vm4, %v5114_v21  ;;  %v4963_v62 = vpop.permute.xlu1 %4962 }
 0x3c5   : > { %v4965_v44 = vpop.permute.xlu0 %4964  ;;  %v5115_v37 = vadd.f32 %v4963_v62, %v4475_v17  ;;  %v4497_v62 = vld [vmem:[%s6695_s10 + $0x1e8] sm:$0xff] }
 0x3c6   : > { %v5116_v34 = vadd.f32 %v4965_v44, %v4476_v24 }
 0x3c7   : > { %5180 = vst.msk [vmem:[%s6695_s10 + $0x138] sm:$0xff] %vm5140_vm4, %v5115_v37  ;;  %v4498_v37 = vld [vmem:[%s6695_s10 + $0x1f0] sm:$0xff] }
 0x3c8   : > { %5181 = vst.msk [vmem:[%s6695_s10 + $0x140] sm:$0xff] %vm5140_vm4, %v5116_v34  ;;  %v4967_v19 = vpop.permute.xlu1 %4966 }
 0x3c9   : > { %v4969_v53 = vpop.permute.xlu0 %4968  ;;  %v5117_v59 = vadd.f32 %v4967_v19, %v4477_v23  ;;  %v4499_v23 = vld [vmem:[%s6695_s10 + $0x1f8] sm:$0xff] }
 0x3ca   : > { %v5118_v10 = vadd.f32 %v4969_v53, %v4478_v14 }
 0x3cb   : > { %5182 = vst.msk [vmem:[%s6695_s10 + $0x148] sm:$0xff] %vm5140_vm4, %v5117_v59 }
 0x3cc   : > { %5183 = vst.msk [vmem:[%s6695_s10 + $0x150] sm:$0xff] %vm5140_vm4, %v5118_v10  ;;  %v4971_v29 = vpop.permute.xlu1 %4970 }
 0x3cd   : > { %v4973_v7 = vpop.permute.xlu0 %4972  ;;  %v5119_v30 = vadd.f32 %v4971_v29, %v4479_v48 }
 0x3ce   : > { %v5120_v35 = vadd.f32 %v4973_v7, %v4480_v38 }
 0x3cf   : > { %5184 = vst.msk [vmem:[%s6695_s10 + $0x158] sm:$0xff] %vm5140_vm4, %v5119_v30 }
 0x3d0   : > { %5185 = vst.msk [vmem:[%s6695_s10 + $0x160] sm:$0xff] %vm5140_vm4, %v5120_v35  ;;  %v4975_v61 = vpop.permute.xlu1 %4974 }
 0x3d1   : > { %v4977_v27 = vpop.permute.xlu0 %4976  ;;  %v5121_v25 = vadd.f32 %v4975_v61, %v4481_v4 }
 0x3d2   : > { %v5122_v54 = vadd.f32 %v4977_v27, %v4482_v63 }
 0x3d3   : > { %5186 = vst.msk [vmem:[%s6695_s10 + $0x168] sm:$0xff] %vm5140_vm4, %v5121_v25 }
 0x3d4   : > { %5187 = vst.msk [vmem:[%s6695_s10 + $0x170] sm:$0xff] %vm5140_vm4, %v5122_v54  ;;  %v4979_v13 = vpop.permute.xlu1 %4978 }
 0x3d5   : > { %v4981_v20 = vpop.permute.xlu0 %4980  ;;  %v5123_v55 = vadd.f32 %v4979_v13, %v4483_v41 }
 0x3d6   : > { %v5124_v40 = vadd.f32 %v4981_v20, %v4484_v43 }
 0x3d7   : > { %5188 = vst.msk [vmem:[%s6695_s10 + $0x178] sm:$0xff] %vm5140_vm4, %v5123_v55 }
 0x3d8   : > { %5189 = vst.msk [vmem:[%s6695_s10 + $0x180] sm:$0xff] %vm5140_vm4, %v5124_v40  ;;  %v4983_v11 = vpop.permute.xlu1 %4982 }
 0x3d9   : > { %v4985_v56 = vpop.permute.xlu0 %4984  ;;  %v5125_v33 = vadd.f32 %v4983_v11, %v4485_v60 }
 0x3da   : > { %v5126_v18 = vadd.f32 %v4985_v56, %v4486_v32 }
 0x3db   : > { %5190 = vst.msk [vmem:[%s6695_s10 + $0x188] sm:$0xff] %vm5140_vm4, %v5125_v33 }
 0x3dc   : > { %5191 = vst.msk [vmem:[%s6695_s10 + $0x190] sm:$0xff] %vm5140_vm4, %v5126_v18  ;;  %v4987_v39 = vpop.permute.xlu1 %4986 }
 0x3dd   : > { %v4989_v45 = vpop.permute.xlu0 %4988  ;;  %v5127_v12 = vadd.f32 %v4987_v39, %v4487_v58 }
 0x3de   : > { %v5128_v47 = vadd.f32 %v4989_v45, %v4488_v51 }
 0x3df   : > { %5192 = vst.msk [vmem:[%s6695_s10 + $0x198] sm:$0xff] %vm5140_vm4, %v5127_v12 }
 0x3e0   : > { %5193 = vst.msk [vmem:[%s6695_s10 + $0x1a0] sm:$0xff] %vm5140_vm4, %v5128_v47  ;;  %v4991_v16 = vpop.permute.xlu1 %4990 }
 0x3e1   : > { %v4993_v36 = vpop.permute.xlu0 %4992  ;;  %v5129_v49 = vadd.f32 %v4991_v16, %v4489_v28 }
 0x3e2   : > { %v5130_v5 = vadd.f32 %v4993_v36, %v4490_v9 }
 0x3e3   : > { %5194 = vst.msk [vmem:[%s6695_s10 + $0x1a8] sm:$0xff] %vm5140_vm4, %v5129_v49 }
 0x3e4   : > { %5195 = vst.msk [vmem:[%s6695_s10 + $0x1b0] sm:$0xff] %vm5140_vm4, %v5130_v5  ;;  %v4995_v8 = vpop.permute.xlu1 %4994 }
 0x3e5   : > { %v4997_v2 = vpop.permute.xlu0 %4996  ;;  %v5131_v46 = vadd.f32 %v4995_v8, %v4491_v26 }
 0x3e6   : > { %v5132_v42 = vadd.f32 %v4997_v2, %v4492_v31 }
 0x3e7   : > { %5196 = vst.msk [vmem:[%s6695_s10 + $0x1b8] sm:$0xff] %vm5140_vm4, %v5131_v46 }
 0x3e8   : > { %5197 = vst.msk [vmem:[%s6695_s10 + $0x1c0] sm:$0xff] %vm5140_vm4, %v5132_v42  ;;  %v4999_v52 = vpop.permute.xlu1 %4998 }
 0x3e9   : > { %v5001_v1 = vpop.permute.xlu0 %5000  ;;  %v5133_v50 = vadd.f32 %v4999_v52, %v4493_v3 }
 0x3ea   : > { %v5134_v6 = vadd.f32 %v5001_v1, %v4494_v15 }
 0x3eb   : > { %5198 = vst.msk [vmem:[%s6695_s10 + $0x1c8] sm:$0xff] %vm5140_vm4, %v5133_v50 }
 0x3ec   : > { %5199 = vst.msk [vmem:[%s6695_s10 + $0x1d0] sm:$0xff] %vm5140_vm4, %v5134_v6  ;;  %v5003_v57 = vpop.permute.xlu1 %5002 }
 0x3ed   : > { %v5005_v21 = vpop.permute.xlu0 %5004  ;;  %v5135_v17 = vadd.f32 %v5003_v57, %v4495_v0 }
 0x3ee   : > { %v5136_v24 = vadd.f32 %v5005_v21, %v4496_v22 }
 0x3ef   : > { %5200 = vst.msk [vmem:[%s6695_s10 + $0x1d8] sm:$0xff] %vm5140_vm4, %v5135_v17 }
 0x3f0   : > { %5201 = vst.msk [vmem:[%s6695_s10 + $0x1e0] sm:$0xff] %vm5140_vm4, %v5136_v24  ;;  %v5007_v44 = vpop.permute.xlu1 %5006 }
 0x3f1   : > { %v5137_v34 = vadd.f32 %v5007_v44, %v4497_v62 }
 0x3f3   : > { %v5009_v14 = vpop.permute.xlu0 %5008  ;;  %5202 = vst.msk [vmem:[%s6695_s10 + $0x1e8] sm:$0xff] %vm5140_vm4, %v5137_v34 }
 0x3f4   : > { %v5138_v19 = vadd.f32 %v5009_v14, %v4498_v37  ;;  %v5011_v53 = vpop.permute.xlu1 %5010 }
 0x3f5   : > { %v5139_v59 = vadd.f32 %v5011_v53, %v4499_v23 }
 0x3f6   : > { %5203 = vst.msk [vmem:[%s6695_s10 + $0x1f0] sm:$0xff] %vm5140_vm4, %v5138_v19 }
 0x3f7   : > { %5204 = vst.msk [vmem:[%s6695_s10 + $0x1f8] sm:$0xff] %vm5140_vm4, %v5139_v59 }
 0x3f8 PF: > { %s18_s28 = sadd.s32 1, %s6594_s28   ;;  %s13486_s24 = smov %s6586_s26 }
 0x3f9   : > { %p15_p8 = scmp.ge.s32.totalorder %s18_s28, 6   ;;  %s13487_s25 = smov %s6590_s27 }
 0x3fa   : > { %s13488_s26 = smov %s13491_s29  ;;  %s13489_s27 = smov %s13495_s30 }
 0x3fb   :  { %17 = sbr.rel (!%p15_p8) target bundleno = 3 (0x3), region = 96 }

</bundles_post_ra>
